<compile_context>
chip_gen: v6e
topology: v6e:2x2x1
jax: 0.10.0
libtpu: 0.0.40
codegen_flags: <defaults>
</compile_context>

<pallas_src>
import jax
import jax.numpy as jnp
from jax import lax
from jax.experimental import pallas as pl
from jax.experimental.pallas import tpu as pltpu

K_CONV = 9
PAD_CONV = 4
K_POOL = 10
STRIDE_POOL = 2
PAD_POOL = 4
NEG = -1e30            # -inf surrogate for pool padding (only ever consumed by max)
BN_EPS = 1e-5
NUM_BLOCKS = 3
PADX = 16              # per-batch leading/trailing zero-pad rows in the conv scratch
                       # (>= PAD_CONV; multiple of 16 keeps bf16 stores sublane-aligned)


def _round_up(v, m):
    return (v + m - 1) // m * m


def _conv_bn_pool_block(xpad_scr, ypad_scr, B, L, C_in, C_out,
                        wcat_ref, b_ref, g_ref, be_ref):
    """Conv1d(9,1,4) + ReLU + BatchNorm1d(batch stats) + MaxPool1d(10,2,4).

    Reads the zero-padded, batch-stacked bf16 conv input from xpad_scr (per-batch row
    stride L + 2*PADX, activation rows at offset PADX) and returns a list of B
    (L//2, C_out) f32 pool outputs.
    """
    stride_x = L + 2 * PADX
    Lo = L // STRIDE_POOL
    half = Lo + PAD_POOL                        # even/odd pool pairs actually needed
    half_pad = _round_up(half, 8)               # 8-aligned strided-read length
    stride_y = 2 * PAD_POOL + 2 * half_pad      # per-batch rows in the pool scratch

    # ---- Conv1d (shift-add form): one stacked bf16 MXU matmul + 9 shifted adds.
    # W_cat[i, k*C_out + o] == torch_w[o, i, k], so
    #   y[b, l, o] = bias[o] + sum_k Z[b*stride_x + (PADX-PAD_CONV) + l + k, k*C_out + o]
    rows = B * stride_x
    navail = (B - 1) * stride_x + L             # rows covering every batch's L outputs
    z = jnp.dot(xpad_scr[0:rows, 0:C_in], wcat_ref[...],
                preferred_element_type=jnp.float32)            # (rows, 9*C_out) f32
    off0 = PADX - PAD_CONV
    yall = z[off0:off0 + navail, 0:C_out]
    for k in range(1, K_CONV):
        yall = yall + z[off0 + k:off0 + k + navail, k * C_out:(k + 1) * C_out]
    yall = jnp.maximum(yall + b_ref[...], 0.0)                 # bias + ReLU

    # ---- BatchNorm1d, training-mode statistics over (B, L); two-pass, masked so the
    # garbage rows between batch segments are excluded.
    rowid = lax.broadcasted_iota(jnp.int32, (navail, 1), 0)
    valid = rowid < L
    for b in range(1, B):
        lo = b * stride_x
        valid = valid | ((rowid >= lo) & (rowid < lo + L))
    n = float(B * L)
    mean = jnp.sum(jnp.where(valid, yall, 0.0), axis=0, keepdims=True) / n
    diff = jnp.where(valid, yall - mean, 0.0)
    var = jnp.sum(diff * diff, axis=0, keepdims=True) / n      # biased variance (torch)
    inv_std = lax.rsqrt(var + BN_EPS)
    scale = g_ref[...] * inv_std
    shift = be_ref[...] - mean * scale
    ynorm = yall * scale + shift                               # garbage rows ignored later

    # ---- MaxPool1d(10, 2, 4).  Store normalized rows (-1e30 only on the pad rows),
    # then per batch:
    #   p2[i]  = max(ypad[2*(i+2)], ypad[2*(i+2)+1])              (stride-2 even/odd reads)
    #   out[j] = max(p2[j-2], p2[j-1], p2[j], p2[j+1], p2[j+2])   (centred 5-tap window)
    # Shifts use pltpu.roll in BOTH directions, so correctness does not depend on the
    # roll sign convention; wrapped entries land on -1e30 pad rows by construction.
    for b in range(B):
        pb = b * stride_y
        ypad_scr[pb:pb + 2 * PAD_POOL, 0:C_out] = jnp.full(
            (2 * PAD_POOL, C_out), NEG, jnp.float32)
        ypad_scr[pb + 2 * PAD_POOL + L:pb + stride_y, 0:C_out] = jnp.full(
            (stride_y - 2 * PAD_POOL - L, C_out), NEG, jnp.float32)
        ypad_scr[pb + 2 * PAD_POOL:pb + 2 * PAD_POOL + L, 0:C_out] = (
            ynorm[b * stride_x:b * stride_x + L, :])

    # TODO(synk): for larger batch, replace the per-batch Python loops with
    # lax.fori_loop over the stacked scratch.
    outs = []
    for b in range(B):
        pb = b * stride_y
        ev = ypad_scr[pl.ds(pb + 2 * PAD_POOL, half_pad, stride=2), 0:C_out]
        od = ypad_scr[pl.ds(pb + 2 * PAD_POOL + 1, half_pad, stride=2), 0:C_out]
        p2 = jnp.maximum(ev, od)                               # (half_pad, C_out)
        win = p2
        for s in (1, 2):
            win = jnp.maximum(win, pltpu.roll(p2, shift=s, axis=0))
            win = jnp.maximum(win, pltpu.roll(p2, shift=half_pad - s, axis=0))
        outs.append(win[0:Lo, :])                              # aligned (Lo, C_out) slice
    return outs


def cnv_fused_kernel(x_ref,
                     w1_ref, b1_ref, g1_ref, be1_ref,
                     w2_ref, b2_ref, g2_ref, be2_ref,
                     w3_ref, b3_ref, g3_ref, be3_ref,
                     wfc_ref, bfc_ref,
                     out_ref,
                     xpad_scr, ypad_scr):
    B, L0, C0 = x_ref.shape
    n_out = out_ref.shape[1]
    features = w1_ref.shape[1] // K_CONV

    # ---- Stage the zero-padded, batch-stacked bf16 conv input for block 1 (only the
    # pad rows are zero-filled; the live rows carry the input itself).
    stride0 = L0 + 2 * PADX
    for b in range(B):
        base = b * stride0
        xpad_scr[base:base + PADX, 0:C0] = jnp.zeros((PADX, C0), xpad_scr.dtype)
        xpad_scr[base + PADX + L0:base + stride0, 0:C0] = jnp.zeros(
            (PADX, C0), xpad_scr.dtype)
        xpad_scr[base + PADX:base + PADX + L0, 0:C0] = x_ref[b].astype(xpad_scr.dtype)

    params = ((w1_ref, b1_ref, g1_ref, be1_ref),
              (w2_ref, b2_ref, g2_ref, be2_ref),
              (w3_ref, b3_ref, g3_ref, be3_ref))
    L = L0
    C_in = C0
    outs = None
    for blk, (w_ref, b_ref, g_ref, be_ref) in enumerate(params):
        outs = _conv_bn_pool_block(xpad_scr, ypad_scr, B, L, C_in, features,
                                   w_ref, b_ref, g_ref, be_ref)
        L //= STRIDE_POOL
        C_in = features
        if blk + 1 < NUM_BLOCKS:
            # Pool output becomes the next block's conv input: re-zero only the pad
            # rows (the previous, longer block may have left stale data there).
            stride_n = L + 2 * PADX
            for b in range(B):
                base = b * stride_n
                xpad_scr[base:base + PADX, 0:features] = jnp.zeros(
                    (PADX, features), xpad_scr.dtype)
                xpad_scr[base + PADX + L:base + stride_n, 0:features] = jnp.zeros(
                    (PADX, features), xpad_scr.dtype)
                xpad_scr[base + PADX:base + PADX + L, 0:features] = (
                    outs[b].astype(xpad_scr.dtype))

    # ---- Linear head, flatten-free:
    # out[b, o] = bias[o] + sum_{l,c} pool[b, l, c] * Wfc[o, l, c]
    # (Wfc pre-permuted in the wrapper so this equals fc(torch.flatten(x_NCL, 1));
    #  n_out=3, so a few VPU multiply+full-reductions beat any flatten relayout.)
    wplanes = [wfc_ref[o] for o in range(n_out)]
    rowi = lax.broadcasted_iota(jnp.int32, (B, n_out), 0)
    coli = lax.broadcasted_iota(jnp.int32, (B, n_out), 1)
    outv = jnp.zeros((B, n_out), jnp.float32)
    for b in range(B):
        for o in range(n_out):
            s = jnp.sum(outs[b] * wplanes[o])
            outv = outv + jnp.where((rowi == b) & (coli == o), s, 0.0)
    out_ref[...] = outv + bfc_ref[...]


def cnv_model_forward(x_ncl, blocks, wfc, bfc):
    B, c0, L0 = x_ncl.shape
    assert len(blocks) == NUM_BLOCKS
    # L stays a multiple of 16 through all three halvings (bf16 scratch alignment).
    assert L0 % 64 == 0, "L0 must be a multiple of 64"
    features = blocks[0][0].shape[0]
    Lf = L0 // (2 ** NUM_BLOCKS)
    n_out = wfc.shape[0]

    # Layout glue (outside the kernel): NCL -> NLC; conv weights to the tap-concatenated
    # (C_in, 9*C_out) bf16 form; FC weight to (n_out, Lf, C) planes matching
    # torch.flatten(NCL, 1) (flatten index = c*Lf + l).
    x_nlc = jnp.transpose(x_ncl, (0, 2, 1))
    params = []
    for (w, bb, gamma, beta) in blocks:
        c_out, c_in, k = w.shape
        wcat = jnp.transpose(w, (1, 2, 0)).reshape(c_in, k * c_out).astype(jnp.bfloat16)
        params += [wcat, bb.reshape(1, -1), gamma.reshape(1, -1), beta.reshape(1, -1)]
    wfc3 = jnp.transpose(wfc.reshape(n_out, features, Lf), (0, 2, 1))
    inputs = [x_nlc] + params + [wfc3, bfc.reshape(1, -1)]

    def full_spec(a):
        if a.ndim == 3:
            return pl.BlockSpec(a.shape, lambda i: (0, 0, 0))
        return pl.BlockSpec(a.shape, lambda i: (0, 0))

    stride_x0 = L0 + 2 * PADX
    stride_y0 = 2 * PAD_POOL + 2 * _round_up(L0 // 2 + PAD_POOL, 8)
    c_max = max(c0, features)
    scratch_shapes = [
        pltpu.VMEM((B * stride_x0, c_max), jnp.bfloat16),    # zero-padded conv input (bf16)
        pltpu.VMEM((B * stride_y0, features), jnp.float32),  # -1e30 padded pool input
    ]

    return pl.pallas_call(
        cnv_fused_kernel,
        grid=(1,),
        in_specs=[full_spec(a) for a in inputs],
        out_specs=pl.BlockSpec((B, n_out), lambda i: (0, 0)),
        out_shape=jax.ShapeDtypeStruct((B, n_out), jnp.float32),
        scratch_shapes=scratch_shapes,
        compiler_params=pltpu.CompilerParams(
            dimension_semantics=("arbitrary",),
            vmem_limit_bytes=32 * 1024 * 1024,
        ),
    )(*inputs)


def reference_forward(x_ncl, blocks, wfc, bfc, conv_dtype=jnp.float32):
    """Plain-JAX mirror of the PyTorch forward (training-mode BN).

    conv_dtype=jnp.bfloat16 reproduces the kernel's bf16-rounded conv operands
    (accumulation stays f32), isolating kernel bugs from the intentional bf16 MXU
    precision choice."""
    x = x_ncl
    for (w, bb, gamma, beta) in blocks:
        L = x.shape[2]
        xq = x.astype(conv_dtype).astype(jnp.float32)
        wq = w.astype(conv_dtype).astype(jnp.float32)
        xpad = jnp.pad(xq, ((0, 0), (0, 0), (PAD_CONV, PAD_CONV)))
        y = bb[None, :, None] + sum(
            jnp.einsum('bil,oi->bol', xpad[:, :, k:k + L], wq[:, :, k],
                       precision=lax.Precision.HIGHEST)
            for k in range(K_CONV))
        y = jnp.maximum(y, 0.0)
        mean = jnp.mean(y, axis=(0, 2), keepdims=True)
        var = jnp.mean((y - mean) ** 2, axis=(0, 2), keepdims=True)
        y = (y - mean) / jnp.sqrt(var + BN_EPS) * gamma[None, :, None] + beta[None, :, None]
        ypad = jnp.pad(y, ((0, 0), (0, 0), (PAD_POOL, PAD_POOL)),
                       constant_values=-jnp.inf)
        x = lax.reduce_window(ypad, -jnp.inf, lax.max,
                              (1, 1, K_POOL), (1, 1, STRIDE_POOL), 'VALID')
    flat = x.reshape(x.shape[0], -1)
    return jnp.dot(flat, wfc.T, precision=lax.Precision.HIGHEST) + bfc


if __name__ == "__main__":
    B = 2
    C_IN = 2
    L0 = 128                              # scaled-down sequence length (original assumes 20000)
    FEATURES = 32
    L_FINAL = L0 // (2 ** NUM_BLOCKS)     # 16
    FC_OUT = 3

    key = jax.random.PRNGKey(0)
    k_x, k_p = jax.random.split(key)
    x_ncl = jax.random.normal(k_x, (B, C_IN, L0), jnp.float32)

    pkeys = list(jax.random.split(k_p, 4 * NUM_BLOCKS + 2))
    ki = iter(pkeys)

    blocks = []
    c_in = C_IN
    for _ in range(NUM_BLOCKS):
        fan_in = c_in * K_CONV
        bound = 1.0 / (fan_in ** 0.5)
        w = jax.random.uniform(next(ki), (FEATURES, c_in, K_CONV), jnp.float32,
                               -bound, bound)                 # torch Conv1d weight shape
        bb = jax.random.uniform(next(ki), (FEATURES,), jnp.float32, -bound, bound)
        gamma = 1.0 + 0.1 * jax.random.normal(next(ki), (FEATURES,), jnp.float32)
        beta = 0.1 * jax.random.normal(next(ki), (FEATURES,), jnp.float32)
        blocks.append((w, bb, gamma, beta))
        c_in = FEATURES

    fc_in = FEATURES * L_FINAL
    fb = 1.0 / (fc_in ** 0.5)
    wfc = jax.random.uniform(next(ki), (FC_OUT, fc_in), jnp.float32, -fb, fb)
    bfc = jax.random.uniform(next(ki), (FC_OUT,), jnp.float32, -fb, fb)

    fwd = jax.jit(cnv_model_forward)
    out = jax.block_until_ready(fwd(x_ncl, blocks, wfc, bfc))
    assert out.shape == (B, FC_OUT), out.shape
    assert bool(jnp.all(jnp.isfinite(out)))

    # Reference with the same bf16 rounding of the conv operands (everything else f32),
    # so the check isolates kernel correctness from the intended bf16 MXU precision.
    ref = jax.block_until_ready(
        reference_forward(x_ncl, blocks, wfc, bfc, conv_dtype=jnp.bfloat16))
    assert bool(jnp.allclose(out, ref, rtol=2e-3, atol=2e-3)), (out, ref)

    print("KERNEL_OK")
</pallas_src>

<mosaic_0001>
module attributes {stable_mosaic.version = 11 : i64} {
  func.func @cnv_fused_kernel(%arg0: i32, %arg1: memref<2x128x2xf32, #tpu.memory_space<vmem>>, %arg2: memref<2x288xbf16, #tpu.memory_space<vmem>>, %arg3: memref<1x32xf32, #tpu.memory_space<vmem>>, %arg4: memref<1x32xf32, #tpu.memory_space<vmem>>, %arg5: memref<1x32xf32, #tpu.memory_space<vmem>>, %arg6: memref<32x288xbf16, #tpu.memory_space<vmem>>, %arg7: memref<1x32xf32, #tpu.memory_space<vmem>>, %arg8: memref<1x32xf32, #tpu.memory_space<vmem>>, %arg9: memref<1x32xf32, #tpu.memory_space<vmem>>, %arg10: memref<32x288xbf16, #tpu.memory_space<vmem>>, %arg11: memref<1x32xf32, #tpu.memory_space<vmem>>, %arg12: memref<1x32xf32, #tpu.memory_space<vmem>>, %arg13: memref<1x32xf32, #tpu.memory_space<vmem>>, %arg14: memref<3x16x32xf32, #tpu.memory_space<vmem>>, %arg15: memref<1x3xf32, #tpu.memory_space<vmem>>, %arg16: memref<2x3xf32, #tpu.memory_space<vmem>>, %arg17: memref<320x32xbf16, #tpu.memory_space<vmem>>, %arg18: memref<304x32xf32, #tpu.memory_space<vmem>>) attributes {dimension_semantics = [#tpu.dimension_semantics<arbitrary>], iteration_bounds = array<i64: 1>, scalar_prefetch = 0 : i64, scratch_operands = 2 : i64, tpu.core_type = #tpu.core_type<tc>, window_params = [{pipeline_mode = #tpu.pipeline_mode<synchronous>, transform_indices = @transform_0, window_bounds = array<i64: 2, 128, 2>}, {pipeline_mode = #tpu.pipeline_mode<synchronous>, transform_indices = @transform_1, window_bounds = array<i64: 2, 288>}, {pipeline_mode = #tpu.pipeline_mode<synchronous>, transform_indices = @transform_2, window_bounds = array<i64: 1, 32>}, {pipeline_mode = #tpu.pipeline_mode<synchronous>, transform_indices = @transform_3, window_bounds = array<i64: 1, 32>}, {pipeline_mode = #tpu.pipeline_mode<synchronous>, transform_indices = @transform_4, window_bounds = array<i64: 1, 32>}, {pipeline_mode = #tpu.pipeline_mode<synchronous>, transform_indices = @transform_5, window_bounds = array<i64: 32, 288>}, {pipeline_mode = #tpu.pipeline_mode<synchronous>, transform_indices = @transform_6, window_bounds = array<i64: 1, 32>}, {pipeline_mode = #tpu.pipeline_mode<synchronous>, transform_indices = @transform_7, window_bounds = array<i64: 1, 32>}, {pipeline_mode = #tpu.pipeline_mode<synchronous>, transform_indices = @transform_8, window_bounds = array<i64: 1, 32>}, {pipeline_mode = #tpu.pipeline_mode<synchronous>, transform_indices = @transform_9, window_bounds = array<i64: 32, 288>}, {pipeline_mode = #tpu.pipeline_mode<synchronous>, transform_indices = @transform_10, window_bounds = array<i64: 1, 32>}, {pipeline_mode = #tpu.pipeline_mode<synchronous>, transform_indices = @transform_11, window_bounds = array<i64: 1, 32>}, {pipeline_mode = #tpu.pipeline_mode<synchronous>, transform_indices = @transform_12, window_bounds = array<i64: 1, 32>}, {pipeline_mode = #tpu.pipeline_mode<synchronous>, transform_indices = @transform_13, window_bounds = array<i64: 3, 16, 32>}, {pipeline_mode = #tpu.pipeline_mode<synchronous>, transform_indices = @transform_14, window_bounds = array<i64: 1, 3>}, {pipeline_mode = #tpu.pipeline_mode<synchronous>, transform_indices = @transform_15, window_bounds = array<i64: 2, 3>}]} {
    %cst = arith.constant 0.000000e+00 : bf16
    %0 = vector.broadcast %cst : bf16 to vector<16x2xbf16>
    %c0 = arith.constant 0 : index
    %c0_0 = arith.constant 0 : index
    %1 = vector.load %arg17[%c0, %c0_0] : memref<320x32xbf16, #tpu.memory_space<vmem>>, vector<16x2xbf16>
    tpu.vector_store %arg17[%c0, %c0_0], %0 {strides = array<i32>} : memref<320x32xbf16, #tpu.memory_space<vmem>>, vector<16x2xbf16>,
    %cst_1 = arith.constant 0.000000e+00 : bf16
    %2 = vector.broadcast %cst_1 : bf16 to vector<16x2xbf16>
    %c144 = arith.constant 144 : index
    %c0_2 = arith.constant 0 : index
    %3 = vector.load %arg17[%c144, %c0_2] : memref<320x32xbf16, #tpu.memory_space<vmem>>, vector<16x2xbf16>
    tpu.vector_store %arg17[%c144, %c0_2], %2 {strides = array<i32>} : memref<320x32xbf16, #tpu.memory_space<vmem>>, vector<16x2xbf16>,
    %c0_3 = arith.constant 0 : index
    %c0_4 = arith.constant 0 : index
    %c0_5 = arith.constant 0 : index
    %4 = vector.load %arg1[%c0_3, %c0_4, %c0_5] : memref<2x128x2xf32, #tpu.memory_space<vmem>>, vector<1x128x2xf32>
    %5 = vector.shape_cast %4 : vector<1x128x2xf32> to vector<128x2xf32>
    %6 = arith.truncf %5 : vector<128x2xf32> to vector<128x2xbf16>
    %c16 = arith.constant 16 : index
    %c0_6 = arith.constant 0 : index
    %7 = vector.load %arg17[%c16, %c0_6] : memref<320x32xbf16, #tpu.memory_space<vmem>>, vector<128x2xbf16>
    tpu.vector_store %arg17[%c16, %c0_6], %6 {strides = array<i32>} : memref<320x32xbf16, #tpu.memory_space<vmem>>, vector<128x2xbf16>,
    %cst_7 = arith.constant 0.000000e+00 : bf16
    %8 = vector.broadcast %cst_7 : bf16 to vector<16x2xbf16>
    %c160 = arith.constant 160 : index
    %c0_8 = arith.constant 0 : index
    %9 = vector.load %arg17[%c160, %c0_8] : memref<320x32xbf16, #tpu.memory_space<vmem>>, vector<16x2xbf16>
    tpu.vector_store %arg17[%c160, %c0_8], %8 {strides = array<i32>} : memref<320x32xbf16, #tpu.memory_space<vmem>>, vector<16x2xbf16>,
    %cst_9 = arith.constant 0.000000e+00 : bf16
    %10 = vector.broadcast %cst_9 : bf16 to vector<16x2xbf16>
    %c304 = arith.constant 304 : index
    %c0_10 = arith.constant 0 : index
    %11 = vector.load %arg17[%c304, %c0_10] : memref<320x32xbf16, #tpu.memory_space<vmem>>, vector<16x2xbf16>
    tpu.vector_store %arg17[%c304, %c0_10], %10 {strides = array<i32>} : memref<320x32xbf16, #tpu.memory_space<vmem>>, vector<16x2xbf16>,
    %c1 = arith.constant 1 : index
    %c0_11 = arith.constant 0 : index
    %c0_12 = arith.constant 0 : index
    %12 = vector.load %arg1[%c1, %c0_11, %c0_12] : memref<2x128x2xf32, #tpu.memory_space<vmem>>, vector<1x128x2xf32>
    %13 = vector.shape_cast %12 : vector<1x128x2xf32> to vector<128x2xf32>
    %14 = arith.truncf %13 : vector<128x2xf32> to vector<128x2xbf16>
    %c176 = arith.constant 176 : index
    %c0_13 = arith.constant 0 : index
    %15 = vector.load %arg17[%c176, %c0_13] : memref<320x32xbf16, #tpu.memory_space<vmem>>, vector<128x2xbf16>
    tpu.vector_store %arg17[%c176, %c0_13], %14 {strides = array<i32>} : memref<320x32xbf16, #tpu.memory_space<vmem>>, vector<128x2xbf16>,
    %c0_14 = arith.constant 0 : index
    %c0_15 = arith.constant 0 : index
    %16 = vector.load %arg17[%c0_14, %c0_15] : memref<320x32xbf16, #tpu.memory_space<vmem>>, vector<320x2xbf16>
    %c0_16 = arith.constant 0 : index
    %c0_17 = arith.constant 0 : index
    %17 = vector.load %arg2[%c0_16, %c0_17] : memref<2x288xbf16, #tpu.memory_space<vmem>>, vector<2x288xbf16>
    %cst_18 = arith.constant dense<0.000000e+00> : vector<320x288xf32>
    %18 = tpu.matmul %16, %17, %cst_18 {dimension_numbers = #tpu.dot_dimension_numbers<[1], [0], [0], [1], [0, 0, 1, 1], [], []>} : vector<320x2xbf16>, vector<2x288xbf16>, vector<320x288xf32> -> vector<320x288xf32>
    %19 = vector.extract_strided_slice %18 {offsets = [12, 0], sizes = [288, 32], strides = [1, 1]} : vector<320x288xf32> to vector<288x32xf32>
    %20 = vector.extract_strided_slice %18 {offsets = [13, 32], sizes = [288, 32], strides = [1, 1]} : vector<320x288xf32> to vector<288x32xf32>
    %21 = arith.addf %19, %20 : vector<288x32xf32>
    %22 = vector.extract_strided_slice %18 {offsets = [14, 64], sizes = [288, 32], strides = [1, 1]} : vector<320x288xf32> to vector<288x32xf32>
    %23 = arith.addf %21, %22 : vector<288x32xf32>
    %24 = vector.extract_strided_slice %18 {offsets = [15, 96], sizes = [288, 32], strides = [1, 1]} : vector<320x288xf32> to vector<288x32xf32>
    %25 = arith.addf %23, %24 : vector<288x32xf32>
    %26 = vector.extract_strided_slice %18 {offsets = [16, 128], sizes = [288, 32], strides = [1, 1]} : vector<320x288xf32> to vector<288x32xf32>
    %27 = arith.addf %25, %26 : vector<288x32xf32>
    %28 = vector.extract_strided_slice %18 {offsets = [17, 160], sizes = [288, 32], strides = [1, 1]} : vector<320x288xf32> to vector<288x32xf32>
    %29 = arith.addf %27, %28 : vector<288x32xf32>
    %30 = vector.extract_strided_slice %18 {offsets = [18, 192], sizes = [288, 32], strides = [1, 1]} : vector<320x288xf32> to vector<288x32xf32>
    %31 = arith.addf %29, %30 : vector<288x32xf32>
    %32 = vector.extract_strided_slice %18 {offsets = [19, 224], sizes = [288, 32], strides = [1, 1]} : vector<320x288xf32> to vector<288x32xf32>
    %33 = arith.addf %31, %32 : vector<288x32xf32>
    %34 = vector.extract_strided_slice %18 {offsets = [20, 256], sizes = [288, 32], strides = [1, 1]} : vector<320x288xf32> to vector<288x32xf32>
    %35 = arith.addf %33, %34 : vector<288x32xf32>
    %c0_19 = arith.constant 0 : index
    %c0_20 = arith.constant 0 : index
    %36 = vector.load %arg3[%c0_19, %c0_20] : memref<1x32xf32, #tpu.memory_space<vmem>>, vector<1x32xf32>
    %37 = vector.broadcast %36 : vector<1x32xf32> to vector<288x32xf32>
    %38 = arith.addf %35, %37 : vector<288x32xf32>
    %cst_21 = arith.constant 0.000000e+00 : f32
    %39 = vector.broadcast %cst_21 : f32 to vector<288x32xf32>
    %40 = arith.maximumf %38, %39 : vector<288x32xf32>
    %41 = tpu.iota {dimensions = array<i32: 0>} : vector<288x1xi32>
    %c128_i32 = arith.constant 128 : i32
    %42 = vector.broadcast %c128_i32 : i32 to vector<288x1xi32>
    %43 = arith.cmpi slt, %41, %42 : vector<288x1xi32>
    %c160_i32 = arith.constant 160 : i32
    %44 = vector.broadcast %c160_i32 : i32 to vector<288x1xi32>
    %45 = arith.cmpi sge, %41, %44 : vector<288x1xi32>
    %c288_i32 = arith.constant 288 : i32
    %46 = vector.broadcast %c288_i32 : i32 to vector<288x1xi32>
    %47 = arith.cmpi slt, %41, %46 : vector<288x1xi32>
    %48 = arith.andi %45, %47 : vector<288x1xi1>
    %49 = arith.ori %43, %48 : vector<288x1xi1>
    %cst_22 = arith.constant 0.000000e+00 : f32
    %50 = vector.shape_cast %49 : vector<288x1xi1> to vector<288x1xi1>
    %51 = vector.broadcast %50 : vector<288x1xi1> to vector<288x32xi1>
    %52 = vector.broadcast %cst_22 : f32 to vector<288x32xf32>
    %53 = arith.select %51, %40, %52 : vector<288x32xi1>, vector<288x32xf32>
    %cst_23 = arith.constant dense<0.000000e+00> : vector<32xf32>
    %54 = vector.multi_reduction <add>, %53, %cst_23 [0] : vector<288x32xf32> to vector<32xf32>
    %55 = vector.shape_cast %54 : vector<32xf32> to vector<1x32xf32>
    %cst_24 = arith.constant 2.560000e+02 : f32
    %56 = vector.broadcast %cst_24 : f32 to vector<1x32xf32>
    %57 = arith.divf %55, %56 : vector<1x32xf32>
    %58 = vector.broadcast %57 : vector<1x32xf32> to vector<288x32xf32>
    %59 = arith.subf %40, %58 : vector<288x32xf32>
    %cst_25 = arith.constant 0.000000e+00 : f32
    %60 = vector.shape_cast %49 : vector<288x1xi1> to vector<288x1xi1>
    %61 = vector.broadcast %60 : vector<288x1xi1> to vector<288x32xi1>
    %62 = vector.broadcast %cst_25 : f32 to vector<288x32xf32>
    %63 = arith.select %61, %59, %62 : vector<288x32xi1>, vector<288x32xf32>
    %64 = arith.mulf %63, %63 : vector<288x32xf32>
    %cst_26 = arith.constant dense<0.000000e+00> : vector<32xf32>
    %65 = vector.multi_reduction <add>, %64, %cst_26 [0] : vector<288x32xf32> to vector<32xf32>
    %66 = vector.shape_cast %65 : vector<32xf32> to vector<1x32xf32>
    %cst_27 = arith.constant 2.560000e+02 : f32
    %67 = vector.broadcast %cst_27 : f32 to vector<1x32xf32>
    %68 = arith.divf %66, %67 : vector<1x32xf32>
    %cst_28 = arith.constant 9.99999974E-6 : f32
    %69 = vector.broadcast %cst_28 : f32 to vector<1x32xf32>
    %70 = arith.addf %68, %69 : vector<1x32xf32>
    %71 = math.rsqrt %70 : vector<1x32xf32>
    %c0_29 = arith.constant 0 : index
    %c0_30 = arith.constant 0 : index
    %72 = vector.load %arg4[%c0_29, %c0_30] : memref<1x32xf32, #tpu.memory_space<vmem>>, vector<1x32xf32>
    %73 = arith.mulf %72, %71 : vector<1x32xf32>
    %c0_31 = arith.constant 0 : index
    %c0_32 = arith.constant 0 : index
    %74 = vector.load %arg5[%c0_31, %c0_32] : memref<1x32xf32, #tpu.memory_space<vmem>>, vector<1x32xf32>
    %75 = arith.mulf %57, %73 : vector<1x32xf32>
    %76 = arith.subf %74, %75 : vector<1x32xf32>
    %77 = vector.broadcast %73 : vector<1x32xf32> to vector<288x32xf32>
    %78 = arith.mulf %40, %77 : vector<288x32xf32>
    %79 = vector.broadcast %76 : vector<1x32xf32> to vector<288x32xf32>
    %80 = arith.addf %78, %79 : vector<288x32xf32>
    %cst_33 = arith.constant -1.000000e+30 : f32
    %81 = vector.broadcast %cst_33 : f32 to vector<8x32xf32>
    %c0_34 = arith.constant 0 : index
    %c0_35 = arith.constant 0 : index
    %82 = vector.load %arg18[%c0_34, %c0_35] : memref<304x32xf32, #tpu.memory_space<vmem>>, vector<8x32xf32>
    tpu.vector_store %arg18[%c0_34, %c0_35], %81 {strides = array<i32>} : memref<304x32xf32, #tpu.memory_space<vmem>>, vector<8x32xf32>,
    %cst_36 = arith.constant -1.000000e+30 : f32
    %83 = vector.broadcast %cst_36 : f32 to vector<16x32xf32>
    %c136 = arith.constant 136 : index
    %c0_37 = arith.constant 0 : index
    %84 = vector.load %arg18[%c136, %c0_37] : memref<304x32xf32, #tpu.memory_space<vmem>>, vector<16x32xf32>
    tpu.vector_store %arg18[%c136, %c0_37], %83 {strides = array<i32>} : memref<304x32xf32, #tpu.memory_space<vmem>>, vector<16x32xf32>,
    %85 = vector.extract_strided_slice %80 {offsets = [0, 0], sizes = [128, 32], strides = [1, 1]} : vector<288x32xf32> to vector<128x32xf32>
    %c8 = arith.constant 8 : index
    %c0_38 = arith.constant 0 : index
    %86 = vector.load %arg18[%c8, %c0_38] : memref<304x32xf32, #tpu.memory_space<vmem>>, vector<128x32xf32>
    tpu.vector_store %arg18[%c8, %c0_38], %85 {strides = array<i32>} : memref<304x32xf32, #tpu.memory_space<vmem>>, vector<128x32xf32>,
    %cst_39 = arith.constant -1.000000e+30 : f32
    %87 = vector.broadcast %cst_39 : f32 to vector<8x32xf32>
    %c152 = arith.constant 152 : index
    %c0_40 = arith.constant 0 : index
    %88 = vector.load %arg18[%c152, %c0_40] : memref<304x32xf32, #tpu.memory_space<vmem>>, vector<8x32xf32>
    tpu.vector_store %arg18[%c152, %c0_40], %87 {strides = array<i32>} : memref<304x32xf32, #tpu.memory_space<vmem>>, vector<8x32xf32>,
    %cst_41 = arith.constant -1.000000e+30 : f32
    %89 = vector.broadcast %cst_41 : f32 to vector<16x32xf32>
    %c288 = arith.constant 288 : index
    %c0_42 = arith.constant 0 : index
    %90 = vector.load %arg18[%c288, %c0_42] : memref<304x32xf32, #tpu.memory_space<vmem>>, vector<16x32xf32>
    tpu.vector_store %arg18[%c288, %c0_42], %89 {strides = array<i32>} : memref<304x32xf32, #tpu.memory_space<vmem>>, vector<16x32xf32>,
    %91 = vector.extract_strided_slice %80 {offsets = [160, 0], sizes = [128, 32], strides = [1, 1]} : vector<288x32xf32> to vector<128x32xf32>
    %c160_43 = arith.constant 160 : index
    %c0_44 = arith.constant 0 : index
    %92 = vector.load %arg18[%c160_43, %c0_44] : memref<304x32xf32, #tpu.memory_space<vmem>>, vector<128x32xf32>
    tpu.vector_store %arg18[%c160_43, %c0_44], %91 {strides = array<i32>} : memref<304x32xf32, #tpu.memory_space<vmem>>, vector<128x32xf32>,
    %c8_45 = arith.constant 8 : index
    %c0_46 = arith.constant 0 : index
    %93 = tpu.strided_load %arg18[%c8_45, %c0_46] {strides = array<i32: 2, 1>} : memref<304x32xf32, #tpu.memory_space<vmem>>, vector<72x32xf32>
    %c9 = arith.constant 9 : index
    %c0_47 = arith.constant 0 : index
    %94 = tpu.strided_load %arg18[%c9, %c0_47] {strides = array<i32: 2, 1>} : memref<304x32xf32, #tpu.memory_space<vmem>>, vector<72x32xf32>
    %95 = arith.maximumf %93, %94 : vector<72x32xf32>
    %c1_i32 = arith.constant 1 : i32
    %96 = tpu.dynamic_rotate %95 by %c1_i32 dim 0 : vector<72x32xf32>, i32 -> vector<72x32xf32>
    %97 = arith.maximumf %95, %96 : vector<72x32xf32>
    %c71_i32 = arith.constant 71 : i32
    %98 = tpu.dynamic_rotate %95 by %c71_i32 dim 0 : vector<72x32xf32>, i32 -> vector<72x32xf32>
    %99 = arith.maximumf %97, %98 : vector<72x32xf32>
    %c2_i32 = arith.constant 2 : i32
    %100 = tpu.dynamic_rotate %95 by %c2_i32 dim 0 : vector<72x32xf32>, i32 -> vector<72x32xf32>
    %101 = arith.maximumf %99, %100 : vector<72x32xf32>
    %c70_i32 = arith.constant 70 : i32
    %102 = tpu.dynamic_rotate %95 by %c70_i32 dim 0 : vector<72x32xf32>, i32 -> vector<72x32xf32>
    %103 = arith.maximumf %101, %102 : vector<72x32xf32>
    %104 = vector.extract_strided_slice %103 {offsets = [0, 0], sizes = [64, 32], strides = [1, 1]} : vector<72x32xf32> to vector<64x32xf32>
    %c160_48 = arith.constant 160 : index
    %c0_49 = arith.constant 0 : index
    %105 = tpu.strided_load %arg18[%c160_48, %c0_49] {strides = array<i32: 2, 1>} : memref<304x32xf32, #tpu.memory_space<vmem>>, vector<72x32xf32>
    %c161 = arith.constant 161 : index
    %c0_50 = arith.constant 0 : index
    %106 = tpu.strided_load %arg18[%c161, %c0_50] {strides = array<i32: 2, 1>} : memref<304x32xf32, #tpu.memory_space<vmem>>, vector<72x32xf32>
    %107 = arith.maximumf %105, %106 : vector<72x32xf32>
    %c1_i32_51 = arith.constant 1 : i32
    %108 = tpu.dynamic_rotate %107 by %c1_i32_51 dim 0 : vector<72x32xf32>, i32 -> vector<72x32xf32>
    %109 = arith.maximumf %107, %108 : vector<72x32xf32>
    %c71_i32_52 = arith.constant 71 : i32
    %110 = tpu.dynamic_rotate %107 by %c71_i32_52 dim 0 : vector<72x32xf32>, i32 -> vector<72x32xf32>
    %111 = arith.maximumf %109, %110 : vector<72x32xf32>
    %c2_i32_53 = arith.constant 2 : i32
    %112 = tpu.dynamic_rotate %107 by %c2_i32_53 dim 0 : vector<72x32xf32>, i32 -> vector<72x32xf32>
    %113 = arith.maximumf %111, %112 : vector<72x32xf32>
    %c70_i32_54 = arith.constant 70 : i32
    %114 = tpu.dynamic_rotate %107 by %c70_i32_54 dim 0 : vector<72x32xf32>, i32 -> vector<72x32xf32>
    %115 = arith.maximumf %113, %114 : vector<72x32xf32>
    %116 = vector.extract_strided_slice %115 {offsets = [0, 0], sizes = [64, 32], strides = [1, 1]} : vector<72x32xf32> to vector<64x32xf32>
    %cst_55 = arith.constant 0.000000e+00 : bf16
    %117 = vector.broadcast %cst_55 : bf16 to vector<16x32xbf16>
    %c0_56 = arith.constant 0 : index
    %c0_57 = arith.constant 0 : index
    %118 = vector.load %arg17[%c0_56, %c0_57] : memref<320x32xbf16, #tpu.memory_space<vmem>>, vector<16x32xbf16>
    tpu.vector_store %arg17[%c0_56, %c0_57], %117 {strides = array<i32>} : memref<320x32xbf16, #tpu.memory_space<vmem>>, vector<16x32xbf16>,
    %cst_58 = arith.constant 0.000000e+00 : bf16
    %119 = vector.broadcast %cst_58 : bf16 to vector<16x32xbf16>
    %c80 = arith.constant 80 : index
    %c0_59 = arith.constant 0 : index
    %120 = vector.load %arg17[%c80, %c0_59] : memref<320x32xbf16, #tpu.memory_space<vmem>>, vector<16x32xbf16>
    tpu.vector_store %arg17[%c80, %c0_59], %119 {strides = array<i32>} : memref<320x32xbf16, #tpu.memory_space<vmem>>, vector<16x32xbf16>,
    %121 = arith.truncf %104 : vector<64x32xf32> to vector<64x32xbf16>
    %c16_60 = arith.constant 16 : index
    %c0_61 = arith.constant 0 : index
    %122 = vector.load %arg17[%c16_60, %c0_61] : memref<320x32xbf16, #tpu.memory_space<vmem>>, vector<64x32xbf16>
    tpu.vector_store %arg17[%c16_60, %c0_61], %121 {strides = array<i32>} : memref<320x32xbf16, #tpu.memory_space<vmem>>, vector<64x32xbf16>,
    %cst_62 = arith.constant 0.000000e+00 : bf16
    %123 = vector.broadcast %cst_62 : bf16 to vector<16x32xbf16>
    %c96 = arith.constant 96 : index
    %c0_63 = arith.constant 0 : index
    %124 = vector.load %arg17[%c96, %c0_63] : memref<320x32xbf16, #tpu.memory_space<vmem>>, vector<16x32xbf16>
    tpu.vector_store %arg17[%c96, %c0_63], %123 {strides = array<i32>} : memref<320x32xbf16, #tpu.memory_space<vmem>>, vector<16x32xbf16>,
    %cst_64 = arith.constant 0.000000e+00 : bf16
    %125 = vector.broadcast %cst_64 : bf16 to vector<16x32xbf16>
    %c176_65 = arith.constant 176 : index
    %c0_66 = arith.constant 0 : index
    %126 = vector.load %arg17[%c176_65, %c0_66] : memref<320x32xbf16, #tpu.memory_space<vmem>>, vector<16x32xbf16>
    tpu.vector_store %arg17[%c176_65, %c0_66], %125 {strides = array<i32>} : memref<320x32xbf16, #tpu.memory_space<vmem>>, vector<16x32xbf16>,
    %127 = arith.truncf %116 : vector<64x32xf32> to vector<64x32xbf16>
    %c112 = arith.constant 112 : index
    %c0_67 = arith.constant 0 : index
    %128 = vector.load %arg17[%c112, %c0_67] : memref<320x32xbf16, #tpu.memory_space<vmem>>, vector<64x32xbf16>
    tpu.vector_store %arg17[%c112, %c0_67], %127 {strides = array<i32>} : memref<320x32xbf16, #tpu.memory_space<vmem>>, vector<64x32xbf16>,
    %c0_68 = arith.constant 0 : index
    %c0_69 = arith.constant 0 : index
    %129 = vector.load %arg17[%c0_68, %c0_69] : memref<320x32xbf16, #tpu.memory_space<vmem>>, vector<192x32xbf16>
    %c0_70 = arith.constant 0 : index
    %c0_71 = arith.constant 0 : index
    %130 = vector.load %arg6[%c0_70, %c0_71] : memref<32x288xbf16, #tpu.memory_space<vmem>>, vector<32x288xbf16>
    %cst_72 = arith.constant dense<0.000000e+00> : vector<192x288xf32>
    %131 = tpu.matmul %129, %130, %cst_72 {dimension_numbers = #tpu.dot_dimension_numbers<[1], [0], [0], [1], [0, 0, 1, 1], [], []>} : vector<192x32xbf16>, vector<32x288xbf16>, vector<192x288xf32> -> vector<192x288xf32>
    %132 = vector.extract_strided_slice %131 {offsets = [12, 0], sizes = [160, 32], strides = [1, 1]} : vector<192x288xf32> to vector<160x32xf32>
    %133 = vector.extract_strided_slice %131 {offsets = [13, 32], sizes = [160, 32], strides = [1, 1]} : vector<192x288xf32> to vector<160x32xf32>
    %134 = arith.addf %132, %133 : vector<160x32xf32>
    %135 = vector.extract_strided_slice %131 {offsets = [14, 64], sizes = [160, 32], strides = [1, 1]} : vector<192x288xf32> to vector<160x32xf32>
    %136 = arith.addf %134, %135 : vector<160x32xf32>
    %137 = vector.extract_strided_slice %131 {offsets = [15, 96], sizes = [160, 32], strides = [1, 1]} : vector<192x288xf32> to vector<160x32xf32>
    %138 = arith.addf %136, %137 : vector<160x32xf32>
    %139 = vector.extract_strided_slice %131 {offsets = [16, 128], sizes = [160, 32], strides = [1, 1]} : vector<192x288xf32> to vector<160x32xf32>
    %140 = arith.addf %138, %139 : vector<160x32xf32>
    %141 = vector.extract_strided_slice %131 {offsets = [17, 160], sizes = [160, 32], strides = [1, 1]} : vector<192x288xf32> to vector<160x32xf32>
    %142 = arith.addf %140, %141 : vector<160x32xf32>
    %143 = vector.extract_strided_slice %131 {offsets = [18, 192], sizes = [160, 32], strides = [1, 1]} : vector<192x288xf32> to vector<160x32xf32>
    %144 = arith.addf %142, %143 : vector<160x32xf32>
    %145 = vector.extract_strided_slice %131 {offsets = [19, 224], sizes = [160, 32], strides = [1, 1]} : vector<192x288xf32> to vector<160x32xf32>
    %146 = arith.addf %144, %145 : vector<160x32xf32>
    %147 = vector.extract_strided_slice %131 {offsets = [20, 256], sizes = [160, 32], strides = [1, 1]} : vector<192x288xf32> to vector<160x32xf32>
    %148 = arith.addf %146, %147 : vector<160x32xf32>
    %c0_73 = arith.constant 0 : index
    %c0_74 = arith.constant 0 : index
    %149 = vector.load %arg7[%c0_73, %c0_74] : memref<1x32xf32, #tpu.memory_space<vmem>>, vector<1x32xf32>
    %150 = vector.broadcast %149 : vector<1x32xf32> to vector<160x32xf32>
    %151 = arith.addf %148, %150 : vector<160x32xf32>
    %cst_75 = arith.constant 0.000000e+00 : f32
    %152 = vector.broadcast %cst_75 : f32 to vector<160x32xf32>
    %153 = arith.maximumf %151, %152 : vector<160x32xf32>
    %154 = tpu.iota {dimensions = array<i32: 0>} : vector<160x1xi32>
    %c64_i32 = arith.constant 64 : i32
    %155 = vector.broadcast %c64_i32 : i32 to vector<160x1xi32>
    %156 = arith.cmpi slt, %154, %155 : vector<160x1xi32>
    %c96_i32 = arith.constant 96 : i32
    %157 = vector.broadcast %c96_i32 : i32 to vector<160x1xi32>
    %158 = arith.cmpi sge, %154, %157 : vector<160x1xi32>
    %c160_i32_76 = arith.constant 160 : i32
    %159 = vector.broadcast %c160_i32_76 : i32 to vector<160x1xi32>
    %160 = arith.cmpi slt, %154, %159 : vector<160x1xi32>
    %161 = arith.andi %158, %160 : vector<160x1xi1>
    %162 = arith.ori %156, %161 : vector<160x1xi1>
    %cst_77 = arith.constant 0.000000e+00 : f32
    %163 = vector.shape_cast %162 : vector<160x1xi1> to vector<160x1xi1>
    %164 = vector.broadcast %163 : vector<160x1xi1> to vector<160x32xi1>
    %165 = vector.broadcast %cst_77 : f32 to vector<160x32xf32>
    %166 = arith.select %164, %153, %165 : vector<160x32xi1>, vector<160x32xf32>
    %cst_78 = arith.constant dense<0.000000e+00> : vector<32xf32>
    %167 = vector.multi_reduction <add>, %166, %cst_78 [0] : vector<160x32xf32> to vector<32xf32>
    %168 = vector.shape_cast %167 : vector<32xf32> to vector<1x32xf32>
    %cst_79 = arith.constant 1.280000e+02 : f32
    %169 = vector.broadcast %cst_79 : f32 to vector<1x32xf32>
    %170 = arith.divf %168, %169 : vector<1x32xf32>
    %171 = vector.broadcast %170 : vector<1x32xf32> to vector<160x32xf32>
    %172 = arith.subf %153, %171 : vector<160x32xf32>
    %cst_80 = arith.constant 0.000000e+00 : f32
    %173 = vector.shape_cast %162 : vector<160x1xi1> to vector<160x1xi1>
    %174 = vector.broadcast %173 : vector<160x1xi1> to vector<160x32xi1>
    %175 = vector.broadcast %cst_80 : f32 to vector<160x32xf32>
    %176 = arith.select %174, %172, %175 : vector<160x32xi1>, vector<160x32xf32>
    %177 = arith.mulf %176, %176 : vector<160x32xf32>
    %cst_81 = arith.constant dense<0.000000e+00> : vector<32xf32>
    %178 = vector.multi_reduction <add>, %177, %cst_81 [0] : vector<160x32xf32> to vector<32xf32>
    %179 = vector.shape_cast %178 : vector<32xf32> to vector<1x32xf32>
    %cst_82 = arith.constant 1.280000e+02 : f32
    %180 = vector.broadcast %cst_82 : f32 to vector<1x32xf32>
    %181 = arith.divf %179, %180 : vector<1x32xf32>
    %cst_83 = arith.constant 9.99999974E-6 : f32
    %182 = vector.broadcast %cst_83 : f32 to vector<1x32xf32>
    %183 = arith.addf %181, %182 : vector<1x32xf32>
    %184 = math.rsqrt %183 : vector<1x32xf32>
    %c0_84 = arith.constant 0 : index
    %c0_85 = arith.constant 0 : index
    %185 = vector.load %arg8[%c0_84, %c0_85] : memref<1x32xf32, #tpu.memory_space<vmem>>, vector<1x32xf32>
    %186 = arith.mulf %185, %184 : vector<1x32xf32>
    %c0_86 = arith.constant 0 : index
    %c0_87 = arith.constant 0 : index
    %187 = vector.load %arg9[%c0_86, %c0_87] : memref<1x32xf32, #tpu.memory_space<vmem>>, vector<1x32xf32>
    %188 = arith.mulf %170, %186 : vector<1x32xf32>
    %189 = arith.subf %187, %188 : vector<1x32xf32>
    %190 = vector.broadcast %186 : vector<1x32xf32> to vector<160x32xf32>
    %191 = arith.mulf %153, %190 : vector<160x32xf32>
    %192 = vector.broadcast %189 : vector<1x32xf32> to vector<160x32xf32>
    %193 = arith.addf %191, %192 : vector<160x32xf32>
    %cst_88 = arith.constant -1.000000e+30 : f32
    %194 = vector.broadcast %cst_88 : f32 to vector<8x32xf32>
    %c0_89 = arith.constant 0 : index
    %c0_90 = arith.constant 0 : index
    %195 = vector.load %arg18[%c0_89, %c0_90] : memref<304x32xf32, #tpu.memory_space<vmem>>, vector<8x32xf32>
    tpu.vector_store %arg18[%c0_89, %c0_90], %194 {strides = array<i32>} : memref<304x32xf32, #tpu.memory_space<vmem>>, vector<8x32xf32>,
    %cst_91 = arith.constant -1.000000e+30 : f32
    %196 = vector.broadcast %cst_91 : f32 to vector<16x32xf32>
    %c72 = arith.constant 72 : index
    %c0_92 = arith.constant 0 : index
    %197 = vector.load %arg18[%c72, %c0_92] : memref<304x32xf32, #tpu.memory_space<vmem>>, vector<16x32xf32>
    tpu.vector_store %arg18[%c72, %c0_92], %196 {strides = array<i32>} : memref<304x32xf32, #tpu.memory_space<vmem>>, vector<16x32xf32>,
    %198 = vector.extract_strided_slice %193 {offsets = [0, 0], sizes = [64, 32], strides = [1, 1]} : vector<160x32xf32> to vector<64x32xf32>
    %c8_93 = arith.constant 8 : index
    %c0_94 = arith.constant 0 : index
    %199 = vector.load %arg18[%c8_93, %c0_94] : memref<304x32xf32, #tpu.memory_space<vmem>>, vector<64x32xf32>
    tpu.vector_store %arg18[%c8_93, %c0_94], %198 {strides = array<i32>} : memref<304x32xf32, #tpu.memory_space<vmem>>, vector<64x32xf32>,
    %cst_95 = arith.constant -1.000000e+30 : f32
    %200 = vector.broadcast %cst_95 : f32 to vector<8x32xf32>
    %c88 = arith.constant 88 : index
    %c0_96 = arith.constant 0 : index
    %201 = vector.load %arg18[%c88, %c0_96] : memref<304x32xf32, #tpu.memory_space<vmem>>, vector<8x32xf32>
    tpu.vector_store %arg18[%c88, %c0_96], %200 {strides = array<i32>} : memref<304x32xf32, #tpu.memory_space<vmem>>, vector<8x32xf32>,
    %cst_97 = arith.constant -1.000000e+30 : f32
    %202 = vector.broadcast %cst_97 : f32 to vector<16x32xf32>
    %c160_98 = arith.constant 160 : index
    %c0_99 = arith.constant 0 : index
    %203 = vector.load %arg18[%c160_98, %c0_99] : memref<304x32xf32, #tpu.memory_space<vmem>>, vector<16x32xf32>
    tpu.vector_store %arg18[%c160_98, %c0_99], %202 {strides = array<i32>} : memref<304x32xf32, #tpu.memory_space<vmem>>, vector<16x32xf32>,
    %204 = vector.extract_strided_slice %193 {offsets = [96, 0], sizes = [64, 32], strides = [1, 1]} : vector<160x32xf32> to vector<64x32xf32>
    %c96_100 = arith.constant 96 : index
    %c0_101 = arith.constant 0 : index
    %205 = vector.load %arg18[%c96_100, %c0_101] : memref<304x32xf32, #tpu.memory_space<vmem>>, vector<64x32xf32>
    tpu.vector_store %arg18[%c96_100, %c0_101], %204 {strides = array<i32>} : memref<304x32xf32, #tpu.memory_space<vmem>>, vector<64x32xf32>,
    %c8_102 = arith.constant 8 : index
    %c0_103 = arith.constant 0 : index
    %206 = tpu.strided_load %arg18[%c8_102, %c0_103] {strides = array<i32: 2, 1>} : memref<304x32xf32, #tpu.memory_space<vmem>>, vector<40x32xf32>
    %c9_104 = arith.constant 9 : index
    %c0_105 = arith.constant 0 : index
    %207 = tpu.strided_load %arg18[%c9_104, %c0_105] {strides = array<i32: 2, 1>} : memref<304x32xf32, #tpu.memory_space<vmem>>, vector<40x32xf32>
    %208 = arith.maximumf %206, %207 : vector<40x32xf32>
    %c1_i32_106 = arith.constant 1 : i32
    %209 = tpu.dynamic_rotate %208 by %c1_i32_106 dim 0 : vector<40x32xf32>, i32 -> vector<40x32xf32>
    %210 = arith.maximumf %208, %209 : vector<40x32xf32>
    %c39_i32 = arith.constant 39 : i32
    %211 = tpu.dynamic_rotate %208 by %c39_i32 dim 0 : vector<40x32xf32>, i32 -> vector<40x32xf32>
    %212 = arith.maximumf %210, %211 : vector<40x32xf32>
    %c2_i32_107 = arith.constant 2 : i32
    %213 = tpu.dynamic_rotate %208 by %c2_i32_107 dim 0 : vector<40x32xf32>, i32 -> vector<40x32xf32>
    %214 = arith.maximumf %212, %213 : vector<40x32xf32>
    %c38_i32 = arith.constant 38 : i32
    %215 = tpu.dynamic_rotate %208 by %c38_i32 dim 0 : vector<40x32xf32>, i32 -> vector<40x32xf32>
    %216 = arith.maximumf %214, %215 : vector<40x32xf32>
    %217 = vector.extract_strided_slice %216 {offsets = [0, 0], sizes = [32, 32], strides = [1, 1]} : vector<40x32xf32> to vector<32x32xf32>
    %c96_108 = arith.constant 96 : index
    %c0_109 = arith.constant 0 : index
    %218 = tpu.strided_load %arg18[%c96_108, %c0_109] {strides = array<i32: 2, 1>} : memref<304x32xf32, #tpu.memory_space<vmem>>, vector<40x32xf32>
    %c97 = arith.constant 97 : index
    %c0_110 = arith.constant 0 : index
    %219 = tpu.strided_load %arg18[%c97, %c0_110] {strides = array<i32: 2, 1>} : memref<304x32xf32, #tpu.memory_space<vmem>>, vector<40x32xf32>
    %220 = arith.maximumf %218, %219 : vector<40x32xf32>
    %c1_i32_111 = arith.constant 1 : i32
    %221 = tpu.dynamic_rotate %220 by %c1_i32_111 dim 0 : vector<40x32xf32>, i32 -> vector<40x32xf32>
    %222 = arith.maximumf %220, %221 : vector<40x32xf32>
    %c39_i32_112 = arith.constant 39 : i32
    %223 = tpu.dynamic_rotate %220 by %c39_i32_112 dim 0 : vector<40x32xf32>, i32 -> vector<40x32xf32>
    %224 = arith.maximumf %222, %223 : vector<40x32xf32>
    %c2_i32_113 = arith.constant 2 : i32
    %225 = tpu.dynamic_rotate %220 by %c2_i32_113 dim 0 : vector<40x32xf32>, i32 -> vector<40x32xf32>
    %226 = arith.maximumf %224, %225 : vector<40x32xf32>
    %c38_i32_114 = arith.constant 38 : i32
    %227 = tpu.dynamic_rotate %220 by %c38_i32_114 dim 0 : vector<40x32xf32>, i32 -> vector<40x32xf32>
    %228 = arith.maximumf %226, %227 : vector<40x32xf32>
    %229 = vector.extract_strided_slice %228 {offsets = [0, 0], sizes = [32, 32], strides = [1, 1]} : vector<40x32xf32> to vector<32x32xf32>
    %cst_115 = arith.constant 0.000000e+00 : bf16
    %230 = vector.broadcast %cst_115 : bf16 to vector<16x32xbf16>
    %c0_116 = arith.constant 0 : index
    %c0_117 = arith.constant 0 : index
    %231 = vector.load %arg17[%c0_116, %c0_117] : memref<320x32xbf16, #tpu.memory_space<vmem>>, vector<16x32xbf16>
    tpu.vector_store %arg17[%c0_116, %c0_117], %230 {strides = array<i32>} : memref<320x32xbf16, #tpu.memory_space<vmem>>, vector<16x32xbf16>,
    %cst_118 = arith.constant 0.000000e+00 : bf16
    %232 = vector.broadcast %cst_118 : bf16 to vector<16x32xbf16>
    %c48 = arith.constant 48 : index
    %c0_119 = arith.constant 0 : index
    %233 = vector.load %arg17[%c48, %c0_119] : memref<320x32xbf16, #tpu.memory_space<vmem>>, vector<16x32xbf16>
    tpu.vector_store %arg17[%c48, %c0_119], %232 {strides = array<i32>} : memref<320x32xbf16, #tpu.memory_space<vmem>>, vector<16x32xbf16>,
    %234 = arith.truncf %217 : vector<32x32xf32> to vector<32x32xbf16>
    %c16_120 = arith.constant 16 : index
    %c0_121 = arith.constant 0 : index
    %235 = vector.load %arg17[%c16_120, %c0_121] : memref<320x32xbf16, #tpu.memory_space<vmem>>, vector<32x32xbf16>
    tpu.vector_store %arg17[%c16_120, %c0_121], %234 {strides = array<i32>} : memref<320x32xbf16, #tpu.memory_space<vmem>>, vector<32x32xbf16>,
    %cst_122 = arith.constant 0.000000e+00 : bf16
    %236 = vector.broadcast %cst_122 : bf16 to vector<16x32xbf16>
    %c64 = arith.constant 64 : index
    %c0_123 = arith.constant 0 : index
    %237 = vector.load %arg17[%c64, %c0_123] : memref<320x32xbf16, #tpu.memory_space<vmem>>, vector<16x32xbf16>
    tpu.vector_store %arg17[%c64, %c0_123], %236 {strides = array<i32>} : memref<320x32xbf16, #tpu.memory_space<vmem>>, vector<16x32xbf16>,
    %cst_124 = arith.constant 0.000000e+00 : bf16
    %238 = vector.broadcast %cst_124 : bf16 to vector<16x32xbf16>
    %c112_125 = arith.constant 112 : index
    %c0_126 = arith.constant 0 : index
    %239 = vector.load %arg17[%c112_125, %c0_126] : memref<320x32xbf16, #tpu.memory_space<vmem>>, vector<16x32xbf16>
    tpu.vector_store %arg17[%c112_125, %c0_126], %238 {strides = array<i32>} : memref<320x32xbf16, #tpu.memory_space<vmem>>, vector<16x32xbf16>,
    %240 = arith.truncf %229 : vector<32x32xf32> to vector<32x32xbf16>
    %c80_127 = arith.constant 80 : index
    %c0_128 = arith.constant 0 : index
    %241 = vector.load %arg17[%c80_127, %c0_128] : memref<320x32xbf16, #tpu.memory_space<vmem>>, vector<32x32xbf16>
    tpu.vector_store %arg17[%c80_127, %c0_128], %240 {strides = array<i32>} : memref<320x32xbf16, #tpu.memory_space<vmem>>, vector<32x32xbf16>,
    %c0_129 = arith.constant 0 : index
    %c0_130 = arith.constant 0 : index
    %242 = vector.load %arg17[%c0_129, %c0_130] : memref<320x32xbf16, #tpu.memory_space<vmem>>, vector<128x32xbf16>
    %c0_131 = arith.constant 0 : index
    %c0_132 = arith.constant 0 : index
    %243 = vector.load %arg10[%c0_131, %c0_132] : memref<32x288xbf16, #tpu.memory_space<vmem>>, vector<32x288xbf16>
    %cst_133 = arith.constant dense<0.000000e+00> : vector<128x288xf32>
    %244 = tpu.matmul %242, %243, %cst_133 {dimension_numbers = #tpu.dot_dimension_numbers<[1], [0], [0], [1], [0, 0, 1, 1], [], []>} : vector<128x32xbf16>, vector<32x288xbf16>, vector<128x288xf32> -> vector<128x288xf32>
    %245 = vector.extract_strided_slice %244 {offsets = [12, 0], sizes = [96, 32], strides = [1, 1]} : vector<128x288xf32> to vector<96x32xf32>
    %246 = vector.extract_strided_slice %244 {offsets = [13, 32], sizes = [96, 32], strides = [1, 1]} : vector<128x288xf32> to vector<96x32xf32>
    %247 = arith.addf %245, %246 : vector<96x32xf32>
    %248 = vector.extract_strided_slice %244 {offsets = [14, 64], sizes = [96, 32], strides = [1, 1]} : vector<128x288xf32> to vector<96x32xf32>
    %249 = arith.addf %247, %248 : vector<96x32xf32>
    %250 = vector.extract_strided_slice %244 {offsets = [15, 96], sizes = [96, 32], strides = [1, 1]} : vector<128x288xf32> to vector<96x32xf32>
    %251 = arith.addf %249, %250 : vector<96x32xf32>
    %252 = vector.extract_strided_slice %244 {offsets = [16, 128], sizes = [96, 32], strides = [1, 1]} : vector<128x288xf32> to vector<96x32xf32>
    %253 = arith.addf %251, %252 : vector<96x32xf32>
    %254 = vector.extract_strided_slice %244 {offsets = [17, 160], sizes = [96, 32], strides = [1, 1]} : vector<128x288xf32> to vector<96x32xf32>
    %255 = arith.addf %253, %254 : vector<96x32xf32>
    %256 = vector.extract_strided_slice %244 {offsets = [18, 192], sizes = [96, 32], strides = [1, 1]} : vector<128x288xf32> to vector<96x32xf32>
    %257 = arith.addf %255, %256 : vector<96x32xf32>
    %258 = vector.extract_strided_slice %244 {offsets = [19, 224], sizes = [96, 32], strides = [1, 1]} : vector<128x288xf32> to vector<96x32xf32>
    %259 = arith.addf %257, %258 : vector<96x32xf32>
    %260 = vector.extract_strided_slice %244 {offsets = [20, 256], sizes = [96, 32], strides = [1, 1]} : vector<128x288xf32> to vector<96x32xf32>
    %261 = arith.addf %259, %260 : vector<96x32xf32>
    %c0_134 = arith.constant 0 : index
    %c0_135 = arith.constant 0 : index
    %262 = vector.load %arg11[%c0_134, %c0_135] : memref<1x32xf32, #tpu.memory_space<vmem>>, vector<1x32xf32>
    %263 = vector.broadcast %262 : vector<1x32xf32> to vector<96x32xf32>
    %264 = arith.addf %261, %263 : vector<96x32xf32>
    %cst_136 = arith.constant 0.000000e+00 : f32
    %265 = vector.broadcast %cst_136 : f32 to vector<96x32xf32>
    %266 = arith.maximumf %264, %265 : vector<96x32xf32>
    %267 = tpu.iota {dimensions = array<i32: 0>} : vector<96x1xi32>
    %c32_i32 = arith.constant 32 : i32
    %268 = vector.broadcast %c32_i32 : i32 to vector<96x1xi32>
    %269 = arith.cmpi slt, %267, %268 : vector<96x1xi32>
    %c64_i32_137 = arith.constant 64 : i32
    %270 = vector.broadcast %c64_i32_137 : i32 to vector<96x1xi32>
    %271 = arith.cmpi sge, %267, %270 : vector<96x1xi32>
    %c96_i32_138 = arith.constant 96 : i32
    %272 = vector.broadcast %c96_i32_138 : i32 to vector<96x1xi32>
    %273 = arith.cmpi slt, %267, %272 : vector<96x1xi32>
    %274 = arith.andi %271, %273 : vector<96x1xi1>
    %275 = arith.ori %269, %274 : vector<96x1xi1>
    %cst_139 = arith.constant 0.000000e+00 : f32
    %276 = vector.shape_cast %275 : vector<96x1xi1> to vector<96x1xi1>
    %277 = vector.broadcast %276 : vector<96x1xi1> to vector<96x32xi1>
    %278 = vector.broadcast %cst_139 : f32 to vector<96x32xf32>
    %279 = arith.select %277, %266, %278 : vector<96x32xi1>, vector<96x32xf32>
    %cst_140 = arith.constant dense<0.000000e+00> : vector<32xf32>
    %280 = vector.multi_reduction <add>, %279, %cst_140 [0] : vector<96x32xf32> to vector<32xf32>
    %281 = vector.shape_cast %280 : vector<32xf32> to vector<1x32xf32>
    %cst_141 = arith.constant 6.400000e+01 : f32
    %282 = vector.broadcast %cst_141 : f32 to vector<1x32xf32>
    %283 = arith.divf %281, %282 : vector<1x32xf32>
    %284 = vector.broadcast %283 : vector<1x32xf32> to vector<96x32xf32>
    %285 = arith.subf %266, %284 : vector<96x32xf32>
    %cst_142 = arith.constant 0.000000e+00 : f32
    %286 = vector.shape_cast %275 : vector<96x1xi1> to vector<96x1xi1>
    %287 = vector.broadcast %286 : vector<96x1xi1> to vector<96x32xi1>
    %288 = vector.broadcast %cst_142 : f32 to vector<96x32xf32>
    %289 = arith.select %287, %285, %288 : vector<96x32xi1>, vector<96x32xf32>
    %290 = arith.mulf %289, %289 : vector<96x32xf32>
    %cst_143 = arith.constant dense<0.000000e+00> : vector<32xf32>
    %291 = vector.multi_reduction <add>, %290, %cst_143 [0] : vector<96x32xf32> to vector<32xf32>
    %292 = vector.shape_cast %291 : vector<32xf32> to vector<1x32xf32>
    %cst_144 = arith.constant 6.400000e+01 : f32
    %293 = vector.broadcast %cst_144 : f32 to vector<1x32xf32>
    %294 = arith.divf %292, %293 : vector<1x32xf32>
    %cst_145 = arith.constant 9.99999974E-6 : f32
    %295 = vector.broadcast %cst_145 : f32 to vector<1x32xf32>
    %296 = arith.addf %294, %295 : vector<1x32xf32>
    %297 = math.rsqrt %296 : vector<1x32xf32>
    %c0_146 = arith.constant 0 : index
    %c0_147 = arith.constant 0 : index
    %298 = vector.load %arg12[%c0_146, %c0_147] : memref<1x32xf32, #tpu.memory_space<vmem>>, vector<1x32xf32>
    %299 = arith.mulf %298, %297 : vector<1x32xf32>
    %c0_148 = arith.constant 0 : index
    %c0_149 = arith.constant 0 : index
    %300 = vector.load %arg13[%c0_148, %c0_149] : memref<1x32xf32, #tpu.memory_space<vmem>>, vector<1x32xf32>
    %301 = arith.mulf %283, %299 : vector<1x32xf32>
    %302 = arith.subf %300, %301 : vector<1x32xf32>
    %303 = vector.broadcast %299 : vector<1x32xf32> to vector<96x32xf32>
    %304 = arith.mulf %266, %303 : vector<96x32xf32>
    %305 = vector.broadcast %302 : vector<1x32xf32> to vector<96x32xf32>
    %306 = arith.addf %304, %305 : vector<96x32xf32>
    %cst_150 = arith.constant -1.000000e+30 : f32
    %307 = vector.broadcast %cst_150 : f32 to vector<8x32xf32>
    %c0_151 = arith.constant 0 : index
    %c0_152 = arith.constant 0 : index
    %308 = vector.load %arg18[%c0_151, %c0_152] : memref<304x32xf32, #tpu.memory_space<vmem>>, vector<8x32xf32>
    tpu.vector_store %arg18[%c0_151, %c0_152], %307 {strides = array<i32>} : memref<304x32xf32, #tpu.memory_space<vmem>>, vector<8x32xf32>,
    %cst_153 = arith.constant -1.000000e+30 : f32
    %309 = vector.broadcast %cst_153 : f32 to vector<16x32xf32>
    %c40 = arith.constant 40 : index
    %c0_154 = arith.constant 0 : index
    %310 = vector.load %arg18[%c40, %c0_154] : memref<304x32xf32, #tpu.memory_space<vmem>>, vector<16x32xf32>
    tpu.vector_store %arg18[%c40, %c0_154], %309 {strides = array<i32>} : memref<304x32xf32, #tpu.memory_space<vmem>>, vector<16x32xf32>,
    %311 = vector.extract_strided_slice %306 {offsets = [0, 0], sizes = [32, 32], strides = [1, 1]} : vector<96x32xf32> to vector<32x32xf32>
    %c8_155 = arith.constant 8 : index
    %c0_156 = arith.constant 0 : index
    %312 = vector.load %arg18[%c8_155, %c0_156] : memref<304x32xf32, #tpu.memory_space<vmem>>, vector<32x32xf32>
    tpu.vector_store %arg18[%c8_155, %c0_156], %311 {strides = array<i32>} : memref<304x32xf32, #tpu.memory_space<vmem>>, vector<32x32xf32>,
    %cst_157 = arith.constant -1.000000e+30 : f32
    %313 = vector.broadcast %cst_157 : f32 to vector<8x32xf32>
    %c56 = arith.constant 56 : index
    %c0_158 = arith.constant 0 : index
    %314 = vector.load %arg18[%c56, %c0_158] : memref<304x32xf32, #tpu.memory_space<vmem>>, vector<8x32xf32>
    tpu.vector_store %arg18[%c56, %c0_158], %313 {strides = array<i32>} : memref<304x32xf32, #tpu.memory_space<vmem>>, vector<8x32xf32>,
    %cst_159 = arith.constant -1.000000e+30 : f32
    %315 = vector.broadcast %cst_159 : f32 to vector<16x32xf32>
    %c96_160 = arith.constant 96 : index
    %c0_161 = arith.constant 0 : index
    %316 = vector.load %arg18[%c96_160, %c0_161] : memref<304x32xf32, #tpu.memory_space<vmem>>, vector<16x32xf32>
    tpu.vector_store %arg18[%c96_160, %c0_161], %315 {strides = array<i32>} : memref<304x32xf32, #tpu.memory_space<vmem>>, vector<16x32xf32>,
    %317 = vector.extract_strided_slice %306 {offsets = [64, 0], sizes = [32, 32], strides = [1, 1]} : vector<96x32xf32> to vector<32x32xf32>
    %c64_162 = arith.constant 64 : index
    %c0_163 = arith.constant 0 : index
    %318 = vector.load %arg18[%c64_162, %c0_163] : memref<304x32xf32, #tpu.memory_space<vmem>>, vector<32x32xf32>
    tpu.vector_store %arg18[%c64_162, %c0_163], %317 {strides = array<i32>} : memref<304x32xf32, #tpu.memory_space<vmem>>, vector<32x32xf32>,
    %c8_164 = arith.constant 8 : index
    %c0_165 = arith.constant 0 : index
    %319 = tpu.strided_load %arg18[%c8_164, %c0_165] {strides = array<i32: 2, 1>} : memref<304x32xf32, #tpu.memory_space<vmem>>, vector<24x32xf32>
    %c9_166 = arith.constant 9 : index
    %c0_167 = arith.constant 0 : index
    %320 = tpu.strided_load %arg18[%c9_166, %c0_167] {strides = array<i32: 2, 1>} : memref<304x32xf32, #tpu.memory_space<vmem>>, vector<24x32xf32>
    %321 = arith.maximumf %319, %320 : vector<24x32xf32>
    %c1_i32_168 = arith.constant 1 : i32
    %322 = tpu.dynamic_rotate %321 by %c1_i32_168 dim 0 : vector<24x32xf32>, i32 -> vector<24x32xf32>
    %323 = arith.maximumf %321, %322 : vector<24x32xf32>
    %c23_i32 = arith.constant 23 : i32
    %324 = tpu.dynamic_rotate %321 by %c23_i32 dim 0 : vector<24x32xf32>, i32 -> vector<24x32xf32>
    %325 = arith.maximumf %323, %324 : vector<24x32xf32>
    %c2_i32_169 = arith.constant 2 : i32
    %326 = tpu.dynamic_rotate %321 by %c2_i32_169 dim 0 : vector<24x32xf32>, i32 -> vector<24x32xf32>
    %327 = arith.maximumf %325, %326 : vector<24x32xf32>
    %c22_i32 = arith.constant 22 : i32
    %328 = tpu.dynamic_rotate %321 by %c22_i32 dim 0 : vector<24x32xf32>, i32 -> vector<24x32xf32>
    %329 = arith.maximumf %327, %328 : vector<24x32xf32>
    %330 = vector.extract_strided_slice %329 {offsets = [0, 0], sizes = [16, 32], strides = [1, 1]} : vector<24x32xf32> to vector<16x32xf32>
    %c64_170 = arith.constant 64 : index
    %c0_171 = arith.constant 0 : index
    %331 = tpu.strided_load %arg18[%c64_170, %c0_171] {strides = array<i32: 2, 1>} : memref<304x32xf32, #tpu.memory_space<vmem>>, vector<24x32xf32>
    %c65 = arith.constant 65 : index
    %c0_172 = arith.constant 0 : index
    %332 = tpu.strided_load %arg18[%c65, %c0_172] {strides = array<i32: 2, 1>} : memref<304x32xf32, #tpu.memory_space<vmem>>, vector<24x32xf32>
    %333 = arith.maximumf %331, %332 : vector<24x32xf32>
    %c1_i32_173 = arith.constant 1 : i32
    %334 = tpu.dynamic_rotate %333 by %c1_i32_173 dim 0 : vector<24x32xf32>, i32 -> vector<24x32xf32>
    %335 = arith.maximumf %333, %334 : vector<24x32xf32>
    %c23_i32_174 = arith.constant 23 : i32
    %336 = tpu.dynamic_rotate %333 by %c23_i32_174 dim 0 : vector<24x32xf32>, i32 -> vector<24x32xf32>
    %337 = arith.maximumf %335, %336 : vector<24x32xf32>
    %c2_i32_175 = arith.constant 2 : i32
    %338 = tpu.dynamic_rotate %333 by %c2_i32_175 dim 0 : vector<24x32xf32>, i32 -> vector<24x32xf32>
    %339 = arith.maximumf %337, %338 : vector<24x32xf32>
    %c22_i32_176 = arith.constant 22 : i32
    %340 = tpu.dynamic_rotate %333 by %c22_i32_176 dim 0 : vector<24x32xf32>, i32 -> vector<24x32xf32>
    %341 = arith.maximumf %339, %340 : vector<24x32xf32>
    %342 = vector.extract_strided_slice %341 {offsets = [0, 0], sizes = [16, 32], strides = [1, 1]} : vector<24x32xf32> to vector<16x32xf32>
    %c0_177 = arith.constant 0 : index
    %c0_178 = arith.constant 0 : index
    %c0_179 = arith.constant 0 : index
    %343 = vector.load %arg14[%c0_177, %c0_178, %c0_179] : memref<3x16x32xf32, #tpu.memory_space<vmem>>, vector<1x16x32xf32>
    %344 = vector.shape_cast %343 : vector<1x16x32xf32> to vector<16x32xf32>
    %c1_180 = arith.constant 1 : index
    %c0_181 = arith.constant 0 : index
    %c0_182 = arith.constant 0 : index
    %345 = vector.load %arg14[%c1_180, %c0_181, %c0_182] : memref<3x16x32xf32, #tpu.memory_space<vmem>>, vector<1x16x32xf32>
    %346 = vector.shape_cast %345 : vector<1x16x32xf32> to vector<16x32xf32>
    %c2 = arith.constant 2 : index
    %c0_183 = arith.constant 0 : index
    %c0_184 = arith.constant 0 : index
    %347 = vector.load %arg14[%c2, %c0_183, %c0_184] : memref<3x16x32xf32, #tpu.memory_space<vmem>>, vector<1x16x32xf32>
    %348 = vector.shape_cast %347 : vector<1x16x32xf32> to vector<16x32xf32>
    %349 = tpu.iota {dimensions = array<i32: 0>} : vector<2x3xi32>
    %350 = tpu.iota {dimensions = array<i32: 1>} : vector<2x3xi32>
    %cst_185 = arith.constant 0.000000e+00 : f32
    %351 = vector.broadcast %cst_185 : f32 to vector<2x3xf32>
    %352 = arith.mulf %330, %344 : vector<16x32xf32>
    %353 = vector.shape_cast %352 : vector<16x32xf32> to vector<1x16x32xf32>
    %cst_186 = arith.constant dense<0.000000e+00> : vector<1xf32>
    %354 = vector.multi_reduction <add>, %353, %cst_186 [1, 2] : vector<1x16x32xf32> to vector<1xf32>
    %355 = vector.shape_cast %354 : vector<1xf32> to vector<1x1x1xf32>
    %356 = vector.extract %355[0, 0, 0] : f32 from vector<1x1x1xf32>
    %c0_i32 = arith.constant 0 : i32
    %357 = vector.broadcast %c0_i32 : i32 to vector<2x3xi32>
    %358 = arith.cmpi eq, %349, %357 : vector<2x3xi32>
    %c0_i32_187 = arith.constant 0 : i32
    %359 = vector.broadcast %c0_i32_187 : i32 to vector<2x3xi32>
    %360 = arith.cmpi eq, %350, %359 : vector<2x3xi32>
    %361 = arith.andi %358, %360 : vector<2x3xi1>
    %cst_188 = arith.constant 0.000000e+00 : f32
    %362 = vector.broadcast %356 : f32 to vector<2x3xf32>
    %363 = vector.broadcast %cst_188 : f32 to vector<2x3xf32>
    %364 = arith.select %361, %362, %363 : vector<2x3xi1>, vector<2x3xf32>
    %365 = arith.addf %351, %364 : vector<2x3xf32>
    %366 = arith.mulf %330, %346 : vector<16x32xf32>
    %367 = vector.shape_cast %366 : vector<16x32xf32> to vector<1x16x32xf32>
    %cst_189 = arith.constant dense<0.000000e+00> : vector<1xf32>
    %368 = vector.multi_reduction <add>, %367, %cst_189 [1, 2] : vector<1x16x32xf32> to vector<1xf32>
    %369 = vector.shape_cast %368 : vector<1xf32> to vector<1x1x1xf32>
    %370 = vector.extract %369[0, 0, 0] : f32 from vector<1x1x1xf32>
    %c0_i32_190 = arith.constant 0 : i32
    %371 = vector.broadcast %c0_i32_190 : i32 to vector<2x3xi32>
    %372 = arith.cmpi eq, %349, %371 : vector<2x3xi32>
    %c1_i32_191 = arith.constant 1 : i32
    %373 = vector.broadcast %c1_i32_191 : i32 to vector<2x3xi32>
    %374 = arith.cmpi eq, %350, %373 : vector<2x3xi32>
    %375 = arith.andi %372, %374 : vector<2x3xi1>
    %cst_192 = arith.constant 0.000000e+00 : f32
    %376 = vector.broadcast %370 : f32 to vector<2x3xf32>
    %377 = vector.broadcast %cst_192 : f32 to vector<2x3xf32>
    %378 = arith.select %375, %376, %377 : vector<2x3xi1>, vector<2x3xf32>
    %379 = arith.addf %365, %378 : vector<2x3xf32>
    %380 = arith.mulf %330, %348 : vector<16x32xf32>
    %381 = vector.shape_cast %380 : vector<16x32xf32> to vector<1x16x32xf32>
    %cst_193 = arith.constant dense<0.000000e+00> : vector<1xf32>
    %382 = vector.multi_reduction <add>, %381, %cst_193 [1, 2] : vector<1x16x32xf32> to vector<1xf32>
    %383 = vector.shape_cast %382 : vector<1xf32> to vector<1x1x1xf32>
    %384 = vector.extract %383[0, 0, 0] : f32 from vector<1x1x1xf32>
    %c0_i32_194 = arith.constant 0 : i32
    %385 = vector.broadcast %c0_i32_194 : i32 to vector<2x3xi32>
    %386 = arith.cmpi eq, %349, %385 : vector<2x3xi32>
    %c2_i32_195 = arith.constant 2 : i32
    %387 = vector.broadcast %c2_i32_195 : i32 to vector<2x3xi32>
    %388 = arith.cmpi eq, %350, %387 : vector<2x3xi32>
    %389 = arith.andi %386, %388 : vector<2x3xi1>
    %cst_196 = arith.constant 0.000000e+00 : f32
    %390 = vector.broadcast %384 : f32 to vector<2x3xf32>
    %391 = vector.broadcast %cst_196 : f32 to vector<2x3xf32>
    %392 = arith.select %389, %390, %391 : vector<2x3xi1>, vector<2x3xf32>
    %393 = arith.addf %379, %392 : vector<2x3xf32>
    %394 = arith.mulf %342, %344 : vector<16x32xf32>
    %395 = vector.shape_cast %394 : vector<16x32xf32> to vector<1x16x32xf32>
    %cst_197 = arith.constant dense<0.000000e+00> : vector<1xf32>
    %396 = vector.multi_reduction <add>, %395, %cst_197 [1, 2] : vector<1x16x32xf32> to vector<1xf32>
    %397 = vector.shape_cast %396 : vector<1xf32> to vector<1x1x1xf32>
    %398 = vector.extract %397[0, 0, 0] : f32 from vector<1x1x1xf32>
    %c1_i32_198 = arith.constant 1 : i32
    %399 = vector.broadcast %c1_i32_198 : i32 to vector<2x3xi32>
    %400 = arith.cmpi eq, %349, %399 : vector<2x3xi32>
    %c0_i32_199 = arith.constant 0 : i32
    %401 = vector.broadcast %c0_i32_199 : i32 to vector<2x3xi32>
    %402 = arith.cmpi eq, %350, %401 : vector<2x3xi32>
    %403 = arith.andi %400, %402 : vector<2x3xi1>
    %cst_200 = arith.constant 0.000000e+00 : f32
    %404 = vector.broadcast %398 : f32 to vector<2x3xf32>
    %405 = vector.broadcast %cst_200 : f32 to vector<2x3xf32>
    %406 = arith.select %403, %404, %405 : vector<2x3xi1>, vector<2x3xf32>
    %407 = arith.addf %393, %406 : vector<2x3xf32>
    %408 = arith.mulf %342, %346 : vector<16x32xf32>
    %409 = vector.shape_cast %408 : vector<16x32xf32> to vector<1x16x32xf32>
    %cst_201 = arith.constant dense<0.000000e+00> : vector<1xf32>
    %410 = vector.multi_reduction <add>, %409, %cst_201 [1, 2] : vector<1x16x32xf32> to vector<1xf32>
    %411 = vector.shape_cast %410 : vector<1xf32> to vector<1x1x1xf32>
    %412 = vector.extract %411[0, 0, 0] : f32 from vector<1x1x1xf32>
    %c1_i32_202 = arith.constant 1 : i32
    %413 = vector.broadcast %c1_i32_202 : i32 to vector<2x3xi32>
    %414 = arith.cmpi eq, %349, %413 : vector<2x3xi32>
    %c1_i32_203 = arith.constant 1 : i32
    %415 = vector.broadcast %c1_i32_203 : i32 to vector<2x3xi32>
    %416 = arith.cmpi eq, %350, %415 : vector<2x3xi32>
    %417 = arith.andi %414, %416 : vector<2x3xi1>
    %cst_204 = arith.constant 0.000000e+00 : f32
    %418 = vector.broadcast %412 : f32 to vector<2x3xf32>
    %419 = vector.broadcast %cst_204 : f32 to vector<2x3xf32>
    %420 = arith.select %417, %418, %419 : vector<2x3xi1>, vector<2x3xf32>
    %421 = arith.addf %407, %420 : vector<2x3xf32>
    %422 = arith.mulf %342, %348 : vector<16x32xf32>
    %423 = vector.shape_cast %422 : vector<16x32xf32> to vector<1x16x32xf32>
    %cst_205 = arith.constant dense<0.000000e+00> : vector<1xf32>
    %424 = vector.multi_reduction <add>, %423, %cst_205 [1, 2] : vector<1x16x32xf32> to vector<1xf32>
    %425 = vector.shape_cast %424 : vector<1xf32> to vector<1x1x1xf32>
    %426 = vector.extract %425[0, 0, 0] : f32 from vector<1x1x1xf32>
    %c1_i32_206 = arith.constant 1 : i32
    %427 = vector.broadcast %c1_i32_206 : i32 to vector<2x3xi32>
    %428 = arith.cmpi eq, %349, %427 : vector<2x3xi32>
    %c2_i32_207 = arith.constant 2 : i32
    %429 = vector.broadcast %c2_i32_207 : i32 to vector<2x3xi32>
    %430 = arith.cmpi eq, %350, %429 : vector<2x3xi32>
    %431 = arith.andi %428, %430 : vector<2x3xi1>
    %cst_208 = arith.constant 0.000000e+00 : f32
    %432 = vector.broadcast %426 : f32 to vector<2x3xf32>
    %433 = vector.broadcast %cst_208 : f32 to vector<2x3xf32>
    %434 = arith.select %431, %432, %433 : vector<2x3xi1>, vector<2x3xf32>
    %435 = arith.addf %421, %434 : vector<2x3xf32>
    %c0_209 = arith.constant 0 : index
    %c0_210 = arith.constant 0 : index
    %436 = vector.load %arg15[%c0_209, %c0_210] : memref<1x3xf32, #tpu.memory_space<vmem>>, vector<1x3xf32>
    %437 = vector.broadcast %436 : vector<1x3xf32> to vector<2x3xf32>
    %438 = arith.addf %435, %437 : vector<2x3xf32>
    %c0_211 = arith.constant 0 : index
    %c0_212 = arith.constant 0 : index
    %439 = vector.load %arg16[%c0_211, %c0_212] : memref<2x3xf32, #tpu.memory_space<vmem>>, vector<2x3xf32>
    tpu.vector_store %arg16[%c0_211, %c0_212], %438 {strides = array<i32>} : memref<2x3xf32, #tpu.memory_space<vmem>>, vector<2x3xf32>,
    return
  }
  func.func @transform_0(%arg0: i32) -> (i32, i32, i32) {
    %c0_i32 = arith.constant 0 : i32
    %c0_i32_0 = arith.constant 0 : i32
    %c0_i32_1 = arith.constant 0 : i32
    %c0_i32_2 = arith.constant 0 : i32
    return %c0_i32, %c0_i32_0, %c0_i32_1 : i32, i32, i32
  }
  func.func @transform_1(%arg0: i32) -> (i32, i32) {
    %c0_i32 = arith.constant 0 : i32
    %c0_i32_0 = arith.constant 0 : i32
    %c0_i32_1 = arith.constant 0 : i32
    return %c0_i32, %c0_i32_0 : i32, i32
  }
  func.func @transform_2(%arg0: i32) -> (i32, i32) {
    %c0_i32 = arith.constant 0 : i32
    %c0_i32_0 = arith.constant 0 : i32
    %c0_i32_1 = arith.constant 0 : i32
    return %c0_i32, %c0_i32_0 : i32, i32
  }
  func.func @transform_3(%arg0: i32) -> (i32, i32) {
    %c0_i32 = arith.constant 0 : i32
    %c0_i32_0 = arith.constant 0 : i32
    %c0_i32_1 = arith.constant 0 : i32
    return %c0_i32, %c0_i32_0 : i32, i32
  }
  func.func @transform_4(%arg0: i32) -> (i32, i32) {
    %c0_i32 = arith.constant 0 : i32
    %c0_i32_0 = arith.constant 0 : i32
    %c0_i32_1 = arith.constant 0 : i32
    return %c0_i32, %c0_i32_0 : i32, i32
  }
  func.func @transform_5(%arg0: i32) -> (i32, i32) {
    %c0_i32 = arith.constant 0 : i32
    %c0_i32_0 = arith.constant 0 : i32
    %c0_i32_1 = arith.constant 0 : i32
    return %c0_i32, %c0_i32_0 : i32, i32
  }
  func.func @transform_6(%arg0: i32) -> (i32, i32) {
    %c0_i32 = arith.constant 0 : i32
    %c0_i32_0 = arith.constant 0 : i32
    %c0_i32_1 = arith.constant 0 : i32
    return %c0_i32, %c0_i32_0 : i32, i32
  }
  func.func @transform_7(%arg0: i32) -> (i32, i32) {
    %c0_i32 = arith.constant 0 : i32
    %c0_i32_0 = arith.constant 0 : i32
    %c0_i32_1 = arith.constant 0 : i32
    return %c0_i32, %c0_i32_0 : i32, i32
  }
  func.func @transform_8(%arg0: i32) -> (i32, i32) {
    %c0_i32 = arith.constant 0 : i32
    %c0_i32_0 = arith.constant 0 : i32
    %c0_i32_1 = arith.constant 0 : i32
    return %c0_i32, %c0_i32_0 : i32, i32
  }
  func.func @transform_9(%arg0: i32) -> (i32, i32) {
    %c0_i32 = arith.constant 0 : i32
    %c0_i32_0 = arith.constant 0 : i32
    %c0_i32_1 = arith.constant 0 : i32
    return %c0_i32, %c0_i32_0 : i32, i32
  }
  func.func @transform_10(%arg0: i32) -> (i32, i32) {
    %c0_i32 = arith.constant 0 : i32
    %c0_i32_0 = arith.constant 0 : i32
    %c0_i32_1 = arith.constant 0 : i32
    return %c0_i32, %c0_i32_0 : i32, i32
  }
  func.func @transform_11(%arg0: i32) -> (i32, i32) {
    %c0_i32 = arith.constant 0 : i32
    %c0_i32_0 = arith.constant 0 : i32
    %c0_i32_1 = arith.constant 0 : i32
    return %c0_i32, %c0_i32_0 : i32, i32
  }
  func.func @transform_12(%arg0: i32) -> (i32, i32) {
    %c0_i32 = arith.constant 0 : i32
    %c0_i32_0 = arith.constant 0 : i32
    %c0_i32_1 = arith.constant 0 : i32
    return %c0_i32, %c0_i32_0 : i32, i32
  }
  func.func @transform_13(%arg0: i32) -> (i32, i32, i32) {
    %c0_i32 = arith.constant 0 : i32
    %c0_i32_0 = arith.constant 0 : i32
    %c0_i32_1 = arith.constant 0 : i32
    %c0_i32_2 = arith.constant 0 : i32
    return %c0_i32, %c0_i32_0, %c0_i32_1 : i32, i32, i32
  }
  func.func @transform_14(%arg0: i32) -> (i32, i32) {
    %c0_i32 = arith.constant 0 : i32
    %c0_i32_0 = arith.constant 0 : i32
    %c0_i32_1 = arith.constant 0 : i32
    return %c0_i32, %c0_i32_0 : i32, i32
  }
  func.func @transform_15(%arg0: i32) -> (i32, i32) {
    %c0_i32 = arith.constant 0 : i32
    %c0_i32_0 = arith.constant 0 : i32
    %c0_i32_1 = arith.constant 0 : i32
    return %c0_i32, %c0_i32_0 : i32, i32
  }
}

</mosaic_0001>

<bundles_post_ra>
// kernel: cnv_model_forward.1
= control target key start
LH: loop header
LB: loop body
LE: loop exit
PB: predicated region body
PF: predicated region fallthrough
CT: control target
= control target key end

     0   :  { %v13158_v1 = vlaneseq  ;;  %v8081_v2 = vmov 1966171168   ;;  %v13159_v9 = vmov 0   ;;  %vm52_vm0 = vcmask 11264   ;;  %s13142_s0 = inlined_call_operand.vmem [shape: f32[2,128,2], index: 0, kind: input, shape index: {}]   ;;  %s13143_s1 = inlined_call_operand.vmem [shape: bf16[2,288], index: 1, kind: input, shape index: {}]   ;;  %s13144_s2 = inlined_call_operand.vmem [shape: f32[1,32], index: 2, kind: input, shape index: {}]   ;;  %s13145_s3 = inlined_call_operand.vmem [shape: f32[1,32], index: 3, kind: input, shape index: {}]   ;;  %s13146_s4 = inlined_call_operand.vmem [shape: f32[1,32], index: 4, kind: input, shape index: {}]   ;;  %s13147_s5 = inlined_call_operand.vmem [shape: bf16[32,288], index: 5, kind: input, shape index: {}]   ;;  %s13148_s6 = inlined_call_operand.vmem [shape: f32[1,32], index: 6, kind: input, shape index: {}]   ;;  %s13149_s7 = inlined_call_operand.vmem [shape: f32[1,32], index: 7, kind: input, shape index: {}]   ;;  %s13150_s8 = inlined_call_operand.vmem [shape: f32[1,32], index: 8, kind: input, shape index: {}]   ;;  %s13151_s9 = inlined_call_operand.vmem [shape: bf16[32,288], index: 9, kind: input, shape index: {}]   ;;  %s13152_s10 = inlined_call_operand.vmem [shape: f32[1,32], index: 10, kind: input, shape index: {}]   ;;  %s13153_s11 = inlined_call_operand.vmem [shape: f32[1,32], index: 11, kind: input, shape index: {}]   ;;  %s13154_s12 = inlined_call_operand.vmem [shape: f32[1,32], index: 12, kind: input, shape index: {}]   ;;  %s13155_s13 = inlined_call_operand.vmem [shape: f32[3,16,32], index: 13, kind: input, shape index: {}]   ;;  %s13156_s14 = inlined_call_operand.vmem [shape: f32[1,3], index: 14, kind: input, shape index: {}]   ;;  %s13157_s15 = inlined_call_operand.hbm [shape: f32[2,3], index: 15, kind: output, shape index: {}]  }
   0x1   :  { %v7640_v0 = vld.sshfl [vmem:[%s13143_s1] sm:$0x13 pattern:$0x75316420]  ;;  %v405_v3 = vunpack.c.l.s4 %v8081_v2  ;;  %v58_v5 = vld [vmem:[%s13142_s0 + $0x8] sm:$0xff]  ;;  %v59_v6 = vld [vmem:[%s13142_s0 + $0x10] sm:$0xff]  ;;  %522 = vmatprep.mubr.bf16.mxu0 %v13159_v9 }
   0x2   :  { %v57_v4 = vld [vmem:[%s13142_s0] sm:$0xff]  ;;  %v403_v7 = vcombine.high %v7640_v0, %v7640_v0  ;;  %v8181_v8 = vshrl.u32 %v13158_v1, 7  ;;  %v60_v10 = vld [vmem:[%s13142_s0 + $0x18] sm:$0xff]  ;;  %53 = vst.msk [vmem:[#allocation2] sm:$0xf] %vm52_vm0, %v13159_v9  ;;  %v7787_v14 = vpack.c.bf16 %v58_v5, %v58_v5  ;;  %v7788_v15 = vpack.c.bf16 %v59_v6, %v59_v6  ;;  %v62_v16 = vld [vmem:[%s13142_s0 + $0x28] sm:$0xff] }
   0x3   :  { %v61_v11 = vld [vmem:[%s13142_s0 + $0x20] sm:$0xff]  ;;  %v406_v12 = vunpack.c.0.s8 %v405_v3  ;;  %54 = vst.msk [vmem:[#allocation2 + $0x4] sm:$0xf] %vm52_vm0, %v13159_v9  ;;  %55 = vst.msk [vmem:[#allocation2 + $0x48] sm:$0xf] %vm52_vm0, %v13159_v9  ;;  %v7786_v13 = vpack.c.bf16 %v57_v4, %v57_v4  ;;  %v63_v17 = vld [vmem:[%s13142_s0 + $0x30] sm:$0xff]  ;;  %v7789_v22 = vpack.c.bf16 %v60_v10, %v60_v10  ;;  %v7791_v27 = vpack.c.bf16 %v62_v16, %v62_v16 }
   0x4   :  { %13279 = vst [vmem:[#allocation7_spill] sm:$0xff] %v8181_v8  ;;  %56 = vst.msk [vmem:[#allocation2 + $0x4c] sm:$0xf] %vm52_vm0, %v13159_v9  ;;  %v64_v18 = vld [vmem:[%s13142_s0 + $0x38] sm:$0xff]  ;;  %vm480_vm1 = vcmask 1040384   ;;  %v65_v19 = vld [vmem:[%s13142_s0 + $0x40] sm:$0xff]  ;;  %v7790_v23 = vpack.c.bf16 %v61_v11, %v61_v11  ;;  %v7792_v28 = vpack.c.bf16 %v63_v17, %v63_v17 }
   0x5   :  { %153 = vst.msk [vmem:[#allocation2 + $0x50] sm:$0xf] %vm52_vm0, %v13159_v9  ;;  %154 = vst.msk [vmem:[#allocation2 + $0x54] sm:$0xf] %vm52_vm0, %v13159_v9  ;;  %v66_v20 = vld [vmem:[%s13142_s0 + $0x48] sm:$0xff]  ;;  %v409_v21 = vsub.s32 %v406_v12, %v8181_v8  ;;  %vm419_vm2 = vcmask 15360   ;;  %v7793_v29 = vpack.c.bf16 %v64_v18, %v64_v18  ;;  %v7794_v30 = vpack.c.bf16 %v65_v19, %v65_v19 }
   0x6   :  { %155 = vst.msk [vmem:[#allocation2 + $0x98] sm:$0xf] %vm52_vm0, %v13159_v9  ;;  %156 = vst.msk [vmem:[#allocation2 + $0x9c] sm:$0xf] %vm52_vm0, %v13159_v9  ;;  %v67_v24 = vld [vmem:[%s13142_s0 + $0x50] sm:$0xff]  ;;  %v68_v25 = vld [vmem:[%s13142_s0 + $0x58] sm:$0xff]  ;;  %v7795_v36 = vpack.c.bf16 %v66_v20, %v66_v20 }
   0x7   :  { %137 = vst.msk [vmem:[#allocation2 + $0x8] sm:$0xf] %vm52_vm0, %v7786_v13  ;;  %138 = vst.msk [vmem:[#allocation2 + $0xc] sm:$0xf] %vm52_vm0, %v7787_v14  ;;  %v69_v26 = vld [vmem:[%s13142_s0 + $0x60] sm:$0xff]  ;;  %v70_v31 = vld [vmem:[%s13142_s0 + $0x68] sm:$0xff]  ;;  %v417_v34 = vrot.slane %v403_v7, %v409_v21  ;;  %v410_v35 = vrot.slane %v7640_v0, %v409_v21  ;;  %v7796_v37 = vpack.c.bf16 %v67_v24, %v67_v24 }
   0x8   :  { %139 = vst.msk [vmem:[#allocation2 + $0x10] sm:$0xf] %vm52_vm0, %v7788_v15  ;;  %v71_v32 = vld [vmem:[%s13142_s0 + $0x70] sm:$0xff]  ;;  %v72_v33 = vld [vmem:[%s13142_s0 + $0x78] sm:$0xff]  ;;  %140 = vst.msk [vmem:[#allocation2 + $0x14] sm:$0xf] %vm52_vm0, %v7789_v22  ;;  %v7797_v38 = vpack.c.bf16 %v68_v25, %v68_v25  ;;  %v7798_v39 = vpack.c.bf16 %v69_v26, %v69_v26  ;;  %v7799_v40 = vpack.c.bf16 %v70_v31, %v70_v31 }
   0x9   :  { %141 = vst.msk [vmem:[#allocation2 + $0x18] sm:$0xf] %vm52_vm0, %v7790_v23  ;;  %142 = vst.msk [vmem:[#allocation2 + $0x1c] sm:$0xf] %vm52_vm0, %v7791_v27  ;;  %v7800_v41 = vpack.c.bf16 %v71_v32, %v71_v32  ;;  %7641 = vmatprep.subr.msk.bf16.mxu0 %vm480_vm1, %v417_v34  ;;  %v482_v42 = vsel %vm480_vm1, %v410_v35, 0  ;;  %v418_v43 = vcombine.high %v410_v35, %v410_v35  ;;  %vm3567_vm3 = vcmask 257024  }
   0xa   :  { %143 = vst.msk [vmem:[#allocation2 + $0x20] sm:$0xf] %vm52_vm0, %v7792_v28  ;;  %144 = vst.msk [vmem:[#allocation2 + $0x24] sm:$0xf] %vm52_vm0, %v7793_v29  ;;  %v7801_v44 = vpack.c.bf16 %v72_v33, %v72_v33  ;;  %505 = vmatpush1.bf16.msra.mxu0 %v482_v42  ;;  %v7997_v45 = vld [vmem:[#allocation2] sm:$0xff]  }
   0xb   :  { %145 = vst.msk [vmem:[#allocation2 + $0x28] sm:$0xf] %vm52_vm0, %v7794_v30  ;;  %146 = vst.msk [vmem:[#allocation2 + $0x2c] sm:$0xf] %vm52_vm0, %v7795_v36  ;;  %7977 = vmatprep.subr.msk.bf16.mxu1 %vm480_vm1, %v418_v43  ;;  %v488_v46 = vsel %vm480_vm1, %v418_v43, 0  ;;  %7889 = vmatprep.mubr.msk.bf16.mxu1 %vm419_vm2, %v7997_v45 }
   0xc   :  { %147 = vst.msk [vmem:[#allocation2 + $0x30] sm:$0xf] %vm52_vm0, %v7796_v37  ;;  %148 = vst.msk [vmem:[#allocation2 + $0x34] sm:$0xf] %vm52_vm0, %v7797_v38  ;;  %7888 = vmatpush3.bf16.msra.mxu1 %v488_v46 }
   0xd   :  { %149 = vst.msk [vmem:[#allocation2 + $0x38] sm:$0xf] %vm52_vm0, %v7798_v39  ;;  %150 = vst.msk [vmem:[#allocation2 + $0x3c] sm:$0xf] %vm52_vm0, %v7799_v40  ;;  %7642 = vmatmul.mubr.msk.bf16.vlgmr.msra.gmra.mxu0 %vm419_vm2, %v7997_v45 }
   0xe   :  { %151 = vst.msk [vmem:[#allocation2 + $0x40] sm:$0xf] %vm52_vm0, %v7800_v41  ;;  %152 = vst.msk [vmem:[#allocation2 + $0x44] sm:$0xf] %vm52_vm0, %v7801_v44  ;;  %v7998_v47 = vld [vmem:[#allocation2 + $0x8] sm:$0xff]   ;;  %529 = vmatprep.mubr.bf16.mxu0 %v13159_v9 }
   0xf   :  { %3883 = vst.msk [vmem:[#allocation2] sm:$0xf] %vm3567_vm3, %v13159_v9  ;;  %3884 = vst.msk [vmem:[#allocation2 + $0x4] sm:$0xf] %vm3567_vm3, %v13159_v9  ;;  %v7999_v48 = vld [vmem:[#allocation2 + $0x10] sm:$0xff]   ;;  %7890 = vmatmul.mubr.msk.bf16.vlgmr.msra.gmra.mxu1 %vm419_vm2, %v7998_v47 }
  0x10   :  { %7893 = vmatprep.mubr.msk.bf16.mxu1 %vm419_vm2, %v7999_v48  ;;  %v8000_v52 = vld [vmem:[#allocation2 + $0x18] sm:$0xff]  }
  0x11   :  { %v8001_v53 = vld [vmem:[#allocation2 + $0x20] sm:$0xff]  }
  0x12   :  { %v8002_v49 = vld [vmem:[#allocation2 + $0x28] sm:$0xff]  }
  0x13   :  { %3885 = vst.msk [vmem:[#allocation2 + $0x28] sm:$0xf] %vm3567_vm3, %v13159_v9  ;;  %3886 = vst.msk [vmem:[#allocation2 + $0x2c] sm:$0xf] %vm3567_vm3, %v13159_v9  ;;  %v8003_v51 = vld [vmem:[#allocation2 + $0x30] sm:$0xff]  }
  0x14   :  { %3927 = vst.msk [vmem:[#allocation2 + $0x30] sm:$0xf] %vm3567_vm3, %v13159_v9  ;;  %3928 = vst.msk [vmem:[#allocation2 + $0x34] sm:$0xf] %vm3567_vm3, %v13159_v9 }
  0x15   :  { %7643 = vmatmul.mubr.msk.bf16.gmra.mxu0 %vm419_vm2, %v7998_v47 }
  0x16   :  { %v8269_v50 = vld [vmem:[#allocation2] sm:$0xff]   ;;  %539 = vmatprep.mubr.bf16.mxu0 %v13159_v9 }
  0x17   :  { %13280 = vst [vmem:[#allocation8_spill] sm:$0xff] %v8269_v50  ;;  %6046 = vst.msk [vmem:[#allocation2] sm:$0xf] %vm3567_vm3, %v13159_v9  ;;  %7894 = vmatmul.mubr.msk.bf16.gmra.mxu1 %vm419_vm2, %v8000_v52 }
  0x18   :  { %6047 = vst.msk [vmem:[#allocation2 + $0x4] sm:$0xf] %vm3567_vm3, %v13159_v9  ;;  %7897 = vmatprep.mubr.msk.bf16.mxu1 %vm419_vm2, %v8001_v53 }
  0x19   :  { %20 = vsyncpa [#allocation5], 0  ;;  %v8004_v54 = vld [vmem:[#allocation2 + $0x38] sm:$0xff]   ;;  %v8005_v55 = vld [vmem:[#allocation2 + $0x40] sm:$0xff]   ;;  %vm1388_vm4 = vcmask 1044480   ;;  %vm944_vm5 = vcmask 1046528  }
  0x1a   :  { %v8006_v56 = vld [vmem:[#allocation2 + $0x48] sm:$0xff]   ;;  %v8007_v57 = vld [vmem:[#allocation2 + $0x50] sm:$0xff]   ;;  %v7588_v58 = vld [vmem:[%s13142_s0 + $0x80] sm:$0xff]  ;;  %s8083_s20 = smov 32   ;;  %s8084_s21 = smov 96   ;;  %vm1166_vm6 = vcmask 1045504  }
  0x1b   :  { %v7589_v59 = vld [vmem:[%s13142_s0 + $0x88] sm:$0xff]  ;;  %v7802_v60 = vpack.c.bf16 %v7588_v58, %v7588_v58  ;;  %v7590_v62 = vld [vmem:[%s13142_s0 + $0x90] sm:$0xff]  ;;  %v7591_v63 = vld [vmem:[%s13142_s0 + $0x98] sm:$0xff]  ;;  %vm1793_vm7 = vcmask 1042432   ;;  %vm1646_vm8 = vcmask 1043456   ;;  %vm2015_vm9 = vcmask 1041408  }
  0x1c   :  { %v7803_v61 = vpack.c.bf16 %v7589_v59, %v7589_v59  ;;  %v7804_v0 = vpack.c.bf16 %v7590_v62, %v7590_v62  ;;  %v7805_v2 = vpack.c.bf16 %v7591_v63, %v7591_v63  ;;  %v7592_v5 = vld [vmem:[%s13142_s0 + $0xa0] sm:$0xff]  ;;  %v7593_v6 = vld [vmem:[%s13142_s0 + $0xa8] sm:$0xff]  ;;  %v7594_v12 = vld [vmem:[%s13142_s0 + $0xb0] sm:$0xff]  ;;  %vm3047_vm10 = vcmask 261120   ;;  %s8087_s18 = smov [#allocation4]  }
  0x1d   :  { %7644 = vmatmul.mubr.msk.bf16.gmra.mxu0 %vm419_vm2, %v7999_v48  ;;  %238 = vst.msk [vmem:[#allocation2 + $0x58] sm:$0xf] %vm52_vm0, %v7802_v60  ;;  %v7806_v7 = vpack.c.bf16 %v7592_v5, %v7592_v5  ;;  %v7807_v10 = vpack.c.bf16 %v7593_v6, %v7593_v6  ;;  %v7595_v13 = vld [vmem:[%s13142_s0 + $0xb8] sm:$0xff]  ;;  %v7808_v14 = vpack.c.bf16 %v7594_v12, %v7594_v12  ;;  %v7596_v17 = vld [vmem:[%s13142_s0 + $0xc0] sm:$0xff]  ;;  %v7597_v18 = vld [vmem:[%s13142_s0 + $0xc8] sm:$0xff]  ;;  %vm3550_vm11 = vcmask 261124  }
  0x1e   :  { %549 = vmatprep.mubr.bf16.mxu0 %v13159_v9  ;;  %239 = vst.msk [vmem:[#allocation2 + $0x5c] sm:$0xf] %vm52_vm0, %v7803_v61  ;;  %240 = vst.msk [vmem:[#allocation2 + $0x60] sm:$0xf] %vm52_vm0, %v7804_v0  ;;  %v7809_v15 = vpack.c.bf16 %v7595_v13, %v7595_v13  ;;  %v7810_v19 = vpack.c.bf16 %v7596_v17, %v7596_v17  ;;  %v7811_v20 = vpack.c.bf16 %v7597_v18, %v7597_v18  ;;  %v7598_v22 = vld [vmem:[%s13142_s0 + $0xd0] sm:$0xff]  ;;  %v7599_v23 = vld [vmem:[%s13142_s0 + $0xd8] sm:$0xff] }
  0x1f   :  { %7898 = vmatmul.mubr.msk.bf16.gmra.mxu1 %vm419_vm2, %v8002_v49  ;;  %241 = vst.msk [vmem:[#allocation2 + $0x64] sm:$0xf] %vm52_vm0, %v7805_v2  ;;  %242 = vst.msk [vmem:[#allocation2 + $0x68] sm:$0xf] %vm52_vm0, %v7806_v7  ;;  %v7812_v24 = vpack.c.bf16 %v7598_v22, %v7598_v22  ;;  %v7813_v25 = vpack.c.bf16 %v7599_v23, %v7599_v23  ;;  %v7600_v27 = vld [vmem:[%s13142_s0 + $0xe0] sm:$0xff]  ;;  %v7601_v28 = vld [vmem:[%s13142_s0 + $0xe8] sm:$0xff] }
  0x20   :  { %7901 = vmatprep.mubr.msk.bf16.mxu1 %vm419_vm2, %v8003_v51  ;;  %243 = vst.msk [vmem:[#allocation2 + $0x6c] sm:$0xf] %vm52_vm0, %v7807_v10  ;;  %244 = vst.msk [vmem:[#allocation2 + $0x70] sm:$0xf] %vm52_vm0, %v7808_v14  ;;  %v7814_v29 = vpack.c.bf16 %v7600_v27, %v7600_v27  ;;  %v7815_v30 = vpack.c.bf16 %v7601_v28, %v7601_v28  ;;  %v7602_v45 = vld [vmem:[%s13142_s0 + $0xf0] sm:$0xff]  ;;  %v7603_v46 = vld [vmem:[%s13142_s0 + $0xf8] sm:$0xff] }
  0x21   :  { %245 = vst.msk [vmem:[#allocation2 + $0x74] sm:$0xf] %vm52_vm0, %v7809_v15  ;;  %246 = vst.msk [vmem:[#allocation2 + $0x78] sm:$0xf] %vm52_vm0, %v7810_v19  ;;  %s8085_s0 = smov 64  }
  0x22   :  { %247 = vst.msk [vmem:[#allocation2 + $0x7c] sm:$0xf] %vm52_vm0, %v7811_v20  ;;  %248 = vst.msk [vmem:[#allocation2 + $0x80] sm:$0xf] %vm52_vm0, %v7812_v24 }
  0x23   :  { %249 = vst.msk [vmem:[#allocation2 + $0x84] sm:$0xf] %vm52_vm0, %v7813_v25  ;;  %250 = vst.msk [vmem:[#allocation2 + $0x88] sm:$0xf] %vm52_vm0, %v7814_v29 }
  0x24   :  { %251 = vst.msk [vmem:[#allocation2 + $0x8c] sm:$0xf] %vm52_vm0, %v7815_v30 }
  0x25   :  { %7645 = vmatmul.mubr.msk.bf16.gmra.mxu0 %vm419_vm2, %v8000_v52  ;;  %v8008_v3 = vld [vmem:[#allocation2 + $0x58] sm:$0xff]   ;;  %v7817_v52 = vpack.c.bf16 %v7603_v46, %v7603_v46 }
  0x26   :  { %559 = vmatprep.mubr.bf16.mxu0 %v13159_v9  ;;  %3929 = vst.msk [vmem:[#allocation2 + $0x58] sm:$0xf] %vm3567_vm3, %v13159_v9  ;;  %3930 = vst.msk [vmem:[#allocation2 + $0x5c] sm:$0xf] %vm3567_vm3, %v13159_v9  ;;  %v8009_v4 = vld [vmem:[#allocation2 + $0x60] sm:$0xff]  }
  0x27   :  { %7902 = vmatmul.mubr.msk.bf16.gmra.mxu1 %vm419_vm2, %v8004_v54  ;;  %v8010_v11 = vld [vmem:[#allocation2 + $0x68] sm:$0xff]   ;;  %253 = vst.msk [vmem:[#allocation2 + $0x94] sm:$0xf] %vm52_vm0, %v7817_v52 }
  0x28   :  { %7905 = vmatprep.mubr.msk.bf16.mxu1 %vm419_vm2, %v8005_v55  ;;  %v8011_v16 = vld [vmem:[#allocation2 + $0x70] sm:$0xff]  }
  0x29   :  { %v8012_v21 = vld [vmem:[#allocation2 + $0x78] sm:$0xff]  }
  0x2a   :  { %v8013_v26 = vld [vmem:[#allocation2 + $0x80] sm:$0xff]  }
  0x2b   :  { %v8014_v32 = vld [vmem:[#allocation2 + $0x88] sm:$0xff]  }
  0x2d   :  { %7646 = vmatmul.mubr.msk.bf16.gmra.mxu0 %vm419_vm2, %v8001_v53 }
  0x2e   :  { %569 = vmatprep.mubr.bf16.mxu0 %v13159_v9 }
  0x2f   :  { %7906 = vmatmul.mubr.msk.bf16.gmra.mxu1 %vm419_vm2, %v8006_v56 }
  0x30   :  { %7909 = vmatprep.mubr.msk.bf16.mxu1 %vm419_vm2, %v8007_v57 }
  0x35   :  { %7647 = vmatmul.mubr.msk.bf16.gmra.mxu0 %vm419_vm2, %v8002_v49  ;;  %v7816_v49 = vpack.c.bf16 %v7602_v45, %v7602_v45 }
  0x36   :  { %579 = vmatprep.mubr.bf16.mxu0 %v13159_v9 }
  0x37   :  { %7910 = vmatmul.mubr.msk.bf16.gmra.mxu1 %vm419_vm2, %v8008_v3  ;;  %252 = vst.msk [vmem:[#allocation2 + $0x90] sm:$0xf] %vm52_vm0, %v7816_v49 }
  0x38   :  { %7913 = vmatprep.mubr.msk.bf16.mxu1 %vm419_vm2, %v8009_v4 }
  0x3d   :  { %7648 = vmatmul.mubr.msk.bf16.gmra.mxu0 %vm419_vm2, %v8003_v51 }
  0x3e   :  { %589 = vmatprep.mubr.bf16.mxu0 %v13159_v9 }
  0x3f   :  { %7914 = vmatmul.mubr.msk.bf16.gmra.mxu1 %vm419_vm2, %v8010_v11 }
  0x40   :  { %7917 = vmatprep.mubr.msk.bf16.mxu1 %vm419_vm2, %v8011_v16 }
  0x45   :  { %7649 = vmatmul.mubr.msk.bf16.gmra.mxu0 %vm419_vm2, %v8004_v54 }
  0x46   :  { %599 = vmatprep.mubr.bf16.mxu0 %v13159_v9 }
  0x47   :  { %7918 = vmatmul.mubr.msk.bf16.gmra.mxu1 %vm419_vm2, %v8012_v21 }
  0x48   :  { %7921 = vmatprep.mubr.msk.bf16.mxu1 %vm419_vm2, %v8013_v26 }
  0x4d   :  { %7650 = vmatmul.mubr.msk.bf16.gmra.mxu0 %vm419_vm2, %v8005_v55 }
  0x4e   :  { %609 = vmatprep.mubr.bf16.mxu0 %v13159_v9 }
  0x4f   :  { %7922 = vmatmul.mubr.msk.bf16.gmra.mxu1 %vm419_vm2, %v8014_v32 }
  0x55   :  { %7651 = vmatmul.mubr.msk.bf16.gmra.mxu0 %vm419_vm2, %v8006_v56 }
  0x56   :  { %619 = vmatprep.mubr.bf16.mxu0 %v13159_v9 }
  0x5d   :  { %7652 = vmatmul.mubr.msk.bf16.gmra.mxu0 %vm419_vm2, %v8007_v57 }
  0x5e   :  { %629 = vmatprep.mubr.bf16.mxu0 %v13159_v9 }
  0x65   :  { %7653 = vmatmul.mubr.msk.bf16.gmra.mxu0 %vm419_vm2, %v8008_v3  ;;  %v8015_v3 = vld [vmem:[#allocation2 + $0x90] sm:$0xff]  }
  0x66   :  { %639 = vmatprep.mubr.bf16.mxu0 %v13159_v9  ;;  %7925 = vmatprep.mubr.msk.bf16.mxu1 %vm419_vm2, %v8015_v3 }
  0x6d   :  { %7654 = vmatmul.mubr.msk.bf16.gmra.mxu0 %vm419_vm2, %v8009_v4 }
  0x6e   :  { %649 = vmatprep.mubr.bf16.mxu0 %v13159_v9 }
  0x75   :  { %7655 = vmatmul.mubr.msk.bf16.gmra.mxu0 %vm419_vm2, %v8010_v11 }
  0x76   :  { %659 = vmatprep.mubr.bf16.mxu0 %v13159_v9 }
  0x7d   :  { %7656 = vmatmul.mubr.msk.bf16.gmra.mxu0 %vm419_vm2, %v8011_v16 }
  0x7e   :  { %669 = vmatprep.mubr.bf16.mxu0 %v13159_v9 }
  0x85   :  { %7657 = vmatmul.mubr.msk.bf16.gmra.mxu0 %vm419_vm2, %v8012_v21 }
  0x86   :  { %679 = vmatprep.mubr.bf16.mxu0 %v13159_v9 }
  0x8d   :  { %7658 = vmatmul.mubr.msk.bf16.gmra.mxu0 %vm419_vm2, %v8013_v26 }
  0x8e   :  { %689 = vmatprep.mubr.bf16.mxu0 %v13159_v9 }
  0x95   :  { %7659 = vmatmul.mubr.msk.bf16.gmra.mxu0 %vm419_vm2, %v8014_v32 }
  0x96   :  { %699 = vmatprep.mubr.bf16.mxu0 %v13159_v9 }
  0x9d   :  { %7660 = vmatmul.mubr.msk.bf16.gmra.mxu0 %vm419_vm2, %v8015_v3 }
  0x9e   :  { %709 = vmatprep.mubr.bf16.mxu0 %v13159_v9 }
  0xcd   :  { %v524_v31 = vpop.f32.mrf.mxu0 }
  0xcf   :  { %v525_v33 = vpop.f32.mrf.mxu0  ;;  %v8415_v48 = vpop.f32.mrf.mxu1 }
  0xd0   :  { %13285 = vst [vmem:[#allocation13_spill] sm:$0xff] %v8415_v48 }
  0xd1   :  { %v8391_v34 = vpop.f32.mrf.mxu0  ;;  %v751_v55 = vpop.f32.mrf.mxu1 }
  0xd2   :  { %13281 = vst [vmem:[#allocation9_spill] sm:$0xff] %v8391_v34  ;;  %v1389_v37 = vrot.slane %v8391_v34, 3  ;;  %v945_v39 = vrot.slane %v8391_v34, 1  ;;  %v1167_v51 = vrot.slane %v8391_v34, 2 }
  0xd3   :  { %v528_v35 = vpop.f32.mrf.mxu0  ;;  %v8445_v10 = vpop.f32.mrf.mxu1 }
  0xd4   :  { %13290 = vst [vmem:[#allocation18_spill] sm:$0xff] %v8445_v10 }
  0xd5   :  { %v8394_v36 = vpop.f32.mrf.mxu0  ;;  %v753_v13 = vpop.f32.mrf.mxu1 }
  0xd6   :  { %13282 = vst [vmem:[#allocation10_spill] sm:$0xff] %v8394_v36  ;;  %v1390_v38 = vrot.slane %v8394_v36, 3  ;;  %v946_v40 = vrot.slane %v8394_v36, 1  ;;  %v1168_v42 = vrot.slane %v8394_v36, 2 }
  0xd7   :  { %v8400_v41 = vpop.f32.mrf.mxu0 }
  0xd8   :  { %13283 = vst [vmem:[#allocation11_spill] sm:$0xff] %v8400_v41  ;;  %v1391_v43 = vsel %vm1388_vm4, %v1389_v37, %v1390_v38  ;;  %v947_v44 = vsel %vm944_vm5, %v945_v39, %v946_v40  ;;  %v2016_v54 = vrot.slane %v8400_v41, 6  ;;  %v1169_v56 = vsel %vm1166_vm6, %v1167_v51, %v1168_v42 }
  0xd9   :  { %1462 = vrot.lane.b32.xlu1 %v1391_v43, %s8083_s20  ;;  %1018 = vrot.lane.b32.xlu0 %v947_v44, %s8084_s21  ;;  %v8413_v47 = vpop.f32.mrf.mxu0  ;;  %v2237_v59 = vrot.slane %v8400_v41, 7  ;;  %v1794_v60 = vrot.slane %v8400_v41, 5 }
  0xda   :  { %13284 = vst [vmem:[#allocation12_spill] sm:$0xff] %v8413_v47  ;;  %v948_v61 = vrot.slane %v8413_v47, 1  ;;  %v1170_v62 = vrot.slane %v8413_v47, 2  ;;  %v1392_v0 = vrot.slane %v8413_v47, 3 }
  0xdb   :  { %v8418_v53 = vpop.f32.mrf.mxu0 }
  0xdc   :  { %13286 = vst [vmem:[#allocation14_spill] sm:$0xff] %v8418_v53  ;;  %v1171_v4 = vsel %vm1166_vm6, %v1168_v42, %v1170_v62  ;;  %v949_v5 = vsel %vm944_vm5, %v946_v40, %v948_v61  ;;  %v1795_v7 = vrot.slane %v8418_v53, 5  ;;  %v1393_v14 = vsel %vm1388_vm4, %v1390_v38, %v1392_v0  ;;  %v8016_v40 = vld [vmem:[#allocation2 + $0x98] sm:$0xff]  }
  0xdd   :  { %1240 = vrot.lane.b32.xlu0 %v1169_v56, %s8085_s0  ;;  %2089 = vrot.lane.b32.xlu1 %v2016_v54, %s8085_s0  ;;  %v8426_v57 = vpop.f32.mrf.mxu0  ;;  %v2017_v20 = vrot.slane %v8418_v53, 6  ;;  %v2238_v22 = vrot.slane %v8418_v53, 7 }
  0xde   :  { %13287 = vst [vmem:[#allocation15_spill] sm:$0xff] %v8426_v57  ;;  %v950_v17 = vrot.slane %v8426_v57, 1  ;;  %v1796_v18 = vsel %vm1793_vm7, %v1794_v60, %v1795_v7  ;;  %v1394_v25 = vrot.slane %v8426_v57, 3  ;;  %v1172_v30 = vrot.slane %v8426_v57, 2  ;;  %7661 = vmatmul.mubr.msk.bf16.gmra.mxu0 %vm419_vm2, %v8016_v40  ;;  %7926 = vmatmul.mubr.msk.bf16.gmra.mxu1 %vm419_vm2, %v8016_v40 }
  0xdf   :  { %v8428_v58 = vpop.f32.mrf.mxu0  ;;  %v2018_v26 = vsel %vm2015_vm9, %v2016_v54, %v2017_v20  ;;  %v2239_v35 = vsel %vm480_vm1, %v2237_v59, %v2238_v22  ;;  %4163 = vmatprep.mubr.bf16.mxu1 %v13159_v9 }
  0xe0   :  { %13288 = vst [vmem:[#allocation16_spill] sm:$0xff] %v8428_v58  ;;  %v13161_v11 = vrot.slane %v8428_v58, 4  ;;  %v951_v27 = vsel %vm944_vm5, %v948_v61, %v950_v17  ;;  %v2019_v33 = vrot.slane %v8428_v58, 6  ;;  %v1395_v37 = vsel %vm1388_vm4, %v1392_v0, %v1394_v25 }
  0xe1   :  { %2310 = vrot.lane.b32.xlu1 %v2237_v59, %s8083_s20  ;;  %1867 = vrot.lane.b32.xlu0 %v1794_v60, %s8084_s21  ;;  %v8436_v63 = vpop.f32.mrf.mxu0  ;;  %v2240_v42 = vrot.slane %v8428_v58, 7  ;;  %v1797_v45 = vrot.slane %v8428_v58, 5  ;;  %v1173_v46 = vsel %vm1166_vm6, %v1170_v62, %v1172_v30 }
  0xe2   :  { %13289 = vst [vmem:[#allocation17_spill] sm:$0xff] %v8436_v63  ;;  %v2020_v49 = vsel %vm2015_vm9, %v2017_v20, %v2019_v33  ;;  %v952_v54 = vrot.slane %v8436_v63, 1  ;;  %v1174_v55 = vrot.slane %v8436_v63, 2  ;;  %v13168_v13 = vrot.slane %v8436_v63, 3 }
  0xe3   :  { %v8439_v2 = vpop.f32.mrf.mxu0  ;;  %v2241_v56 = vsel %vm480_vm1, %v2238_v22, %v2240_v42  ;;  %v1798_v0 = vsel %vm1793_vm7, %v1795_v7, %v1797_v45 }
  0xe4   :  { %v1652_v6 = vrot.slane %v8439_v2, 4  ;;  %v1175_v7 = vsel %vm1166_vm6, %v1172_v30, %v1174_v55 }
  0xe5   :  { %1242 = vrot.lane.b32.xlu1 %v1171_v4, %s8085_s0  ;;  %1020 = vrot.lane.b32.xlu0 %v949_v5, %s8084_s21  ;;  %v8450_v12 = vpop.f32.mrf.mxu0 }
  0xe6   :  { %13291 = vst [vmem:[#allocation19_spill] sm:$0xff] %v8450_v12  ;;  %v8461_v16 = vsel %vm1646_vm8, %v13161_v11, %v1652_v6 }
  0xe7   :  { %v8455_v15 = vpop.f32.mrf.mxu0  ;;  %13292 = vst [vmem:[#allocation20_spill] sm:$0xff] %v8461_v16 }
  0xe8   :  { %v1654_v19 = vrot.slane %v8455_v15, 4 }
  0xe9   :  { %1464 = vrot.lane.b32.xlu0 %v1393_v14, %s8083_s20  ;;  %1869 = vrot.lane.b32.xlu1 %v1796_v18, %s8084_s21  ;;  %v8471_v21 = vpop.f32.mrf.mxu0  ;;  %v13164_v14 = vrot.slane %v8439_v2, 7 }
  0xea   :  { %13293 = vst [vmem:[#allocation21_spill] sm:$0xff] %v8471_v21  ;;  %v8477_v24 = vsel %vm1646_vm8, %v1652_v6, %v1654_v19 }
  0xeb   :  { %v8474_v23 = vpop.f32.mrf.mxu0  ;;  %13294 = vst [vmem:[#allocation22_spill] sm:$0xff] %v8477_v24 }
  0xec   :  { %v1656_v28 = vrot.slane %v8474_v23, 4 }
  0xed   :  { %2091 = vrot.lane.b32.xlu0 %v2018_v26, %s8085_s0  ;;  %1022 = vrot.lane.b32.xlu1 %v951_v27, %s8084_s21  ;;  %v8487_v29 = vpop.f32.mrf.mxu0  ;;  %v953_v26 = vsel %vm944_vm5, %v950_v17, %v952_v54  ;;  %v1397_v17 = vsel %vm1388_vm4, %v1394_v25, %v13168_v13 }
  0xee   :  { %13295 = vst [vmem:[#allocation23_spill] sm:$0xff] %v8487_v29  ;;  %v8493_v32 = vsel %vm1646_vm8, %v1654_v19, %v1656_v28 }
  0xef   :  { %v8490_v31 = vpop.f32.mrf.mxu0  ;;  %13296 = vst [vmem:[#allocation24_spill] sm:$0xff] %v8493_v32 }
  0xf0   :  { %v1658_v38 = vrot.slane %v8490_v31, 4 }
  0xf1   :  { %2312 = vrot.lane.b32.xlu0 %v2239_v35, %s8083_s20  ;;  %1466 = vrot.lane.b32.xlu1 %v1395_v37, %s8083_s20  ;;  %v8501_v39 = vpop.f32.mrf.mxu0  ;;  %v13165_v37 = vrot.slane %v8439_v2, 5 }
  0xf2   :  { %13297 = vst [vmem:[#allocation25_spill] sm:$0xff] %v8501_v39  ;;  %v8508_v44 = vsel %vm1646_vm8, %v1656_v28, %v1658_v38  ;;  %v1182_v36 = vrot.slane %v8501_v39, 2 }
  0xf3   :  { %v8504_v43 = vpop.f32.mrf.mxu0  ;;  %13298 = vst [vmem:[#allocation26_spill] sm:$0xff] %v8508_v44 }
  0xf4   :  { %v1660_v51 = vrot.slane %v8504_v43, 4  ;;  %v13163_v59 = vrot.slane %v8504_v43, 5  ;;  %v13162_v60 = vrot.slane %v8504_v43, 7 }
  0xf5   :  { %1244 = vrot.lane.b32.xlu0 %v1173_v46, %s8085_s0  ;;  %2093 = vrot.lane.b32.xlu1 %v2020_v49, %s8085_s0  ;;  %v8520_v52 = vpop.f32.mrf.mxu0  ;;  %v2243_v46 = vsel %vm480_vm1, %v2240_v42, %v13164_v14  ;;  %v2021_v42 = vrot.slane %v8439_v2, 6 }
  0xf6   :  { %13299 = vst [vmem:[#allocation27_spill] sm:$0xff] %v8520_v52  ;;  %v8530_v62 = vsel %vm1646_vm8, %v1658_v38, %v1660_v51  ;;  %v13167_v38 = vrot.slane %v8450_v12, 1  ;;  %v1406_v47 = vrot.slane %v8520_v52, 3 }
  0xf7   :  { %v8527_v61 = vpop.f32.mrf.mxu0  ;;  %13300 = vst [vmem:[#allocation28_spill] sm:$0xff] %v8530_v62 }
  0xf8   :  { %v1662_v3 = vrot.slane %v8527_v61, 4  ;;  %v1809_v4 = vrot.slane %v8527_v61, 5  ;;  %v2252_v5 = vrot.slane %v8527_v61, 7 }
  0xf9   :  { %2314 = vrot.lane.b32.xlu1 %v2241_v56, %s8083_s20  ;;  %1871 = vrot.lane.b32.xlu0 %v1798_v0, %s8084_s21  ;;  %v8540_v6 = vpop.f32.mrf.mxu0 }
  0xfa   :  { %13301 = vst [vmem:[#allocation29_spill] sm:$0xff] %v8540_v6  ;;  %v8552_v19 = vsel %vm1793_vm7, %v13163_v59, %v1809_v4  ;;  %v8557_v20 = vsel %vm480_vm1, %v13162_v60, %v2252_v5  ;;  %v8560_v22 = vsel %vm1646_vm8, %v1660_v51, %v1662_v3 }
  0xfb   :  { %v8547_v18 = vpop.f32.mrf.mxu0  ;;  %13302 = vst [vmem:[#allocation30_spill] sm:$0xff] %v8560_v22 }
  0xfc   :  { %v1664_v27 = vrot.slane %v8547_v18, 4  ;;  %v1811_v28 = vrot.slane %v8547_v18, 5  ;;  %v2254_v30 = vrot.slane %v8547_v18, 7  ;;  %v13166_v40 = vrot.slane %v8547_v18, 6 }
  0xfd   :  { %1246 = vrot.lane.b32.xlu0 %v1175_v7, %s8085_s0  ;;  %1024 = vrot.lane.b32.xlu1 %v953_v26, %s8084_s21  ;;  %v8570_v35 = vpop.f32.mrf.mxu0 }
  0xfe   :  { %13303 = vst [vmem:[#allocation31_spill] sm:$0xff] %v8570_v35  ;;  %v8582_v51 = vsel %vm1793_vm7, %v1809_v4, %v1811_v28  ;;  %v8585_v56 = vsel %vm480_vm1, %v2252_v5, %v2254_v30  ;;  %v8588_v0 = vsel %vm1646_vm8, %v1662_v3, %v1664_v27  ;;  %v13171_v4 = vrot.slane %v8450_v12, 2 }
  0xff   :  { %v583_v49 = vpop.f32.mrf.mxu0  ;;  %13304 = vst [vmem:[#allocation32_spill] sm:$0xff] %v8588_v0  ;;  %v1800_v5 = vsel %vm1793_vm7, %v1797_v45, %v13165_v37 }
 0x100   :  { %v1666_v7 = vrot.slane %v583_v49, 4  ;;  %v1813_v26 = vrot.slane %v583_v49, 5  ;;  %v2035_v1 = vrot.slane %v583_v49, 6  ;;  %v2256_v25 = vrot.slane %v583_v49, 7 }
 0x101   :  { %1468 = vrot.lane.b32.xlu0 %v1397_v17, %s8083_s20  ;;  %2316 = vrot.lane.b32.xlu1 %v2243_v46, %s8083_s20  ;;  %v8592_v9 = vpop.f32.mrf.mxu0  ;;  %v955_v17 = vsel %vm944_vm5, %v952_v54, %v13167_v38 }
 0x102   :  { %13305 = vst [vmem:[#allocation33_spill] sm:$0xff] %v8592_v9  ;;  %v8602_v3 = vsel %vm2015_vm9, %v13166_v40, %v2035_v1  ;;  %v8608_v49 = vsel %vm1793_vm7, %v1811_v28, %v1813_v26  ;;  %v8611_v11 = vsel %vm480_vm1, %v2254_v30, %v2256_v25  ;;  %v8614_v60 = vsel %vm1646_vm8, %v1664_v27, %v1666_v7 }
 0x103   :  { %v587_v46 = vpop.f32.mrf.mxu0  ;;  %13306 = vst [vmem:[#allocation34_spill] sm:$0xff] %v8614_v60  ;;  %v2022_v30 = vsel %vm2015_vm9, %v2019_v33, %v2021_v42 }
 0x104   :  { %v1668_v45 = vrot.slane %v587_v46, 4  ;;  %v1815_v59 = vrot.slane %v587_v46, 5  ;;  %v2037_v14 = vrot.slane %v587_v46, 6  ;;  %v2258_v37 = vrot.slane %v587_v46, 7 }
 0x105   :  { %1873 = vrot.lane.b32.xlu0 %v1800_v5, %s8084_s21  ;;  %1026 = vrot.lane.b32.xlu1 %v955_v17, %s8084_s21  ;;  %v8618_v40 = vpop.f32.mrf.mxu0  ;;  %v1177_v5 = vsel %vm1166_vm6, %v1174_v55, %v13171_v4  ;;  %v13311_v4 = vrot.slane %v8436_v63, 3 }
 0x106   :  { %13307 = vst [vmem:[#allocation35_spill] sm:$0xff] %v8618_v40  ;;  %v8626_v27 = vsel %vm2015_vm9, %v2035_v1, %v2037_v14  ;;  %v8634_v46 = vsel %vm480_vm1, %v2256_v25, %v2258_v37  ;;  %v8637_v38 = vsel %vm1793_vm7, %v1813_v26, %v1815_v59  ;;  %v8640_v28 = vsel %vm1646_vm8, %v1666_v7, %v1668_v45 }
 0x107   :  { %v593_v17 = vpop.f32.mrf.mxu0  ;;  %13308 = vst [vmem:[#allocation36_spill] sm:$0xff] %v8640_v28  ;;  %v13310_v26 = vrot.slane %v8450_v12, 3 }
 0x108   :  { %v1670_v33 = vrot.slane %v593_v17, 4  ;;  %v1817_v13 = vrot.slane %v593_v17, 5  ;;  %v2039_v1 = vrot.slane %v593_v17, 6  ;;  %v2260_v54 = vrot.slane %v593_v17, 7 }
 0x109   :  { %2095 = vrot.lane.b32.xlu0 %v2022_v30, %s8085_s0  ;;  %1248 = vrot.lane.b32.xlu1 %v1177_v5, %s8085_s0  ;;  %v8644_v8 = vpop.f32.mrf.mxu0  ;;  %v1399_v7 = vsel %vm1388_vm4, %v13311_v4, %v13310_v26  ;;  %v13312_v17 = vrot.slane %v8455_v15, 6 }
 0x10a   :  { %13309 = vst [vmem:[#allocation37_spill] sm:$0xff] %v8644_v8  ;;  %v8654_v50 = vsel %vm1793_vm7, %v1815_v59, %v1817_v13  ;;  %v8660_v28 = vsel %vm2015_vm9, %v2037_v14, %v2039_v1  ;;  %v8663_v55 = vsel %vm480_vm1, %v2258_v37, %v2260_v54  ;;  %v8666_v25 = vsel %vm1646_vm8, %v1668_v45, %v1670_v33 }
 0x10b   :  { %v2024_v30 = vsel %vm2015_vm9, %v2021_v42, %v13312_v17  ;;  %v597_v5 = vpop.f32.mrf.mxu0  ;;  %13313 = vst [vmem:[#allocation38_spill] sm:$0xff] %v8666_v25  ;;  %v1178_v14 = vrot.slane %v8471_v21, 2  ;;  %v13315_v37 = vrot.slane %v8455_v15, 5  ;;  %v13316_v17 = vrot.slane %v8439_v2, 5 }
 0x10c   :  { %v1672_v60 = vrot.slane %v597_v5, 4  ;;  %v1819_v0 = vrot.slane %v597_v5, 5  ;;  %v2041_v4 = vrot.slane %v597_v5, 6  ;;  %v2262_v26 = vrot.slane %v597_v5, 7 }
 0x10d   :  { %1470 = vrot.lane.b32.xlu1 %v1399_v7, %s8083_s20  ;;  %2097 = vrot.lane.b32.xlu0 %v2024_v30, %s8085_s0  ;;  %v8670_v59 = vpop.f32.mrf.mxu0  ;;  %v1802_v45 = vsel %vm1793_vm7, %v13316_v17, %v13315_v37  ;;  %v13317_v5 = vrot.slane %v8471_v21, 1  ;;  %v13318_v7 = vrot.slane %v8450_v12, 1 }
 0x10e   :  { %13314 = vst [vmem:[#allocation39_spill] sm:$0xff] %v8670_v59  ;;  %v8680_v25 = vsel %vm1793_vm7, %v1817_v13, %v1819_v0  ;;  %v8688_v42 = vsel %vm2015_vm9, %v2039_v1, %v2041_v4  ;;  %v8691_v22 = vsel %vm480_vm1, %v2260_v54, %v2262_v26  ;;  %v8694_v10 = vsel %vm1646_vm8, %v1670_v33, %v1672_v60 }
 0x10f   :  { %v957_v30 = vsel %vm944_vm5, %v13318_v7, %v13317_v5  ;;  %v603_v48 = vpop.f32.mrf.mxu0  ;;  %13319 = vst [vmem:[#allocation40_spill] sm:$0xff] %v8694_v10  ;;  %v1400_v5 = vrot.slane %v8471_v21, 3  ;;  %v2025_v1 = vrot.slane %v8474_v23, 6  ;;  %v13321_v54 = vrot.slane %v8455_v15, 7 }
 0x110   :  { %v1674_v37 = vrot.slane %v603_v48, 4  ;;  %v1821_v17 = vrot.slane %v603_v48, 5  ;;  %v2043_v13 = vrot.slane %v603_v48, 6  ;;  %v2264_v62 = vrot.slane %v603_v48, 7 }
 0x111   :  { %1875 = vrot.lane.b32.xlu1 %v1802_v45, %s8084_s21  ;;  %1028 = vrot.lane.b32.xlu0 %v957_v30, %s8084_s21  ;;  %v8698_v44 = vpop.f32.mrf.mxu0  ;;  %v13322_v7 = vrot.slane %v8439_v2, 7  ;;  %v13323_v48 = vrot.slane %v8450_v12, 2 }
 0x112   :  { %13320 = vst [vmem:[#allocation41_spill] sm:$0xff] %v8698_v44  ;;  %v8708_v10 = vsel %vm1793_vm7, %v1819_v0, %v1821_v17  ;;  %v8714_v32 = vsel %vm480_vm1, %v2262_v26, %v2264_v62  ;;  %v8717_v24 = vsel %vm2015_vm9, %v2041_v4, %v2043_v13  ;;  %v8720_v16 = vsel %vm1646_vm8, %v1672_v60, %v1674_v37 }
 0x113   :  { %v2245_v33 = vsel %vm480_vm1, %v13322_v7, %v13321_v54  ;;  %v1179_v45 = vsel %vm1166_vm6, %v13323_v48, %v1178_v14  ;;  %v607_v30 = vpop.f32.mrf.mxu0  ;;  %13324 = vst [vmem:[#allocation42_spill] sm:$0xff] %v8720_v16  ;;  %v1803_v48 = vrot.slane %v8474_v23, 5  ;;  %v13325_v4 = vrot.slane %v8450_v12, 3 }
 0x114   :  { %v1676_v2 = vrot.slane %v607_v30, 4  ;;  %v1823_v63 = vrot.slane %v607_v30, 5  ;;  %v2045_v54 = vrot.slane %v607_v30, 6  ;;  %v2266_v7 = vrot.slane %v607_v30, 7 }
 0x115   :  { %2318 = vrot.lane.b32.xlu1 %v2245_v33, %s8083_s20  ;;  %1250 = vrot.lane.b32.xlu0 %v1179_v45, %s8085_s0  ;;  %v8724_v0 = vpop.f32.mrf.mxu0  ;;  %v1401_v58 = vsel %vm1388_vm4, %v13325_v4, %v1400_v5  ;;  %v13326_v16 = vrot.slane %v8455_v15, 6 }
 0x116   :  { %v8732_v60 = vsel %vm1793_vm7, %v1821_v17, %v1823_v63  ;;  %v8738_v45 = vsel %vm2015_vm9, %v2043_v13, %v2045_v54  ;;  %v8741_v41 = vsel %vm480_vm1, %v2264_v62, %v2266_v7  ;;  %v8744_v26 = vsel %vm1646_vm8, %v1674_v37, %v1676_v2 }
 0x117   :  { %v2026_v30 = vsel %vm2015_vm9, %v13326_v16, %v2025_v1  ;;  %v613_v33 = vpop.f32.mrf.mxu0  ;;  %13327 = vst [vmem:[#allocation43_spill] sm:$0xff] %v8744_v26 }
 0x118   :  { %v1678_v12 = vrot.slane %v613_v33, 4  ;;  %v1825_v53 = vrot.slane %v613_v33, 5  ;;  %v2047_v4 = vrot.slane %v613_v33, 6  ;;  %v2268_v57 = vrot.slane %v613_v33, 7 }
 0x119   :  { %1472 = vrot.lane.b32.xlu1 %v1401_v58, %s8083_s20  ;;  %2099 = vrot.lane.b32.xlu0 %v2026_v30, %s8085_s0  ;;  %v615_v17 = vpop.f32.mrf.mxu0  ;;  %v2246_v33 = vrot.slane %v8474_v23, 7  ;;  %v1402_v58 = vrot.slane %v8487_v29, 3  ;;  %v13330_v30 = vrot.slane %v8455_v15, 5  ;;  %v2027_v23 = vrot.slane %v8490_v31, 6 }
 0x11a   :  { %v8749_v16 = vsel %vm1793_vm7, %v1823_v63, %v1825_v53  ;;  %v8752_v13 = vsel %vm2015_vm9, %v2045_v54, %v2047_v4  ;;  %v8755_v62 = vsel %vm480_vm1, %v2266_v7, %v2268_v57  ;;  %v8758_v37 = vsel %vm1646_vm8, %v1676_v2, %v1678_v12 }
 0x11b   :  { %13328 = vst [vmem:[#allocation44_spill] sm:$0xff] %v8755_v62  ;;  %13329 = vst [vmem:[#allocation45_spill] sm:$0xff] %v8758_v37  ;;  %v617_v26 = vpop.f32.mrf.mxu0  ;;  %v1804_v17 = vsel %vm1793_vm7, %v13330_v30, %v1803_v48  ;;  %v13331_v53 = vrot.slane %v8487_v29, 2  ;;  %v958_v2 = vrot.slane %v8487_v29, 1  ;;  %v13332_v54 = vrot.slane %v8455_v15, 7 }
 0x11c   :  { %v1403_v26 = vsel %vm1388_vm4, %v1400_v5, %v1402_v58  ;;  %v1805_v30 = vrot.slane %v8490_v31, 5 }
 0x11d   :  { %v1181_v63 = vsel %vm1166_vm6, %v1178_v14, %v13331_v53  ;;  %1877 = vrot.lane.b32.xlu1 %v1804_v17, %s8084_s21  ;;  %v621_v57 = vpop.f32.mrf.mxu0  ;;  %v2247_v7 = vsel %vm480_vm1, %v13332_v54, %v2246_v33  ;;  %v1404_v17 = vrot.slane %v8501_v39, 3  ;;  %v13335_v53 = vrot.slane %v8471_v21, 1 }
 0x11e   :  { %1252 = vrot.lane.b32.xlu0 %v1181_v63, %s8085_s0  ;;  %v2028_v63 = vsel %vm2015_vm9, %v2025_v1, %v2027_v23  ;;  %v962_v21 = vrot.slane %v8520_v52, 1 }
 0x11f   :  { %v623_v12 = vpop.f32.mrf.mxu0  ;;  %v959_v15 = vsel %vm944_vm5, %v13335_v53, %v958_v2  ;;  %v1405_v53 = vsel %vm1388_vm4, %v1402_v58, %v1404_v17 }
 0x121   :  { %2320 = vrot.lane.b32.xlu1 %v2247_v7, %s8083_s20  ;;  %v8778_v14 = vpop.f32.mrf.mxu0  ;;  %v2029_v7 = vrot.slane %v8504_v43, 6 }
 0x122   :  { %1474 = vrot.lane.b32.xlu0 %v1403_v26, %s8083_s20  ;;  %13333 = vst [vmem:[#allocation46_spill] sm:$0xff] %v8778_v14  ;;  %v1806_v26 = vsel %vm1793_vm7, %v1803_v48, %v1805_v30  ;;  %v13339_v48 = vrot.slane %v8490_v31, 7 }
 0x123   :  { %v8780_v4 = vpop.f32.mrf.mxu0  ;;  %v2030_v34 = vsel %vm2015_vm9, %v2027_v23, %v2029_v7 }
 0x124   :  { %13334 = vst [vmem:[#allocation47_spill] sm:$0xff] %v8780_v4  ;;  %v1684_v12 = vrot.slane %v8780_v4, 4  ;;  %v2249_v58 = vsel %vm480_vm1, %v2246_v33, %v13339_v48 }
 0x125   :  { %1030 = vrot.lane.b32.xlu1 %v959_v15, %s8084_s21  ;;  %v8790_v5 = vpop.f32.mrf.mxu0 }
 0x126   :  { %2101 = vrot.lane.b32.xlu0 %v2028_v63, %s8085_s0  ;;  %13336 = vst [vmem:[#allocation48_spill] sm:$0xff] %v8790_v5  ;;  %v960_v63 = vrot.slane %v8501_v39, 1 }
 0x127   :  { %v8794_v54 = vpop.f32.mrf.mxu0 }
 0x128   :  { %v1686_v1 = vrot.slane %v8794_v54, 4  ;;  %v961_v33 = vsel %vm944_vm5, %v958_v2, %v960_v63  ;;  %v963_v23 = vsel %vm944_vm5, %v960_v63, %v962_v21  ;;  %v1407_v63 = vsel %vm1388_vm4, %v1404_v17, %v1406_v47 }
 0x129   :  { %1879 = vrot.lane.b32.xlu1 %v1806_v26, %s8084_s21  ;;  %v8802_v15 = vpop.f32.mrf.mxu0 }
 0x12a   :  { %1476 = vrot.lane.b32.xlu0 %v1405_v53, %s8083_s20  ;;  %13337 = vst [vmem:[#allocation49_spill] sm:$0xff] %v8802_v15  ;;  %v8808_v37 = vsel %vm1646_vm8, %v1684_v12, %v1686_v1 }
 0x12b   :  { %v8805_v57 = vpop.f32.mrf.mxu0  ;;  %13338 = vst [vmem:[#allocation50_spill] sm:$0xff] %v8808_v37 }
 0x12c   :  { %v1688_v26 = vrot.slane %v8805_v57, 4 }
 0x12d   :  { %2322 = vrot.lane.b32.xlu1 %v2249_v58, %s8083_s20  ;;  %v8818_v53 = vpop.f32.mrf.mxu0  ;;  %v2031_v58 = vrot.slane %v8527_v61, 6 }
 0x12e   :  { %2103 = vrot.lane.b32.xlu0 %v2030_v34, %s8085_s0  ;;  %13340 = vst [vmem:[#allocation51_spill] sm:$0xff] %v8818_v53  ;;  %v8824_v37 = vsel %vm1646_vm8, %v1686_v1, %v1688_v26 }
 0x12f   :  { %v8821_v12 = vpop.f32.mrf.mxu0  ;;  %13341 = vst [vmem:[#allocation52_spill] sm:$0xff] %v8824_v37  ;;  %v13344_v37 = vrot.slane %v8487_v29, 2  ;;  %v2032_v17 = vsel %vm2015_vm9, %v2029_v7, %v2031_v58 }
 0x130   :  { %v1690_v48 = vrot.slane %v8821_v12, 4 }
 0x131   :  { %1032 = vrot.lane.b32.xlu1 %v961_v33, %s8084_s21  ;;  %v8832_v34 = vpop.f32.mrf.mxu0  ;;  %v1183_v2 = vsel %vm1166_vm6, %v13344_v37, %v1182_v36 }
 0x132   :  { %1034 = vrot.lane.b32.xlu0 %v963_v23, %s8084_s21  ;;  %13342 = vst [vmem:[#allocation53_spill] sm:$0xff] %v8832_v34  ;;  %v8838_v1 = vsel %vm1646_vm8, %v1688_v26, %v1690_v48  ;;  %v964_v34 = vrot.slane %v8540_v6, 1  ;;  %v13346_v26 = vrot.slane %v8504_v43, 5 }
 0x133   :  { %v8835_v39 = vpop.f32.mrf.mxu0  ;;  %13343 = vst [vmem:[#allocation54_spill] sm:$0xff] %v8838_v1 }
 0x134   :  { %v2061_v33 = vrot.slane %v8835_v39, 6  ;;  %v2282_v23 = vrot.slane %v8835_v39, 7  ;;  %v1808_v1 = vsel %vm1793_vm7, %v1805_v30, %v13346_v26  ;;  %v13192_v37 = vrot.slane %v8835_v39, 5 }
 0x135   :  { %1254 = vrot.lane.b32.xlu1 %v1183_v2, %s8085_s0  ;;  %v8848_v61 = vpop.f32.mrf.mxu0  ;;  %v13191_v2 = vrot.slane %v8821_v12, 6  ;;  %v1692_v29 = vrot.slane %v8835_v39, 4 }
 0x136   :  { %1478 = vrot.lane.b32.xlu0 %v1407_v63, %s8083_s20  ;;  %13345 = vst [vmem:[#allocation55_spill] sm:$0xff] %v8848_v61  ;;  %v13190_v63 = vrot.slane %v8821_v12, 7 }
 0x137   :  { %v8859_v4 = vpop.f32.mrf.mxu0  ;;  %v8875_v26 = vsel %vm2015_vm9, %v13191_v2, %v2061_v33 }
 0x138   :  { %v13193_v53 = vrot.slane %v8859_v4, 5  ;;  %v13194_v62 = vrot.slane %v8859_v4, 6  ;;  %v13195_v30 = vrot.slane %v8859_v4, 7  ;;  %v8870_v7 = vsel %vm480_vm1, %v13190_v63, %v2282_v23  ;;  %13347 = vst [vmem:[#allocation56_spill] sm:$0xff] %v8875_v26 }
 0x139   :  { %1881 = vrot.lane.b32.xlu1 %v1808_v1, %s8084_s21  ;;  %v8895_v63 = vsel %vm1646_vm8, %v1690_v48, %v1692_v29  ;;  %v13350_v2 = vrot.slane %v8859_v4, 4 }
 0x13a   :  { %2105 = vrot.lane.b32.xlu0 %v2032_v17, %s8085_s0  ;;  %v8882_v61 = vsel %vm1793_vm7, %v13192_v37, %v13193_v53  ;;  %v8887_v1 = vsel %vm2015_vm9, %v2061_v33, %v13194_v62  ;;  %v8892_v17 = vsel %vm480_vm1, %v2282_v23, %v13195_v30  ;;  %13349 = vst [vmem:[#allocation58_spill] sm:$0xff] %v8895_v63  ;;  %v1184_v37 = vrot.slane %v8520_v52, 2 }
 0x13b   :  { %13348 = vst [vmem:[#allocation57_spill] sm:$0xff] %v8887_v1  ;;  %v8900_v26 = vsel %vm1646_vm8, %v1692_v29, %v13350_v2  ;;  %v1408_v53 = vrot.slane %v8540_v6, 3  ;;  %v13352_v33 = vrot.slane %v8504_v43, 7  ;;  %v13353_v62 = vrot.slane %v8490_v31, 7 }
 0x13c   :  { %13351 = vst [vmem:[#allocation59_spill] sm:$0xff] %v8900_v26  ;;  %v965_v23 = vsel %vm944_vm5, %v962_v21, %v964_v34  ;;  %v1185_v48 = vsel %vm1166_vm6, %v1182_v36, %v1184_v37  ;;  %v966_v43 = vrot.slane %v8570_v35, 1  ;;  %v13354_v31 = vrot.slane %v8547_v18, 6 }
 0x13d   :  { %v2251_v1 = vsel %vm480_vm1, %v13353_v62, %v13352_v33  ;;  %v1409_v29 = vsel %vm1388_vm4, %v1406_v47, %v1408_v53  ;;  %v1186_v21 = vrot.slane %v8540_v6, 2  ;;  %v1410_v36 = vrot.slane %v8570_v35, 3 }
 0x13e   :  { %2324 = vrot.lane.b32.xlu1 %v2251_v1, %s8083_s20  ;;  %1036 = vrot.lane.b32.xlu0 %v965_v23, %s8084_s21  ;;  %v2034_v62 = vsel %vm2015_vm9, %v2031_v58, %v13354_v31  ;;  %v967_v47 = vsel %vm944_vm5, %v964_v34, %v966_v43  ;;  %v8935_v1 = vpop.f32.mrf.mxu0  ;;  %v13197_v23 = vrot.slane %v8592_v9, 1  ;;  %v1188_v31 = vrot.slane %v8570_v35, 2 }
 0x13f   :  { %v1187_v58 = vsel %vm1166_vm6, %v1184_v37, %v1186_v21  ;;  %13357 = vst [vmem:[#allocation62_spill] sm:$0xff] %v8935_v1 }
 0x140   :  { %v657_v34 = vpop.f32.mrf.mxu0 }
 0x142   :  { %1256 = vrot.lane.b32.xlu1 %v1185_v48, %s8085_s0  ;;  %1480 = vrot.lane.b32.xlu0 %v1409_v29, %s8083_s20  ;;  %v8944_v48 = vpop.f32.mrf.mxu0 }
 0x143   :  { %13360 = vst [vmem:[#allocation65_spill] sm:$0xff] %v8944_v48 }
 0x146   :  { %1883 = vrot.lane.b32.xlu1 %v8552_v19, %s8084_s21  ;;  %2107 = vrot.lane.b32.xlu0 %v2034_v62, %s8085_s0  ;;  %v1411_v19 = vsel %vm1388_vm4, %v1408_v53, %v1410_v36  ;;  %v8950_v53 = vpop.f32.mrf.mxu0  ;;  %v1696_v62 = vrot.slane %v657_v34, 4 }
 0x147   :  { %v2067_v30 = vrot.slane %v8950_v53, 6  ;;  %v13369_v6 = vrot.slane %v8950_v53, 5 }
 0x14a   :  { %2326 = vrot.lane.b32.xlu1 %v8557_v20, %s8083_s20  ;;  %1038 = vrot.lane.b32.xlu0 %v967_v47, %s8084_s21  ;;  %v969_v47 = vsel %vm944_vm5, %v966_v43, %v13197_v23  ;;  %v13365_v23 = vrot.slane %v8859_v4, 6  ;;  %v13368_v43 = vrot.slane %v8859_v4, 7 }
 0x14b   :  { %v8929_v2 = vpop.permute.xlu1 %1462  ;;  %v8931_v18 = vpop.permute.xlu0 %1018 }
 0x14c   :  { %13355 = vst [vmem:[#allocation60_spill] sm:$0xff] %v8929_v2  ;;  %13356 = vst [vmem:[#allocation61_spill] sm:$0xff] %v8931_v18  ;;  %v13390_v2 = vrot.slane %v8592_v9, 3 }
 0x14e   :  { %1258 = vrot.lane.b32.xlu1 %v1187_v58, %s8085_s0  ;;  %1482 = vrot.lane.b32.xlu0 %v1411_v19, %s8083_s20  ;;  %v2065_v58 = vrot.slane %v657_v34, 6  ;;  %v13366_v19 = vrot.slane %v8592_v9, 3 }
 0x14f   :  { %v8939_v33 = vpop.permute.xlu0 %1240  ;;  %v8941_v20 = vpop.permute.xlu1 %2089 }
 0x150   :  { %13358 = vst [vmem:[#allocation63_spill] sm:$0xff] %v8939_v33  ;;  %13359 = vst [vmem:[#allocation64_spill] sm:$0xff] %v8941_v20 }
 0x152   :  { %1885 = vrot.lane.b32.xlu1 %v8582_v51, %s8084_s21  ;;  %2109 = vrot.lane.b32.xlu0 %v8602_v3, %s8085_s0  ;;  %v1843_v51 = vrot.slane %v657_v34, 5  ;;  %v2286_v3 = vrot.slane %v657_v34, 7  ;;  %v13367_v34 = vrot.slane %v8859_v4, 5 }
 0x153   :  { %v8952_v37 = vpop.permute.xlu1 %2310  ;;  %v8954_v29 = vpop.permute.xlu0 %1867 }
 0x154   :  { %13361 = vst [vmem:[#allocation66_spill] sm:$0xff] %v8952_v37  ;;  %13362 = vst [vmem:[#allocation67_spill] sm:$0xff] %v8954_v29  ;;  %v1413_v37 = vsel %vm1388_vm4, %v1410_v36, %v13366_v19  ;;  %v8986_v35 = vsel %vm1793_vm7, %v13367_v34, %v1843_v51  ;;  %v8999_v36 = vsel %vm1793_vm7, %v1843_v51, %v13369_v6  ;;  %v9020_v6 = vpop.f32.mrf.mxu1  ;;  %v9022_v51 = vpop.f32.mrf.mxu0 }
 0x155   :  { %13377 = vst [vmem:[#allocation74_spill] sm:$0xff] %v9020_v6  ;;  %13378 = vst [vmem:[#allocation75_spill] sm:$0xff] %v9022_v51 }
 0x156   :  { %2328 = vrot.lane.b32.xlu1 %v8585_v56, %s8083_s20  ;;  %1040 = vrot.lane.b32.xlu0 %v969_v47, %s8084_s21  ;;  %v8975_v56 = vsel %vm2015_vm9, %v13365_v23, %v2065_v58  ;;  %v1189_v47 = vsel %vm1166_vm6, %v1186_v21, %v1188_v31  ;;  %v8991_v23 = vsel %vm480_vm1, %v13368_v43, %v2286_v3  ;;  %v13373_v43 = vrot.slane %v8859_v4, 4 }
 0x157   :  { %v8966_v26 = vpop.permute.xlu1 %1242  ;;  %v8968_v63 = vpop.permute.xlu0 %1020  ;;  %v8994_v21 = vsel %vm2015_vm9, %v2065_v58, %v2067_v30  ;;  %v13375_v58 = vrot.slane %v8950_v53, 4  ;;  %v1190_v4 = vrot.slane %v8592_v9, 2 }
 0x158   :  { %13363 = vst [vmem:[#allocation68_spill] sm:$0xff] %v8966_v26  ;;  %13364 = vst [vmem:[#allocation69_spill] sm:$0xff] %v8968_v63  ;;  %v9013_v52 = vsel %vm1646_vm8, %v13373_v43, %v1696_v62  ;;  %v13394_v26 = vrot.slane %v8950_v53, 7 }
 0x159   :  { %13374 = vst [vmem:[#allocation72_spill] sm:$0xff] %v9013_v52  ;;  %v9018_v20 = vsel %vm1646_vm8, %v1696_v62, %v13375_v58  ;;  %v970_v62 = vrot.slane %v8618_v40, 1  ;;  %v9034_v58 = vpop.f32.mrf.mxu1 }
 0x15a   :  { %1260 = vrot.lane.b32.xlu1 %v1189_v47, %s8085_s0  ;;  %1484 = vrot.lane.b32.xlu0 %v1413_v37, %s8083_s20  ;;  %v13372_v47 = vrot.slane %v8950_v53, 7  ;;  %13376 = vst [vmem:[#allocation73_spill] sm:$0xff] %v9018_v20  ;;  %13381 = vst [vmem:[#allocation78_spill] sm:$0xff] %v9034_v58  ;;  %v13200_v58 = vmov -1e+30  }
 0x15b   :  { %v9001_v19 = vpop.permute.xlu0 %1464  ;;  %v9003_v37 = vpop.permute.xlu1 %1869  ;;  %3548 = vst.msk [vmem:[#allocation3 + $0x88] sm:$0xff] %vm3047_vm10, %v13200_v58  ;;  %3549 = vst.msk [vmem:[#allocation3 + $0x90] sm:$0xff] %vm3047_vm10, %v13200_v58 }
 0x15c   :  { %13370 = vst [vmem:[#allocation70_spill] sm:$0xff] %v9001_v19  ;;  %13371 = vst [vmem:[#allocation71_spill] sm:$0xff] %v9003_v37  ;;  %v9008_v34 = vsel %vm480_vm1, %v2286_v3, %v13372_v47  ;;  %v667_v3 = vpop.f32.mrf.mxu0 }
 0x15d   :  { %3569 = vst.msk [vmem:[#allocation3 + $0x98] sm:$0xff] %vm3047_vm10, %v13200_v58  ;;  %3570 = vst.msk [vmem:[#allocation3 + $0x120] sm:$0xff] %vm3047_vm10, %v13200_v58  ;;  %v2290_v29 = vrot.slane %v667_v3, 7 }
 0x15e   :  { %1887 = vrot.lane.b32.xlu1 %v8608_v49, %s8084_s21  ;;  %2111 = vrot.lane.b32.xlu0 %v8626_v27, %s8085_s0  ;;  %v9036_v20 = vpop.f32.mrf.mxu0  ;;  %v9042_v49 = vpop.f32.mrf.mxu1  ;;  %3571 = vst.msk [vmem:[#allocation3 + $0x128] sm:$0xff] %vm3047_vm10, %v13200_v58  ;;  %v13392_v58 = vrot.slane %v8950_v53, 5 }
 0x15f   :  { %v9029_v47 = vpop.permute.xlu0 %2091  ;;  %v9031_v43 = vpop.permute.xlu1 %1022  ;;  %13382 = vst [vmem:[#allocation79_spill] sm:$0xff] %v9036_v20  ;;  %13383 = vst [vmem:[#allocation80_spill] sm:$0xff] %v9042_v49  ;;  %v1847_v49 = vrot.slane %v667_v3, 5 }
 0x160   :  { %13379 = vst [vmem:[#allocation76_spill] sm:$0xff] %v9029_v47  ;;  %13380 = vst [vmem:[#allocation77_spill] sm:$0xff] %v9031_v43  ;;  %v9044_v27 = vpop.f32.mrf.mxu0  ;;  %v1191_v47 = vsel %vm1166_vm6, %v1188_v31, %v1190_v4  ;;  %v9067_v37 = vpop.f32.mrf.mxu1 }
 0x161   :  { %13387 = vst [vmem:[#allocation83_spill] sm:$0xff] %v9067_v37  ;;  %v972_v37 = vrot.slane %v8644_v8, 1 }
 0x162   :  { %2330 = vrot.lane.b32.xlu1 %v8611_v11, %s8083_s20  ;;  %2332 = vrot.lane.b32.xlu0 %v8634_v46, %s8083_s20  ;;  %v1414_v11 = vrot.slane %v8618_v40, 3  ;;  %v13386_v46 = vrot.slane %v8592_v9, 1  ;;  %v9085_v18 = vpop.f32.mrf.mxu1 }
 0x163   :  { %v9046_v52 = vpop.permute.xlu0 %2312  ;;  %v9048_v6 = vpop.permute.xlu1 %1466  ;;  %13391 = vst [vmem:[#allocation86_spill] sm:$0xff] %v9085_v18  ;;  %v13395_v18 = vrot.slane %v9044_v27, 5 }
 0x164   :  { %13384 = vst [vmem:[#allocation81_spill] sm:$0xff] %v9046_v52  ;;  %13385 = vst [vmem:[#allocation82_spill] sm:$0xff] %v9048_v6  ;;  %v971_v31 = vsel %vm944_vm5, %v13386_v46, %v970_v62  ;;  %v2069_v52 = vrot.slane %v667_v3, 6  ;;  %v1700_v46 = vrot.slane %v667_v3, 4  ;;  %v1415_v19 = vsel %vm1388_vm4, %v13390_v2, %v1414_v11 }
 0x165   :  { %v9103_v2 = vsel %vm480_vm1, %v13394_v26, %v2290_v29  ;;  %v13401_v26 = vrot.slane %v9044_v27, 4 }
 0x166   :  { %1262 = vrot.lane.b32.xlu1 %v1191_v47, %s8085_s0  ;;  %1042 = vrot.lane.b32.xlu0 %v971_v31, %s8084_s21  ;;  %v9078_v47 = vsel %vm2015_vm9, %v2067_v30, %v2069_v52  ;;  %v1192_v31 = vrot.slane %v8618_v40, 2  ;;  %v13393_v30 = vrot.slane %v9044_v27, 6  ;;  %v13396_v40 = vrot.slane %v9044_v27, 7 }
 0x167   :  { %v9072_v6 = vpop.permute.xlu0 %1244  ;;  %v9074_v33 = vpop.permute.xlu1 %2093 }
 0x168   :  { %13388 = vst [vmem:[#allocation84_spill] sm:$0xff] %v9072_v6  ;;  %13389 = vst [vmem:[#allocation85_spill] sm:$0xff] %v9074_v33  ;;  %v9090_v33 = vsel %vm1793_vm7, %v13392_v58, %v1847_v49  ;;  %v9098_v3 = vsel %vm2015_vm9, %v2069_v52, %v13393_v30  ;;  %v9108_v58 = vsel %vm1793_vm7, %v1847_v49, %v13395_v18  ;;  %v13399_v52 = vrot.slane %v8950_v53, 4 }
 0x169   :  { %v9127_v6 = vsel %vm1646_vm8, %v1700_v46, %v13401_v26  ;;  %v1416_v18 = vrot.slane %v8644_v8, 3  ;;  %v1193_v49 = vsel %vm1166_vm6, %v1190_v4, %v1192_v31 }
 0x16a   :  { %1889 = vrot.lane.b32.xlu1 %v8637_v38, %s8084_s21  ;;  %1486 = vrot.lane.b32.xlu0 %v1415_v19, %s8083_s20  ;;  %v9113_v38 = vsel %vm480_vm1, %v2290_v29, %v13396_v40  ;;  %v9122_v30 = vsel %vm1646_vm8, %v13399_v52, %v1700_v46  ;;  %13402 = vst [vmem:[#allocation90_spill] sm:$0xff] %v9127_v6  ;;  %v9132_v29 = vpop.f32.mrf.mxu1  ;;  %v1194_v6 = vrot.slane %v8644_v8, 2  ;;  %v1196_v8 = vrot.slane %v8670_v59, 2 }
 0x16b   :  { %v9115_v19 = vpop.permute.xlu1 %2314  ;;  %v9117_v9 = vpop.permute.xlu0 %1871  ;;  %13400 = vst [vmem:[#allocation89_spill] sm:$0xff] %v9122_v30  ;;  %v973_v40 = vsel %vm944_vm5, %v970_v62, %v972_v37  ;;  %13403 = vst [vmem:[#allocation91_spill] sm:$0xff] %v9132_v29  ;;  %v1417_v46 = vsel %vm1388_vm4, %v1414_v11, %v1416_v18  ;;  %v974_v29 = vrot.slane %v8670_v59, 1 }
 0x16c   :  { %13397 = vst [vmem:[#allocation87_spill] sm:$0xff] %v9115_v19  ;;  %13398 = vst [vmem:[#allocation88_spill] sm:$0xff] %v9117_v9  ;;  %v9136_v53 = vpop.f32.mrf.mxu1  ;;  %v13423_v9 = vrot.slane %v9044_v27, 6 }
 0x16d   :  { %13404 = vst [vmem:[#allocation92_spill] sm:$0xff] %v9136_v53 }
 0x16e   :  { %1264 = vrot.lane.b32.xlu1 %v1193_v49, %s8085_s0  ;;  %1044 = vrot.lane.b32.xlu0 %v973_v40, %s8084_s21  ;;  %v9146_v4 = vpop.f32.mrf.mxu1  ;;  %v9154_v40 = vpop.f32.mrf.mxu0 }
 0x16f   :  { %v9138_v52 = vpop.permute.xlu0 %1246  ;;  %v9140_v30 = vpop.permute.xlu1 %1024  ;;  %13407 = vst [vmem:[#allocation95_spill] sm:$0xff] %v9146_v4  ;;  %13411 = vst [vmem:[#allocation99_spill] sm:$0xff] %v9154_v40 }
 0x170   :  { %13405 = vst [vmem:[#allocation93_spill] sm:$0xff] %v9138_v52  ;;  %13406 = vst [vmem:[#allocation94_spill] sm:$0xff] %v9140_v30  ;;  %v9152_v49 = vpop.f32.mrf.mxu1  ;;  %v677_v11 = vpop.f32.mrf.mxu0  ;;  %v13484_v30 = vrot.slane %v8794_v54, 6 }
 0x171   :  { %13410 = vst [vmem:[#allocation98_spill] sm:$0xff] %v9152_v49 }
 0x172   :  { %1891 = vrot.lane.b32.xlu1 %v8654_v50, %s8084_s21  ;;  %1488 = vrot.lane.b32.xlu0 %v1417_v46, %s8083_s20  ;;  %v9165_v53 = vpop.f32.mrf.mxu1  ;;  %v9167_v4 = vpop.f32.mrf.mxu0 }
 0x173   :  { %v9148_v62 = vpop.permute.xlu0 %1468  ;;  %v9150_v26 = vpop.permute.xlu1 %2316  ;;  %13414 = vst [vmem:[#allocation102_spill] sm:$0xff] %v9165_v53  ;;  %13415 = vst [vmem:[#allocation103_spill] sm:$0xff] %v9167_v4  ;;  %v1195_v53 = vsel %vm1166_vm6, %v1192_v31, %v1194_v6 }
 0x174   :  { %13408 = vst [vmem:[#allocation96_spill] sm:$0xff] %v9148_v62  ;;  %13409 = vst [vmem:[#allocation97_spill] sm:$0xff] %v9150_v26  ;;  %v9182_v26 = vpop.f32.mrf.mxu0  ;;  %v975_v62 = vsel %vm944_vm5, %v972_v37, %v974_v29  ;;  %v13425_v37 = vrot.slane %v9044_v27, 5 }
 0x176   :  { %2113 = vrot.lane.b32.xlu1 %v8660_v28, %s8085_s0  ;;  %1893 = vrot.lane.b32.xlu0 %v8680_v25, %s8084_s21  ;;  %v9173_v28 = vpop.f32.mrf.mxu1 }
 0x177   :  { %v9160_v50 = vpop.permute.xlu0 %1873  ;;  %v9162_v46 = vpop.permute.xlu1 %1026  ;;  %13416 = vst [vmem:[#allocation104_spill] sm:$0xff] %v9173_v28  ;;  %v1851_v28 = vrot.slane %v677_v11, 5 }
 0x178   :  { %13412 = vst [vmem:[#allocation100_spill] sm:$0xff] %v9160_v50  ;;  %13413 = vst [vmem:[#allocation101_spill] sm:$0xff] %v9162_v46  ;;  %v2294_v50 = vrot.slane %v677_v11, 7 }
 0x17a   :  { %2334 = vrot.lane.b32.xlu1 %v8663_v55, %s8083_s20  ;;  %2115 = vrot.lane.b32.xlu0 %v8688_v42, %s8085_s0  ;;  %v2073_v55 = vrot.slane %v677_v11, 6  ;;  %v9187_v42 = vpop.f32.mrf.mxu1 }
 0x17b   :  { %v9175_v25 = vpop.permute.xlu0 %2095  ;;  %v9177_v49 = vpop.permute.xlu1 %1248  ;;  %13419 = vst [vmem:[#allocation107_spill] sm:$0xff] %v9187_v42  ;;  %v1704_v42 = vrot.slane %v677_v11, 4 }
 0x17c   :  { %13417 = vst [vmem:[#allocation105_spill] sm:$0xff] %v9175_v25  ;;  %13418 = vst [vmem:[#allocation106_spill] sm:$0xff] %v9177_v49  ;;  %v1418_v49 = vrot.slane %v8670_v59, 3  ;;  %v9199_v46 = vpop.f32.mrf.mxu1  ;;  %v9207_v31 = vsel %vm2015_vm9, %v13423_v9, %v2073_v55 }
 0x17d   :  { %13422 = vst [vmem:[#allocation110_spill] sm:$0xff] %v9199_v46  ;;  %v13430_v46 = vrot.slane %v9044_v27, 7 }
 0x17e   :  { %1266 = vrot.lane.b32.xlu1 %v1195_v53, %s8085_s0  ;;  %2336 = vrot.lane.b32.xlu0 %v8691_v22, %s8083_s20  ;;  %v1197_v53 = vsel %vm1166_vm6, %v1194_v6, %v1196_v8  ;;  %v9209_v59 = vpop.f32.mrf.mxu1  ;;  %v9214_v6 = vsel %vm1793_vm7, %v13425_v37, %v1851_v28  ;;  %v1419_v37 = vsel %vm1388_vm4, %v1416_v18, %v1418_v49 }
 0x17f   :  { %v9189_v25 = vpop.permute.xlu1 %1470  ;;  %v9191_v19 = vpop.permute.xlu0 %2097  ;;  %13424 = vst [vmem:[#allocation111_spill] sm:$0xff] %v9209_v59  ;;  %v9233_v59 = vsel %vm480_vm1, %v13430_v46, %v2294_v50  ;;  %v13435_v46 = vrot.slane %v9182_v26, 4 }
 0x180   :  { %13420 = vst [vmem:[#allocation108_spill] sm:$0xff] %v9189_v25  ;;  %13421 = vst [vmem:[#allocation109_spill] sm:$0xff] %v9191_v19  ;;  %v13429_v19 = vrot.slane %v9182_v26, 5  ;;  %v13431_v25 = vrot.slane %v9182_v26, 7 }
 0x181   :  { %v9252_v18 = vsel %vm1646_vm8, %v1704_v42, %v13435_v46 }
 0x182   :  { %1268 = vrot.lane.b32.xlu1 %v1197_v53, %s8085_s0  ;;  %1046 = vrot.lane.b32.xlu0 %v975_v62, %s8084_s21  ;;  %v13428_v62 = vrot.slane %v9182_v26, 6  ;;  %v9228_v9 = vsel %vm1793_vm7, %v1851_v28, %v13429_v19  ;;  %v13433_v19 = vrot.slane %v9044_v27, 4  ;;  %13436 = vst [vmem:[#allocation116_spill] sm:$0xff] %v9252_v18  ;;  %v978_v18 = vrot.slane %v8724_v0, 1 }
 0x183   :  { %v9216_v22 = vpop.permute.xlu1 %1875  ;;  %v9218_v53 = vpop.permute.xlu0 %1028 }
 0x184   :  { %13426 = vst [vmem:[#allocation112_spill] sm:$0xff] %v9216_v22  ;;  %13427 = vst [vmem:[#allocation113_spill] sm:$0xff] %v9218_v53  ;;  %v9223_v11 = vsel %vm2015_vm9, %v2073_v55, %v13428_v62  ;;  %v7908_v22 = vpop.f32.mrf.mxu1  ;;  %v9239_v53 = vsel %vm480_vm1, %v2294_v50, %v13431_v25  ;;  %v9247_v28 = vsel %vm1646_vm8, %v13433_v19, %v1704_v42  ;;  %v976_v50 = vrot.slane %v8698_v44, 1  ;;  %v9271_v19 = vpop.f32.mrf.mxu0 }
 0x185   :  { %13432 = vst [vmem:[#allocation114_spill] sm:$0xff] %v9239_v53  ;;  %13434 = vst [vmem:[#allocation115_spill] sm:$0xff] %v9247_v28  ;;  %v1198_v25 = vrot.slane %v8698_v44, 2  ;;  %v1420_v42 = vrot.slane %v8698_v44, 3 }
 0x186   :  { %1490 = vrot.lane.b32.xlu0 %v1419_v37, %s8083_s20  ;;  %1895 = vrot.lane.b32.xlu1 %v8708_v10, %s8084_s21  ;;  %v977_v37 = vsel %vm944_vm5, %v974_v29, %v976_v50  ;;  %13441 = vst [vmem:[#allocation121_spill] sm:$0xff] %v9271_v19 }
 0x187   :  { %v9254_v55 = vpop.permute.xlu1 %2318  ;;  %v9256_v22 = vpop.permute.xlu0 %1250  ;;  %v1199_v62 = vsel %vm1166_vm6, %v1196_v8, %v1198_v25  ;;  %v1421_v28 = vsel %vm1388_vm4, %v1418_v49, %v1420_v42 }
 0x188   :  { %13437 = vst [vmem:[#allocation117_spill] sm:$0xff] %v9254_v55  ;;  %13438 = vst [vmem:[#allocation118_spill] sm:$0xff] %v9256_v22  ;;  %v1200_v55 = vrot.slane %v8724_v0, 2 }
 0x18a   :  { %2338 = vrot.lane.b32.xlu0 %v8714_v32, %s8083_s20  ;;  %2117 = vrot.lane.b32.xlu1 %v8717_v24, %s8085_s0  ;;  %v687_v32 = vpop.f32.mrf.mxu0 }
 0x18b   :  { %v9264_v10 = vpop.permute.xlu1 %1472  ;;  %v9266_v27 = vpop.permute.xlu0 %2099  ;;  %v2077_v49 = vrot.slane %v687_v32, 6 }
 0x18c   :  { %13439 = vst [vmem:[#allocation119_spill] sm:$0xff] %v9264_v10  ;;  %13440 = vst [vmem:[#allocation120_spill] sm:$0xff] %v9266_v27  ;;  %v9281_v44 = vpop.f32.mrf.mxu0  ;;  %v979_v27 = vsel %vm944_vm5, %v976_v50, %v978_v18  ;;  %v1708_v10 = vrot.slane %v687_v32, 4  ;;  %v13449_v50 = vrot.slane %v9182_v26, 5 }
 0x18d   :  { %13444 = vst [vmem:[#allocation124_spill] sm:$0xff] %v9281_v44 }
 0x18e   :  { %1270 = vrot.lane.b32.xlu1 %v1199_v62, %s8085_s0  ;;  %1048 = vrot.lane.b32.xlu0 %v977_v37, %s8084_s21  ;;  %v9286_v8 = vpop.f32.mrf.mxu0  ;;  %v1855_v37 = vrot.slane %v687_v32, 5 }
 0x18f   :  { %v9275_v46 = vpop.permute.xlu1 %1877 }
 0x190   :  { %13442 = vst [vmem:[#allocation122_spill] sm:$0xff] %v9275_v46  ;;  %v9277_v24 = vpop.permute.xlu0 %1252  ;;  %v1201_v46 = vsel %vm1166_vm6, %v1198_v25, %v1200_v55  ;;  %v986_v55 = vrot.slane %v8790_v5, 1 }
 0x191   :  { %13443 = vst [vmem:[#allocation123_spill] sm:$0xff] %v9277_v24 }
 0x192   :  { %1492 = vrot.lane.b32.xlu1 %v1421_v28, %s8083_s20  ;;  %1897 = vrot.lane.b32.xlu0 %v8732_v60, %s8084_s21  ;;  %v2298_v60 = vrot.slane %v687_v32, 7  ;;  %v13450_v32 = vrot.slane %v9286_v8, 5 }
 0x193   :  { %v9288_v29 = vpop.permute.xlu1 %2320 }
 0x194   :  { %13445 = vst [vmem:[#allocation125_spill] sm:$0xff] %v9288_v29  ;;  %v9290_v62 = vpop.permute.xlu0 %1474  ;;  %v9319_v18 = vsel %vm1793_vm7, %v1855_v37, %v13450_v32  ;;  %v13452_v29 = vrot.slane %v9182_v26, 6 }
 0x195   :  { %13446 = vst [vmem:[#allocation126_spill] sm:$0xff] %v9290_v62  ;;  %13451 = vst [vmem:[#allocation129_spill] sm:$0xff] %v9319_v18 }
 0x196   :  { %2119 = vrot.lane.b32.xlu1 %v8738_v45, %s8085_s0  ;;  %1050 = vrot.lane.b32.xlu0 %v979_v27, %s8084_s21  ;;  %v9308_v45 = vsel %vm1793_vm7, %v13449_v50, %v1855_v37  ;;  %v1422_v27 = vrot.slane %v8724_v0, 3  ;;  %v9324_v50 = vsel %vm2015_vm9, %v13452_v29, %v2077_v49  ;;  %v13454_v0 = vrot.slane %v9286_v8, 6 }
 0x197   :  { %v9300_v24 = vpop.permute.xlu1 %1030  ;;  %13453 = vst [vmem:[#allocation130_spill] sm:$0xff] %v9324_v50 }
 0x198   :  { %13447 = vst [vmem:[#allocation127_spill] sm:$0xff] %v9300_v24  ;;  %v9302_v62 = vpop.permute.xlu0 %2101  ;;  %v9329_v28 = vsel %vm2015_vm9, %v2077_v49, %v13454_v0  ;;  %v13464_v0 = vrot.slane %v9286_v8, 4  ;;  %v1423_v24 = vsel %vm1388_vm4, %v1420_v42, %v1422_v27  ;;  %v9372_v27 = vpop.f32.mrf.mxu1 }
 0x199   :  { %13448 = vst [vmem:[#allocation128_spill] sm:$0xff] %v9302_v62  ;;  %13455 = vst [vmem:[#allocation131_spill] sm:$0xff] %v9329_v28  ;;  %v13462_v62 = vrot.slane %v9182_v26, 4 }
 0x19a   :  { %2340 = vrot.lane.b32.xlu1 %v8741_v41, %s8083_s20  ;;  %1272 = vrot.lane.b32.xlu0 %v1201_v46, %s8085_s0  ;;  %v13456_v41 = vrot.slane %v9182_v26, 7  ;;  %v13458_v46 = vrot.slane %v9286_v8, 7  ;;  %v9354_v22 = vsel %vm1646_vm8, %v1708_v10, %v13464_v0  ;;  %v1208_v26 = vrot.slane %v8790_v5, 2  ;;  %13469 = vst [vmem:[#allocation140_spill] sm:$0xff] %v9372_v27  ;;  %v9374_v0 = vpop.f32.mrf.mxu0 }
 0x19b   :  { %v9342_v32 = vpop.permute.xlu1 %1879  ;;  %v9349_v49 = vsel %vm1646_vm8, %v13462_v62, %v1708_v10  ;;  %13465 = vst [vmem:[#allocation137_spill] sm:$0xff] %v9354_v22  ;;  %13470 = vst [vmem:[#allocation141_spill] sm:$0xff] %v9374_v0  ;;  %v13474_v27 = vrot.slane %v8802_v15, 3 }
 0x19c   :  { %v9335_v25 = vsel %vm480_vm1, %v13456_v41, %v2298_v60  ;;  %v9340_v37 = vsel %vm480_vm1, %v2298_v60, %v13458_v46  ;;  %13460 = vst [vmem:[#allocation134_spill] sm:$0xff] %v9342_v32  ;;  %v9344_v29 = vpop.permute.xlu0 %1476  ;;  %13463 = vst [vmem:[#allocation136_spill] sm:$0xff] %v9349_v49  ;;  %v13207_v41 = vrot.slane %v8802_v15, 2  ;;  %v13466_v60 = vrot.slane %v8802_v15, 1 }
 0x19d   :  { %13457 = vst [vmem:[#allocation132_spill] sm:$0xff] %v9335_v25  ;;  %13459 = vst [vmem:[#allocation133_spill] sm:$0xff] %v9340_v37 }
 0x19e   :  { %13461 = vst [vmem:[#allocation135_spill] sm:$0xff] %v9344_v29  ;;  %v989_v46 = vsel %vm944_vm5, %v986_v55, %v13466_v60  ;;  %1494 = vrot.lane.b32.xlu0 %v1423_v24, %s8083_s20  ;;  %v1211_v42 = vsel %vm1166_vm6, %v1208_v26, %v13207_v41  ;;  %v13208_v24 = vrot.slane %v8790_v5, 3  ;;  %v9380_v60 = vpop.f32.mrf.mxu1  ;;  %v984_v29 = vrot.slane %v8778_v14, 1 }
 0x19f   :  { %1060 = vrot.lane.b32.xlu1 %v989_v46, %s8084_s21  ;;  %v9364_v62 = vpop.permute.xlu1 %2322  ;;  %13471 = vst [vmem:[#allocation142_spill] sm:$0xff] %v9380_v60  ;;  %v697_v46 = vpop.f32.mrf.mxu0 }
 0x1a0   :  { %13467 = vst [vmem:[#allocation138_spill] sm:$0xff] %v9364_v62  ;;  %v9366_v49 = vpop.permute.xlu0 %2103  ;;  %v1433_v62 = vsel %vm1388_vm4, %v13208_v24, %v13474_v27  ;;  %v1712_v43 = vrot.slane %v697_v46, 4 }
 0x1a1   :  { %13468 = vst [vmem:[#allocation139_spill] sm:$0xff] %v9366_v49  ;;  %v9396_v60 = vpop.f32.mrf.mxu0 }
 0x1a2   :  { %1899 = vrot.lane.b32.xlu0 %v8749_v16, %s8084_s21  ;;  %v829_v16 = vpop.f32.mrf.mxu1  ;;  %13475 = vst [vmem:[#allocation145_spill] sm:$0xff] %v9396_v60 }
 0x1a3   :  { %1282 = vrot.lane.b32.xlu1 %v1211_v42, %s8085_s0  ;;  %v9382_v22 = vpop.permute.xlu1 %1032  ;;  %v13209_v42 = vrot.slane %v8794_v54, 5  ;;  %v13479_v16 = vrot.slane %v8805_v57, 5 }
 0x1a4   :  { %13472 = vst [vmem:[#allocation143_spill] sm:$0xff] %v9382_v22  ;;  %v9384_v10 = vpop.permute.xlu0 %1034  ;;  %v9398_v49 = vpop.f32.mrf.mxu1  ;;  %v1206_v22 = vrot.slane %v8778_v14, 2 }
 0x1a5   :  { %13473 = vst [vmem:[#allocation144_spill] sm:$0xff] %v9384_v10  ;;  %13476 = vst [vmem:[#allocation146_spill] sm:$0xff] %v9398_v49  ;;  %v13480_v10 = vld [vmem:[#allocation44_spill] sm:$0xff]  ;;  %v1859_v49 = vrot.slane %v697_v46, 5 }
 0x1a6   :  { %2121 = vrot.lane.b32.xlu0 %v8752_v13, %s8085_s0  ;;  %v1836_v13 = vsel %vm1793_vm7, %v13209_v42, %v13479_v16  ;;  %v832_v24 = vpop.f32.mrf.mxu1  ;;  %v2302_v16 = vrot.slane %v697_v46, 7 }
 0x1a7   :  { %1504 = vrot.lane.b32.xlu1 %v1433_v62, %s8083_s20  ;;  %v9400_v32 = vpop.permute.xlu1 %1254  ;;  %v9411_v62 = vpop.f32.mrf.mxu0 }
 0x1a8   :  { %13477 = vst [vmem:[#allocation147_spill] sm:$0xff] %v9400_v32  ;;  %v9402_v41 = vpop.permute.xlu0 %1478  ;;  %v2081_v32 = vrot.slane %v697_v46, 6  ;;  %v1861_v27 = vrot.slane %v9411_v62, 5  ;;  %v2083_v24 = vrot.slane %v9411_v62, 6 }
 0x1a9   :  { %13478 = vst [vmem:[#allocation148_spill] sm:$0xff] %v9402_v41  ;;  %v13483_v41 = vrot.slane %v8805_v57, 6 }
 0x1aa   :  { %2342 = vrot.lane.b32.xlu0 %v13480_v10, %s8083_s20 }
 0x1ab   :  { %1909 = vrot.lane.b32.xlu1 %v1836_v13, %s8084_s21  ;;  %v9419_v52 = vpop.permute.xlu1 %1881  ;;  %v987_v13 = vsel %vm944_vm5, %v984_v29, %v986_v55  ;;  %v2058_v63 = vsel %vm2015_vm9, %v13484_v30, %v13483_v41  ;;  %v13487_v29 = vrot.slane %v9286_v8, 6  ;;  %v9447_v30 = vsel %vm1793_vm7, %v1859_v49, %v1861_v27 }
 0x1ac   :  { %13481 = vst [vmem:[#allocation44_spill] sm:$0xff] %v9419_v52  ;;  %v9421_v37 = vpop.permute.xlu0 %2105  ;;  %v13485_v52 = vrot.slane %v9286_v8, 5  ;;  %13489 = vst [vmem:[#allocation152_spill] sm:$0xff] %v9447_v30  ;;  %v1428_v41 = vrot.slane %v8778_v14, 3  ;;  %v1209_v14 = vsel %vm1166_vm6, %v1206_v22, %v1208_v26 }
 0x1ad   :  { %13482 = vst [vmem:[#allocation149_spill] sm:$0xff] %v9421_v37  ;;  %v1714_v37 = vrot.slane %v9411_v62, 4  ;;  %v9444_v10 = vsel %vm2015_vm9, %v13487_v29, %v2081_v32  ;;  %v13495_v29 = vrot.slane %v9411_v62, 7 }
 0x1ae   :  { %1058 = vrot.lane.b32.xlu0 %v987_v13, %s8084_s21  ;;  %v9438_v42 = vsel %vm1793_vm7, %v13485_v52, %v1859_v49  ;;  %13488 = vst [vmem:[#allocation151_spill] sm:$0xff] %v9444_v10  ;;  %v9455_v13 = vsel %vm2015_vm9, %v2081_v32, %v2083_v24  ;;  %v13493_v52 = vrot.slane %v9286_v8, 7  ;;  %v13497_v49 = vld [vmem:[#allocation51_spill] sm:$0xff] }
 0x1af   :  { %2131 = vrot.lane.b32.xlu1 %v2058_v63, %s8085_s0  ;;  %13486 = vst [vmem:[#allocation150_spill] sm:$0xff] %v9438_v42  ;;  %13492 = vst [vmem:[#allocation155_spill] sm:$0xff] %v9455_v13  ;;  %v9465_v10 = vsel %vm480_vm1, %v2302_v16, %v13495_v29  ;;  %v9474_v13 = vpop.f32.mrf.mxu0  ;;  %v13514_v42 = vrot.slane %v8802_v15, 2 }
 0x1b0   :  { %v9450_v63 = vpop.permute.xlu1 %2324  ;;  %v9452_v46 = vpop.permute.xlu0 %1036  ;;  %v9460_v55 = vsel %vm480_vm1, %v13493_v52, %v2302_v16  ;;  %13496 = vst [vmem:[#allocation157_spill] sm:$0xff] %v9465_v10  ;;  %13500 = vst [vmem:[#allocation158_spill] sm:$0xff] %v9474_v13  ;;  %v13501_v52 = vrot.slane %v9286_v8, 4  ;;  %v9484_v16 = vsel %vm1646_vm8, %v1712_v43, %v1714_v37  ;;  %v1212_v8 = vrot.slane %v13497_v49, 2 }
 0x1b1   :  { %13490 = vst [vmem:[#allocation153_spill] sm:$0xff] %v9450_v63  ;;  %13491 = vst [vmem:[#allocation154_spill] sm:$0xff] %v9452_v46  ;;  %v13498_v63 = vrot.slane %v8805_v57, 7  ;;  %v13499_v46 = vrot.slane %v8794_v54, 7  ;;  %v9486_v22 = vpop.f32.mrf.mxu0 }
 0x1b2   :  { %13494 = vst [vmem:[#allocation156_spill] sm:$0xff] %v9460_v55  ;;  %v9479_v55 = vsel %vm1646_vm8, %v13501_v52, %v1712_v43  ;;  %1280 = vrot.lane.b32.xlu0 %v1209_v14, %s8085_s0  ;;  %13503 = vst [vmem:[#allocation160_spill] sm:$0xff] %v9484_v16  ;;  %v13508_v52 = vrot.slane %v8790_v5, 3  ;;  %v13509_v14 = vrot.slane %v13497_v49, 1  ;;  %v1213_v28 = vsel %vm1166_vm6, %v13514_v42, %v1212_v8 }
 0x1b3   :  { %v2279_v32 = vsel %vm480_vm1, %v13499_v46, %v13498_v63  ;;  %13502 = vst [vmem:[#allocation159_spill] sm:$0xff] %v9479_v55  ;;  %13504 = vst [vmem:[#allocation161_spill] sm:$0xff] %v9486_v22  ;;  %v13507_v63 = vld [vmem:[#allocation47_spill] sm:$0xff]  ;;  %v711_v16 = vpop.f32.mrf.mxu0  ;;  %v13212_v50 = vrot.slane %v9486_v22, 4 }
 0x1b4   :  { %2352 = vrot.lane.b32.xlu1 %v2279_v32, %s8083_s20  ;;  %v9488_v26 = vpop.permute.xlu1 %1256  ;;  %v9490_v29 = vpop.permute.xlu0 %1480  ;;  %v1831_v46 = vrot.slane %v13507_v63, 5  ;;  %v1431_v30 = vsel %vm1388_vm4, %v1428_v41, %v13508_v52  ;;  %v13510_v32 = vrot.slane %v8802_v15, 1  ;;  %v2053_v55 = vrot.slane %v13507_v63, 6 }
 0x1b5   :  { %13505 = vst [vmem:[#allocation162_spill] sm:$0xff] %v9488_v26  ;;  %13506 = vst [vmem:[#allocation163_spill] sm:$0xff] %v9490_v29  ;;  %v1863_v29 = vrot.slane %v9486_v22, 5  ;;  %v2085_v26 = vrot.slane %v9486_v22, 6  ;;  %v712_v5 = vpop.f32.mrf.mxu0  ;;  %v2306_v52 = vrot.slane %v9486_v22, 7 }
 0x1b6   :  { %v991_v43 = vsel %vm944_vm5, %v13510_v32, %v13509_v14  ;;  %1502 = vrot.lane.b32.xlu0 %v1431_v30, %s8083_s20  ;;  %v1865_v25 = vrot.slane %v712_v5, 5  ;;  %v2087_v14 = vrot.slane %v712_v5, 6  ;;  %v2308_v16 = vrot.slane %v712_v5, 7 }
 0x1b7   :  { %v1434_v30 = vrot.slane %v13497_v49, 3  ;;  %v13513_v32 = vrot.slane %v8794_v54, 5  ;;  %v9524_v5 = vsel %vm1793_vm7, %v1861_v27, %v1863_v29  ;;  %v9527_v18 = vsel %vm2015_vm9, %v2083_v24, %v2085_v26 }
 0x1b8   :  { %1062 = vrot.lane.b32.xlu1 %v991_v43, %s8084_s21  ;;  %v9507_v10 = vpop.permute.xlu1 %1883  ;;  %v9509_v41 = vpop.permute.xlu0 %2107  ;;  %v9534_v42 = vsel %vm1793_vm7, %v1863_v29, %v1865_v25  ;;  %v13515_v27 = vrot.slane %v9411_v62, 7  ;;  %v1837_v24 = vrot.slane %v8821_v12, 5  ;;  %v13517_v25 = vrot.slane %v8802_v15, 3 }
 0x1b9   :  { %13511 = vst [vmem:[#allocation47_spill] sm:$0xff] %v9507_v10  ;;  %13512 = vst [vmem:[#allocation164_spill] sm:$0xff] %v9509_v41  ;;  %v1834_v43 = vsel %vm1793_vm7, %v1831_v46, %v13513_v32  ;;  %v714_v10 = vpop.f32.mrf.mxu0  ;;  %v2274_v41 = vrot.slane %v13507_v63, 7  ;;  %v13516_v63 = vrot.slane %v8794_v54, 6  ;;  %v13527_v15 = vrot.slane %v8805_v57, 7 }
 0x1ba   :  { %1907 = vrot.lane.b32.xlu0 %v1834_v43, %s8084_s21  ;;  %v9537_v10 = vsel %vm2015_vm9, %v2085_v26, %v2087_v14  ;;  %v1435_v29 = vsel %vm1388_vm4, %v13517_v25, %v1434_v30  ;;  %v9557_v26 = vsel %vm1646_vm8, %v1714_v37, %v13212_v50  ;;  %v13519_v14 = vld [vmem:[#allocation53_spill] sm:$0xff]  ;;  %v13522_v50 = vrot.slane %v8821_v12, 6 }
 0x1bb   :  { %v715_v53 = vpop.f32.mrf.mxu0  ;;  %v2056_v43 = vsel %vm2015_vm9, %v2053_v55, %v13516_v63  ;;  %13518 = vst [vmem:[#allocation165_spill] sm:$0xff] %v9557_v26  ;;  %v13520_v55 = vrot.slane %v8794_v54, 7  ;;  %v13521_v63 = vrot.slane %v8805_v57, 5  ;;  %v13523_v54 = vrot.slane %v8805_v57, 6 }
 0x1bc   :  { %1284 = vrot.lane.b32.xlu1 %v1213_v28, %s8085_s0  ;;  %v9529_v46 = vpop.permute.xlu1 %2326  ;;  %v9531_v32 = vpop.permute.xlu0 %1038  ;;  %v9540_v28 = vsel %vm480_vm1, %v2306_v52, %v2308_v16  ;;  %v9545_v53 = vsel %vm480_vm1, %v13515_v27, %v2306_v52  ;;  %v992_v16 = vrot.slane %v13519_v14, 1  ;;  %v1436_v22 = vrot.slane %v13519_v14, 3 }
 0x1bd   :  { %v2277_v27 = vsel %vm480_vm1, %v2274_v41, %v13520_v55  ;;  %v1838_v25 = vsel %vm1793_vm7, %v13521_v63, %v1837_v24  ;;  %v2060_v41 = vsel %vm2015_vm9, %v13523_v54, %v13522_v50  ;;  %v13524_v55 = vrot.slane %v13497_v49, 1 }
 0x1be   :  { %2129 = vrot.lane.b32.xlu0 %v2056_v43, %s8085_s0  ;;  %v13526_v26 = vrot.slane %v8821_v12, 7 }
 0x1bf   :  { %v993_v63 = vsel %vm944_vm5, %v13524_v55, %v992_v16 }
 0x1c0   :  { %1506 = vrot.lane.b32.xlu1 %v1435_v29, %s8083_s20  ;;  %v9561_v62 = vpop.permute.xlu1 %1258  ;;  %v9563_v52 = vpop.permute.xlu0 %1482  ;;  %v1214_v29 = vrot.slane %v13519_v14, 2  ;;  %v2281_v50 = vsel %vm480_vm1, %v13527_v15, %v13526_v26  ;;  %v13528_v14 = vrot.slane %v8835_v39, 5 }
 0x1c2   :  { %2350 = vrot.lane.b32.xlu0 %v2277_v27, %s8083_s20  ;;  %v1215_v54 = vsel %vm1166_vm6, %v1212_v8, %v1214_v29  ;;  %v1840_v12 = vsel %vm1793_vm7, %v1837_v24, %v13528_v14  ;;  %v13529_v8 = vld [vmem:[#allocation55_spill] sm:$0xff] }
 0x1c3   :  { %v994_v26 = vrot.slane %v13529_v8, 1  ;;  %v1438_v14 = vrot.slane %v13529_v8, 3 }
 0x1c4   :  { %1911 = vrot.lane.b32.xlu1 %v1838_v25, %s8084_s21  ;;  %v9574_v37 = vpop.permute.xlu1 %1885  ;;  %v9576_v43 = vpop.permute.xlu0 %2109 }
 0x1c6   :  { %1064 = vrot.lane.b32.xlu0 %v993_v63, %s8084_s21  ;;  %v1437_v63 = vsel %vm1388_vm4, %v1434_v30, %v1436_v22  ;;  %v13530_v30 = vld [vmem:[#allocation56_spill] sm:$0xff] }
 0x1c8   :  { %2133 = vrot.lane.b32.xlu1 %v2060_v41, %s8085_s0  ;;  %v9589_v27 = vpop.permute.xlu1 %2328  ;;  %v9591_v25 = vpop.permute.xlu0 %1040 }
 0x1c9   :  { %13525 = vst [vmem:[#allocation166_spill] sm:$0xff] %v9589_v27 }
 0x1ca   :  { %1286 = vrot.lane.b32.xlu0 %v1215_v54, %s8085_s0 }
 0x1cc   :  { %2354 = vrot.lane.b32.xlu1 %v2281_v50, %s8083_s20  ;;  %v9602_v41 = vpop.permute.xlu1 %1260  ;;  %v9604_v55 = vpop.permute.xlu0 %1484  ;;  %v1216_v50 = vrot.slane %v13529_v8, 2 }
 0x1ce   :  { %1913 = vrot.lane.b32.xlu0 %v1840_v12, %s8084_s21  ;;  %v1217_v54 = vsel %vm1166_vm6, %v1214_v29, %v1216_v50 }
 0x1d0   :  { %1508 = vrot.lane.b32.xlu1 %v1437_v63, %s8083_s20  ;;  %v9612_v57 = vpop.permute.xlu1 %1887  ;;  %v9614_v15 = vpop.permute.xlu0 %2111  ;;  %v995_v63 = vsel %vm944_vm5, %v992_v16, %v994_v26  ;;  %v996_v16 = vrot.slane %v8935_v1, 1 }
 0x1d2   :  { %2135 = vrot.lane.b32.xlu0 %v13530_v30, %s8085_s0  ;;  %v1439_v30 = vsel %vm1388_vm4, %v1436_v22, %v1438_v14  ;;  %v997_v49 = vsel %vm944_vm5, %v994_v26, %v996_v16 }
 0x1d4   :  { %2356 = vrot.lane.b32.xlu1 %v8870_v7, %s8083_s20  ;;  %v9622_v39 = vpop.permute.xlu1 %2330  ;;  %v9624_v24 = vpop.permute.xlu0 %2332 }
 0x1d5   :  { %13531 = vst [vmem:[#allocation56_spill] sm:$0xff] %v9622_v39  ;;  %13532 = vst [vmem:[#allocation167_spill] sm:$0xff] %v9624_v24  ;;  %v1220_v39 = vrot.slane %v8944_v48, 2 }
 0x1d6   :  { %1288 = vrot.lane.b32.xlu0 %v1217_v54, %s8085_s0  ;;  %v13534_v54 = vld [vmem:[#allocation57_spill] sm:$0xff] }
 0x1d8   :  { %1066 = vrot.lane.b32.xlu1 %v995_v63, %s8084_s21  ;;  %v9631_v12 = vpop.permute.xlu1 %1262  ;;  %v9633_v7 = vpop.permute.xlu0 %1042 }
 0x1da   :  { %1510 = vrot.lane.b32.xlu0 %v1439_v30, %s8083_s20  ;;  %v1218_v30 = vrot.slane %v8935_v1, 2 }
 0x1dc   :  { %1915 = vrot.lane.b32.xlu1 %v8882_v61, %s8084_s21  ;;  %v9639_v8 = vpop.permute.xlu1 %1889  ;;  %v9641_v29 = vpop.permute.xlu0 %1486  ;;  %v998_v61 = vrot.slane %v8944_v48, 1  ;;  %v1219_v27 = vsel %vm1166_vm6, %v1216_v50, %v1218_v30 }
 0x1dd   :  { %13533 = vst [vmem:[#allocation168_spill] sm:$0xff] %v9641_v29 }
 0x1de   :  { %2137 = vrot.lane.b32.xlu0 %v13534_v54, %s8085_s0  ;;  %v999_v29 = vsel %vm944_vm5, %v996_v16, %v998_v61 }
 0x1e0   :  { %2358 = vrot.lane.b32.xlu1 %v8892_v17, %s8083_s20  ;;  %v9648_v63 = vpop.permute.xlu1 %1264  ;;  %v9650_v22 = vpop.permute.xlu0 %1044  ;;  %v1440_v17 = vrot.slane %v8935_v1, 3  ;;  %v1221_v1 = vsel %vm1166_vm6, %v1218_v30, %v1220_v39  ;;  %v1444_v30 = vrot.slane %v9022_v51, 3 }
 0x1e2   :  { %2139 = vrot.lane.b32.xlu0 %v8975_v56, %s8085_s0  ;;  %v1442_v56 = vrot.slane %v8944_v48, 3  ;;  %v1002_v48 = vrot.slane %v9036_v20, 1 }
 0x1e4   :  { %1068 = vrot.lane.b32.xlu1 %v997_v49, %s8084_s21  ;;  %v9658_v24 = vpop.permute.xlu1 %1891  ;;  %v9660_v54 = vpop.permute.xlu0 %1488 }
 0x1e5   :  { %13535 = vst [vmem:[#allocation57_spill] sm:$0xff] %v9658_v24  ;;  %v1441_v24 = vsel %vm1388_vm4, %v1438_v14, %v1440_v17 }
 0x1e6   :  { %1070 = vrot.lane.b32.xlu0 %v999_v29, %s8084_s21 }
 0x1e8   :  { %1290 = vrot.lane.b32.xlu1 %v1219_v27, %s8085_s0  ;;  %v9668_v49 = vpop.permute.xlu1 %2113  ;;  %v9670_v26 = vpop.permute.xlu0 %1893  ;;  %v1443_v27 = vsel %vm1388_vm4, %v1440_v17, %v1442_v56 }
 0x1ea   :  { %1292 = vrot.lane.b32.xlu0 %v1221_v1, %s8085_s0 }
 0x1ec   :  { %1512 = vrot.lane.b32.xlu1 %v1441_v24, %s8083_s20  ;;  %v9677_v50 = vpop.permute.xlu1 %2334  ;;  %v9679_v16 = vpop.permute.xlu0 %2115 }
 0x1ed   :  { %13536 = vst [vmem:[#allocation169_spill] sm:$0xff] %v9679_v16 }
 0x1ee   :  { %1514 = vrot.lane.b32.xlu0 %v1443_v27, %s8083_s20 }
 0x1f0   :  { %1917 = vrot.lane.b32.xlu1 %v8986_v35, %s8084_s21  ;;  %v9685_v29 = vpop.permute.xlu1 %1266  ;;  %v9687_v14 = vpop.permute.xlu0 %2336  ;;  %v1445_v35 = vsel %vm1388_vm4, %v1442_v56, %v1444_v30 }
 0x1f1   :  { %13537 = vst [vmem:[#allocation170_spill] sm:$0xff] %v9687_v14 }
 0x1f2   :  { %2141 = vrot.lane.b32.xlu0 %v8994_v21, %s8085_s0 }
 0x1f4   :  { %2360 = vrot.lane.b32.xlu1 %v8991_v23, %s8083_s20  ;;  %v9694_v1 = vpop.permute.xlu1 %1268  ;;  %v9696_v24 = vpop.permute.xlu0 %1046  ;;  %v1000_v23 = vrot.slane %v9022_v51, 1 }
 0x1f6   :  { %1516 = vrot.lane.b32.xlu0 %v1445_v35, %s8083_s20  ;;  %v1446_v35 = vrot.slane %v9036_v20, 3  ;;  %v1001_v14 = vsel %vm944_vm5, %v998_v61, %v1000_v23 }
 0x1f8   :  { %1919 = vrot.lane.b32.xlu1 %v8999_v36, %s8084_s21  ;;  %v9702_v17 = vpop.permute.xlu0 %1490  ;;  %v9704_v27 = vpop.permute.xlu1 %1895  ;;  %v1222_v36 = vrot.slane %v9022_v51, 2 }
 0x1f9   :  { %13538 = vst [vmem:[#allocation171_spill] sm:$0xff] %v9704_v27  ;;  %v1003_v27 = vsel %vm944_vm5, %v1000_v23, %v1002_v48  ;;  %v1448_v23 = vrot.slane %v9154_v40, 3 }
 0x1fa   :  { %2143 = vrot.lane.b32.xlu0 %v9078_v47, %s8085_s0  ;;  %v1223_v47 = vsel %vm1166_vm6, %v1220_v39, %v1222_v36 }
 0x1fc   :  { %2362 = vrot.lane.b32.xlu1 %v9008_v34, %s8083_s20  ;;  %v9712_v21 = vpop.permute.xlu0 %2338  ;;  %v9714_v56 = vpop.permute.xlu1 %2117 }
 0x1fd   :  { %13539 = vst [vmem:[#allocation172_spill] sm:$0xff] %v9712_v21  ;;  %v1447_v21 = vsel %vm1388_vm4, %v1444_v30, %v1446_v35  ;;  %v1224_v30 = vrot.slane %v9036_v20, 2 }
 0x1fe   :  { %1074 = vrot.lane.b32.xlu0 %v1003_v27, %s8084_s21 }
 0x200   :  { %1072 = vrot.lane.b32.xlu1 %v1001_v14, %s8084_s21  ;;  %v9722_v34 = vpop.permute.xlu1 %1270  ;;  %v9724_v16 = vpop.permute.xlu0 %1048  ;;  %v1004_v14 = vrot.slane %v9154_v40, 1 }
 0x202   :  { %1518 = vrot.lane.b32.xlu0 %v1447_v21, %s8083_s20  ;;  %v1005_v21 = vsel %vm944_vm5, %v1002_v48, %v1004_v14 }
 0x204   :  { %1294 = vrot.lane.b32.xlu1 %v1223_v47, %s8085_s0  ;;  %v9730_v51 = vpop.permute.xlu1 %1492  ;;  %v9732_v61 = vpop.permute.xlu0 %1897 }
 0x206   :  { %2145 = vrot.lane.b32.xlu0 %v9098_v3, %s8085_s0  ;;  %v1225_v3 = vsel %vm1166_vm6, %v1222_v36, %v1224_v30 }
 0x208   :  { %1921 = vrot.lane.b32.xlu1 %v9090_v33, %s8084_s21  ;;  %v9739_v27 = vpop.permute.xlu1 %2119  ;;  %v9741_v39 = vpop.permute.xlu0 %1050 }
 0x209   :  { %13540 = vst [vmem:[#allocation173_spill] sm:$0xff] %v9739_v27  ;;  %v1449_v27 = vsel %vm1388_vm4, %v1446_v35, %v1448_v23  ;;  %v1226_v35 = vrot.slane %v9154_v40, 2 }
 0x20a   :  { %1076 = vrot.lane.b32.xlu0 %v1005_v21, %s8084_s21 }
 0x20c   :  { %2364 = vrot.lane.b32.xlu1 %v9103_v2, %s8083_s20  ;;  %v9749_v47 = vpop.permute.xlu1 %2340  ;;  %v9751_v33 = vpop.permute.xlu0 %1272  ;;  %v1006_v2 = vrot.slane %v9167_v4, 1 }
 0x20d   :  { %13541 = vst [vmem:[#allocation174_spill] sm:$0xff] %v9749_v47 }
 0x20e   :  { %1520 = vrot.lane.b32.xlu0 %v1449_v27, %s8083_s20  ;;  %v1450_v27 = vrot.slane %v9167_v4, 3 }
 0x210   :  { %1296 = vrot.lane.b32.xlu1 %v1225_v3, %s8085_s0  ;;  %v9757_v20 = vpop.permute.xlu0 %1494  ;;  %v1007_v3 = vsel %vm944_vm5, %v1004_v14, %v1006_v2 }
 0x211   :  { %v9759_v48 = vpop.permute.xlu1 %1060 }
 0x212   :  { %13542 = vst [vmem:[#allocation175_spill] sm:$0xff] %v9759_v48  ;;  %2147 = vrot.lane.b32.xlu0 %v9207_v31, %s8085_s0  ;;  %v1227_v31 = vsel %vm1166_vm6, %v1224_v30, %v1226_v35 }
 0x214   :  { %1923 = vrot.lane.b32.xlu1 %v9108_v58, %s8084_s21  ;;  %v9766_v21 = vpop.permute.xlu0 %1899 }
 0x215   :  { %13543 = vst [vmem:[#allocation176_spill] sm:$0xff] %v9766_v21  ;;  %v9768_v36 = vpop.permute.xlu1 %1282  ;;  %v1451_v21 = vsel %vm1388_vm4, %v1448_v23, %v1450_v27 }
 0x216   :  { %13544 = vst [vmem:[#allocation177_spill] sm:$0xff] %v9768_v36  ;;  %1078 = vrot.lane.b32.xlu0 %v1007_v3, %s8084_s21  ;;  %v1008_v3 = vrot.slane %v9271_v19, 1 }
 0x218   :  { %2366 = vrot.lane.b32.xlu1 %v9113_v38, %s8083_s20  ;;  %v9776_v47 = vpop.permute.xlu0 %2121  ;;  %v1228_v38 = vrot.slane %v9167_v4, 2 }
 0x219   :  { %13545 = vst [vmem:[#allocation178_spill] sm:$0xff] %v9776_v47  ;;  %v9778_v58 = vpop.permute.xlu1 %1504 }
 0x21a   :  { %13546 = vst [vmem:[#allocation179_spill] sm:$0xff] %v9778_v58  ;;  %1522 = vrot.lane.b32.xlu0 %v1451_v21, %s8083_s20  ;;  %v1452_v21 = vrot.slane %v9271_v19, 3  ;;  %v1236_v58 = vrot.slane %v9396_v60, 2 }
 0x21c   :  { %1298 = vrot.lane.b32.xlu1 %v1227_v31, %s8085_s0  ;;  %v9784_v40 = vpop.permute.xlu0 %2342  ;;  %v1229_v31 = vsel %vm1166_vm6, %v1226_v35, %v1228_v38 }
 0x21d   :  { %13547 = vst [vmem:[#allocation180_spill] sm:$0xff] %v9784_v40  ;;  %v9786_v14 = vpop.permute.xlu1 %1909  ;;  %v1010_v40 = vrot.slane %v9281_v44, 1 }
 0x21e   :  { %13548 = vst [vmem:[#allocation181_spill] sm:$0xff] %v9786_v14  ;;  %2149 = vrot.lane.b32.xlu0 %v9223_v11, %s8085_s0  ;;  %v1009_v14 = vsel %vm944_vm5, %v1006_v2, %v1008_v3  ;;  %v1230_v11 = vrot.slane %v9271_v19, 2 }
 0x220   :  { %1925 = vrot.lane.b32.xlu1 %v9214_v6, %s8084_s21  ;;  %v9794_v30 = vpop.permute.xlu0 %1058 }
 0x221   :  { %v9796_v23 = vpop.permute.xlu1 %2131 }
 0x222   :  { %13549 = vst [vmem:[#allocation182_spill] sm:$0xff] %v9796_v23  ;;  %1080 = vrot.lane.b32.xlu0 %v1009_v14, %s8084_s21  ;;  %v1453_v23 = vsel %vm1388_vm4, %v1450_v27, %v1452_v21  ;;  %v1454_v14 = vrot.slane %v9281_v44, 3 }
 0x224   :  { %1300 = vrot.lane.b32.xlu1 %v1229_v31, %s8085_s0  ;;  %v9803_v4 = vpop.permute.xlu0 %1280  ;;  %v1231_v31 = vsel %vm1166_vm6, %v1228_v38, %v1230_v11  ;;  %v1455_v47 = vsel %vm1388_vm4, %v1452_v21, %v1454_v14  ;;  %v9842_v21 = vpop.f32.mrf.mxu1 }
 0x225   :  { %13557 = vst [vmem:[#allocation190_spill] sm:$0xff] %v9842_v21  ;;  %v1016_v21 = vrot.slane %v9474_v13, 1 }
 0x226   :  { %v9805_v6 = vpop.permute.xlu1 %2352  ;;  %1524 = vrot.lane.b32.xlu0 %v1453_v23, %s8083_s20  ;;  %v1012_v23 = vrot.slane %v9374_v0, 1 }
 0x227   :  { %13550 = vst [vmem:[#allocation183_spill] sm:$0xff] %v9805_v6  ;;  %v1011_v6 = vsel %vm944_vm5, %v1008_v3, %v1010_v40 }
 0x228   :  { %1927 = vrot.lane.b32.xlu1 %v9228_v9, %s8084_s21  ;;  %v9813_v2 = vpop.permute.xlu0 %1502  ;;  %v1232_v9 = vrot.slane %v9281_v44, 2  ;;  %v1013_v44 = vsel %vm944_vm5, %v1010_v40, %v1012_v23  ;;  %v9854_v40 = vpop.f32.mrf.mxu1 }
 0x229   :  { %13551 = vst [vmem:[#allocation184_spill] sm:$0xff] %v9813_v2  ;;  %13560 = vst [vmem:[#allocation193_spill] sm:$0xff] %v9854_v40  ;;  %v13629_v2 = vld [vmem:[#allocation19_spill] sm:$0xff] }
 0x22a   :  { %v9815_v35 = vpop.permute.xlu1 %1062  ;;  %1082 = vrot.lane.b32.xlu0 %v1011_v6, %s8084_s21  ;;  %v1234_v6 = vrot.slane %v9374_v0, 2 }
 0x22b   :  { %13552 = vst [vmem:[#allocation185_spill] sm:$0xff] %v9815_v35  ;;  %v13634_v35 = vld [vmem:[#allocation127_spill] sm:$0xff] }
 0x22c   :  { %1302 = vrot.lane.b32.xlu1 %v1231_v31, %s8085_s0  ;;  %v9822_v27 = vpop.permute.xlu0 %1907  ;;  %v1456_v31 = vrot.slane %v9374_v0, 3  ;;  %v1235_v0 = vsel %vm1166_vm6, %v1232_v9, %v1234_v6 }
 0x22d   :  { %13553 = vst [vmem:[#allocation186_spill] sm:$0xff] %v9822_v27  ;;  %v1233_v27 = vsel %vm1166_vm6, %v1230_v11, %v1232_v9  ;;  %v1238_v9 = vrot.slane %v9474_v13, 2 }
 0x22e   :  { %v9824_v19 = vpop.permute.xlu1 %1284  ;;  %1526 = vrot.lane.b32.xlu0 %v1455_v47, %s8083_s20  ;;  %v1457_v11 = vsel %vm1388_vm4, %v1454_v14, %v1456_v31 }
 0x22f   :  { %13554 = vst [vmem:[#allocation187_spill] sm:$0xff] %v9824_v19  ;;  %v13626_v19 = vld [vmem:[#allocation101_spill] sm:$0xff] }
 0x230   :  { %1929 = vrot.lane.b32.xlu1 %v9308_v45, %s8084_s21  ;;  %v9832_v38 = vpop.permute.xlu0 %2129 }
 0x231   :  { %13555 = vst [vmem:[#allocation188_spill] sm:$0xff] %v9832_v38  ;;  %v1014_v38 = vrot.slane %v9396_v60, 1 }
 0x232   :  { %v9834_v3 = vpop.permute.xlu1 %1506  ;;  %1084 = vrot.lane.b32.xlu0 %v1013_v44, %s8084_s21 }
 0x233   :  { %13556 = vst [vmem:[#allocation189_spill] sm:$0xff] %v9834_v3  ;;  %v9863_v3 = vpop.f32.mrf.mxu1 }
 0x234   :  { %1304 = vrot.lane.b32.xlu1 %v1233_v27, %s8085_s0  ;;  %v9844_v45 = vpop.permute.xlu0 %2350  ;;  %13563 = vst [vmem:[#allocation196_spill] sm:$0xff] %v9863_v3  ;;  %v1239_v3 = vsel %vm1166_vm6, %v1236_v58, %v1238_v9 }
 0x235   :  { %13558 = vst [vmem:[#allocation191_spill] sm:$0xff] %v9844_v45  ;;  %v1237_v45 = vsel %vm1166_vm6, %v1234_v6, %v1236_v58  ;;  %v9873_v40 = vpop.f32.mrf.mxu1 }
 0x236   :  { %v9846_v47 = vpop.permute.xlu1 %1911  ;;  %1528 = vrot.lane.b32.xlu0 %v1457_v11, %s8083_s20  ;;  %v1017_v11 = vsel %vm944_vm5, %v1014_v38, %v1016_v21  ;;  %13566 = vst [vmem:[#allocation199_spill] sm:$0xff] %v9873_v40 }
 0x237   :  { %13559 = vst [vmem:[#allocation192_spill] sm:$0xff] %v9846_v47  ;;  %v1015_v47 = vsel %vm944_vm5, %v1012_v23, %v1014_v38  ;;  %v9878_v23 = vpop.f32.mrf.mxu1 }
 0x238   :  { %1306 = vrot.lane.b32.xlu1 %v1235_v0, %s8085_s0  ;;  %v9858_v27 = vpop.permute.xlu0 %1064  ;;  %13567 = vst [vmem:[#allocation200_spill] sm:$0xff] %v9878_v23 }
 0x239   :  { %13562 = vst [vmem:[#allocation195_spill] sm:$0xff] %v9858_v27  ;;  %v9888_v38 = vpop.f32.mrf.mxu1 }
 0x23a   :  { %v9856_v44 = vpop.permute.xlu1 %2133  ;;  %1086 = vrot.lane.b32.xlu0 %v1015_v47, %s8084_s21  ;;  %v1458_v47 = vrot.slane %v9396_v60, 3  ;;  %13570 = vst [vmem:[#allocation203_spill] sm:$0xff] %v9888_v38  ;;  %v13578_v38 = vld [vmem:[#allocation114_spill] sm:$0xff] }
 0x23b   :  { %13561 = vst [vmem:[#allocation194_spill] sm:$0xff] %v9856_v44  ;;  %v9895_v23 = vpop.f32.mrf.mxu1 }
 0x23c   :  { %1308 = vrot.lane.b32.xlu1 %v1237_v45, %s8085_s0  ;;  %v9869_v14 = vpop.permute.xlu0 %1286  ;;  %13573 = vst [vmem:[#allocation206_spill] sm:$0xff] %v9895_v23 }
 0x23d   :  { %13565 = vst [vmem:[#allocation198_spill] sm:$0xff] %v9869_v14  ;;  %v9905_v60 = vpop.f32.mrf.mxu1 }
 0x23e   :  { %v9867_v0 = vpop.permute.xlu1 %2354  ;;  %1088 = vrot.lane.b32.xlu0 %v1017_v11, %s8084_s21  ;;  %v1459_v11 = vsel %vm1388_vm4, %v1456_v31, %v1458_v47  ;;  %13577 = vst [vmem:[#allocation208_spill] sm:$0xff] %v9905_v60  ;;  %v13579_v31 = vld [vmem:[#allocation130_spill] sm:$0xff] }
 0x23f   :  { %13564 = vst [vmem:[#allocation197_spill] sm:$0xff] %v9867_v0  ;;  %v13574_v0 = vld [vmem:[#allocation129_spill] sm:$0xff]  ;;  %v9911_v23 = vpop.f32.mrf.mxu1 }
 0x240   :  { %2368 = vrot.lane.b32.xlu1 %v9233_v59, %s8083_s20  ;;  %v9882_v45 = vpop.permute.xlu0 %1913  ;;  %13580 = vst [vmem:[#allocation114_spill] sm:$0xff] %v9911_v23  ;;  %v13588_v23 = vld [vmem:[#allocation150_spill] sm:$0xff] }
 0x241   :  { %13569 = vst [vmem:[#allocation202_spill] sm:$0xff] %v9882_v45  ;;  %v13602_v45 = vld [vmem:[#allocation69_spill] sm:$0xff] }
 0x242   :  { %v9880_v6 = vpop.permute.xlu1 %1508  ;;  %1090 = vrot.lane.b32.xlu0 %v1016_v21, %s8084_s21  ;;  %v1460_v21 = vrot.slane %v9474_v13, 3  ;;  %v9920_v13 = vpop.f32.mrf.mxu1 }
 0x243   :  { %13568 = vst [vmem:[#allocation201_spill] sm:$0xff] %v9880_v6  ;;  %13583 = vst [vmem:[#allocation210_spill] sm:$0xff] %v9920_v13 }
 0x244   :  { %1310 = vrot.lane.b32.xlu1 %v1239_v3, %s8085_s0  ;;  %v9892_v59 = vpop.permute.xlu0 %2135 }
 0x245   :  { %13572 = vst [vmem:[#allocation205_spill] sm:$0xff] %v9892_v59  ;;  %v9926_v59 = vpop.f32.mrf.mxu1 }
 0x246   :  { %v9890_v40 = vpop.permute.xlu1 %2356  ;;  %1530 = vrot.lane.b32.xlu0 %v1459_v11, %s8083_s20  ;;  %v1461_v11 = vsel %vm1388_vm4, %v1458_v47, %v1460_v21  ;;  %13586 = vst [vmem:[#allocation213_spill] sm:$0xff] %v9926_v59 }
 0x247   :  { %13571 = vst [vmem:[#allocation204_spill] sm:$0xff] %v9890_v40 }
 0x248   :  { %1931 = vrot.lane.b32.xlu1 %v13574_v0, %s8084_s21  ;;  %v9900_v58 = vpop.permute.xlu0 %1288 }
 0x249   :  { %13575 = vst [vmem:[#allocation129_spill] sm:$0xff] %v9900_v58  ;;  %v13607_v58 = vld [vmem:[#allocation61_spill] sm:$0xff] }
 0x24a   :  { %v9902_v3 = vpop.permute.xlu1 %1066  ;;  %2151 = vrot.lane.b32.xlu0 %v13579_v31, %s8085_s0  ;;  %v13587_v31 = vld [vmem:[#allocation131_spill] sm:$0xff] }
 0x24b   :  { %13576 = vst [vmem:[#allocation207_spill] sm:$0xff] %v9902_v3  ;;  %v13617_v3 = vld [vmem:[#allocation93_spill] sm:$0xff] }
 0x24c   :  { %2370 = vrot.lane.b32.xlu1 %v13578_v38, %s8083_s20  ;;  %v9913_v40 = vpop.permute.xlu0 %1510 }
 0x24d   :  { %13581 = vst [vmem:[#allocation130_spill] sm:$0xff] %v9913_v40 }
 0x24e   :  { %v9915_v0 = vpop.permute.xlu1 %1915  ;;  %1312 = vrot.lane.b32.xlu0 %v1238_v9, %s8085_s0  ;;  %v13592_v9 = vld [vmem:[#allocation132_spill] sm:$0xff] }
 0x24f   :  { %13582 = vst [vmem:[#allocation209_spill] sm:$0xff] %v9915_v0 }
 0x250   :  { %1532 = vrot.lane.b32.xlu1 %v1461_v11, %s8083_s20  ;;  %v9922_v60 = vpop.permute.xlu0 %2137  ;;  %v9936_v11 = vpop.f32.mrf.mxu1 }
 0x251   :  { %13584 = vst [vmem:[#allocation211_spill] sm:$0xff] %v9922_v60  ;;  %13591 = vst [vmem:[#allocation214_spill] sm:$0xff] %v9936_v11  ;;  %v13598_v60 = vld [vmem:[#allocation77_spill] sm:$0xff]  ;;  %v13600_v11 = vld [vmem:[#allocation152_spill] sm:$0xff] }
 0x252   :  { %v9924_v38 = vpop.permute.xlu1 %2358  ;;  %1933 = vrot.lane.b32.xlu0 %v13588_v23, %s8084_s21  ;;  %v9941_v13 = vpop.f32.mrf.mxu1  ;;  %v13597_v23 = vld [vmem:[#allocation12_spill] sm:$0xff] }
 0x253   :  { %13585 = vst [vmem:[#allocation212_spill] sm:$0xff] %v9924_v38  ;;  %13593 = vst [vmem:[#allocation132_spill] sm:$0xff] %v9941_v13  ;;  %v1131_v44 = vadd.f32 %v13598_v60, %v13597_v23  ;;  %v13603_v13 = vld [vmem:[#allocation84_spill] sm:$0xff]  ;;  %v13608_v60 = vld [vmem:[#allocation15_spill] sm:$0xff] }
 0x254   :  { %2153 = vrot.lane.b32.xlu1 %v13587_v31, %s8085_s0  ;;  %v9934_v47 = vpop.permute.xlu0 %2139  ;;  %v9947_v31 = vpop.f32.mrf.mxu1  ;;  %v13609_v23 = vld [vmem:[#allocation94_spill] sm:$0xff] }
 0x255   :  { %13590 = vst [vmem:[#allocation150_spill] sm:$0xff] %v9934_v47  ;;  %13596 = vst [vmem:[#allocation217_spill] sm:$0xff] %v9947_v31  ;;  %v13599_v47 = vld [vmem:[#allocation151_spill] sm:$0xff]  ;;  %v13606_v31 = vld [vmem:[#allocation9_spill] sm:$0xff]  ;;  %v1132_v36 = vadd.f32 %v13609_v23, %v13608_v60 }
 0x256   :  { %v9932_v0 = vpop.permute.xlu1 %1068  ;;  %2372 = vrot.lane.b32.xlu0 %v13592_v9, %s8083_s20  ;;  %v7928_v40 = vpop.f32.mrf.mxu1  ;;  %v1129_v6 = vadd.f32 %v13607_v58, %v13606_v31  ;;  %v13616_v58 = vld [vmem:[#allocation14_spill] sm:$0xff]  ;;  %v13618_v23 = vld [vmem:[#allocation155_spill] sm:$0xff] }
 0x257   :  { %13589 = vst [vmem:[#allocation131_spill] sm:$0xff] %v9932_v0  ;;  %v1353_v0 = vadd.f32 %v13603_v13, %v1131_v44  ;;  %v13613_v44 = vld [vmem:[#allocation82_spill] sm:$0xff]  ;;  %v1648_v31 = vrot.slane %v13616_v58, 4  ;;  %v1354_v60 = vadd.f32 %v13617_v3, %v1132_v36  ;;  %v13625_v58 = vld [vmem:[#allocation17_spill] sm:$0xff] }
 0x258   :  { %1534 = vrot.lane.b32.xlu1 %v1460_v21, %s8083_s20  ;;  %v9945_v38 = vpop.permute.xlu0 %1070  ;;  %v13601_v21 = vld [vmem:[#allocation10_spill] sm:$0xff]  ;;  %v1133_v36 = vadd.f32 %v13626_v19, %v13625_v58 }
 0x259   :  { %13595 = vst [vmem:[#allocation216_spill] sm:$0xff] %v9945_v38  ;;  %v1130_v9 = vadd.f32 %v13602_v45, %v13601_v21  ;;  %v13611_v45 = vld [vmem:[#allocation68_spill] sm:$0xff]  ;;  %v1575_v21 = vadd.f32 %v13613_v44, %v1353_v0 }
 0x25a   :  { %v9943_v59 = vpop.permute.xlu1 %1290  ;;  %1935 = vrot.lane.b32.xlu0 %v13600_v11, %s8084_s21  ;;  %v13612_v11 = vld [vmem:[#allocation63_spill] sm:$0xff] }
 0x25b   :  { %13594 = vst [vmem:[#allocation215_spill] sm:$0xff] %v9943_v59  ;;  %v1352_v40 = vadd.f32 %v13611_v45, %v1130_v9  ;;  %v1351_v13 = vadd.f32 %v13612_v11, %v1129_v6  ;;  %v13621_v45 = vld [vmem:[#allocation70_spill] sm:$0xff]  ;;  %v13622_v11 = vld [vmem:[#allocation16_spill] sm:$0xff] }
 0x25c   :  { %2155 = vrot.lane.b32.xlu1 %v13599_v47, %s8085_s0  ;;  %v9960_v38 = vpop.permute.xlu0 %1292  ;;  %v13610_v47 = vld [vmem:[#allocation133_spill] sm:$0xff]  ;;  %v13623_v0 = vrot.slane %v13622_v11, 4  ;;  %v13632_v11 = vld [vmem:[#allocation106_spill] sm:$0xff] }
 0x25d   :  { %13605 = vst [vmem:[#allocation77_spill] sm:$0xff] %v9960_v38  ;;  %v1574_v6 = vadd.f32 %v13621_v45, %v1352_v40  ;;  %v13631_v40 = vld [vmem:[#allocation96_spill] sm:$0xff]  ;;  %v1355_v27 = vadd.f32 %v13632_v11, %v1133_v36 }
 0x25e   :  { %v9958_v59 = vpop.permute.xlu1 %1512  ;;  %2374 = vrot.lane.b32.xlu0 %v13610_v47, %s8083_s20  ;;  %v13619_v47 = vld [vmem:[#allocation156_spill] sm:$0xff]  ;;  %v1651_v44 = vsel %vm1646_vm8, %v1648_v31, %v13623_v0  ;;  %v1576_v45 = vadd.f32 %v13631_v40, %v1354_v60  ;;  %v13633_v0 = vld [vmem:[#allocation21_spill] sm:$0xff]  ;;  %v13639_v40 = vld [vmem:[#allocation119_spill] sm:$0xff] }
 0x25f   :  { %13604 = vst [vmem:[#allocation12_spill] sm:$0xff] %v9958_v59  ;;  %v1757_v14 = vadd.f32 %v1651_v44, %v1575_v21  ;;  %v13636_v44 = vld [vmem:[#allocation88_spill] sm:$0xff] }
 0x260   :  { %1937 = vrot.lane.b32.xlu1 %v9524_v5, %s8084_s21  ;;  %v9975_v38 = vpop.permute.xlu0 %1514  ;;  %v13620_v5 = vld [vmem:[#allocation11_spill] sm:$0xff]  ;;  %v13640_v11 = vld [vmem:[#allocation20_spill] sm:$0xff] }
 0x261   :  { %13615 = vst [vmem:[#allocation152_spill] sm:$0xff] %v9975_v38  ;;  %v1647_v9 = vrot.slane %v13620_v5, 4  ;;  %v13630_v5 = vld [vmem:[#allocation113_spill] sm:$0xff]  ;;  %v1980_v58 = vadd.f32 %v13636_v44, %v1757_v14 }
 0x262   :  { %v9973_v59 = vpop.permute.xlu1 %1917  ;;  %2157 = vrot.lane.b32.xlu0 %v13618_v23, %s8085_s0  ;;  %v1134_v48 = vadd.f32 %v13630_v5, %v13629_v2  ;;  %v13637_v2 = vld [vmem:[#allocation108_spill] sm:$0xff] }
 0x263   :  { %13614 = vst [vmem:[#allocation151_spill] sm:$0xff] %v9973_v59  ;;  %v13624_v59 = vld [vmem:[#allocation60_spill] sm:$0xff]  ;;  %v1577_v5 = vadd.f32 %v13637_v2, %v1355_v27  ;;  %v13645_v27 = vld [vmem:[#allocation143_spill] sm:$0xff] }
 0x264   :  { %2376 = vrot.lane.b32.xlu1 %v13619_v47, %s8083_s20  ;;  %v1573_v38 = vadd.f32 %v13624_v59, %v1351_v13  ;;  %v9993_v23 = vpop.permute.xlu0 %2141  ;;  %v1649_v47 = vsel %vm1646_vm8, %v1647_v9, %v1648_v31  ;;  %v1135_v59 = vadd.f32 %v13634_v35, %v13633_v0  ;;  %v13635_v13 = vld [vmem:[#allocation118_spill] sm:$0xff]  ;;  %v1758_v0 = vadd.f32 %v13640_v11, %v1576_v45  ;;  %v13652_v11 = vld [vmem:[#allocation25_spill] sm:$0xff] }
 0x265   :  { %13628 = vst [vmem:[#allocation69_spill] sm:$0xff] %v9993_v23  ;;  %v1756_v19 = vadd.f32 %v1649_v47, %v1574_v6  ;;  %v1356_v21 = vadd.f32 %v13635_v13, %v1134_v48  ;;  %v13643_v48 = vld [vmem:[#allocation71_spill] sm:$0xff]  ;;  %v13647_v13 = vld [vmem:[#allocation85_spill] sm:$0xff] }
 0x266   :  { %v9991_v3 = vpop.permute.xlu1 %2360  ;;  %1939 = vrot.lane.b32.xlu0 %v9534_v42, %s8084_s21  ;;  %v1755_v31 = vadd.f32 %v1647_v9, %v1573_v38  ;;  %v13642_v42 = vld [vmem:[#allocation157_spill] sm:$0xff]  ;;  %v13644_v38 = vld [vmem:[#allocation23_spill] sm:$0xff]  ;;  %v2202_v44 = vadd.f32 %v13647_v13, %v1980_v58 }
 0x267   :  { %13627 = vst [vmem:[#allocation10_spill] sm:$0xff] %v9991_v3  ;;  %v1578_v35 = vadd.f32 %v13639_v40, %v1356_v21  ;;  %v1979_v14 = vadd.f32 %v13643_v48, %v1756_v19  ;;  %v1136_v9 = vadd.f32 %v13645_v27, %v13644_v38  ;;  %v13646_v6 = vld [vmem:[#allocation67_spill] sm:$0xff]  ;;  %v13648_v21 = vld [vmem:[#allocation22_spill] sm:$0xff]  ;;  %v13651_v40 = vld [vmem:[#allocation24_spill] sm:$0xff] }
 0x268   :  { %2159 = vrot.lane.b32.xlu1 %v9527_v18, %s8085_s0  ;;  %v10011_v36 = vpop.permute.xlu0 %1516  ;;  %v13641_v18 = vld [vmem:[#allocation123_spill] sm:$0xff]  ;;  %v1978_v47 = vadd.f32 %v13646_v6, %v1755_v31  ;;  %v1759_v2 = vadd.f32 %v13648_v21, %v1577_v5  ;;  %v13655_v48 = vld [vmem:[#allocation100_spill] sm:$0xff]  ;;  %v13656_v38 = vld [vmem:[#allocation126_spill] sm:$0xff] }
 0x269   :  { %v1357_v3 = vadd.f32 %v13641_v18, %v1135_v59  ;;  %v13653_v18 = vld [vmem:[#allocation144_spill] sm:$0xff]  ;;  %v13654_v23 = vld [vmem:[#allocation147_spill] sm:$0xff]  ;;  %v13658_v5 = vld [vmem:[#allocation162_spill] sm:$0xff] }
 0x26a   :  { %v10009_v60 = vpop.permute.xlu1 %1919  ;;  %2378 = vrot.lane.b32.xlu0 %v13642_v42, %s8083_s20  ;;  %v1137_v42 = vadd.f32 %v13653_v18, %v13652_v11  ;;  %v1358_v19 = vadd.f32 %v13654_v23, %v1136_v9  ;;  %v13657_v31 = vld [vmem:[#allocation76_spill] sm:$0xff]  ;;  %v13660_v21 = vld [vmem:[#allocation87_spill] sm:$0xff]  ;;  %v13661_v11 = vld [vmem:[#allocation105_spill] sm:$0xff] }
 0x26b   :  { %13638 = vst [vmem:[#allocation84_spill] sm:$0xff] %v10009_v60  ;;  %v1981_v60 = vadd.f32 %v13655_v48, %v1758_v0  ;;  %v1579_v27 = vadd.f32 %v13656_v38, %v1357_v3  ;;  %v2201_v58 = vadd.f32 %v13657_v31, %v1979_v14  ;;  %v13662_v9 = vld [vmem:[#allocation112_spill] sm:$0xff]  ;;  %v13664_v38 = vld [vmem:[#allocation135_spill] sm:$0xff]  ;;  %v13666_v14 = vld [vmem:[#allocation154_spill] sm:$0xff] }
 0x26c   :  { %2161 = vrot.lane.b32.xlu1 %v9537_v10, %s8085_s0  ;;  %v10028_v59 = vpop.permute.xlu0 %2143  ;;  %v1760_v10 = vadd.f32 %v13651_v40, %v1578_v35  ;;  %v1359_v6 = vadd.f32 %v13658_v5, %v1137_v42  ;;  %v13659_v35 = vld [vmem:[#allocation64_spill] sm:$0xff]  ;;  %v2423_v40 = vadd.f32 %v13660_v21, %v2202_v44  ;;  %v1982_v0 = vadd.f32 %v13662_v9, %v1759_v2  ;;  %v13667_v42 = vld [vmem:[#allocation29_spill] sm:$0xff]  ;;  %v13668_v5 = vld [vmem:[#allocation26_spill] sm:$0xff] }
 0x26d   :  { %13650 = vst [vmem:[#allocation61_spill] sm:$0xff] %v10028_v59  ;;  %v2200_v13 = vadd.f32 %v13659_v35, %v1978_v47  ;;  %v2203_v23 = vadd.f32 %v13661_v11, %v1981_v60  ;;  %v13665_v59 = vld [vmem:[#allocation27_spill] sm:$0xff]  ;;  %v1139_v47 = vadd.f32 %v9531_v32, %v13667_v42  ;;  %v1761_v44 = vadd.f32 %v13668_v5, %v1579_v27  ;;  %v13669_v35 = vld [vmem:[#allocation81_spill] sm:$0xff]  ;;  %v13670_v21 = vld [vmem:[#allocation148_spill] sm:$0xff] }
 0x26e   :  { %v10026_v45 = vpop.permute.xlu1 %2362  ;;  %2380 = vrot.lane.b32.xlu0 %v9545_v53, %s8083_s20  ;;  %v1580_v53 = vadd.f32 %v13664_v38, %v1358_v19  ;;  %v1138_v31 = vadd.f32 %v13666_v14, %v13665_v59  ;;  %v2422_v60 = vadd.f32 %v13669_v35, %v2201_v58  ;;  %v1581_v2 = vadd.f32 %v13670_v21, %v1359_v6  ;;  %v13673_v38 = vld [vmem:[#allocation31_spill] sm:$0xff]  ;;  %v13674_v27 = vld [vmem:[#allocation97_spill] sm:$0xff]  ;;  %v13676_v6 = vld [vmem:[#allocation120_spill] sm:$0xff] }
 0x26f   :  { %13649 = vst [vmem:[#allocation9_spill] sm:$0xff] %v10026_v45  ;;  %v1361_v9 = vadd.f32 %v9602_v41, %v1139_v47  ;;  %v13671_v45 = vld [vmem:[#allocation66_spill] sm:$0xff]  ;;  %v1140_v59 = vadd.f32 %v9591_v25, %v13673_v38  ;;  %v2424_v42 = vadd.f32 %v13674_v27, %v2203_v23  ;;  %v13675_v58 = vld [vmem:[#allocation109_spill] sm:$0xff]  ;;  %v10078_v25 = vld [vmem:[%s13144_s2] ss:$0 sm:$0xff] }
 0x270   :  { %2382 = vrot.lane.b32.xlu1 %v9540_v28, %s8083_s20  ;;  %v10048_v3 = vpop.permute.xlu0 %1074  ;;  %v13663_v28 = vld [vmem:[#allocation122_spill] sm:$0xff]  ;;  %v1360_v11 = vadd.f32 %v9561_v62, %v1138_v31  ;;  %v2204_v5 = vadd.f32 %v13675_v58, %v1982_v0  ;;  %v13677_v62 = vld [vmem:[#allocation28_spill] sm:$0xff]  ;;  %v13681_v23 = vld [vmem:[#allocation163_spill] sm:$0xff] }
 0x271   :  { %v1983_v48 = vadd.f32 %v13663_v28, %v1760_v10  ;;  %v2421_v10 = vadd.f32 %v13671_v45, %v2200_v13  ;;  %v13672_v28 = vld [vmem:[#allocation78_spill] sm:$0xff]  ;;  %v1762_v31 = vadd.f32 %v13677_v62, %v1580_v53  ;;  %v1362_v45 = vadd.f32 %v9631_v12, %v1140_v59  ;;  %v13685_v59 = vld [vmem:[#allocation83_spill] sm:$0xff] }
 0x272   :  { %v10046_v18 = vpop.permute.xlu1 %1072  ;;  %v2460_v19 = vadd.f32 %v2423_v40, %v13672_v28  ;;  %v13678_v41 = vld [vmem:[#allocation134_spill] sm:$0xff]  ;;  %v1582_v38 = vadd.f32 %v13681_v23, %v1360_v11  ;;  %v1583_v0 = vadd.f32 %v9563_v52, %v1361_v9  ;;  %v2461_v58 = vadd.f32 %v2424_v42, %v13685_v59  ;;  %v13691_v23 = vld [vmem:[#allocation32_spill] sm:$0xff] }
 0x273   :  { %v2205_v35 = vadd.f32 %v13676_v6, %v1983_v48  ;;  %v1984_v47 = vadd.f32 %v13678_v41, %v1761_v44  ;;  %v13679_v13 = vld [vmem:[#allocation18_spill] sm:$0xff]  ;;  %v13682_v48 = vld [vmem:[#allocation13_spill] sm:$0xff]  ;;  %v1584_v52 = vadd.f32 %v9604_v55, %v1362_v45  ;;  %v13695_v45 = vld [vmem:[#allocation80_spill] sm:$0xff] }
 0x274   :  { %v10067_v32 = vpop.permute.xlu0 %1518  ;;  %v2459_v40 = vadd.f32 %v13679_v13, %v2422_v60  ;;  %v13680_v21 = vld [vmem:[#allocation30_spill] sm:$0xff]  ;;  %v2458_v27 = vadd.f32 %v13682_v48, %v2421_v10  ;;  %v2504_v53 = vadd.f32 %v10078_v25, %v2460_v19  ;;  %v13686_v6 = vld [vmem:[#allocation117_spill] sm:$0xff]  ;;  %v13688_v13 = vld [vmem:[#allocation44_spill] sm:$0xff]  ;;  %v1764_v48 = vadd.f32 %v13691_v23, %v1582_v38 }
 0x275   :  { %v1763_v28 = vadd.f32 %v13680_v21, %v1581_v2  ;;  %v2425_v62 = vadd.f32 %v13686_v6, %v2204_v5  ;;  %v13687_v41 = vld [vmem:[#allocation125_spill] sm:$0xff]  ;;  %v1985_v2 = vadd.f32 %v13688_v13, %v1762_v31  ;;  %v13689_v21 = vld [vmem:[#allocation128_spill] sm:$0xff]  ;;  %v13690_v10 = vld [vmem:[#allocation47_spill] sm:$0xff]  ;;  %v2505_v31 = vadd.f32 %v10078_v25, %v2461_v58 }
 0x276   :  { %v10065_v14 = vpop.permute.xlu1 %1294  ;;  %v2426_v60 = vadd.f32 %v13687_v41, %v2205_v35  ;;  %v2206_v11 = vadd.f32 %v13689_v21, %v1984_v47  ;;  %v2503_v9 = vadd.f32 %v10078_v25, %v2459_v40  ;;  %v2502_v42 = vadd.f32 %v10078_v25, %v2458_v27  ;;  %v13694_v47 = vld [vmem:[#allocation74_spill] sm:$0xff]  ;;  %v13696_v6 = vld [vmem:[#allocation139_spill] sm:$0xff]  ;;  %v13698_v13 = vld [vmem:[#allocation36_spill] sm:$0xff] }
 0x277   :  { %v1986_v19 = vadd.f32 %v13690_v10, %v1763_v28  ;;  %v10101_v59 = vmax.f32 %v2504_v53, 0.0  ;;  %v2462_v55 = vadd.f32 %v13694_v47, %v2425_v62  ;;  %v2207_v28 = vadd.f32 %v13696_v6, %v1985_v2  ;;  %v13697_v41 = vld [vmem:[#allocation138_spill] sm:$0xff]  ;;  %v13700_v27 = vld [vmem:[#allocation149_spill] sm:$0xff] }
 0x278   :  { %v10088_v12 = vpop.permute.xlu0 %2145  ;;  %v2463_v40 = vadd.f32 %v13695_v45, %v2426_v60  ;;  %v2427_v38 = vadd.f32 %v13697_v41, %v2206_v11  ;;  %v1987_v21 = vadd.f32 %v9574_v37, %v1764_v48  ;;  %v10118_v23 = vmax.f32 %v2502_v42, 0.0  ;;  %v13702_v62 = vld [vmem:[#allocation33_spill] sm:$0xff]  ;;  %v13706_v45 = vld [vmem:[#allocation35_spill] sm:$0xff]  ;;  %v13707_v41 = vld [vmem:[#allocation164_spill] sm:$0xff] }
 0x279   :  { %13684 = vst [vmem:[#allocation94_spill] sm:$0xff] %v10088_v12  ;;  %13693 = vst [vmem:[#allocation133_spill] sm:$0xff] %v10101_v59  ;;  %v2208_v53 = vadd.f32 %v13700_v27, %v1986_v19  ;;  %v2905_v58 = vrot.slane %v10101_v59, 4  ;;  %v1141_v60 = vadd.f32 %v9633_v7, %v13702_v62  ;;  %v13704_v37 = vld [vmem:[#allocation153_spill] sm:$0xff]  ;;  %v1142_v7 = vadd.f32 %v9650_v22, %v13706_v45  ;;  %v13709_v27 = vld [vmem:[#allocation95_spill] sm:$0xff] }
 0x27a   :  { %v10086_v44 = vpop.permute.xlu1 %1921  ;;  %13701 = vst [vmem:[#allocation63_spill] sm:$0xff] %v10118_v23  ;;  %v2507_v19 = vadd.f32 %v10078_v25, %v2463_v40  ;;  %v2428_v48 = vadd.f32 %v13704_v37, %v2207_v28  ;;  %v2902_v40 = vrot.slane %v10118_v23, 4  ;;  %v13712_v62 = vld [vmem:[#allocation86_spill] sm:$0xff]  ;;  %v13714_v45 = vld [vmem:[#allocation56_spill] sm:$0xff]  ;;  %v13791_v23 = vld [vmem:[#allocation205_spill] sm:$0xff] }
 0x27b   :  { %13683 = vst [vmem:[#allocation15_spill] sm:$0xff] %v10086_v44  ;;  %v13692_v44 = vld [vmem:[#allocation34_spill] sm:$0xff]  ;;  %v1363_v47 = vadd.f32 %v9648_v63, %v1141_v60  ;;  %v1364_v28 = vadd.f32 %v9685_v29, %v1142_v7  ;;  %v13777_v59 = vld [vmem:[#allocation188_spill] sm:$0xff] }
 0x27c   :  { %v1765_v12 = vadd.f32 %v13692_v44, %v1583_v0  ;;  %v10105_v35 = vpop.permute.xlu0 %1076  ;;  %v1766_v0 = vadd.f32 %v13698_v13, %v1584_v52  ;;  %v10113_v44 = vmax.f32 %v2503_v9, 0.0  ;;  %v10127_v52 = vmax.f32 %v2505_v31, 0.0  ;;  %v13713_v37 = vld [vmem:[#allocation166_spill] sm:$0xff] }
 0x27d   :  { %v2506_v9 = vadd.f32 %v10078_v25, %v2462_v55  ;;  %v2429_v31 = vadd.f32 %v9529_v46, %v2208_v53  ;;  %v2209_v13 = vadd.f32 %v13707_v41, %v1987_v21  ;;  %v2465_v46 = vadd.f32 %v2428_v48, %v13709_v27  ;;  %v13715_v41 = vld [vmem:[#allocation37_spill] sm:$0xff]  ;;  %v13719_v27 = vld [vmem:[#allocation92_spill] sm:$0xff] }
 0x27e   :  { %v10103_v5 = vpop.permute.xlu1 %2364  ;;  %13699 = vst [vmem:[#allocation68_spill] sm:$0xff] %v10113_v44  ;;  %v1988_v10 = vadd.f32 %v9612_v57, %v1765_v12  ;;  %13703 = vst [vmem:[#allocation82_spill] sm:$0xff] %v10127_v52  ;;  %v13705_v57 = vld [vmem:[#allocation91_spill] sm:$0xff]  ;;  %v1989_v42 = vadd.f32 %v9639_v8, %v1766_v0  ;;  %v2903_v6 = vrot.slane %v10113_v44, 4  ;;  %v2907_v22 = vrot.slane %v10127_v52, 4  ;;  %v13790_v44 = vld [vmem:[#allocation197_spill] sm:$0xff] }
 0x27f   :  { %v2464_v12 = vadd.f32 %v2427_v38, %v13705_v57  ;;  %v10149_v0 = vmax.f32 %v2506_v9, 0.0  ;;  %v10152_v53 = vmax.f32 %v2507_v19, 0.0  ;;  %v2466_v60 = vadd.f32 %v13712_v62, %v2429_v31  ;;  %v13720_v62 = vld [vmem:[#allocation102_spill] sm:$0xff] }
 0x280   :  { %v10125_v11 = vpop.permute.xlu0 %1520  ;;  %v2210_v55 = vadd.f32 %v9576_v43, %v1988_v10  ;;  %v2906_v63 = vsel %vm1646_vm8, %v2903_v6, %v2905_v58  ;;  %v2211_v21 = vadd.f32 %v9614_v15, %v1989_v42  ;;  %v13711_v10 = vld [vmem:[#allocation168_spill] sm:$0xff]  ;;  %v2430_v57 = vadd.f32 %v13713_v37, %v2209_v13 }
 0x281   :  { %13708 = vst [vmem:[#allocation14_spill] sm:$0xff] %v10149_v0  ;;  %13710 = vst [vmem:[#allocation93_spill] sm:$0xff] %v10152_v53  ;;  %v2508_v43 = vadd.f32 %v10078_v25, %v2464_v12  ;;  %v1585_v29 = vadd.f32 %v13711_v10, %v1363_v47  ;;  %v1143_v9 = vadd.f32 %v9696_v24, %v13715_v41  ;;  %v3049_v15 = vsel %vm3047_vm10, %v2906_v63, 0.0  ;;  %v13717_v24 = vld [vmem:[#allocation167_spill] sm:$0xff] }
 0x282   :  { %v10123_v2 = vpop.permute.xlu1 %1296  ;;  %v2431_v7 = vadd.f32 %v13714_v45, %v2210_v55  ;;  %v2904_v52 = vsel %vm1646_vm8, %v2902_v40, %v2903_v6  ;;  %v1586_v19 = vadd.f32 %v9660_v54, %v1364_v28  ;;  %v2908_v42 = vsel %vm1646_vm8, %v2905_v58, %v2907_v22  ;;  %v13718_v40 = vld [vmem:[#allocation38_spill] sm:$0xff]  ;;  %v13721_v45 = vld [vmem:[#allocation40_spill] sm:$0xff]  ;;  %v13722_v41 = vld [vmem:[#allocation39_spill] sm:$0xff] }
 0x283   :  { %v2909_v47 = vrot.slane %v10149_v0, 4  ;;  %v2509_v31 = vadd.f32 %v10078_v25, %v2465_v46  ;;  %v2911_v13 = vrot.slane %v10152_v53, 4  ;;  %v10173_v55 = vmax.f32 %v2508_v43, 0.0 }
 0x284   :  { %v10145_v8 = vpop.permute.xlu0 %2147  ;;  %v2432_v6 = vadd.f32 %v13717_v24, %v2211_v21  ;;  %v1767_v54 = vadd.f32 %v13718_v40, %v1585_v29  ;;  %v2510_v28 = vadd.f32 %v10078_v25, %v2466_v60  ;;  %v2467_v10 = vadd.f32 %v13719_v27, %v2430_v57 }
 0x285   :  { %13716 = vst [vmem:[#allocation155_spill] sm:$0xff] %v10173_v55  ;;  %v2468_v63 = vadd.f32 %v2431_v7, %v13720_v62  ;;  %v1365_v58 = vadd.f32 %v9694_v1, %v1143_v9  ;;  %v3048_v37 = vsel %vm3047_vm10, %v2904_v52, 0.0  ;;  %v1768_v46 = vadd.f32 %v13721_v45, %v1586_v19  ;;  %v13724_v7 = vld [vmem:[#allocation107_spill] sm:$0xff]  ;;  %v13725_v19 = vld [vmem:[#allocation57_spill] sm:$0xff]  ;;  %v13729_v45 = vld [vmem:[#allocation42_spill] sm:$0xff] }
 0x286   :  { %v10143_v38 = vpop.permute.xlu1 %1923  ;;  %v1144_v43 = vadd.f32 %v9724_v16, %v13722_v41  ;;  %v3050_v29 = vadd.f32 %v3049_v15, %v3048_v37  ;;  %v3051_v60 = vsel %vm3047_vm10, %v2908_v42, 0.0  ;;  %v2910_v57 = vsel %vm1646_vm8, %v2907_v22, %v2909_v47 }
 0x287   :  { %v10191_v24 = vmax.f32 %v2509_v31, 0.0  ;;  %v2912_v1 = vsel %vm1646_vm8, %v2909_v47, %v2911_v13  ;;  %v2913_v52 = vrot.slane %v10173_v55, 4  ;;  %v2469_v9 = vadd.f32 %v2432_v6, %v13724_v7 }
 0x288   :  { %v10166_v12 = vpop.permute.xlu0 %1078  ;;  %v1990_v40 = vadd.f32 %v13725_v19, %v1767_v54  ;;  %v10197_v16 = vmax.f32 %v2510_v28, 0.0  ;;  %v2511_v27 = vadd.f32 %v10078_v25, %v2467_v10  ;;  %v2512_v15 = vadd.f32 %v10078_v25, %v2468_v63 }
 0x289   :  { %13723 = vst [vmem:[#allocation156_spill] sm:$0xff] %v10191_v24  ;;  %v1587_v42 = vadd.f32 %v9702_v17, %v1365_v58  ;;  %v1991_v22 = vadd.f32 %v9670_v26, %v1768_v46  ;;  %v1366_v31 = vadd.f32 %v9722_v34, %v1144_v43  ;;  %v3052_v37 = vadd.f32 %v3051_v60, %v3050_v29  ;;  %v13730_v29 = vld [vmem:[#allocation169_spill] sm:$0xff] }
 0x28a   :  { %v10164_v48 = vpop.permute.xlu1 %2366  ;;  %13726 = vst [vmem:[#allocation11_spill] sm:$0xff] %v10197_v16  ;;  %v3053_v6 = vsel %vm3047_vm10, %v2910_v57, 0.0  ;;  %v2915_v54 = vrot.slane %v10191_v24, 4  ;;  %v3055_v28 = vsel %vm3047_vm10, %v2912_v1, 0.0  ;;  %v2914_v10 = vsel %vm1646_vm8, %v2911_v13, %v2913_v52  ;;  %v13757_v24 = vld [vmem:[#allocation201_spill] sm:$0xff] }
 0x28b   :  { %v2513_v63 = vadd.f32 %v10078_v25, %v2469_v9  ;;  %v2212_v17 = vadd.f32 %v9668_v49, %v1990_v40  ;;  %v2917_v26 = vrot.slane %v10197_v16, 4  ;;  %v10215_v34 = vmax.f32 %v2511_v27, 0.0 }
 0x28c   :  { %v10187_v21 = vpop.permute.xlu0 %1522  ;;  %v10217_v58 = vmax.f32 %v2512_v15, 0.0  ;;  %v1769_v46 = vadd.f32 %v13729_v45, %v1587_v42  ;;  %v3054_v41 = vadd.f32 %v3053_v6, %v3052_v37  ;;  %v2213_v60 = vadd.f32 %v13730_v29, %v1991_v22  ;;  %v13732_v15 = vld [vmem:[#allocation171_spill] sm:$0xff]  ;;  %v13733_v22 = vld [vmem:[#allocation98_spill] sm:$0xff] }
 0x28d   :  { %13727 = vst [vmem:[#allocation70_spill] sm:$0xff] %v10215_v34  ;;  %v2433_v43 = vadd.f32 %v9677_v50, %v2212_v17  ;;  %v1588_v57 = vadd.f32 %v9730_v51, %v1366_v31  ;;  %v2916_v49 = vsel %vm1646_vm8, %v2913_v52, %v2915_v54  ;;  %v3057_v9 = vsel %vm3047_vm10, %v2914_v10, 0.0  ;;  %v13734_v37 = vld [vmem:[#allocation170_spill] sm:$0xff]  ;;  %v13735_v52 = vld [vmem:[#allocation43_spill] sm:$0xff] }
 0x28e   :  { %v10185_v53 = vpop.permute.xlu1 %1298  ;;  %13728 = vst [vmem:[#allocation16_spill] sm:$0xff] %v10217_v58  ;;  %v3056_v7 = vadd.f32 %v3055_v28, %v3054_v41  ;;  %v10229_v19 = vmax.f32 %v2513_v63, 0.0  ;;  %v2918_v40 = vsel %vm1646_vm8, %v2915_v54, %v2917_v26  ;;  %v2919_v27 = vrot.slane %v10215_v34, 4  ;;  %v13736_v41 = vld [vmem:[#allocation41_spill] sm:$0xff] }
 0x28f   :  { %v2921_v50 = vrot.slane %v10217_v58, 4  ;;  %v1992_v42 = vadd.f32 %v13732_v15, %v1769_v46  ;;  %v3059_v51 = vsel %vm3047_vm10, %v2916_v49, 0.0  ;;  %v2470_v31 = vadd.f32 %v13733_v22, %v2433_v43  ;;  %v13737_v15 = vld [vmem:[#allocation104_spill] sm:$0xff]  ;;  %v13755_v34 = vld [vmem:[#allocation177_spill] sm:$0xff] }
 0x290   :  { %v10206_v47 = vpop.permute.xlu0 %2149  ;;  %13731 = vst [vmem:[#allocation60_spill] sm:$0xff] %v10229_v19  ;;  %v2434_v6 = vadd.f32 %v13734_v37, %v2213_v60  ;;  %v1770_v28 = vadd.f32 %v13735_v52, %v1588_v57  ;;  %v3058_v63 = vadd.f32 %v3057_v9, %v3056_v7  ;;  %v3061_v54 = vsel %vm3047_vm10, %v2918_v40, 0.0  ;;  %v13740_v52 = vld [vmem:[#allocation49_spill] sm:$0xff] }
 0x291   :  { %v2923_v45 = vrot.slane %v10229_v19, 4  ;;  %v1145_v46 = vadd.f32 %v9741_v39, %v13736_v41  ;;  %v2920_v49 = vsel %vm1646_vm8, %v2917_v26, %v2919_v27  ;;  %v2922_v43 = vsel %vm1646_vm8, %v2919_v27, %v2921_v50  ;;  %v13742_v41 = vld [vmem:[#allocation51_spill] sm:$0xff] }
 0x292   :  { %v10204_v62 = vpop.permute.xlu1 %1925  ;;  %v3060_v29 = vadd.f32 %v3059_v51, %v3058_v63  ;;  %v2214_v60 = vadd.f32 %v9714_v56, %v1992_v42  ;;  %v2514_v57 = vadd.f32 %v10078_v25, %v2470_v31  ;;  %v2471_v22 = vadd.f32 %v13737_v15, %v2434_v6  ;;  %v13738_v51 = vld [vmem:[#allocation46_spill] sm:$0xff]  ;;  %v13739_v6 = vld [vmem:[#allocation172_spill] sm:$0xff] }
 0x293   :  { %v1993_v7 = vadd.f32 %v9732_v61, %v1770_v28  ;;  %v1367_v9 = vadd.f32 %v9751_v33, %v1145_v46  ;;  %v1149_v26 = vadd.f32 %v9794_v30, %v13738_v51  ;;  %v3063_v27 = vsel %vm3047_vm10, %v2920_v49, 0.0  ;;  %v13741_v28 = vld [vmem:[#allocation185_spill] sm:$0xff]  ;;  %v13746_v15 = vld [vmem:[#allocation48_spill] sm:$0xff] }
 0x294   :  { %v10225_v1 = vpop.permute.xlu0 %1080  ;;  %v3062_v39 = vadd.f32 %v3061_v54, %v3060_v29  ;;  %v3065_v56 = vsel %vm3047_vm10, %v2922_v43, 0.0  ;;  %v2924_v42 = vsel %vm1646_vm8, %v2921_v50, %v2923_v45  ;;  %v2435_v61 = vadd.f32 %v13739_v6, %v2214_v60  ;;  %v13743_v54 = vld [vmem:[#allocation195_spill] sm:$0xff]  ;;  %v13745_v49 = vld [vmem:[#allocation173_spill] sm:$0xff] }
 0x295   :  { %v1589_v31 = vadd.f32 %v9757_v20, %v1367_v9  ;;  %v1371_v33 = vadd.f32 %v9803_v4, %v1149_v26  ;;  %v1151_v63 = vadd.f32 %v13741_v28, %v13740_v52  ;;  %v1152_v46 = vadd.f32 %v13743_v54, %v13742_v41  ;;  %v13747_v50 = vld [vmem:[#allocation175_spill] sm:$0xff]  ;;  %v13748_v4 = vld [vmem:[#allocation184_spill] sm:$0xff]  ;;  %v13750_v52 = vld [vmem:[#allocation198_spill] sm:$0xff] }
 0x296   :  { %v10223_v13 = vpop.permute.xlu1 %1300  ;;  %v10270_v29 = vmax.f32 %v2514_v57, 0.0  ;;  %v2515_v30 = vadd.f32 %v10078_v25, %v2471_v22  ;;  %v2215_v43 = vadd.f32 %v13745_v49, %v1993_v7  ;;  %v1150_v51 = vadd.f32 %v13747_v50, %v13746_v15  ;;  %v13749_v26 = vld [vmem:[#allocation187_spill] sm:$0xff]  ;;  %v13751_v41 = vld [vmem:[#allocation53_spill] sm:$0xff] }
 0x297   :  { %v1593_v9 = vadd.f32 %v13748_v4, %v1371_v33  ;;  %v1373_v6 = vadd.f32 %v13749_v26, %v1151_v63  ;;  %v1374_v28 = vadd.f32 %v13750_v52, %v1152_v46  ;;  %v13752_v57 = vld [vmem:[#allocation207_spill] sm:$0xff]  ;;  %v3064_v19 = vadd.f32 %v3063_v27, %v3062_v39  ;;  %v13753_v22 = vld [vmem:[#allocation45_spill] sm:$0xff]  ;;  %v13758_v27 = vld [vmem:[#allocation174_spill] sm:$0xff] }
 0x298   :  { %v10241_v10 = vpop.permute.xlu0 %1524  ;;  %13744 = vst [vmem:[#allocation17_spill] sm:$0xff] %v10270_v29  ;;  %v1153_v54 = vadd.f32 %v13752_v57, %v13751_v41  ;;  %v1771_v58 = vadd.f32 %v13753_v22, %v1589_v31  ;;  %v13754_v7 = vld [vmem:[#allocation111_spill] sm:$0xff]  ;;  %v1372_v15 = vadd.f32 %v13755_v34, %v1150_v51  ;;  %v13756_v50 = vld [vmem:[#allocation189_spill] sm:$0xff]  ;;  %v3067_v33 = vsel %vm3047_vm10, %v2924_v42, 0.0  ;;  %v13760_v34 = vld [vmem:[#allocation50_spill] sm:$0xff] }
 0x299   :  { %v2472_v49 = vadd.f32 %v2435_v61, %v13754_v7  ;;  %v1595_v16 = vadd.f32 %v13756_v50, %v1373_v6  ;;  %v1596_v55 = vadd.f32 %v13757_v24, %v1374_v28  ;;  %v3066_v0 = vadd.f32 %v3065_v56, %v3064_v19  ;;  %v13759_v61 = vld [vmem:[#allocation179_spill] sm:$0xff]  ;;  %v13761_v6 = vld [vmem:[#allocation129_spill] sm:$0xff]  ;;  %v13762_v24 = vld [vmem:[#allocation176_spill] sm:$0xff] }
 0x29a   :  { %v10239_v17 = vpop.permute.xlu1 %1927  ;;  %v2925_v63 = vrot.slane %v10270_v29, 4  ;;  %v10292_v46 = vmax.f32 %v2515_v30, 0.0  ;;  %v2436_v31 = vadd.f32 %v13758_v27, %v2215_v43  ;;  %v1594_v26 = vadd.f32 %v13759_v61, %v1372_v15  ;;  %v13763_v28 = vld [vmem:[#allocation54_spill] sm:$0xff]  ;;  %v13766_v15 = vld [vmem:[#allocation55_spill] sm:$0xff] }
 0x29b   :  { %v1775_v51 = vadd.f32 %v13760_v34, %v1593_v9  ;;  %v1375_v52 = vadd.f32 %v13761_v6, %v1153_v54  ;;  %v1994_v19 = vadd.f32 %v13762_v24, %v1771_v58  ;;  %v3068_v56 = vadd.f32 %v3067_v33, %v3066_v0  ;;  %v13764_v41 = vld [vmem:[#allocation58_spill] sm:$0xff]  ;;  %v13767_v27 = vld [vmem:[#allocation131_spill] sm:$0xff]  ;;  %v13768_v0 = vld [vmem:[#allocation140_spill] sm:$0xff] }
 0x29c   :  { %v10256_v37 = vpop.permute.xlu0 %1082  ;;  %v2516_v42 = vadd.f32 %v10078_v25, %v2472_v49  ;;  %v1777_v30 = vadd.f32 %v13763_v28, %v1595_v16  ;;  %v1778_v57 = vadd.f32 %v13764_v41, %v1596_v55  ;;  %v2926_v22 = vsel %vm1646_vm8, %v2923_v45, %v2925_v63  ;;  %v13765_v43 = vld [vmem:[#allocation178_spill] sm:$0xff]  ;;  %v13769_v49 = vld [vmem:[#allocation52_spill] sm:$0xff]  ;;  %v13773_v28 = vld [vmem:[#allocation215_spill] sm:$0xff] }
 0x29d   :  { %v2216_v50 = vadd.f32 %v13765_v43, %v1994_v19  ;;  %v1154_v9 = vadd.f32 %v13767_v27, %v13766_v15  ;;  %v2473_v58 = vadd.f32 %v2436_v31, %v13768_v0  ;;  %v1776_v33 = vadd.f32 %v13769_v49, %v1594_v26  ;;  %v13770_v16 = vld [vmem:[#allocation186_spill] sm:$0xff]  ;;  %v13772_v45 = vld [vmem:[#allocation180_spill] sm:$0xff]  ;;  %v13776_v15 = vld [vmem:[#allocation65_spill] sm:$0xff] }
 0x29e   :  { %v10254_v40 = vpop.permute.xlu1 %1302  ;;  %v1998_v34 = vadd.f32 %v13770_v16, %v1775_v51  ;;  %v13771_v55 = vld [vmem:[#allocation130_spill] sm:$0xff]  ;;  %v13775_v43 = vld [vmem:[#allocation216_spill] sm:$0xff]  ;;  %v1156_v27 = vadd.f32 %v10046_v18, %v13776_v15  ;;  %v10325_v29 = vmax.f32 %v2516_v42, 0.0 }
 0x29f   :  { %v1597_v6 = vadd.f32 %v13771_v55, %v1375_v52  ;;  %v2437_v24 = vadd.f32 %v13772_v45, %v2216_v50  ;;  %v1376_v41 = vadd.f32 %v13773_v28, %v1154_v9  ;;  %v13774_v19 = vld [vmem:[#allocation62_spill] sm:$0xff]  ;;  %v13778_v0 = vld [vmem:[#allocation192_spill] sm:$0xff]  ;;  %v13781_v55 = vld [vmem:[#allocation77_spill] sm:$0xff]  ;;  %v2517_v42 = vadd.f32 %v10078_v25, %v2473_v58 }
 0x2a0   :  { %v10278_v60 = vpop.permute.xlu0 %1526  ;;  %v1155_v7 = vadd.f32 %v13775_v43, %v13774_v19  ;;  %v2220_v31 = vadd.f32 %v13777_v59, %v1998_v34  ;;  %v2000_v26 = vadd.f32 %v13778_v0, %v1777_v30  ;;  %v13779_v49 = vld [vmem:[#allocation202_spill] sm:$0xff]  ;;  %v13780_v16 = vld [vmem:[#allocation12_spill] sm:$0xff]  ;;  %v13782_v45 = vld [vmem:[#allocation75_spill] sm:$0xff]  ;;  %v1378_v28 = vadd.f32 %v10065_v14, %v1156_v27 }
 0x2a1   :  { %v2001_v51 = vadd.f32 %v13779_v49, %v1778_v57  ;;  %v1598_v52 = vadd.f32 %v13780_v16, %v1376_v41  ;;  %v1157_v9 = vadd.f32 %v10048_v3, %v13782_v45  ;;  %v13783_v59 = vld [vmem:[#allocation181_spill] sm:$0xff]  ;;  %v13784_v30 = vld [vmem:[#allocation194_spill] sm:$0xff]  ;;  %v13785_v57 = vld [vmem:[#allocation59_spill] sm:$0xff]  ;;  %v3069_v27 = vsel %vm3047_vm10, %v2926_v22, 0.0 }
 0x2a2   :  { %v10276_v20 = vpop.permute.xlu1 %1929  ;;  %v1377_v50 = vadd.f32 %v13781_v55, %v1155_v7  ;;  %v1999_v34 = vadd.f32 %v13783_v59, %v1776_v33  ;;  %v2222_v43 = vadd.f32 %v13784_v30, %v2000_v26  ;;  %v1779_v15 = vadd.f32 %v13785_v57, %v1597_v6  ;;  %v13786_v41 = vld [vmem:[#allocation110_spill] sm:$0xff]  ;;  %v13787_v7 = vld [vmem:[#allocation191_spill] sm:$0xff]  ;;  %v13788_v16 = vld [vmem:[#allocation152_spill] sm:$0xff] }
 0x2a3   :  { %v2474_v0 = vadd.f32 %v13786_v41, %v2437_v24  ;;  %v2441_v49 = vadd.f32 %v13787_v7, %v2220_v31  ;;  %v1379_v14 = vadd.f32 %v10123_v2, %v1157_v9  ;;  %v13789_v55 = vld [vmem:[#allocation182_spill] sm:$0xff]  ;;  %v2223_v33 = vadd.f32 %v13791_v23, %v2001_v51  ;;  %v13793_v59 = vld [vmem:[#allocation72_spill] sm:$0xff]  ;;  %v13794_v9 = vld [vmem:[#allocation183_spill] sm:$0xff] }
 0x2a4   :  { %v10296_v39 = vpop.permute.xlu0 %1084  ;;  %v1599_v3 = vadd.f32 %v13788_v16, %v1377_v50  ;;  %v2221_v45 = vadd.f32 %v13789_v55, %v1999_v34  ;;  %v2443_v58 = vadd.f32 %v13790_v44, %v2222_v43  ;;  %v13792_v26 = vrot.slane %v10292_v46, 4  ;;  %v13795_v34 = vld [vmem:[#allocation209_spill] sm:$0xff]  ;;  %v13796_v51 = vld [vmem:[#allocation79_spill] sm:$0xff]  ;;  %v13797_v57 = vld [vmem:[#allocation142_spill] sm:$0xff] }
 0x2a5   :  { %v2929_v24 = vrot.slane %v10325_v29, 4  ;;  %v1780_v31 = vadd.f32 %v13793_v59, %v1598_v52  ;;  %v1600_v50 = vadd.f32 %v10011_v36, %v1378_v28  ;;  %v10361_v22 = vmax.f32 %v2517_v42, 0.0  ;;  %v13798_v52 = vld [vmem:[#allocation73_spill] sm:$0xff]  ;;  %v13800_v55 = vld [vmem:[#allocation204_spill] sm:$0xff] }
 0x2a6   :  { %v10294_v4 = vpop.permute.xlu1 %1304  ;;  %v2928_v6 = vsel %vm1646_vm8, %v2925_v63, %v13792_v26  ;;  %v2442_v44 = vadd.f32 %v13794_v9, %v2221_v45  ;;  %v2002_v23 = vadd.f32 %v13795_v34, %v1779_v15  ;;  %v1158_v43 = vadd.f32 %v10105_v35, %v13796_v51  ;;  %v13799_v28 = vld [vmem:[#allocation193_spill] sm:$0xff]  ;;  %v13801_v26 = vld [vmem:[#allocation99_spill] sm:$0xff]  ;;  %v13803_v34 = vld [vmem:[#allocation84_spill] sm:$0xff] }
 0x2a7   :  { %v2518_v63 = vadd.f32 %v10078_v25, %v2474_v0  ;;  %v2478_v41 = vadd.f32 %v13797_v57, %v2441_v49  ;;  %v1781_v7 = vadd.f32 %v13798_v52, %v1599_v3  ;;  %v1601_v36 = vadd.f32 %v10067_v32, %v1379_v14  ;;  %v13802_v9 = vld [vmem:[#allocation151_spill] sm:$0xff]  ;;  %v13804_v51 = vld [vmem:[#allocation89_spill] sm:$0xff]  ;;  %v13805_v14 = vld [vmem:[#allocation146_spill] sm:$0xff] }
 0x2a8   :  { %v10313_v54 = vpop.permute.xlu0 %1528  ;;  %v2480_v16 = vadd.f32 %v2443_v58, %v13799_v28  ;;  %v2444_v42 = vadd.f32 %v13800_v55, %v2223_v33  ;;  %v1159_v45 = vadd.f32 %v10166_v12, %v13801_v26  ;;  %v1380_v15 = vadd.f32 %v10185_v53, %v1158_v43  ;;  %v13806_v33 = vld [vmem:[#allocation211_spill] sm:$0xff]  ;;  %v13810_v55 = vld [vmem:[#allocation150_spill] sm:$0xff]  ;;  %v13811_v26 = vld [vmem:[#allocation69_spill] sm:$0xff] }
 0x2a9   :  { %v3070_v59 = vadd.f32 %v3069_v27, %v3068_v56  ;;  %v2003_v35 = vadd.f32 %v13802_v9, %v1780_v31  ;;  %v2004_v0 = vadd.f32 %v13803_v34, %v1781_v7  ;;  %v1782_v49 = vadd.f32 %v13804_v51, %v1600_v50  ;;  %v13808_v50 = vld [vmem:[#allocation90_spill] sm:$0xff]  ;;  %v13809_v28 = vld [vmem:[#allocation199_spill] sm:$0xff] }
 0x2aa   :  { %v10311_v61 = vpop.permute.xlu1 %1306  ;;  %v3071_v32 = vsel %vm3047_vm10, %v2928_v6, 0.0  ;;  %v2479_v58 = vadd.f32 %v13805_v14, %v2442_v44  ;;  %v2224_v52 = vadd.f32 %v13806_v33, %v2002_v23  ;;  %v1381_v12 = vadd.f32 %v10223_v13, %v1159_v45  ;;  %v13812_v9 = vld [vmem:[#allocation15_spill] sm:$0xff]  ;;  %v13814_v33 = vld [vmem:[#allocation212_spill] sm:$0xff] }
 0x2ab   :  { %v13807_v53 = vrot.slane %v10292_v46, 4  ;;  %v2931_v27 = vrot.slane %v10361_v22, 4  ;;  %v10391_v31 = vmax.f32 %v2518_v63, 0.0  ;;  %v1783_v43 = vadd.f32 %v13808_v50, %v1601_v36  ;;  %v13813_v51 = vld [vmem:[#allocation103_spill] sm:$0xff] }
 0x2ac   :  { %v10337_v18 = vpop.permute.xlu0 %1086  ;;  %v2522_v7 = vadd.f32 %v10078_v25, %v2478_v41  ;;  %v2524_v6 = vadd.f32 %v10078_v25, %v2480_v16  ;;  %v2481_v44 = vadd.f32 %v2444_v42, %v13809_v28  ;;  %v1602_v23 = vadd.f32 %v10125_v11, %v1380_v15  ;;  %v13818_v28 = vld [vmem:[#allocation61_spill] sm:$0xff] }
 0x2ad   :  { %v2930_v56 = vsel %vm1646_vm8, %v13807_v53, %v2929_v24  ;;  %v2225_v13 = vadd.f32 %v13810_v55, %v2003_v35  ;;  %v2226_v45 = vadd.f32 %v13811_v26, %v2004_v0  ;;  %v2005_v34 = vadd.f32 %v13812_v9, %v1782_v49 }
 0x2ae   :  { %v10335_v19 = vpop.permute.xlu1 %1308  ;;  %v1160_v63 = vadd.f32 %v10225_v1, %v13813_v51  ;;  %v3072_v41 = vadd.f32 %v3071_v32, %v3070_v59  ;;  %v2523_v16 = vadd.f32 %v10078_v25, %v2479_v58  ;;  %v2445_v42 = vadd.f32 %v13814_v33, %v2224_v52  ;;  %v13815_v59 = vld [vmem:[#allocation115_spill] sm:$0xff]  ;;  %v13816_v52 = vld [vmem:[#allocation10_spill] sm:$0xff] }
 0x2af   :  { %v1603_v11 = vadd.f32 %v10187_v21, %v1381_v12  ;;  %v3073_v15 = vsel %vm3047_vm10, %v2930_v56, 0.0  ;;  %v2932_v35 = vsel %vm1646_vm8, %v2929_v24, %v2931_v27  ;;  %v2006_v0 = vadd.f32 %v10143_v38, %v1783_v43  ;;  %v13817_v12 = vld [vmem:[#allocation9_spill] sm:$0xff] }
 0x2b0   :  { %v10359_v2 = vpop.permute.xlu0 %1088  ;;  %v1382_v49 = vadd.f32 %v10254_v40, %v1160_v63  ;;  %v2933_v1 = vrot.slane %v10391_v31, 4  ;;  %v10415_v53 = vmax.f32 %v2522_v7, 0.0  ;;  %v10417_v50 = vmax.f32 %v2524_v6, 0.0  ;;  %v13819_v40 = vld [vmem:[#allocation190_spill] sm:$0xff]  ;;  %v13820_v7 = vld [vmem:[#allocation116_spill] sm:$0xff] }
 0x2b1   :  { %v1784_v32 = vadd.f32 %v13815_v59, %v1602_v23  ;;  %v2525_v58 = vadd.f32 %v10078_v25, %v2481_v44  ;;  %v2446_v21 = vadd.f32 %v13816_v52, %v2225_v13  ;;  %v2447_v56 = vadd.f32 %v13817_v12, %v2226_v45  ;;  %v13821_v23 = vld [vmem:[#allocation94_spill] sm:$0xff] }
 0x2b2   :  { %v10357_v30 = vpop.permute.xlu1 %2368  ;;  %v2227_v24 = vadd.f32 %v13818_v28, %v2005_v34  ;;  %v10424_v43 = vmax.f32 %v2523_v16, 0.0  ;;  %v2482_v26 = vadd.f32 %v13819_v40, %v2445_v42  ;;  %v1785_v9 = vadd.f32 %v13820_v7, %v1603_v11  ;;  %v13822_v42 = vld [vmem:[#allocation196_spill] sm:$0xff]  ;;  %v13823_v11 = vld [vmem:[#allocation203_spill] sm:$0xff] }
 0x2b3   :  { %v3074_v6 = vadd.f32 %v3073_v15, %v3072_v41  ;;  %v3075_v51 = vsel %vm3047_vm10, %v2932_v35, 0.0  ;;  %v2228_v63 = vadd.f32 %v13821_v23, %v2006_v0  ;;  %v1604_v44 = vadd.f32 %v10241_v10, %v1382_v49 }
 0x2b4   :  { %v10381_v3 = vpop.permute.xlu0 %1090  ;;  %v2934_v13 = vsel %vm1646_vm8, %v2931_v27, %v2933_v1  ;;  %v2941_v45 = vrot.slane %v10415_v53, 4  ;;  %v2945_v34 = vrot.slane %v10417_v50, 4  ;;  %v2007_v16 = vadd.f32 %v10204_v62, %v1784_v32  ;;  %v13824_v1 = vld [vmem:[#allocation121_spill] sm:$0xff] }
 0x2b5   :  { %v10435_v33 = vmax.f32 %v2525_v58, 0.0  ;;  %v2483_v59 = vadd.f32 %v13822_v42, %v2446_v21  ;;  %v2484_v41 = vadd.f32 %v2447_v56, %v13823_v11  ;;  %v2448_v15 = vadd.f32 %v10103_v5, %v2227_v24  ;;  %v13825_v21 = vld [vmem:[#allocation136_spill] sm:$0xff] }
 0x2b6   :  { %v10379_v57 = vpop.permute.xlu1 %1310  ;;  %v2943_v10 = vrot.slane %v10424_v43, 4  ;;  %v2526_v27 = vadd.f32 %v10078_v25, %v2482_v26  ;;  %v2008_v49 = vadd.f32 %v10239_v17, %v1785_v9  ;;  %v1161_v62 = vadd.f32 %v10256_v37, %v13824_v1  ;;  %v13826_v26 = vld [vmem:[#allocation208_spill] sm:$0xff] }
 0x2b7   :  { %v3076_v32 = vadd.f32 %v3075_v51, %v3074_v6  ;;  %v3077_v58 = vsel %vm3047_vm10, %v2934_v13, 0.0  ;;  %v2449_v52 = vadd.f32 %v10164_v48, %v2228_v63  ;;  %v1786_v5 = vadd.f32 %v13825_v21, %v1604_v44  ;;  %v13827_v51 = vld [vmem:[#allocation124_spill] sm:$0xff] }
 0x2b8   :  { %v10405_v36 = vpop.permute.xlu0 %1530  ;;  %v2944_v12 = vsel %vm1646_vm8, %v2941_v45, %v2943_v10  ;;  %v2946_v56 = vsel %vm1646_vm8, %v2943_v10, %v2945_v34  ;;  %v1383_v28 = vadd.f32 %v10294_v4, %v1161_v62  ;;  %v2229_v24 = vadd.f32 %v10145_v8, %v2007_v16  ;;  %v13828_v13 = vld [vmem:[#allocation200_spill] sm:$0xff]  ;;  %v13829_v62 = vld [vmem:[#allocation206_spill] sm:$0xff] }
 0x2b9   :  { %v2947_v17 = vrot.slane %v10435_v33, 4  ;;  %v2527_v40 = vadd.f32 %v10078_v25, %v2483_v59  ;;  %v2528_v37 = vadd.f32 %v10078_v25, %v2484_v41  ;;  %v2485_v7 = vadd.f32 %v2448_v15, %v13826_v26  ;;  %v13832_v26 = vld [vmem:[#allocation141_spill] sm:$0xff] }
 0x2ba   :  { %v10403_v14 = vpop.permute.xlu1 %1931  ;;  %v10460_v6 = vmax.f32 %v2526_v27, 0.0  ;;  %v1162_v23 = vadd.f32 %v10296_v39, %v13827_v51  ;;  %v2450_v63 = vadd.f32 %v10357_v30, %v2229_v24  ;;  %v2230_v4 = vadd.f32 %v10206_v47, %v2008_v49 }
 0x2bb   :  { %v3078_v8 = vadd.f32 %v3077_v58, %v3076_v32  ;;  %v3087_v44 = vsel %vm3047_vm10, %v2944_v12, 0.0  ;;  %v2486_v45 = vadd.f32 %v13828_v13, %v2449_v52  ;;  %v2009_v16 = vadd.f32 %v10276_v20, %v1786_v5  ;;  %v13830_v52 = vld [vmem:[#allocation137_spill] sm:$0xff]  ;;  %v13831_v5 = vld [vmem:[#allocation210_spill] sm:$0xff] }
 0x2bc   :  { %v2152_v38 = vpop.permute.xlu0 %2151  ;;  %v3089_v42 = vsel %vm3047_vm10, %v2946_v56, 0.0  ;;  %v1605_v59 = vadd.f32 %v10278_v60, %v1383_v28  ;;  %v1384_v11 = vadd.f32 %v10311_v61, %v1162_v23  ;;  %v10472_v15 = vmax.f32 %v2527_v40, 0.0 }
 0x2bd   :  { %v10474_v39 = vmax.f32 %v2528_v37, 0.0  ;;  %v2529_v47 = vadd.f32 %v10078_v25, %v2485_v7  ;;  %v2231_v30 = vadd.f32 %v2152_v38, %v2009_v16  ;;  %v3088_v49 = vadd.f32 %v3087_v44, %v3078_v8 }
 0x2be   :  { %v2371_v55 = vpop.permute.xlu1 %2370  ;;  %v2948_v1 = vsel %vm1646_vm8, %v2945_v34, %v2947_v17  ;;  %v2949_v20 = vrot.slane %v10460_v6, 4  ;;  %v2487_v32 = vadd.f32 %v13829_v62, %v2450_v63  ;;  %v2530_v60 = vadd.f32 %v10078_v25, %v2486_v45  ;;  %v13833_v63 = vld [vmem:[#allocation214_spill] sm:$0xff]  ;;  %v13834_v45 = vld [vmem:[#allocation159_spill] sm:$0xff] }
 0x2bf   :  { %v2451_v41 = vadd.f32 %v2371_v55, %v2230_v4  ;;  %v3090_v55 = vadd.f32 %v3089_v42, %v3088_v49  ;;  %v1606_v58 = vadd.f32 %v10313_v54, %v1384_v11  ;;  %v1787_v21 = vadd.f32 %v13830_v52, %v1605_v59  ;;  %v13835_v49 = vld [vmem:[#allocation145_spill] sm:$0xff]  ;;  %v13836_v62 = vld [vmem:[#allocation158_spill] sm:$0xff] }
 0x2c0   :  { %v10442_v0 = vpop.permute.xlu0 %1312  ;;  %v3091_v38 = vsel %vm3047_vm10, %v2948_v1, 0.0  ;;  %v2951_v56 = vrot.slane %v10472_v15, 4  ;;  %v2953_v34 = vrot.slane %v10474_v39, 4  ;;  %v10487_v28 = vmax.f32 %v2529_v47, 0.0 }
 0x2c1   :  { %v2488_v12 = vadd.f32 %v2451_v41, %v13831_v5  ;;  %v2950_v37 = vsel %vm1646_vm8, %v2947_v17, %v2949_v20  ;;  %v1163_v7 = vadd.f32 %v10337_v18, %v13832_v26  ;;  %v2531_v54 = vadd.f32 %v10078_v25, %v2487_v32 }
 0x2c2   :  { %v10440_v35 = vpop.permute.xlu1 %1532  ;;  %v2010_v51 = vadd.f32 %v10403_v14, %v1787_v21  ;;  %v10494_v23 = vmax.f32 %v2530_v60, 0.0  ;;  %v3092_v8 = vadd.f32 %v3091_v38, %v3090_v55  ;;  %v1788_v16 = vadd.f32 %v13834_v45, %v1606_v58  ;;  %v13837_v58 = vld [vmem:[#allocation114_spill] sm:$0xff] }
 0x2c3   :  { %v2532_v44 = vadd.f32 %v10078_v25, %v2488_v12  ;;  %v3093_v42 = vsel %vm3047_vm10, %v2950_v37, 0.0  ;;  %v2952_v17 = vsel %vm1646_vm8, %v2949_v20, %v2951_v56  ;;  %v2954_v18 = vsel %vm1646_vm8, %v2951_v56, %v2953_v34 }
 0x2c4   :  { %v1934_v48 = vpop.permute.xlu0 %1933  ;;  %v2955_v59 = vrot.slane %v10487_v28, 4  ;;  %v10503_v41 = vmax.f32 %v2531_v54, 0.0  ;;  %v1385_v47 = vadd.f32 %v10335_v19, %v1163_v7  ;;  %v1164_v1 = vadd.f32 %v10359_v2, %v13835_v49  ;;  %v13838_v54 = vld [vmem:[#allocation160_spill] sm:$0xff]  ;;  %v13841_v49 = vld [vmem:[#allocation161_spill] sm:$0xff] }
 0x2c5   :  { %v1165_v20 = vadd.f32 %v10381_v3, %v13836_v62  ;;  %v3094_v19 = vadd.f32 %v3093_v42, %v3092_v8 }
 0x2c6   :  { %v2154_v9 = vpop.permute.xlu1 %2153  ;;  %v1607_v60 = vadd.f32 %v10405_v36, %v1385_v47  ;;  %v2956_v21 = vsel %vm1646_vm8, %v2953_v34, %v2955_v59  ;;  %v1386_v5 = vadd.f32 %v10379_v57, %v1164_v1  ;;  %v2959_v3 = vrot.slane %v10503_v41, 4 }
 0x2c7   :  { %v2232_v13 = vadd.f32 %v2154_v9, %v2010_v51  ;;  %v2957_v9 = vrot.slane %v10494_v23, 4  ;;  %v1387_v38 = vadd.f32 %v10442_v0, %v1165_v20  ;;  %v3099_v0 = vsel %vm3047_vm10, %v2956_v21, 0.0 }
 0x2c8   :  { %v2373_v27 = vpop.permute.xlu0 %2372  ;;  %v1608_v26 = vadd.f32 %v10440_v35, %v1386_v5  ;;  %v1789_v51 = vadd.f32 %v13838_v54, %v1607_v60  ;;  %v13842_v1 = vrot.slane %v13841_v49, 4 }
 0x2c9   :  { %v2452_v61 = vadd.f32 %v2373_v27, %v2231_v30  ;;  %v2011_v30 = vadd.f32 %v1934_v48, %v1788_v16  ;;  %v3095_v48 = vsel %vm3047_vm10, %v2952_v17, 0.0  ;;  %v2958_v37 = vsel %vm1646_vm8, %v2955_v59, %v2957_v9  ;;  %v13840_v59 = vld [vmem:[#allocation165_spill] sm:$0xff] }
 0x2ca   :  { %v1535_v10 = vpop.permute.xlu1 %1534  ;;  %v3096_v8 = vadd.f32 %v3095_v48, %v3094_v19  ;;  %v2960_v45 = vsel %vm1646_vm8, %v2957_v9, %v2959_v3 }
 0x2cb   :  { %v2489_v4 = vadd.f32 %v2452_v61, %v13833_v63  ;;  %v10513_v61 = vmax.f32 %v2532_v44, 0.0  ;;  %v1609_v57 = vadd.f32 %v1535_v10, %v1387_v38  ;;  %v13839_v63 = vld [vmem:[#allocation213_spill] sm:$0xff]  ;;  %v3103_v62 = vsel %vm3047_vm10, %v2960_v45, 0.0 }
 0x2cc   :  { %v1936_v40 = vpop.permute.xlu0 %1935 }
 0x2cd   :  { %v2533_v32 = vadd.f32 %v10078_v25, %v2489_v4  ;;  %v2961_v34 = vrot.slane %v10513_v61, 4  ;;  %v2012_v16 = vadd.f32 %v1936_v40, %v1789_v51  ;;  %v1791_v9 = vadd.f32 %v13842_v1, %v1609_v57 }
 0x2ce   :  { %v2156_v24 = vpop.permute.xlu1 %2155 }
 0x2cf   :  { %v2233_v55 = vadd.f32 %v2156_v24, %v2011_v30  ;;  %v3097_v24 = vsel %vm3047_vm10, %v2954_v18, 0.0  ;;  %v10525_v7 = vmax.f32 %v2533_v32, 0.0  ;;  %v3101_v18 = vsel %vm3047_vm10, %v2958_v37, 0.0 }
 0x2d0   :  { %v2375_v11 = vpop.permute.xlu0 %2374  ;;  %v3098_v17 = vadd.f32 %v3097_v24, %v3096_v8  ;;  %v2962_v47 = vsel %vm1646_vm8, %v2959_v3, %v2961_v34  ;;  %v13843_v3 = vld [vmem:[#allocation217_spill] sm:$0xff]  ;;  %v13844_v8 = vld [vmem:[#allocation132_spill] sm:$0xff] }
 0x2d1   :  { %v2453_v27 = vadd.f32 %v2375_v11, %v2232_v13  ;;  %v2963_v10 = vrot.slane %v10525_v7, 4  ;;  %v1790_v11 = vadd.f32 %v13840_v59, %v1608_v26  ;;  %v3105_v48 = vsel %vm3047_vm10, %v2962_v47, 0.0 }
 0x2d2   :  { %v1938_v14 = vpop.permute.xlu1 %1937  ;;  %v3100_v40 = vadd.f32 %v3099_v0, %v3098_v17 }
 0x2d3   :  { %v2490_v52 = vadd.f32 %v13837_v58, %v2453_v27  ;;  %v2964_v21 = vsel %vm1646_vm8, %v2961_v34, %v2963_v10 }
 0x2d4   :  { %v2158_v2 = vpop.permute.xlu0 %2157  ;;  %v3102_v19 = vadd.f32 %v3101_v18, %v3100_v40  ;;  %v3107_v51 = vsel %vm3047_vm10, %v2964_v21, 0.0 }
 0x2d5   :  { %v2534_v36 = vadd.f32 %v10078_v25, %v2490_v52  ;;  %v2234_v30 = vadd.f32 %v2158_v2, %v2012_v16 }
 0x2d6   :  { %v2377_v12 = vpop.permute.xlu1 %2376 }
 0x2d7   :  { %v2454_v56 = vadd.f32 %v2377_v12, %v2233_v55  ;;  %v10532_v42 = vmax.f32 %v2534_v36, 0.0  ;;  %v2013_v55 = vadd.f32 %v1938_v14, %v1790_v11  ;;  %v3104_v36 = vadd.f32 %v3103_v62, %v3102_v19 }
 0x2d8   :  { %v1940_v13 = vpop.permute.xlu0 %1939 }
 0x2d9   :  { %v2491_v4 = vadd.f32 %v13839_v63, %v2454_v56  ;;  %v2965_v60 = vrot.slane %v10532_v42, 4  ;;  %v2014_v58 = vadd.f32 %v1940_v13, %v1791_v9  ;;  %v3106_v54 = vadd.f32 %v3105_v48, %v3104_v36  ;;  %v896_v63 = vpop.f32.mrf.mxu1 }
 0x2da   :  { %v2160_v44 = vpop.permute.xlu1 %2159 }
 0x2db   :  { %v2535_v35 = vadd.f32 %v10078_v25, %v2491_v4  ;;  %v2235_v2 = vadd.f32 %v2160_v44, %v2013_v55  ;;  %v2966_v37 = vsel %vm1646_vm8, %v2963_v10, %v2965_v60  ;;  %v3108_v45 = vadd.f32 %v3107_v51, %v3106_v54 }
 0x2dc   :  { %v2379_v32 = vpop.permute.xlu0 %2378  ;;  %v3109_v13 = vsel %vm3047_vm10, %v2966_v37, 0.0  ;;  %v13848_v37 = vld [vmem:[#allocation82_spill] sm:$0xff] }
 0x2dd   :  { %v10539_v27 = vmax.f32 %v2535_v35, 0.0  ;;  %v2455_v52 = vadd.f32 %v2379_v32, %v2234_v30  ;;  %v3110_v10 = vadd.f32 %v3109_v13, %v3108_v45 }
 0x2de   :  { %v2162_v20 = vpop.permute.xlu1 %2161 }
 0x2df   :  { %v2967_v5 = vrot.slane %v10539_v27, 4  ;;  %v2236_v12 = vadd.f32 %v2162_v20, %v2014_v58  ;;  %v2492_v38 = vadd.f32 %v2455_v52, %v13843_v3 }
 0x2e0   :  { %v2381_v24 = vpop.permute.xlu0 %2380 }
 0x2e1   :  { %v2536_v14 = vadd.f32 %v10078_v25, %v2492_v38  ;;  %v2456_v57 = vadd.f32 %v2381_v24, %v2235_v2  ;;  %v2968_v34 = vsel %vm1646_vm8, %v2965_v60, %v2967_v5  ;;  %v13846_v38 = vld [vmem:[#allocation68_spill] sm:$0xff] }
 0x2e2   :  { %v2383_v56 = vpop.permute.xlu1 %2382  ;;  %v3111_v18 = vsel %vm3047_vm10, %v2968_v34, 0.0  ;;  %v13850_v34 = vld [vmem:[#allocation93_spill] sm:$0xff] }
 0x2e3   :  { %v2457_v26 = vadd.f32 %v2383_v56, %v2236_v12  ;;  %v10553_v4 = vmax.f32 %v2536_v14, 0.0  ;;  %v2493_v44 = vadd.f32 %v2456_v57, %v896_v63  ;;  %v3112_v49 = vadd.f32 %v3111_v18, %v3110_v10  ;;  %v13845_v12 = vld [vmem:[#allocation63_spill] sm:$0xff]  ;;  %v13847_v56 = vld [vmem:[#allocation133_spill] sm:$0xff] }
 0x2e5   :  { %v2494_v0 = vadd.f32 %v13844_v8, %v2457_v26  ;;  %v2969_v16 = vrot.slane %v10553_v4, 4  ;;  %v2537_v17 = vadd.f32 %v10078_v25, %v2493_v44  ;;  %v13849_v26 = vld [vmem:[#allocation14_spill] sm:$0xff]  ;;  %v13851_v44 = vld [vmem:[#allocation155_spill] sm:$0xff] }
 0x2e7   :  { %v2538_v35 = vadd.f32 %v10078_v25, %v2494_v0  ;;  %v2970_v59 = vsel %vm1646_vm8, %v2967_v5, %v2969_v16  ;;  %v10564_v47 = vmax.f32 %v2537_v17, 0.0  ;;  %v13852_v17 = vld [vmem:[#allocation156_spill] sm:$0xff] }
 0x2e8   :  { %v3113_v30 = vsel %vm3047_vm10, %v2970_v59, 0.0 }
 0x2e9   :  { %v10562_v11 = vmax.f32 %v2538_v35, 0.0  ;;  %v2971_v9 = vrot.slane %v10564_v47, 4  ;;  %v3114_v40 = vadd.f32 %v3113_v30, %v3112_v49 }
 0x2eb   :  { %v2973_v1 = vrot.slane %v10562_v11, 4  ;;  %v2972_v62 = vsel %vm1646_vm8, %v2969_v16, %v2971_v9 }
 0x2ec   :  { %v3115_v25 = vsel %vm3047_vm10, %v2972_v62, 0.0 }
 0x2ed   :  { %v2974_v20 = vsel %vm1646_vm8, %v2971_v9, %v2973_v1  ;;  %v3116_v32 = vadd.f32 %v3115_v25, %v3114_v40  ;;  %v13853_v1 = vld [vmem:[#allocation11_spill] sm:$0xff] }
 0x2ee   :  { %v3117_v60 = vsel %vm3047_vm10, %v2974_v20, 0.0  ;;  %v13854_v20 = vld [vmem:[#allocation70_spill] sm:$0xff] }
 0x2ef   :  { %v3118_v55 = vadd.f32 %v3117_v60, %v3116_v32 }
 0x2f1   :  { %v3119_v58 = vrot.slane %v3118_v55, 4 }
 0x2f3   :  { %v3120_v52 = vadd.f32 %v3119_v58, %v3118_v55  ;;  %v8019_v58 = vld [vmem:[%s13147_s5 + $0x1c] ss:$12 sps:$4 sm:$0xff]  }
 0x2f4   :  { %4143 = vmatprep.subr.bf16.mxu1 %v8019_v58 }
 0x2f5   :  { %v3121_v19 = vrot.slane %v3120_v52, 2 }
 0x2f7   :  { %v3122_v48 = vadd.f32 %v3121_v19, %v3120_v52 }
 0x2f9   :  { %v3123_v21 = vrot.slane %v3122_v48, 1 }
 0x2fb   :  { %v3124_v5 = vadd.f32 %v3123_v21, %v3122_v48  ;;  %v8017_v21 = vld [vmem:[%s13147_s5 + $0x18] ss:$12 sps:$4 sm:$0xff]  }
 0x2fc   :  { %4144 = vmatpush1.bf16.msra.mxu1 %v8017_v21 }
 0x2fd   :  { %v10573_v2 = vmul.f32 0.00390625, %v3124_v5  ;;  %v13855_v5 = vld [vmem:[#allocation16_spill] sm:$0xff] }
 0x2ff   :  { %v3127_v3 = vsub.f32 %v13845_v12, %v10573_v2  ;;  %v3128_v36 = vsub.f32 %v13846_v38, %v10573_v2  ;;  %v3129_v24 = vsub.f32 %v13847_v56, %v10573_v2  ;;  %v3130_v14 = vsub.f32 %v13848_v37, %v10573_v2 }
 0x300   :  { %v3131_v57 = vsub.f32 %v13849_v26, %v10573_v2  ;;  %v3132_v8 = vsub.f32 %v13850_v34, %v10573_v2  ;;  %v3133_v13 = vsub.f32 %v13851_v44, %v10573_v2  ;;  %v3134_v18 = vsub.f32 %v13852_v17, %v10573_v2 }
 0x301   :  { %v3201_v54 = vrot.slane %v3127_v3, 4  ;;  %v3202_v51 = vrot.slane %v3128_v36, 4  ;;  %v3204_v63 = vrot.slane %v3129_v24, 4  ;;  %v3206_v0 = vrot.slane %v3130_v14, 4 }
 0x302   :  { %v3208_v35 = vrot.slane %v3131_v57, 4  ;;  %v3210_v59 = vrot.slane %v3132_v8, 4  ;;  %v3135_v9 = vsub.f32 %v13853_v1, %v10573_v2  ;;  %v3212_v62 = vrot.slane %v3133_v13, 4 }
 0x303   :  { %v3203_v45 = vsel %vm1646_vm8, %v3201_v54, %v3202_v51  ;;  %v3205_v16 = vsel %vm1646_vm8, %v3202_v51, %v3204_v63  ;;  %v3207_v10 = vsel %vm1646_vm8, %v3204_v63, %v3206_v0  ;;  %v3136_v32 = vsub.f32 %v13854_v20, %v10573_v2  ;;  %v8020_v51 = vld [vmem:[%s13147_s5] ss:$12 sps:$4 sm:$0xff]  }
 0x304   :  { %v3346_v30 = vmul.f32 %v3203_v45, %v3203_v45  ;;  %v3347_v49 = vmul.f32 %v3205_v16, %v3205_v16  ;;  %v3209_v40 = vsel %vm1646_vm8, %v3206_v0, %v3208_v35  ;;  %v3348_v25 = vmul.f32 %v3207_v10, %v3207_v10  ;;  %v13856_v63 = vld [vmem:[#allocation60_spill] sm:$0xff]  ;;  %v8022_v16 = vld [vmem:[%s13147_s5 + $0x4] ss:$12 sps:$4 sm:$0xff]  }
 0x305   :  { %v3211_v60 = vsel %vm1646_vm8, %v3208_v35, %v3210_v59  ;;  %v3214_v55 = vrot.slane %v3134_v18, 4  ;;  %v3349_v52 = vmul.f32 %v3209_v40, %v3209_v40  ;;  %v3137_v3 = vsub.f32 %v13855_v5, %v10573_v2  ;;  %v13857_v10 = vld [vmem:[#allocation17_spill] sm:$0xff]  ;;  %4145 = vmatprep.subr.bf16.mxu1 %v8022_v16 }
 0x306   :  { %v3382_v19 = vsel %vm3047_vm10, %v3346_v30, 0.0  ;;  %v3383_v48 = vsel %vm3047_vm10, %v3347_v49, 0.0  ;;  %v3213_v36 = vsel %vm1646_vm8, %v3210_v59, %v3212_v62  ;;  %v3216_v24 = vrot.slane %v3135_v9, 4  ;;  %v8023_v40 = vld [vmem:[%s13147_s5 + $0x20] ss:$12 sps:$4 sm:$0xff]   ;;  %4146 = vmatpush1.bf16.msra.mxu1 %v8020_v51 }
 0x307   :  { %v3384_v14 = vadd.f32 %v3383_v48, %v3382_v19  ;;  %v3350_v57 = vmul.f32 %v3211_v60, %v3211_v60  ;;  %v3385_v54 = vsel %vm3047_vm10, %v3348_v25, 0.0  ;;  %v3138_v8 = vsub.f32 %v13856_v63, %v10573_v2  ;;  %7929 = vmatprep.subr.bf16.mxu0 %v8023_v40 }
 0x308   :  { %v3215_v0 = vsel %vm1646_vm8, %v3212_v62, %v3214_v55  ;;  %v3218_v13 = vrot.slane %v3136_v32, 4  ;;  %v3351_v35 = vmul.f32 %v3213_v36, %v3213_v36  ;;  %v3387_v18 = vsel %vm3047_vm10, %v3349_v52, 0.0  ;;  %v8024_v32 = vld [vmem:[%s13147_s5 + $0x8] ss:$12 sps:$4 sm:$0xff]   ;;  %7930 = vmatpush3.bf16.msra.mxu0 %v8023_v40  ;;  %s7564_s5 = sshll.u32 %s8087_s18, 4  ;;  %s7565_s5 = int_to_ptr.vmem [resolvable:$true] %s7564_s5 }
 0x309   :  { %v3386_v45 = vadd.f32 %v3385_v54, %v3384_v14  ;;  %v3139_v59 = vsub.f32 %v13857_v10, %v10573_v2  ;;  %v3217_v30 = vsel %vm1646_vm8, %v3214_v55, %v3216_v24  ;;  %v3220_v49 = vrot.slane %v3137_v3, 4  ;;  %7931 = vmatprep.subr.bf16.mxu0 %v8024_v32  ;;  %s8059_s19 = scalar_lea.vmem %s7565_s5, 32  ;;  %p8064_p1 = scmp.lt.s32.totalorder %s7565_s5, %s7565_s5 }
 0x30a   :  { %v3352_v62 = vmul.f32 %v3215_v0, %v3215_v0  ;;  %v3389_v25 = vsel %vm3047_vm10, %v3350_v57, 0.0  ;;  %v3140_v60 = vsub.f32 %v10292_v46, %v10573_v2  ;;  %v3219_v55 = vsel %vm1646_vm8, %v3216_v24, %v3218_v13  ;;  %p8060_p0 = scmp.ne.s32.totalorder %s7565_s5, %s8059_s19  ;;  %p8065_p2 = scmp.lt.s32.totalorder %s8059_s19, %s8059_s19 }
 0x30b   :  { %v3388_v9 = vadd.f32 %v3387_v18, %v3386_v45  ;;  %v3222_v58 = vrot.slane %v3138_v8, 4  ;;  %v3141_v19 = vsub.f32 %v10325_v29, %v10573_v2  ;;  %v3353_v48 = vmul.f32 %v3217_v30, %v3217_v30  ;;  %v13858_v45 = vld [vmem:[#allocation8_spill] sm:$0xff] }
 0x30c   :  { %v3391_v21 = vsel %vm3047_vm10, %v3351_v35, 0.0  ;;  %v3221_v3 = vsel %vm1646_vm8, %v3218_v13, %v3220_v49  ;;  %v3224_v36 = vrot.slane %v3139_v59, 4  ;;  %v3354_v57 = vmul.f32 %v3219_v55, %v3219_v55  ;;  %7717 = vmatmul.mubr.msk.bf16.vlgmr.msra.gmra.mxu1 %vm3047_vm10, %v13858_v45  ;;  %7933 = vmatprep.mubr.msk.bf16.mxu0 %vm3047_vm10, %v13858_v45  ;;  %p8066_p3 = por %p8065_p2, %p8064_p1 }
 0x30d   :  { %v3390_v52 = vadd.f32 %v3389_v25, %v3388_v9  ;;  %v3393_v54 = vsel %vm3047_vm10, %v3352_v62, 0.0  ;;  %v3142_v24 = vsub.f32 %v10361_v22, %v10573_v2  ;;  %v3223_v51 = vsel %vm1646_vm8, %v3220_v49, %v3222_v58  ;;  %7932 = vmatpush3.bf16.msra.mxu0 %v8024_v32 }
 0x30e   :  { %v3226_v8 = vrot.slane %v3140_v60, 4  ;;  %v3355_v13 = vmul.f32 %v3221_v3, %v3221_v3  ;;  %v3395_v16 = vsel %vm3047_vm10, %v3353_v48, 0.0  ;;  %v13859_v35 = vmov 0   ;;  %p8067_p4 = pnand %p8066_p3, %p8060_p0 }
 0x30f   :  { %v3392_v14 = vadd.f32 %v3391_v21, %v3390_v52  ;;  %4170 = vmatprep.mubr.bf16.mxu1 %v13859_v35  ;;  %v3143_v18 = vsub.f32 %v10391_v31, %v10573_v2  ;;  %v3225_v59 = vsel %vm1646_vm8, %v3222_v58, %v3224_v36  ;;  %v3228_v30 = vrot.slane %v3141_v19, 4 }
 0x310   :  { %v3147_v9 = vsub.f32 %v10415_v53, %v10573_v2  ;;  %v3356_v40 = vmul.f32 %v3223_v51, %v3223_v51  ;;  %v3397_v62 = vsel %vm3047_vm10, %v3354_v57, 0.0  ;;  %v3148_v25 = vsub.f32 %v10424_v43, %v10573_v2 }
 0x311   :  { %v3394_v0 = vadd.f32 %v3393_v54, %v3392_v14  ;;  %v3227_v32 = vsel %vm1646_vm8, %v3224_v36, %v3226_v8  ;;  %v3230_v60 = vrot.slane %v3142_v24, 4  ;;  %v3357_v52 = vmul.f32 %v3225_v59, %v3225_v59 }
 0x312   :  { %v3399_v48 = vsel %vm3047_vm10, %v3355_v13, 0.0  ;;  %v3149_v58 = vsub.f32 %v10417_v50, %v10573_v2  ;;  %v3229_v19 = vsel %vm1646_vm8, %v3226_v8, %v3228_v30  ;;  %v3232_v21 = vrot.slane %v3143_v18, 4 }
 0x313   :  { %v3396_v49 = vadd.f32 %v3395_v16, %v3394_v0  ;;  %v3150_v14 = vsub.f32 %v10435_v33, %v10573_v2  ;;  %v3358_v57 = vmul.f32 %v3227_v32, %v3227_v32  ;;  %v3401_v54 = vsel %vm3047_vm10, %v3356_v40, 0.0 }
 0x314   :  { %v3231_v36 = vsel %vm1646_vm8, %v3228_v30, %v3230_v60  ;;  %v3240_v24 = vrot.slane %v3147_v9, 4  ;;  %v3242_v51 = vrot.slane %v3148_v25, 4  ;;  %v3359_v45 = vmul.f32 %v3229_v19, %v3229_v19 }
 0x315   :  { %v3398_v55 = vadd.f32 %v3397_v62, %v3396_v49  ;;  %v3403_v13 = vsel %vm3047_vm10, %v3357_v52, 0.0  ;;  %v3151_v16 = vsub.f32 %v10460_v6, %v10573_v2  ;;  %v3233_v8 = vsel %vm1646_vm8, %v3230_v60, %v3232_v21 }
 0x316   :  { %v3244_v18 = vrot.slane %v3149_v58, 4  ;;  %v3360_v49 = vmul.f32 %v3231_v36, %v3231_v36  ;;  %v3405_v62 = vsel %vm3047_vm10, %v3358_v57, 0.0  ;;  %v3152_v40 = vsub.f32 %v10472_v15, %v10573_v2 }
 0x317   :  { %v3400_v3 = vadd.f32 %v3399_v48, %v3398_v55  ;;  %v3243_v30 = vsel %vm1646_vm8, %v3240_v24, %v3242_v51  ;;  %v3246_v9 = vrot.slane %v3150_v14, 4  ;;  %v3361_v32 = vmul.f32 %v3233_v8, %v3233_v8 }
 0x318   :  { %v3407_v55 = vsel %vm3047_vm10, %v3359_v45, 0.0  ;;  %v3153_v52 = vsub.f32 %v10474_v39, %v10573_v2  ;;  %v3245_v60 = vsel %vm1646_vm8, %v3242_v51, %v3244_v18  ;;  %v3248_v48 = vrot.slane %v3151_v16, 4 }
 0x319   :  { %v3402_v0 = vadd.f32 %v3401_v54, %v3400_v3  ;;  %v3366_v19 = vmul.f32 %v3243_v30, %v3243_v30  ;;  %v3409_v21 = vsel %vm3047_vm10, %v3360_v49, 0.0  ;;  %v3154_v3 = vsub.f32 %v10487_v28, %v10573_v2 }
 0x31a   :  { %v3247_v57 = vsel %vm1646_vm8, %v3244_v18, %v3246_v9  ;;  %v3250_v14 = vrot.slane %v3152_v40, 4  ;;  %v3367_v36 = vmul.f32 %v3245_v60, %v3245_v60  ;;  %v3411_v24 = vsel %vm3047_vm10, %v3361_v32, 0.0 }
 0x31b   :  { %v3404_v59 = vadd.f32 %v3403_v13, %v3402_v0  ;;  %v3155_v0 = vsub.f32 %v10494_v23, %v10573_v2  ;;  %v3249_v51 = vsel %vm1646_vm8, %v3246_v9, %v3248_v48  ;;  %v3252_v45 = vrot.slane %v3153_v52, 4 }
 0x31c   :  { %v3368_v16 = vmul.f32 %v3247_v57, %v3247_v57  ;;  %v3421_v8 = vsel %vm3047_vm10, %v3366_v19, 0.0  ;;  %v3251_v18 = vsel %vm1646_vm8, %v3248_v48, %v3250_v14  ;;  %v3254_v49 = vrot.slane %v3154_v3, 4 }
 0x31d   :  { %v3406_v25 = vadd.f32 %v3405_v62, %v3404_v59  ;;  %v3156_v59 = vsub.f32 %v10503_v41, %v10573_v2  ;;  %v3369_v40 = vmul.f32 %v3249_v51, %v3249_v51  ;;  %v3423_v30 = vsel %vm3047_vm10, %v3367_v36, 0.0 }
 0x31e   :  { %v3253_v9 = vsel %vm1646_vm8, %v3250_v14, %v3252_v45  ;;  %v3256_v32 = vrot.slane %v3155_v0, 4  ;;  %v3370_v52 = vmul.f32 %v3251_v18, %v3251_v18  ;;  %v3425_v60 = vsel %vm3047_vm10, %v3368_v16, 0.0 }
 0x31f   :  { %v3408_v58 = vadd.f32 %v3407_v55, %v3406_v25  ;;  %v3157_v25 = vsub.f32 %v10513_v61, %v10573_v2  ;;  %v3255_v48 = vsel %vm1646_vm8, %v3252_v45, %v3254_v49  ;;  %v3258_v19 = vrot.slane %v3156_v59, 4 }
 0x320   :  { %v3371_v3 = vmul.f32 %v3253_v9, %v3253_v9  ;;  %v3427_v57 = vsel %vm3047_vm10, %v3369_v40, 0.0  ;;  %v3257_v14 = vsel %vm1646_vm8, %v3254_v49, %v3256_v32  ;;  %v3372_v0 = vmul.f32 %v3255_v48, %v3255_v48 }
 0x321   :  { %v3410_v54 = vadd.f32 %v3409_v21, %v3408_v58  ;;  %v3158_v58 = vsub.f32 %v10525_v7, %v10573_v2  ;;  %v3260_v36 = vrot.slane %v3157_v25, 4  ;;  %v3429_v51 = vsel %vm3047_vm10, %v3370_v52, 0.0 }
 0x322   :  { %v3259_v45 = vsel %vm1646_vm8, %v3256_v32, %v3258_v19  ;;  %v3373_v59 = vmul.f32 %v3257_v14, %v3257_v14  ;;  %v3431_v18 = vsel %vm3047_vm10, %v3371_v3, 0.0  ;;  %v3433_v9 = vsel %vm3047_vm10, %v3372_v0, 0.0 }
 0x323   :  { %v3412_v13 = vadd.f32 %v3411_v24, %v3410_v54  ;;  %v3159_v54 = vsub.f32 %v10532_v42, %v10573_v2  ;;  %v3262_v16 = vrot.slane %v3158_v58, 4  ;;  %v3261_v49 = vsel %vm1646_vm8, %v3258_v19, %v3260_v36 }
 0x324   :  { %v3374_v25 = vmul.f32 %v3259_v45, %v3259_v45  ;;  %v3375_v58 = vmul.f32 %v3261_v49, %v3261_v49  ;;  %v3435_v48 = vsel %vm3047_vm10, %v3373_v59, 0.0 }
 0x325   :  { %v3422_v62 = vadd.f32 %v3421_v8, %v3412_v13  ;;  %v3160_v13 = vsub.f32 %v10539_v27, %v10573_v2  ;;  %v3264_v40 = vrot.slane %v3159_v54, 4  ;;  %v3263_v32 = vsel %vm1646_vm8, %v3260_v36, %v3262_v16 }
 0x326   :  { %v3376_v54 = vmul.f32 %v3263_v32, %v3263_v32  ;;  %v3437_v14 = vsel %vm3047_vm10, %v3374_v25, 0.0 }
 0x327   :  { %v3424_v55 = vadd.f32 %v3423_v30, %v3422_v62  ;;  %v3161_v62 = vsub.f32 %v10553_v4, %v10573_v2  ;;  %v3266_v52 = vrot.slane %v3160_v13, 4  ;;  %v3265_v19 = vsel %vm1646_vm8, %v3262_v16, %v3264_v40 }
 0x328   :  { %v3377_v36 = vmul.f32 %v3265_v19, %v3265_v19  ;;  %v3439_v13 = vsel %vm3047_vm10, %v3375_v58, 0.0  ;;  %v3441_v49 = vsel %vm3047_vm10, %v3376_v54, 0.0 }
 0x329   :  { %v3426_v21 = vadd.f32 %v3425_v60, %v3424_v55  ;;  %v3162_v55 = vsub.f32 %v10564_v47, %v10573_v2  ;;  %v3268_v3 = vrot.slane %v3161_v62, 4 }
 0x32a   :  { %v3443_v25 = vsel %vm3047_vm10, %v3377_v36, 0.0 }
 0x32b   :  { %v3428_v24 = vadd.f32 %v3427_v57, %v3426_v21  ;;  %v3163_v21 = vsub.f32 %v10562_v11, %v10573_v2  ;;  %v3270_v0 = vrot.slane %v3162_v55, 4  ;;  %v3269_v45 = vsel %vm1646_vm8, %v3266_v52, %v3268_v3 }
 0x32d   :  { %v3430_v8 = vadd.f32 %v3429_v51, %v3428_v24  ;;  %v3267_v24 = vsel %vm1646_vm8, %v3264_v40, %v3266_v52  ;;  %v3271_v16 = vsel %vm1646_vm8, %v3268_v3, %v3270_v0 }
 0x32e   :  { %v3380_v55 = vmul.f32 %v3271_v16, %v3271_v16 }
 0x32f   :  { %v3432_v30 = vadd.f32 %v3431_v18, %v3430_v8  ;;  %v3272_v8 = vrot.slane %v3163_v21, 4  ;;  %v3378_v18 = vmul.f32 %v3267_v24, %v3267_v24 }
 0x330   :  { %v3449_v21 = vsel %vm3047_vm10, %v3380_v55, 0.0 }
 0x331   :  { %v3434_v60 = vadd.f32 %v3433_v9, %v3432_v30  ;;  %v3379_v30 = vmul.f32 %v3269_v45, %v3269_v45  ;;  %v3273_v40 = vsel %vm1646_vm8, %v3270_v0, %v3272_v8  ;;  %v3445_v32 = vsel %vm3047_vm10, %v3378_v18, 0.0  ;;  %v3462_v8 = vld [vmem:[%s13145_s3] sm:$0x1] }
 0x332   :  { %v3381_v58 = vmul.f32 %v3273_v40, %v3273_v40  ;;  %v3755_v40 = vld [vmem:[#allocation3 + $0x120] ss:$2 sm:$0xff] }
 0x333   :  { %v3436_v57 = vadd.f32 %v3435_v48, %v3434_v60  ;;  %v3447_v52 = vsel %vm3047_vm10, %v3379_v30, 0.0  ;;  %v3624_v30 = vld [vmem:[#allocation3 + $0x89] ss:$2 sm:$0xff] }
 0x334   :  { %v3451_v3 = vsel %vm3047_vm10, %v3381_v58, 0.0 }
 0x335   :  { %v3438_v51 = vadd.f32 %v3437_v14, %v3436_v57 }
 0x337   :  { %v3440_v59 = vadd.f32 %v3439_v13, %v3438_v51 }
 0x339   :  { %v3442_v62 = vadd.f32 %v3441_v49, %v3440_v59  ;;  %v13860_v59 = vld [vmem:[#allocation7_spill] sm:$0xff] }
 0x33a   :  { %v10734_v18 = vsub.s32 0, %v13860_v59  ;;  %vm3643_vm12 = vcmp.lt.s32.totalorder %v13860_v59, 1  ;;  %vm3669_vm13 = vcmp.lt.s32.totalorder %v13860_v59, 7  ;;  %vm3695_vm14 = vcmp.lt.s32.totalorder %v13860_v59, 2 }
 0x33b   :  { %v3444_v9 = vadd.f32 %v3443_v25, %v3442_v62  ;;  %v3606_v62 = vld [vmem:[#allocation3 + $0x88] ss:$2 sm:$0xff]  ;;  %v3464_v25 = vld [vmem:[%s13146_s4] sm:$0x1]  ;;  %vm3721_vm15 = vcmp.lt.s32.totalorder %v13860_v59, 6 }
 0x33c   :  { %13861 = vst [vmem:[#allocation101_spill] sm:$0xff] %v10734_v18 }
 0x33d   :  { %v3446_v60 = vadd.f32 %v3445_v32, %v3444_v9  ;;  %v3773_v9 = vld [vmem:[#allocation3 + $0x121] ss:$2 sm:$0xff] }
 0x33f   :  { %v3448_v48 = vadd.f32 %v3447_v52, %v3446_v60  ;;  %v10743_v60 = vmax.f32 %v3606_v62, %v3624_v30 }
 0x341   :  { %v3450_v19 = vadd.f32 %v3449_v21, %v3448_v48  ;;  %v10749_v21 = vmax.f32 %v3755_v40, %v3773_v9 }
 0x343   :  { %v3452_v57 = vadd.f32 %v3451_v3, %v3450_v19 }
 0x345   :  { %v3453_v54 = vrot.slane %v3452_v57, 4 }
 0x347   :  { %v3454_v14 = vadd.f32 %v3453_v54, %v3452_v57 }
 0x349   :  { %v3455_v24 = vrot.slane %v3454_v14, 2 }
 0x34b   :  { %v3456_v51 = vadd.f32 %v3455_v24, %v3454_v14 }
 0x34d   :  { %v3457_v0 = vrot.slane %v3456_v51, 1 }
 0x34f   :  { %v3458_v36 = vadd.f32 %v3457_v0, %v3456_v51 }
 0x351   :  { %v3459_v13 = vmul.f32 0.00390625, %v3458_v36 }
 0x353   :  { %v3460_v45 = vadd.f32 1e-05, %v3459_v13 }
 0x355   :  { %8053 = vrsqrt.f32 %v3460_v45 }
 0x362   :  { %v8054_v49 = vpop.eup %8053 }
 0x363   :  { %v3463_v16 = vmul.f32 %v8054_v49, %v3462_v8 }
 0x365   :  { %v3465_v55 = vmul.f32 %v3463_v16, %v10573_v2  ;;  %v10741_v32 = vrot.slane %v3463_v16, %v10734_v18 }
 0x367   :  { %v3466_v58 = vsub.f32 %v3464_v25, %v3465_v55  ;;  %v3504_v52 = vmul.f32 %v10741_v32, %v10553_v4  ;;  %v3505_v48 = vmul.f32 %v10741_v32, %v10564_v47  ;;  %v3506_v19 = vmul.f32 %v10741_v32, %v10562_v11 }
 0x368   :  { %v3473_v2 = vmul.f32 %v10741_v32, %v13845_v12  ;;  %v3474_v3 = vmul.f32 %v10741_v32, %v13846_v38  ;;  %v3475_v57 = vmul.f32 %v10741_v32, %v13847_v56  ;;  %v3476_v4 = vmul.f32 %v10741_v32, %v13848_v37 }
 0x369   :  { %v10760_v54 = vrot.slane %v3466_v58, %v10734_v18  ;;  %v3477_v47 = vmul.f32 %v10741_v32, %v13849_v26  ;;  %v3478_v11 = vmul.f32 %v10741_v32, %v13850_v34  ;;  %v3479_v12 = vmul.f32 %v10741_v32, %v13851_v44 }
 0x36a   :  { %v3480_v38 = vmul.f32 %v10741_v32, %v13852_v17  ;;  %v3481_v56 = vmul.f32 %v10741_v32, %v13853_v1  ;;  %v3482_v14 = vmul.f32 %v10741_v32, %v13854_v20  ;;  %v3483_v34 = vmul.f32 %v10741_v32, %v13855_v5 }
 0x36b   :  { %v3544_v37 = vadd.f32 %v10760_v54, %v3504_v52  ;;  %v3545_v24 = vadd.f32 %v10760_v54, %v3505_v48  ;;  %v3546_v26 = vadd.f32 %v10760_v54, %v3506_v19  ;;  %v3484_v44 = vmul.f32 %v10741_v32, %v13856_v63 }
 0x36c   :  { %v3485_v17 = vmul.f32 %v10741_v32, %v13857_v10  ;;  %v3486_v1 = vmul.f32 %v10741_v32, %v10292_v46  ;;  %v3487_v20 = vmul.f32 %v10741_v32, %v10325_v29  ;;  %v3488_v5 = vmul.f32 %v10741_v32, %v10361_v22 }
 0x36d   :  { %3586 = vst.msk [vmem:[#allocation3 + $0x10c] sm:$0xff] %vm3047_vm10, %v3544_v37  ;;  %3587 = vst.msk [vmem:[#allocation3 + $0x114] sm:$0xff] %vm3047_vm10, %v3545_v24  ;;  %v3489_v63 = vmul.f32 %v10741_v32, %v10391_v31  ;;  %v3490_v10 = vmul.f32 %v10741_v32, %v10415_v53  ;;  %v3491_v46 = vmul.f32 %v10741_v32, %v10424_v43  ;;  %v3642_v37 = vrot.slane %v10743_v60, 7 }
 0x36e   :  { %3588 = vst.msk [vmem:[#allocation3 + $0x11c] sm:$0xf] %vm3567_vm3, %v3546_v26  ;;  %v3492_v29 = vmul.f32 %v10741_v32, %v10417_v50  ;;  %v3493_v51 = vmul.f32 %v10741_v32, %v10435_v33  ;;  %v3494_v0 = vmul.f32 %v10741_v32, %v10460_v6  ;;  %v3495_v22 = vmul.f32 %v10741_v32, %v10472_v15 }
 0x36f   :  { %v3496_v31 = vmul.f32 %v10741_v32, %v10474_v39  ;;  %v3497_v53 = vmul.f32 %v10741_v32, %v10487_v28  ;;  %v3498_v43 = vmul.f32 %v10741_v32, %v10494_v23  ;;  %v3499_v50 = vmul.f32 %v10741_v32, %v10503_v41 }
 0x370   :  { %v3500_v33 = vmul.f32 %v10741_v32, %v10513_v61  ;;  %v3501_v6 = vmul.f32 %v10741_v32, %v10525_v7  ;;  %v3502_v15 = vmul.f32 %v10741_v32, %v10532_v42  ;;  %v3513_v39 = vadd.f32 %v10760_v54, %v3473_v2 }
 0x371   :  { %v3514_v36 = vadd.f32 %v10760_v54, %v3474_v3  ;;  %v3515_v28 = vadd.f32 %v10760_v54, %v3475_v57  ;;  %v3516_v23 = vadd.f32 %v10760_v54, %v3476_v4  ;;  %v3517_v13 = vadd.f32 %v10760_v54, %v3477_v47 }
 0x372   :  { %v3518_v41 = vadd.f32 %v10760_v54, %v3478_v11  ;;  %v3519_v61 = vadd.f32 %v10760_v54, %v3479_v12  ;;  %v3520_v45 = vadd.f32 %v10760_v54, %v3480_v38  ;;  %v3521_v7 = vadd.f32 %v10760_v54, %v3481_v56  ;;  %3551 = vst.msk [vmem:[#allocation3 + $0x4] sm:$0xf0] %vm3550_vm11, %v3513_v39 }
 0x373   :  { %v3522_v42 = vadd.f32 %v10760_v54, %v3482_v14  ;;  %v3523_v8 = vadd.f32 %v10760_v54, %v3483_v34  ;;  %v3524_v49 = vadd.f32 %v10760_v54, %v3484_v44  ;;  %v3525_v16 = vadd.f32 %v10760_v54, %v3485_v17  ;;  %3552 = vst.msk [vmem:[#allocation3 + $0xc] sm:$0xff] %vm3047_vm10, %v3514_v36 }
 0x374   :  { %3553 = vst.msk [vmem:[#allocation3 + $0x14] sm:$0xff] %vm3047_vm10, %v3515_v28  ;;  %3554 = vst.msk [vmem:[#allocation3 + $0x1c] sm:$0xff] %vm3047_vm10, %v3516_v23  ;;  %v3526_v25 = vadd.f32 %v10760_v54, %v3486_v1  ;;  %v3527_v40 = vadd.f32 %v10760_v54, %v3487_v20  ;;  %v3528_v9 = vadd.f32 %v10760_v54, %v3488_v5  ;;  %v3668_v24 = vrot.slane %v10743_v60, 1 }
 0x375   :  { %3555 = vst.msk [vmem:[#allocation3 + $0x24] sm:$0xff] %vm3047_vm10, %v3517_v13  ;;  %v3753_v62 = vld [vmem:[#allocation3 + $0x110] ss:$2 sm:$0xff]  ;;  %v3771_v30 = vld [vmem:[#allocation3 + $0x111] ss:$2 sm:$0xff]  ;;  %v3529_v55 = vadd.f32 %v10760_v54, %v3489_v63  ;;  %3556 = vst.msk [vmem:[#allocation3 + $0x2c] sm:$0xff] %vm3047_vm10, %v3518_v41  ;;  %v3503_v58 = vmul.f32 %v10741_v32, %v10539_v27  ;;  %v3530_v52 = vadd.f32 %v10760_v54, %v3490_v10 }
 0x376   :  { %3557 = vst.msk [vmem:[#allocation3 + $0x34] sm:$0xff] %vm3047_vm10, %v3519_v61  ;;  %3558 = vst.msk [vmem:[#allocation3 + $0x3c] sm:$0xff] %vm3047_vm10, %v3520_v45  ;;  %v3531_v48 = vadd.f32 %v10760_v54, %v3491_v46  ;;  %v3532_v19 = vadd.f32 %v10760_v54, %v3492_v29  ;;  %v3533_v2 = vadd.f32 %v10760_v54, %v3493_v51  ;;  %v3720_v26 = vrot.slane %v10743_v60, 2 }
 0x377   :  { %3559 = vst.msk [vmem:[#allocation3 + $0x44] sm:$0xff] %vm3047_vm10, %v3521_v7  ;;  %3560 = vst.msk [vmem:[#allocation3 + $0x4c] sm:$0xff] %vm3047_vm10, %v3522_v42  ;;  %v3534_v3 = vadd.f32 %v10760_v54, %v3494_v0  ;;  %v3535_v27 = vadd.f32 %v10760_v54, %v3495_v22  ;;  %v3536_v32 = vadd.f32 %v10760_v54, %v3496_v31  ;;  %v3791_v34 = vrot.slane %v10749_v21, 7 }
 0x378   :  { %3561 = vst.msk [vmem:[#allocation3 + $0x54] sm:$0xff] %vm3047_vm10, %v3523_v8  ;;  %3562 = vst.msk [vmem:[#allocation3 + $0x5c] sm:$0xff] %vm3047_vm10, %v3524_v49  ;;  %v10865_v57 = vmax.f32 %v3753_v62, %v3771_v30  ;;  %v3537_v4 = vadd.f32 %v10760_v54, %v3497_v53  ;;  %v3538_v47 = vadd.f32 %v10760_v54, %v3498_v43  ;;  %v3816_v17 = vrot.slane %v10749_v21, 1 }
 0x379   :  { %3563 = vst.msk [vmem:[#allocation3 + $0x64] sm:$0xff] %vm3047_vm10, %v3525_v16  ;;  %3564 = vst.msk [vmem:[#allocation3 + $0x6c] sm:$0xff] %vm3047_vm10, %v3526_v25  ;;  %v3539_v11 = vadd.f32 %v10760_v54, %v3499_v50  ;;  %v3540_v12 = vadd.f32 %v10760_v54, %v3500_v33  ;;  %v3541_v38 = vadd.f32 %v10760_v54, %v3501_v6  ;;  %v3841_v1 = vrot.slane %v10749_v21, 6 }
 0x37a   :  { %3565 = vst.msk [vmem:[#allocation3 + $0x74] sm:$0xff] %vm3047_vm10, %v3527_v40  ;;  %3566 = vst.msk [vmem:[#allocation3 + $0x7c] sm:$0xff] %vm3047_vm10, %v3528_v9  ;;  %v3542_v56 = vadd.f32 %v10760_v54, %v3502_v15  ;;  %v3543_v14 = vadd.f32 %v10760_v54, %v3503_v58  ;;  %v3694_v54 = vrot.slane %v10743_v60, 6  ;;  %v3790_v44 = vrot.slane %v10865_v57, 7 }
 0x37b   :  { %3568 = vst.msk [vmem:[#allocation3 + $0x84] sm:$0xf] %vm3567_vm3, %v3529_v55  ;;  %v3866_v20 = vrot.slane %v10749_v21, 2  ;;  %v3590_v5 = vld [vmem:[#allocation3 + $0x8] ss:$2 sm:$0xff]  ;;  %v3815_v10 = vrot.slane %v10865_v57, 1 }
 0x37c   :  { %3572 = vst.msk [vmem:[#allocation3 + $0x9c] sm:$0xf0] %vm3550_vm11, %v3530_v52  ;;  %v3592_v63 = vld [vmem:[#allocation3 + $0x18] ss:$2 sm:$0xff]  ;;  %v3840_v46 = vrot.slane %v10865_v57, 6 }
 0x37d   :  { %3573 = vst.msk [vmem:[#allocation3 + $0xa4] sm:$0xff] %vm3047_vm10, %v3531_v48  ;;  %3574 = vst.msk [vmem:[#allocation3 + $0xac] sm:$0xff] %vm3047_vm10, %v3532_v19  ;;  %v3608_v51 = vld [vmem:[#allocation3 + $0x9] ss:$2 sm:$0xff]  ;;  %v3610_v0 = vld [vmem:[#allocation3 + $0x19] ss:$2 sm:$0xff] }
 0x37e   :  { %3575 = vst.msk [vmem:[#allocation3 + $0xb4] sm:$0xff] %vm3047_vm10, %v3533_v2  ;;  %3576 = vst.msk [vmem:[#allocation3 + $0xbc] sm:$0xff] %vm3047_vm10, %v3534_v3  ;;  %v3594_v22 = vld [vmem:[#allocation3 + $0x28] ss:$2 sm:$0xff]  ;;  %v3596_v50 = vld [vmem:[#allocation3 + $0x38] ss:$2 sm:$0xff]  ;;  %v10908_v36 = vmax.f32 %v3590_v5, %v3608_v51  ;;  %v10913_v7 = vmax.f32 %v3592_v63, %v3610_v0 }
 0x37f   :  { %3577 = vst.msk [vmem:[#allocation3 + $0xc4] sm:$0xff] %vm3047_vm10, %v3535_v27  ;;  %3578 = vst.msk [vmem:[#allocation3 + $0xcc] sm:$0xff] %vm3047_vm10, %v3536_v32  ;;  %v3598_v29 = vld [vmem:[#allocation3 + $0x48] ss:$2 sm:$0xff]  ;;  %v3616_v53 = vld [vmem:[#allocation3 + $0x49] ss:$2 sm:$0xff] }
 0x380   :  { %3579 = vst.msk [vmem:[#allocation3 + $0xd4] sm:$0xff] %vm3047_vm10, %v3537_v4  ;;  %3580 = vst.msk [vmem:[#allocation3 + $0xdc] sm:$0xff] %vm3047_vm10, %v3538_v47  ;;  %v3600_v31 = vld [vmem:[#allocation3 + $0x58] ss:$2 sm:$0xff]  ;;  %v3618_v43 = vld [vmem:[#allocation3 + $0x59] ss:$2 sm:$0xff]  ;;  %v10910_v28 = vmax.f32 %v3598_v29, %v3616_v53 }
 0x381   :  { %3581 = vst.msk [vmem:[#allocation3 + $0xe4] sm:$0xff] %vm3047_vm10, %v3539_v11  ;;  %3582 = vst.msk [vmem:[#allocation3 + $0xec] sm:$0xff] %vm3047_vm10, %v3540_v12  ;;  %v3602_v33 = vld [vmem:[#allocation3 + $0x68] ss:$2 sm:$0xff]  ;;  %v3612_v6 = vld [vmem:[#allocation3 + $0x29] ss:$2 sm:$0xff]  ;;  %v10923_v9 = vmax.f32 %v3600_v31, %v3618_v43 }
 0x382   :  { %3583 = vst.msk [vmem:[#allocation3 + $0xf4] sm:$0xff] %vm3047_vm10, %v3541_v38  ;;  %3584 = vst.msk [vmem:[#allocation3 + $0xfc] sm:$0xff] %vm3047_vm10, %v3542_v56  ;;  %v13862_v15 = vmov -1e+30   ;;  %v3614_v39 = vld [vmem:[#allocation3 + $0x39] ss:$2 sm:$0xff]  ;;  %v10919_v16 = vmax.f32 %v3594_v22, %v3612_v6 }
 0x383   :  { %3585 = vst.msk [vmem:[#allocation3 + $0x104] sm:$0xff] %vm3047_vm10, %v3543_v14  ;;  %5881 = vst.msk [vmem:[#allocation3 + $0x48] sm:$0xff] %vm3047_vm10, %v13862_v15  ;;  %v3604_v41 = vld [vmem:[#allocation3 + $0x78] ss:$2 sm:$0xff]  ;;  %v3620_v61 = vld [vmem:[#allocation3 + $0x69] ss:$2 sm:$0xff]  ;;  %v10921_v62 = vmax.f32 %v3596_v50, %v3614_v39 }
 0x384   :  { %5882 = vst.msk [vmem:[#allocation3 + $0x50] sm:$0xff] %vm3047_vm10, %v13862_v15  ;;  %5892 = vst.msk [vmem:[#allocation3 + $0x58] sm:$0xff] %vm3047_vm10, %v13862_v15  ;;  %v3739_v23 = vld [vmem:[#allocation3 + $0xa0] ss:$2 sm:$0xff]  ;;  %v3757_v13 = vld [vmem:[#allocation3 + $0xa1] ss:$2 sm:$0xff]  ;;  %v10927_v19 = vmax.f32 %v3602_v33, %v3620_v61 }
 0x385   :  { %v3622_v45 = vld [vmem:[#allocation3 + $0x79] ss:$2 sm:$0xff]  ;;  %5893 = vst.msk [vmem:[#allocation3 + $0xa0] sm:$0xff] %vm3047_vm10, %v13862_v15  ;;  %5894 = vst.msk [vmem:[#allocation3 + $0xa8] sm:$0xff] %vm3047_vm10, %v13862_v15  ;;  %v3664_v55 = vrot.slane %v10910_v28, 1  ;;  %v3634_v48 = vrot.slane %v10908_v36, 7  ;;  %v10935_v56 = vmax.f32 %v3739_v23, %v3757_v13 }
 0x386   :  { %v3743_v42 = vld [vmem:[#allocation3 + $0xc0] ss:$2 sm:$0xff]  ;;  %v3761_v25 = vld [vmem:[#allocation3 + $0xc1] ss:$2 sm:$0xff]  ;;  %v10929_v2 = vmax.f32 %v3604_v41, %v3622_v45  ;;  %v3716_v3 = vrot.slane %v10910_v28, 2  ;;  %v3635_v32 = vrot.slane %v10913_v7, 7 }
 0x387   :  { %v3741_v27 = vld [vmem:[#allocation3 + $0xb0] ss:$2 sm:$0xff]  ;;  %v3660_v4 = vrot.slane %v10908_v36, 1  ;;  %v3661_v47 = vrot.slane %v10913_v7, 1  ;;  %v3759_v12 = vld [vmem:[#allocation3 + $0xb1] ss:$2 sm:$0xff]  ;;  %v10937_v14 = vmax.f32 %v3743_v42, %v3761_v25  ;;  %v3651_v63 = vsel %vm3643_vm12, %v3642_v37, %v3634_v48 }
 0x388   :  { %v3747_v8 = vld [vmem:[#allocation3 + $0xe0] ss:$2 sm:$0xff]  ;;  %v3765_v40 = vld [vmem:[#allocation3 + $0xe1] ss:$2 sm:$0xff]  ;;  %v3745_v11 = vld [vmem:[#allocation3 + $0xd0] ss:$2 sm:$0xff]  ;;  %v3650_v0 = vsel %vm3643_vm12, %v3634_v48, %v3635_v32  ;;  %v3652_v22 = vmax.f32 %v10908_v36, %v3651_v63  ;;  %v10960_v39 = vmax.f32 %v3741_v27, %v3759_v12 }
 0x389   :  { %v3749_v49 = vld [vmem:[#allocation3 + $0xf0] ss:$2 sm:$0xff]  ;;  %v3767_v58 = vld [vmem:[#allocation3 + $0xf1] ss:$2 sm:$0xff]  ;;  %v10939_v5 = vmax.f32 %v3747_v8, %v3765_v40  ;;  %v3653_v31 = vmax.f32 %v10913_v7, %v3650_v0  ;;  %v3662_v53 = vrot.slane %v10919_v16, 1  ;;  %v3677_v43 = vsel %vm3669_vm13, %v3660_v4, %v3661_v47 }
 0x38a   :  { %v3751_v30 = vld [vmem:[#allocation3 + $0x100] ss:$2 sm:$0xff]  ;;  %v3769_v52 = vld [vmem:[#allocation3 + $0x101] ss:$2 sm:$0xff]  ;;  %v3763_v38 = vld [vmem:[#allocation3 + $0xd1] ss:$2 sm:$0xff]  ;;  %v10945_v29 = vmax.f32 %v3749_v49, %v3767_v58  ;;  %v3678_v37 = vmax.f32 %v3652_v22, %v3677_v43 }
 0x38b   :  { %v10947_v51 = vmax.f32 %v3751_v30, %v3769_v52  ;;  %v3686_v50 = vrot.slane %v10908_v36, 6  ;;  %v10957_v33 = vmax.f32 %v3745_v11, %v3763_v38  ;;  %v3687_v6 = vrot.slane %v10913_v7, 6 }
 0x38c   :  { %v3787_v23 = vrot.slane %v10939_v5, 7  ;;  %v3676_v13 = vsel %vm3669_vm13, %v3661_v47, %v3662_v53  ;;  %v3712_v41 = vrot.slane %v10908_v36, 2  ;;  %v3713_v61 = vrot.slane %v10913_v7, 2 }
 0x38d   :  { %v3788_v45 = vrot.slane %v10945_v29, 7  ;;  %v3789_v42 = vrot.slane %v10947_v51, 7  ;;  %v3679_v8 = vmax.f32 %v3653_v31, %v3676_v13  ;;  %v3703_v49 = vsel %vm3695_vm14, %v3694_v54, %v3686_v50 }
 0x38e   :  { %v3702_v30 = vsel %vm3695_vm14, %v3686_v50, %v3687_v6  ;;  %v3704_v25 = vmax.f32 %v3678_v37, %v3703_v49  ;;  %v3714_v40 = vrot.slane %v10919_v16, 2  ;;  %v3729_v36 = vsel %vm3721_vm15, %v3712_v41, %v3713_v61 }
 0x38f   :  { %v3705_v7 = vmax.f32 %v3679_v8, %v3702_v30  ;;  %v3636_v58 = vrot.slane %v10919_v16, 7  ;;  %v3637_v52 = vrot.slane %v10921_v62, 7  ;;  %v3663_v48 = vrot.slane %v10921_v62, 1 }
 0x390   :  { %v3728_v27 = vsel %vm3721_vm15, %v3713_v61, %v3714_v40  ;;  %v3730_v54 = vmax.f32 %v3704_v25, %v3729_v36  ;;  %v3688_v4 = vrot.slane %v10919_v16, 6  ;;  %v3689_v47 = vrot.slane %v10921_v62, 6 }
 0x391   :  { %v3731_v11 = vmax.f32 %v3705_v7, %v3728_v27  ;;  %v3648_v12 = vsel %vm3643_vm12, %v3636_v58, %v3637_v52  ;;  %v3649_v38 = vsel %vm3643_vm12, %v3635_v32, %v3636_v58  ;;  %v3674_v63 = vsel %vm3669_vm13, %v3663_v48, %v3664_v55 }
 0x392   :  { %v7818_v0 = vpack.c.bf16 %v3730_v54, %v3730_v54  ;;  %v3654_v22 = vmax.f32 %v10919_v16, %v3649_v38  ;;  %v3655_v31 = vmax.f32 %v10921_v62, %v3648_v12  ;;  %v3675_v43 = vsel %vm3669_vm13, %v3662_v53, %v3663_v48 }
 0x393   :  { %v7819_v50 = vpack.c.bf16 %v3731_v11, %v3731_v11  ;;  %v3700_v37 = vsel %vm3695_vm14, %v3688_v4, %v3689_v47  ;;  %v3701_v32 = vsel %vm3695_vm14, %v3687_v6, %v3688_v4  ;;  %v3715_v13 = vrot.slane %v10921_v62, 2 }
 0x394   :  { %3919 = vst.msk [vmem:[#allocation2 + $0x8] sm:$0xf] %vm3567_vm3, %v7818_v0  ;;  %v3680_v41 = vmax.f32 %v3654_v22, %v3675_v43  ;;  %v3681_v61 = vmax.f32 %v3655_v31, %v3674_v63  ;;  %v3638_v16 = vrot.slane %v10910_v28, 7  ;;  %v3639_v8 = vrot.slane %v10923_v9, 7 }
 0x395   :  { %3920 = vst.msk [vmem:[#allocation2 + $0xc] sm:$0xf] %vm3567_vm3, %v7819_v50  ;;  %v3726_v53 = vsel %vm3721_vm15, %v3715_v13, %v3716_v3  ;;  %v3727_v6 = vsel %vm3721_vm15, %v3714_v40, %v3715_v13  ;;  %v3665_v62 = vrot.slane %v10923_v9, 1  ;;  %v3666_v49 = vrot.slane %v10927_v19, 1 }
 0x396   :  { %v3706_v30 = vmax.f32 %v3680_v41, %v3701_v32  ;;  %v3707_v25 = vmax.f32 %v3681_v61, %v3700_v37  ;;  %v3646_v36 = vsel %vm3643_vm12, %v3638_v16, %v3639_v8  ;;  %v3647_v7 = vsel %vm3643_vm12, %v3637_v52, %v3638_v16 }
 0x397   :  { %v3656_v58 = vmax.f32 %v10910_v28, %v3647_v7  ;;  %v3657_v48 = vmax.f32 %v10923_v9, %v3646_v36  ;;  %v3672_v27 = vsel %vm3669_vm13, %v3665_v62, %v3666_v49  ;;  %v3673_v40 = vsel %vm3669_vm13, %v3664_v55, %v3665_v62 }
 0x398   :  { %v3732_v54 = vmax.f32 %v3706_v30, %v3727_v6  ;;  %v3733_v4 = vmax.f32 %v3707_v25, %v3726_v53  ;;  %v3690_v11 = vrot.slane %v10910_v28, 6  ;;  %v3691_v12 = vrot.slane %v10923_v9, 6 }
 0x399   :  { %v3682_v38 = vmax.f32 %v3656_v58, %v3673_v40  ;;  %v3683_v52 = vmax.f32 %v3657_v48, %v3672_v27  ;;  %v3717_v63 = vrot.slane %v10923_v9, 2  ;;  %v3718_v0 = vrot.slane %v10927_v19, 2 }
 0x39a   :  { %v7820_v22 = vpack.c.bf16 %v3732_v54, %v3732_v54  ;;  %v7821_v31 = vpack.c.bf16 %v3733_v4, %v3733_v4  ;;  %v3698_v43 = vsel %vm3695_vm14, %v3690_v11, %v3691_v12  ;;  %v3699_v55 = vsel %vm3695_vm14, %v3689_v47, %v3690_v11 }
 0x39b   :  { %v3708_v50 = vmax.f32 %v3682_v38, %v3699_v55  ;;  %v3709_v37 = vmax.f32 %v3683_v52, %v3698_v43  ;;  %v3724_v32 = vsel %vm3721_vm15, %v3717_v63, %v3718_v0  ;;  %v3725_v9 = vsel %vm3721_vm15, %v3716_v3, %v3717_v63 }
 0x39c   :  { %v8025_v13 = vld [vmem:[#allocation2 + $0x8] sm:$0xff]   ;;  %3921 = vst.msk [vmem:[#allocation2 + $0x10] sm:$0xf] %vm3567_vm3, %v7820_v22  ;;  %3922 = vst.msk [vmem:[#allocation2 + $0x14] sm:$0xf] %vm3567_vm3, %v7821_v31  ;;  %v3640_v41 = vrot.slane %v10927_v19, 7  ;;  %v11051_v28 = vsel %vm3643_vm12, %v3787_v23, %v3788_v45 }
 0x39d   :  { %v3641_v61 = vrot.slane %v10929_v2, 7  ;;  %v3667_v47 = vrot.slane %v10929_v2, 1  ;;  %v3734_v3 = vmax.f32 %v3708_v50, %v3725_v9  ;;  %v3735_v16 = vmax.f32 %v3709_v37, %v3724_v32  ;;  %7718 = vmatmul.mubr.msk.bf16.gmra.mxu1 %vm3047_vm10, %v8025_v13  ;;  %7934 = vmatmul.mubr.msk.bf16.vlgmr.msra.gmra.mxu0 %vm3047_vm10, %v8025_v13 }
 0x39e   :  { %v3692_v53 = vrot.slane %v10927_v19, 6  ;;  %v3693_v6 = vrot.slane %v10929_v2, 6  ;;  %v3645_v30 = vsel %vm3643_vm12, %v3639_v8, %v3640_v41  ;;  %v3719_v36 = vrot.slane %v10929_v2, 2  ;;  %4180 = vmatprep.mubr.bf16.mxu1 %v13859_v35 }
 0x39f   :  { %v3644_v62 = vsel %vm3643_vm12, %v3640_v41, %v3641_v61  ;;  %v3670_v25 = vsel %vm3669_vm13, %v3667_v47, %v3668_v24  ;;  %v7822_v7 = vpack.c.bf16 %v3734_v3, %v3734_v3  ;;  %v7823_v58 = vpack.c.bf16 %v3735_v16, %v3735_v16 }
 0x3a0   :  { %v3658_v48 = vmax.f32 %v10927_v19, %v3645_v30  ;;  %v3659_v27 = vmax.f32 %v10929_v2, %v3644_v62  ;;  %v3671_v40 = vsel %vm3669_vm13, %v3666_v49, %v3667_v47  ;;  %v3696_v8 = vsel %vm3695_vm14, %v3692_v53, %v3693_v6 }
 0x3a1   :  { %v3697_v54 = vsel %vm3695_vm14, %v3691_v12, %v3692_v53  ;;  %v3722_v24 = vsel %vm3721_vm15, %v3719_v36, %v3720_v26  ;;  %3923 = vst.msk [vmem:[#allocation2 + $0x18] sm:$0xf] %vm3567_vm3, %v7822_v7  ;;  %3924 = vst.msk [vmem:[#allocation2 + $0x1c] sm:$0xf] %vm3567_vm3, %v7823_v58  ;;  %v3723_v49 = vsel %vm3721_vm15, %v3718_v0, %v3719_v36  ;;  %v3783_v4 = vrot.slane %v10935_v56, 7 }
 0x3a2   :  { %v3684_v19 = vmax.f32 %v3658_v48, %v3671_v40  ;;  %v3685_v2 = vmax.f32 %v3659_v27, %v3670_v25  ;;  %v3784_v11 = vrot.slane %v10960_v39, 7  ;;  %v3785_v12 = vrot.slane %v10937_v14, 7 }
 0x3a3   :  { %v3786_v60 = vrot.slane %v10957_v33, 7  ;;  %v3808_v38 = vrot.slane %v10935_v56, 1  ;;  %v8026_v26 = vld [vmem:[#allocation2 + $0x10] sm:$0xff]   ;;  %v3799_v22 = vsel %vm3643_vm12, %v3791_v34, %v3783_v4  ;;  %v3809_v0 = vrot.slane %v10960_v39, 1 }
 0x3a4   :  { %v3710_v52 = vmax.f32 %v3684_v19, %v3697_v54  ;;  %v3711_v63 = vmax.f32 %v3685_v2, %v3696_v8  ;;  %v3797_v43 = vsel %vm3643_vm12, %v3784_v11, %v3785_v12  ;;  %v3798_v55 = vsel %vm3643_vm12, %v3783_v4, %v3784_v11  ;;  %7937 = vmatprep.mubr.msk.bf16.mxu0 %vm3047_vm10, %v8026_v26 }
 0x3a5   :  { %v3796_v31 = vsel %vm3643_vm12, %v3785_v12, %v3786_v60  ;;  %v3800_v50 = vmax.f32 %v10935_v56, %v3799_v22  ;;  %v3801_v9 = vmax.f32 %v10960_v39, %v3798_v55  ;;  %v3802_v34 = vmax.f32 %v10937_v14, %v3797_v43  ;;  %7719 = vmatmul.mubr.msk.bf16.gmra.mxu1 %vm3047_vm10, %v8026_v26 }
 0x3a6   :  { %v3736_v37 = vmax.f32 %v3710_v52, %v3723_v49  ;;  %v3737_v32 = vmax.f32 %v3711_v63, %v3722_v24  ;;  %v3810_v13 = vrot.slane %v10937_v14, 1  ;;  %v3811_v41 = vrot.slane %v10957_v33, 1  ;;  %4190 = vmatprep.mubr.bf16.mxu1 %v13859_v35 }
 0x3a7   :  { %v3812_v61 = vrot.slane %v10939_v5, 1  ;;  %v3824_v47 = vsel %vm3669_vm13, %v3808_v38, %v3809_v0  ;;  %v3833_v6 = vrot.slane %v10935_v56, 6  ;;  %v3834_v7 = vrot.slane %v10960_v39, 6 }
 0x3a8   :  { %v7824_v3 = vpack.c.bf16 %v3736_v37, %v3736_v37  ;;  %v7825_v16 = vpack.c.bf16 %v3737_v32, %v3737_v32  ;;  %v3825_v53 = vmax.f32 %v3800_v50, %v3824_v47  ;;  %v8027_v62 = vld [vmem:[#allocation2 + $0x18] sm:$0xff]   ;;  %v3822_v25 = vsel %vm3669_vm13, %v3810_v13, %v3811_v41 }
 0x3a9   :  { %v3821_v30 = vsel %vm3669_vm13, %v3811_v41, %v3812_v61  ;;  %v3823_v36 = vsel %vm3669_vm13, %v3809_v0, %v3810_v13  ;;  %6048 = vst.msk [vmem:[#allocation2 + $0x18] sm:$0xf] %vm3567_vm3, %v13859_v35  ;;  %6049 = vst.msk [vmem:[#allocation2 + $0x1c] sm:$0xf] %vm3567_vm3, %v13859_v35  ;;  %v3827_v48 = vmax.f32 %v3802_v34, %v3822_v25  ;;  %v3835_v27 = vrot.slane %v10937_v14, 6 }
 0x3aa   :  { %3925 = vst.msk [vmem:[#allocation2 + $0x20] sm:$0xf] %vm3567_vm3, %v7824_v3  ;;  %3926 = vst.msk [vmem:[#allocation2 + $0x24] sm:$0xf] %vm3567_vm3, %v7825_v16  ;;  %v3826_v58 = vmax.f32 %v3801_v9, %v3823_v36  ;;  %v3836_v40 = vrot.slane %v10957_v33, 6  ;;  %7938 = vmatmul.mubr.msk.bf16.gmra.mxu0 %vm3047_vm10, %v8027_v62  ;;  %v3848_v8 = vsel %vm3695_vm14, %v3833_v6, %v3834_v7  ;;  %v3858_v24 = vrot.slane %v10935_v56, 2 }
 0x3ab   :  { %v3849_v54 = vsel %vm3695_vm14, %v3841_v1, %v3833_v6  ;;  %v3859_v19 = vrot.slane %v10960_v39, 2  ;;  %v3847_v49 = vsel %vm3695_vm14, %v3834_v7, %v3835_v27  ;;  %v3860_v38 = vrot.slane %v10937_v14, 2 }
 0x3ac   :  { %v3846_v2 = vsel %vm3695_vm14, %v3835_v27, %v3836_v40  ;;  %v3850_v4 = vmax.f32 %v3825_v53, %v3849_v54  ;;  %v3851_v11 = vmax.f32 %v3826_v58, %v3848_v8  ;;  %v3852_v12 = vmax.f32 %v3827_v48, %v3847_v49 }
 0x3ad   :  { %v3861_v26 = vrot.slane %v10957_v33, 2  ;;  %v3862_v52 = vrot.slane %v10939_v5, 2  ;;  %v3874_v1 = vsel %vm3721_vm15, %v3858_v24, %v3859_v19  ;;  %v3803_v56 = vmax.f32 %v10957_v33, %v3796_v31  ;;  %7720 = vmatmul.mubr.msk.bf16.gmra.mxu1 %vm3047_vm10, %v8027_v62  ;;  %v11160_v31 = vld [vmem:[#allocation2 + $0x28] sm:$0xff]  }
 0x3ae   :  { %v3795_v39 = vsel %vm3643_vm12, %v3786_v60, %v3787_v23  ;;  %v3805_v63 = vmax.f32 %v10945_v29, %v11051_v28  ;;  %v3873_v0 = vsel %vm3721_vm15, %v3859_v19, %v3860_v38  ;;  %v3875_v33 = vmax.f32 %v3850_v4, %v3874_v1  ;;  %4200 = vmatprep.mubr.bf16.mxu1 %v13859_v35  ;;  %v11163_v23 = vld [vmem:[#allocation2 + $0x30] sm:$0xff]  }
 0x3af   :  { %v3871_v14 = vsel %vm3721_vm15, %v3861_v26, %v3862_v52  ;;  %v3872_v22 = vsel %vm3721_vm15, %v3860_v38, %v3861_v26  ;;  %v3876_v60 = vmax.f32 %v3851_v11, %v3873_v0  ;;  %v3828_v43 = vmax.f32 %v3803_v56, %v3821_v30 }
 0x3b0   :  { %v3877_v28 = vmax.f32 %v3852_v12, %v3872_v22  ;;  %v3804_v55 = vmax.f32 %v10939_v5, %v3795_v39  ;;  %v7826_v37 = vpack.c.bf16 %v3875_v33, %v3875_v33  ;;  %v3813_v32 = vrot.slane %v10945_v29, 1  ;;  %v8035_v22 = vld [vmem:[#allocation2 + $0x58] sm:$0xff]  }
 0x3b1   :  { %v8028_v50 = vld [vmem:[#allocation2 + $0x20] sm:$0xff]   ;;  %v3792_v9 = vsel %vm3643_vm12, %v3789_v42, %v3790_v44  ;;  %v3793_v34 = vsel %vm3643_vm12, %v3788_v45, %v3789_v42  ;;  %v7827_v13 = vpack.c.bf16 %v3876_v60, %v3876_v60  ;;  %v3853_v47 = vmax.f32 %v3828_v43, %v3846_v2 }
 0x3b2   :  { %6070 = vst.msk [vmem:[#allocation2 + $0x20] sm:$0xf] %vm3567_vm3, %v13859_v35  ;;  %6071 = vst.msk [vmem:[#allocation2 + $0x24] sm:$0xf] %vm3567_vm3, %v13859_v35  ;;  %v7828_v41 = vpack.c.bf16 %v3877_v28, %v3877_v28  ;;  %v3814_v3 = vrot.slane %v10947_v51, 1  ;;  %7941 = vmatprep.mubr.msk.bf16.mxu0 %vm3047_vm10, %v8028_v50  ;;  %v3820_v44 = vsel %vm3669_vm13, %v3812_v61, %v3813_v32  ;;  %v3837_v45 = vrot.slane %v10939_v5, 6 }
 0x3b3   :  { %3963 = vst.msk [vmem:[#allocation2 + $0x38] sm:$0xf] %vm3567_vm3, %v7826_v37  ;;  %v3838_v42 = vrot.slane %v10945_v29, 6  ;;  %v3863_v16 = vrot.slane %v10945_v29, 2  ;;  %7942 = vmatmul.mubr.msk.bf16.gmra.mxu0 %vm3047_vm10, %v11160_v31  ;;  %3964 = vst.msk [vmem:[#allocation2 + $0x3c] sm:$0xf] %vm3567_vm3, %v7827_v13  ;;  %v3878_v53 = vmax.f32 %v3853_v47, %v3871_v14  ;;  %v3829_v62 = vmax.f32 %v3804_v55, %v3820_v44 }
 0x3b4   :  { %3965 = vst.msk [vmem:[#allocation2 + $0x40] sm:$0xf] %vm3567_vm3, %v7828_v41  ;;  %v3819_v6 = vsel %vm3669_vm13, %v3813_v32, %v3814_v3  ;;  %v3864_v61 = vrot.slane %v10947_v51, 2  ;;  %7945 = vmatprep.mubr.msk.bf16.mxu0 %vm3047_vm10, %v11163_v23  ;;  %v3845_v30 = vsel %vm3695_vm14, %v3836_v40, %v3837_v45  ;;  %v3865_v25 = vrot.slane %v10865_v57, 2 }
 0x3b5   :  { %v3830_v5 = vmax.f32 %v3805_v63, %v3819_v6  ;;  %v3844_v29 = vsel %vm3695_vm14, %v3837_v45, %v3838_v42  ;;  %v7829_v36 = vpack.c.bf16 %v3878_v53, %v3878_v53  ;;  %v3854_v7 = vmax.f32 %v3829_v62, %v3845_v30  ;;  %7721 = vmatmul.mubr.msk.bf16.gmra.mxu1 %vm3047_vm10, %v8028_v50 }
 0x3b6   :  { %v3870_v58 = vsel %vm3721_vm15, %v3862_v52, %v3863_v16  ;;  %v3806_v48 = vmax.f32 %v10947_v51, %v3793_v34  ;;  %v3807_v8 = vmax.f32 %v10865_v57, %v3792_v9  ;;  %v3818_v54 = vsel %vm3669_vm13, %v3814_v3, %v3815_v10  ;;  %4210 = vmatprep.mubr.bf16.mxu1 %v13859_v35 }
 0x3b7   :  { %v3855_v27 = vmax.f32 %v3830_v5, %v3844_v29  ;;  %v3839_v40 = vrot.slane %v10947_v51, 6  ;;  %3966 = vst.msk [vmem:[#allocation2 + $0x44] sm:$0xf] %vm3567_vm3, %v7829_v36  ;;  %v3869_v24 = vsel %vm3721_vm15, %v3863_v16, %v3864_v61  ;;  %v3879_v19 = vmax.f32 %v3854_v7, %v3870_v58 }
 0x3b8   :  { %v3817_v2 = vsel %vm3669_vm13, %v3815_v10, %v3816_v17  ;;  %v3831_v49 = vmax.f32 %v3806_v48, %v3818_v54  ;;  %v3868_v39 = vsel %vm3721_vm15, %v3864_v61, %v3865_v25  ;;  %v3867_v57 = vsel %vm3721_vm15, %v3865_v25, %v3866_v20 }
 0x3b9   :  { %v3880_v4 = vmax.f32 %v3855_v27, %v3869_v24  ;;  %v3832_v11 = vmax.f32 %v3807_v8, %v3817_v2  ;;  %v3843_v51 = vsel %vm3695_vm14, %v3838_v42, %v3839_v40  ;;  %v7830_v12 = vpack.c.bf16 %v3879_v19, %v3879_v19 }
 0x3ba   :  { %v3842_v38 = vsel %vm3695_vm14, %v3839_v40, %v3840_v46  ;;  %v3856_v26 = vmax.f32 %v3831_v49, %v3843_v51  ;;  %v8031_v52 = vld [vmem:[#allocation2 + $0x38] sm:$0xff]  }
 0x3bb   :  { %v7831_v1 = vpack.c.bf16 %v3880_v4, %v3880_v4  ;;  %v3857_v56 = vmax.f32 %v3832_v11, %v3842_v38  ;;  %6072 = vst.msk [vmem:[#allocation2 + $0x38] sm:$0xf] %vm3567_vm3, %v13859_v35  ;;  %6073 = vst.msk [vmem:[#allocation2 + $0x3c] sm:$0xf] %vm3567_vm3, %v13859_v35  ;;  %7946 = vmatmul.mubr.msk.bf16.gmra.mxu0 %vm3047_vm10, %v8031_v52 }
 0x3bc   :  { %3967 = vst.msk [vmem:[#allocation2 + $0x48] sm:$0xf] %vm3567_vm3, %v7830_v12  ;;  %v3881_v17 = vmax.f32 %v3856_v26, %v3868_v39 }
 0x3bd   :  { %3968 = vst.msk [vmem:[#allocation2 + $0x4c] sm:$0xf] %vm3567_vm3, %v7831_v1  ;;  %v3882_v10 = vmax.f32 %v3857_v56, %v3867_v57  ;;  %7722 = vmatmul.mubr.msk.bf16.gmra.mxu1 %vm3047_vm10, %v11160_v31 }
 0x3be   :  { %v7832_v46 = vpack.c.bf16 %v3881_v17, %v3881_v17  ;;  %v8032_v63 = vld [vmem:[#allocation2 + $0x40] sm:$0xff]   ;;  %4220 = vmatprep.mubr.bf16.mxu1 %v13859_v35 }
 0x3bf   :  { %v7833_v14 = vpack.c.bf16 %v3882_v10, %v3882_v10  ;;  %7949 = vmatprep.mubr.msk.bf16.mxu0 %vm3047_vm10, %v8032_v63 }
 0x3c0   :  { %3969 = vst.msk [vmem:[#allocation2 + $0x50] sm:$0xf] %vm3567_vm3, %v7832_v46 }
 0x3c1   :  { %3970 = vst.msk [vmem:[#allocation2 + $0x54] sm:$0xf] %vm3567_vm3, %v7833_v14 }
 0x3c4   :  { %v8033_v21 = vld [vmem:[#allocation2 + $0x48] sm:$0xff]  }
 0x3c5   :  { %7950 = vmatmul.mubr.msk.bf16.gmra.mxu0 %vm3047_vm10, %v8033_v21  ;;  %7723 = vmatmul.mubr.msk.bf16.gmra.mxu1 %vm3047_vm10, %v11163_v23 }
 0x3c6   :  { %4230 = vmatprep.mubr.bf16.mxu1 %v13859_v35 }
 0x3c8   :  { %v8034_v20 = vld [vmem:[#allocation2 + $0x50] sm:$0xff]  }
 0x3c9   :  { %7953 = vmatprep.mubr.msk.bf16.mxu0 %vm3047_vm10, %v8034_v20 }
 0x3cc   :  { %v4165_v0 = vpop.f32.mrf.mxu1 }
 0x3cd   :  { %7954 = vmatmul.mubr.msk.bf16.gmra.mxu0 %vm3047_vm10, %v8035_v22  ;;  %7724 = vmatmul.mubr.msk.bf16.gmra.mxu1 %vm3047_vm10, %v8031_v52 }
 0x3ce   :  { %4240 = vmatprep.mubr.bf16.mxu1 %v13859_v35  ;;  %v4166_v33 = vpop.f32.mrf.mxu1 }
 0x3d0   :  { %v11262_v31 = vpop.f32.mrf.mxu1 }
 0x3d1   :  { %v4675_v43 = vrot.slane %v11262_v31, 3  ;;  %v4425_v37 = vrot.slane %v11262_v31, 1  ;;  %v4550_v44 = vrot.slane %v11262_v31, 2 }
 0x3d2   :  { %v4169_v23 = vpop.f32.mrf.mxu1 }
 0x3d5   :  { %7725 = vmatmul.mubr.msk.bf16.gmra.mxu1 %vm3047_vm10, %v8032_v63 }
 0x3d6   :  { %4250 = vmatprep.mubr.bf16.mxu1 %v13859_v35 }
 0x3dd   :  { %7726 = vmatmul.mubr.msk.bf16.gmra.mxu1 %vm3047_vm10, %v8033_v21 }
 0x3de   :  { %4260 = vmatprep.mubr.bf16.mxu1 %v13859_v35 }
 0x3e5   :  { %7727 = vmatmul.mubr.msk.bf16.gmra.mxu1 %vm3047_vm10, %v8034_v20 }
 0x3e6   :  { %4270 = vmatprep.mubr.bf16.mxu1 %v13859_v35 }
 0x3ed   :  { %7728 = vmatmul.mubr.msk.bf16.gmra.mxu1 %vm3047_vm10, %v8035_v22 }
 0x3ee   :  { %6246 = vmatprep.mubr.bf16.mxu1 %v13859_v35 }
 0x45d   :  { %v11270_v60 = vpop.f32.mrf.mxu1  ;;  %v11272_v28 = vpop.f32.mrf.mxu0 }
 0x45e   :  { %13863 = vst [vmem:[#allocation19_spill] sm:$0xff] %v11272_v28  ;;  %v4426_v55 = vrot.slane %v11270_v60, 1  ;;  %v4676_v50 = vrot.slane %v11270_v60, 3  ;;  %v4551_v13 = vrot.slane %v11270_v60, 2 }
 0x45f   :  { %v11278_v32 = vpop.f32.mrf.mxu1  ;;  %v4312_v9 = vpop.f32.mrf.mxu0 }
 0x460   :  { %13864 = vst [vmem:[#allocation113_spill] sm:$0xff] %v11278_v32  ;;  %v4677_v34 = vsel %vm1388_vm4, %v4675_v43, %v4676_v50  ;;  %v4427_v41 = vsel %vm944_vm5, %v4425_v37, %v4426_v55  ;;  %v5027_v45 = vrot.slane %v11278_v32, 6  ;;  %v4552_v6 = vsel %vm1166_vm6, %v4550_v44, %v4551_v13 }
 0x461   :  { %4716 = vrot.lane.b32.xlu1 %v4677_v34, %s8083_s20  ;;  %v11284_v47 = vpop.f32.mrf.mxu1  ;;  %v11286_v3 = vpop.f32.mrf.mxu0  ;;  %4466 = vrot.lane.b32.xlu0 %v4427_v41, %s8084_s21  ;;  %v13255_v61 = vrot.slane %v11278_v32, 4  ;;  %v5152_v5 = vrot.slane %v11278_v32, 7  ;;  %v4902_v25 = vrot.slane %v11278_v32, 5 }
 0x462   :  { %13865 = vst [vmem:[#allocation96_spill] sm:$0xff] %v11286_v3  ;;  %v4428_v36 = vrot.slane %v11284_v47, 1  ;;  %v4678_v58 = vrot.slane %v11284_v47, 3  ;;  %v4553_v24 = vrot.slane %v11284_v47, 2 }
 0x463   :  { %v11291_v42 = vpop.f32.mrf.mxu1  ;;  %v4314_v16 = vpop.f32.mrf.mxu0 }
 0x464   :  { %v4821_v53 = vrot.slane %v11291_v42, 4  ;;  %v4429_v2 = vsel %vm944_vm5, %v4426_v55, %v4428_v36  ;;  %v5028_v49 = vrot.slane %v11291_v42, 6  ;;  %v4679_v11 = vsel %vm1388_vm4, %v4676_v50, %v4678_v58 }
 0x465   :  { %5068 = vrot.lane.b32.xlu1 %v5027_v45, %s8085_s0  ;;  %v11296_v62 = vpop.f32.mrf.mxu1  ;;  %4591 = vrot.lane.b32.xlu0 %v4552_v6, %s8085_s0  ;;  %v4903_v52 = vrot.slane %v11291_v42, 5  ;;  %v4554_v56 = vsel %vm1166_vm6, %v4551_v13, %v4553_v24  ;;  %v5153_v39 = vrot.slane %v11291_v42, 7 }
 0x466   :  { %13866 = vst [vmem:[#allocation106_spill] sm:$0xff] %v11296_v62  ;;  %v11306_v30 = vsel %vm1646_vm8, %v13255_v61, %v4821_v53  ;;  %v5029_v57 = vsel %vm2015_vm9, %v5027_v45, %v5028_v49  ;;  %v4680_v14 = vrot.slane %v11296_v62, 3  ;;  %v4430_v0 = vrot.slane %v11296_v62, 1 }
 0x467   :  { %v11301_v29 = vpop.f32.mrf.mxu1  ;;  %13867 = vst [vmem:[#allocation21_spill] sm:$0xff] %v11306_v30  ;;  %v4904_v22 = vsel %vm1793_vm7, %v4902_v25, %v4903_v52  ;;  %v5154_v33 = vsel %vm480_vm1, %v5152_v5, %v5153_v39  ;;  %v4555_v41 = vrot.slane %v11296_v62, 2 }
 0x468   :  { %v4823_v7 = vrot.slane %v11301_v29, 4  ;;  %v5030_v37 = vrot.slane %v11301_v29, 6  ;;  %v4681_v13 = vsel %vm1388_vm4, %v4678_v58, %v4680_v14  ;;  %v4431_v44 = vsel %vm944_vm5, %v4428_v36, %v4430_v0 }
 0x469   :  { %5193 = vrot.lane.b32.xlu1 %v5152_v5, %s8083_s20  ;;  %v11315_v27 = vpop.f32.mrf.mxu1  ;;  %4943 = vrot.lane.b32.xlu0 %v4902_v25, %s8084_s21  ;;  %v13258_v6 = vrot.slane %v11301_v29, 7  ;;  %v4905_v36 = vrot.slane %v11301_v29, 5  ;;  %v4556_v58 = vsel %vm1166_vm6, %v4553_v24, %v4555_v41 }
 0x46a   :  { %v11312_v48 = vpop.f32.mrf.mxu0  ;;  %13869 = vst [vmem:[#allocation118_spill] sm:$0xff] %v11315_v27  ;;  %v11323_v40 = vsel %vm1646_vm8, %v4821_v53, %v4823_v7  ;;  %v5031_v25 = vsel %vm2015_vm9, %v5028_v49, %v5030_v37 }
 0x46b   :  { %13868 = vst [vmem:[#allocation127_spill] sm:$0xff] %v11312_v48  ;;  %v11320_v54 = vpop.f32.mrf.mxu1  ;;  %13871 = vst [vmem:[#allocation108_spill] sm:$0xff] %v11323_v40 }
 0x46c   :  { %v11318_v8 = vpop.f32.mrf.mxu0  ;;  %v4825_v19 = vrot.slane %v11320_v54, 4  ;;  %v5157_v61 = vrot.slane %v11320_v54, 7 }
 0x46d   :  { %13870 = vst [vmem:[#allocation88_spill] sm:$0xff] %v11318_v8  ;;  %4468 = vrot.lane.b32.xlu1 %v4429_v2, %s8084_s21  ;;  %v11333_v51 = vpop.f32.mrf.mxu1  ;;  %4718 = vrot.lane.b32.xlu0 %v4679_v11, %s8083_s20  ;;  %v4432_v2 = vrot.slane %v11315_v27, 1 }
 0x46e   :  { %v11329_v4 = vpop.f32.mrf.mxu0  ;;  %13873 = vst [vmem:[#allocation20_spill] sm:$0xff] %v11333_v51  ;;  %v11341_v26 = vsel %vm1646_vm8, %v4823_v7, %v4825_v19 }
 0x46f   :  { %13872 = vst [vmem:[#allocation119_spill] sm:$0xff] %v11329_v4  ;;  %v11338_v38 = vpop.f32.mrf.mxu1  ;;  %13875 = vst [vmem:[#allocation157_spill] sm:$0xff] %v11341_v26 }
 0x470   :  { %v11336_v12 = vpop.f32.mrf.mxu0  ;;  %v4827_v1 = vrot.slane %v11338_v38, 4  ;;  %v13905_v4 = vrot.slane %v11338_v38, 5  ;;  %v13913_v3 = vrot.slane %v11338_v38, 7 }
 0x471   :  { %13874 = vst [vmem:[#allocation123_spill] sm:$0xff] %v11336_v12  ;;  %4593 = vrot.lane.b32.xlu1 %v4554_v56, %s8085_s0  ;;  %v11349_v17 = vpop.f32.mrf.mxu1  ;;  %5070 = vrot.lane.b32.xlu0 %v5029_v57, %s8085_s0 }
 0x472   :  { %v11357_v63 = vsel %vm1646_vm8, %v4825_v19, %v4827_v1  ;;  %v4436_v15 = vrot.slane %v11349_v17, 1 }
 0x473   :  { %v11351_v10 = vpop.f32.mrf.mxu0  ;;  %v11354_v46 = vpop.f32.mrf.mxu1  ;;  %13877 = vst [vmem:[#allocation23_spill] sm:$0xff] %v11357_v63 }
 0x474   :  { %13876 = vst [vmem:[#allocation71_spill] sm:$0xff] %v11351_v10  ;;  %v4829_v20 = vrot.slane %v11354_v46, 4 }
 0x475   :  { %v11360_v21 = vpop.f32.mrf.mxu0  ;;  %4945 = vrot.lane.b32.xlu1 %v4904_v22, %s8084_s21  ;;  %v11367_v23 = vpop.f32.mrf.mxu1  ;;  %5195 = vrot.lane.b32.xlu0 %v5154_v33, %s8083_s20  ;;  %v4557_v22 = vrot.slane %v11315_v27, 2 }
 0x476   :  { %13878 = vst [vmem:[#allocation143_spill] sm:$0xff] %v11360_v21  ;;  %13879 = vst [vmem:[#allocation67_spill] sm:$0xff] %v11367_v23  ;;  %v11373_v50 = vsel %vm1646_vm8, %v4827_v1, %v4829_v20 }
 0x477   :  { %v7944_v43 = vpop.f32.mrf.mxu0  ;;  %v11370_v55 = vpop.f32.mrf.mxu1  ;;  %13880 = vst [vmem:[#allocation85_spill] sm:$0xff] %v11373_v50  ;;  %v13909_v50 = vrot.slane %v11338_v38, 6 }
 0x478   :  { %v4831_v34 = vrot.slane %v11370_v55, 4  ;;  %v4906_v43 = vsel %vm1793_vm7, %v4903_v52, %v4905_v36  ;;  %v4558_v52 = vsel %vm1166_vm6, %v4555_v41, %v4557_v22 }
 0x479   :  { %v11376_v9 = vpop.f32.mrf.mxu0  ;;  %4720 = vrot.lane.b32.xlu1 %v4681_v13, %s8083_s20  ;;  %v11383_v45 = vpop.f32.mrf.mxu1  ;;  %4470 = vrot.lane.b32.xlu0 %v4431_v44, %s8084_s21 }
 0x47a   :  { %13881 = vst [vmem:[#allocation22_spill] sm:$0xff] %v11376_v9  ;;  %v11391_v53 = vsel %vm1646_vm8, %v4829_v20, %v4831_v34  ;;  %v5156_v20 = vsel %vm480_vm1, %v5153_v39, %v13258_v6  ;;  %v4434_v39 = vrot.slane %v11333_v51, 1 }
 0x47b   :  { %v11386_v42 = vpop.f32.mrf.mxu0  ;;  %v11388_v16 = vpop.f32.mrf.mxu1  ;;  %13883 = vst [vmem:[#allocation25_spill] sm:$0xff] %v11391_v53 }
 0x47c   :  { %13882 = vst [vmem:[#allocation24_spill] sm:$0xff] %v11386_v42  ;;  %v4833_v5 = vrot.slane %v11388_v16, 4  ;;  %v13256_v49 = vrot.slane %v11388_v16, 7  ;;  %v13895_v42 = vrot.slane %v11338_v38, 7 }
 0x47d   :  { %v4358_v7 = vpop.f32.mrf.mxu0  ;;  %5072 = vrot.lane.b32.xlu1 %v5031_v25, %s8085_s0  ;;  %v11401_v19 = vpop.f32.mrf.mxu1  ;;  %4595 = vrot.lane.b32.xlu0 %v4556_v58, %s8085_s0  ;;  %v4682_v58 = vrot.slane %v11315_v27, 3  ;;  %v4688_v27 = vrot.slane %v11367_v23, 3 }
 0x47e   :  { %v11410_v56 = vsel %vm1646_vm8, %v4831_v34, %v4833_v5  ;;  %v4433_v7 = vsel %vm944_vm5, %v4430_v0, %v4432_v2  ;;  %v5160_v10 = vsel %vm480_vm1, %v5157_v61, %v13895_v42 }
 0x47f   :  { %v11405_v11 = vpop.f32.mrf.mxu0  ;;  %v11407_v1 = vpop.f32.mrf.mxu1  ;;  %13885 = vst [vmem:[#allocation147_spill] sm:$0xff] %v11410_v56 }
 0x480   :  { %13884 = vst [vmem:[#allocation144_spill] sm:$0xff] %v11405_v11  ;;  %v4835_v57 = vrot.slane %v11407_v1, 4  ;;  %v5167_v24 = vrot.slane %v11407_v1, 7 }
 0x481   :  { %v4361_v33 = vpop.f32.mrf.mxu0  ;;  %5197 = vrot.lane.b32.xlu1 %v5156_v20, %s8083_s20  ;;  %v4216_v13 = vpop.f32.mrf.mxu1  ;;  %4947 = vrot.lane.b32.xlu0 %v4906_v43, %s8084_s21  ;;  %v4683_v43 = vsel %vm1388_vm4, %v4680_v14, %v4682_v58 }
 0x482   :  { %v11425_v34 = vsel %vm480_vm1, %v13256_v49, %v5167_v24  ;;  %v11428_v44 = vsel %vm1646_vm8, %v4833_v5, %v4835_v57  ;;  %v13257_v24 = vrot.slane %v11333_v51, 2  ;;  %v4435_v5 = vsel %vm944_vm5, %v4432_v2, %v4434_v39 }
 0x483   :  { %13886 = vst [vmem:[#allocation100_spill] sm:$0xff] %v11428_v44  ;;  %v4218_v25 = vpop.f32.mrf.mxu1  ;;  %v4907_v57 = vrot.slane %v11320_v54, 5  ;;  %v13259_v13 = vrot.slane %v11333_v51, 3  ;;  %v5032_v2 = vrot.slane %v11320_v54, 6 }
 0x484   :  { %v4560_v25 = vsel %vm1166_vm6, %v4557_v22, %v13257_v24 }
 0x485   :  { %4472 = vrot.lane.b32.xlu1 %v4433_v7, %s8084_s21  ;;  %v4222_v20 = vpop.f32.mrf.mxu1  ;;  %4597 = vrot.lane.b32.xlu0 %v4558_v52, %s8085_s0  ;;  %v4908_v7 = vsel %vm1793_vm7, %v4905_v36, %v4907_v57  ;;  %v5033_v49 = vsel %vm2015_vm9, %v5030_v37, %v5032_v2 }
 0x487   :  { %v4224_v33 = vpop.f32.mrf.mxu1 }
 0x489   :  { %4474 = vrot.lane.b32.xlu1 %v4435_v5, %s8084_s21  ;;  %v11441_v0 = vpop.f32.mrf.mxu1  ;;  %4722 = vrot.lane.b32.xlu0 %v4683_v43, %s8083_s20 }
 0x48b   :  { %v11444_v41 = vpop.f32.mrf.mxu1 }
 0x48c   :  { %v4841_v20 = vrot.slane %v11444_v41, 4  ;;  %v5048_v33 = vrot.slane %v11444_v41, 6  ;;  %v5173_v5 = vrot.slane %v11444_v41, 7 }
 0x48d   :  { %4599 = vrot.lane.b32.xlu1 %v4560_v25, %s8085_s0  ;;  %v11453_v14 = vpop.f32.mrf.mxu1  ;;  %4949 = vrot.lane.b32.xlu0 %v4908_v7, %s8084_s21  ;;  %v4685_v7 = vsel %vm1388_vm4, %v4682_v58, %v13259_v13 }
 0x48f   :  { %v11460_v43 = vpop.f32.mrf.mxu1 }
 0x490   :  { %v4843_v22 = vrot.slane %v11460_v43, 4  ;;  %v13262_v36 = vrot.slane %v11460_v43, 6  ;;  %v5175_v25 = vrot.slane %v11460_v43, 7 }
 0x491   :  { %4724 = vrot.lane.b32.xlu1 %v4685_v7, %s8083_s20  ;;  %v11473_v24 = vpop.f32.mrf.mxu1  ;;  %5074 = vrot.lane.b32.xlu0 %v5033_v49, %s8085_s0  ;;  %v13889_v49 = vrot.slane %v11338_v38, 5 }
 0x492   :  { %13887 = vst [vmem:[#allocation126_spill] sm:$0xff] %v11473_v24  ;;  %v11481_v52 = vsel %vm2015_vm9, %v5048_v33, %v13262_v36  ;;  %v11484_v58 = vsel %vm480_vm1, %v5173_v5, %v5175_v25  ;;  %v11487_v54 = vsel %vm1646_vm8, %v4841_v20, %v4843_v22  ;;  %v13890_v33 = vrot.slane %v11301_v29, 7 }
 0x493   :  { %v11476_v6 = vpop.f32.mrf.mxu1  ;;  %13888 = vst [vmem:[#allocation76_spill] sm:$0xff] %v11487_v54  ;;  %v4910_v59 = vsel %vm1793_vm7, %v4907_v57, %v13889_v49  ;;  %v4437_v36 = vsel %vm944_vm5, %v4434_v39, %v4436_v15 }
 0x494   :  { %v4845_v7 = vrot.slane %v11476_v6, 4  ;;  %v5177_v13 = vrot.slane %v11476_v6, 7  ;;  %v5158_v5 = vsel %vm480_vm1, %v13890_v33, %v5157_v61  ;;  %v13898_v61 = vrot.slane %v11333_v51, 2 }
 0x495   :  { %4951 = vrot.lane.b32.xlu1 %v4910_v59, %s8084_s21  ;;  %v11500_v20 = vpop.f32.mrf.mxu1  ;;  %5199 = vrot.lane.b32.xlu0 %v5158_v5, %s8083_s20  ;;  %v13893_v59 = vrot.slane %v11338_v38, 6 }
 0x496   :  { %13891 = vst [vmem:[#allocation162_spill] sm:$0xff] %v11500_v20  ;;  %v11507_v18 = vsel %vm480_vm1, %v5175_v25, %v5177_v13  ;;  %v11510_v57 = vsel %vm1646_vm8, %v4843_v22, %v4845_v7  ;;  %v4911_v25 = vrot.slane %v11354_v46, 5  ;;  %v13897_v22 = vrot.slane %v11349_v17, 2 }
 0x497   :  { %v11504_v37 = vpop.f32.mrf.mxu1  ;;  %13892 = vst [vmem:[#allocation64_spill] sm:$0xff] %v11510_v57  ;;  %v5035_v33 = vsel %vm2015_vm9, %v5032_v2, %v13893_v59 }
 0x498   :  { %v4847_v29 = vrot.slane %v11504_v37, 4  ;;  %v5179_v49 = vrot.slane %v11504_v37, 7  ;;  %v4562_v42 = vsel %vm1166_vm6, %v13898_v61, %v13897_v22  ;;  %v13903_v22 = vrot.slane %v11504_v37, 6 }
 0x499   :  { %5076 = vrot.lane.b32.xlu1 %v5035_v33, %s8085_s0  ;;  %v11520_v35 = vpop.f32.mrf.mxu1  ;;  %4476 = vrot.lane.b32.xlu0 %v4437_v36, %s8084_s21  ;;  %v13902_v36 = vrot.slane %v11504_v37, 5  ;;  %v4912_v12 = vsel %vm1793_vm7, %v13905_v4, %v4911_v25 }
 0x49a   :  { %13894 = vst [vmem:[#allocation87_spill] sm:$0xff] %v11520_v35  ;;  %v11529_v2 = vsel %vm480_vm1, %v5177_v13, %v5179_v49  ;;  %v11532_v59 = vsel %vm1646_vm8, %v4845_v7, %v4847_v29  ;;  %v13900_v7 = vrot.slane %v11349_v17, 3 }
 0x49b   :  { %v4248_v11 = vpop.f32.mrf.mxu1  ;;  %13896 = vst [vmem:[#allocation105_spill] sm:$0xff] %v11532_v59 }
 0x49c   :  { %v4849_v39 = vrot.slane %v4248_v11, 4  ;;  %v4931_v33 = vrot.slane %v4248_v11, 5  ;;  %v5056_v5 = vrot.slane %v4248_v11, 6  ;;  %v5181_v9 = vrot.slane %v4248_v11, 7 }
 0x49d   :  { %5201 = vrot.lane.b32.xlu1 %v5160_v10, %s8083_s20  ;;  %v11542_v13 = vpop.f32.mrf.mxu1  ;;  %4601 = vrot.lane.b32.xlu0 %v4562_v42, %s8085_s0  ;;  %v13901_v11 = vrot.slane %v11333_v51, 3 }
 0x49e   :  { %13899 = vst [vmem:[#allocation112_spill] sm:$0xff] %v11542_v13  ;;  %v11553_v10 = vsel %vm1793_vm7, %v13902_v36, %v4931_v33  ;;  %v11559_v61 = vsel %vm2015_vm9, %v13903_v22, %v5056_v5  ;;  %v11562_v42 = vsel %vm480_vm1, %v5179_v49, %v5181_v9  ;;  %v11565_v57 = vsel %vm1646_vm8, %v4847_v29, %v4849_v39 }
 0x49f   :  { %v4687_v21 = vsel %vm1388_vm4, %v13901_v11, %v13900_v7  ;;  %v4254_v59 = vpop.f32.mrf.mxu1  ;;  %13904 = vst [vmem:[#allocation122_spill] sm:$0xff] %v11565_v57  ;;  %v5036_v36 = vrot.slane %v11354_v46, 6 }
 0x4a0   :  { %v4851_v7 = vrot.slane %v4254_v59, 4  ;;  %v4933_v11 = vrot.slane %v4254_v59, 5  ;;  %v5058_v48 = vrot.slane %v4254_v59, 6  ;;  %v5183_v54 = vrot.slane %v4254_v59, 7 }
 0x4a1   :  { %4726 = vrot.lane.b32.xlu1 %v4687_v21, %s8083_s20  ;;  %v11572_v22 = vpop.f32.mrf.mxu1  ;;  %4953 = vrot.lane.b32.xlu0 %v4912_v12, %s8084_s21  ;;  %v13907_v59 = vrot.slane %v11367_v23, 1  ;;  %v5037_v63 = vsel %vm2015_vm9, %v13909_v50, %v5036_v36 }
 0x4a2   :  { %13906 = vst [vmem:[#allocation135_spill] sm:$0xff] %v11572_v22  ;;  %v11577_v29 = vsel %vm1793_vm7, %v4931_v33, %v4933_v11  ;;  %v11583_v21 = vsel %vm2015_vm9, %v5056_v5, %v5058_v48  ;;  %v11586_v56 = vsel %vm480_vm1, %v5181_v9, %v5183_v54  ;;  %v11589_v4 = vsel %vm1646_vm8, %v4849_v39, %v4851_v7 }
 0x4a3   :  { %v4258_v57 = vpop.f32.mrf.mxu1  ;;  %v4439_v44 = vsel %vm944_vm5, %v4436_v15, %v13907_v59  ;;  %13908 = vst [vmem:[#allocation27_spill] sm:$0xff] %v11589_v4  ;;  %v5161_v33 = vrot.slane %v11354_v46, 7 }
 0x4a4   :  { %v4853_v49 = vrot.slane %v4258_v57, 4  ;;  %v4935_v53 = vrot.slane %v4258_v57, 5  ;;  %v5060_v12 = vrot.slane %v4258_v57, 6  ;;  %v5185_v8 = vrot.slane %v4258_v57, 7 }
 0x4a5   :  { %4478 = vrot.lane.b32.xlu1 %v4439_v44, %s8084_s21  ;;  %v11596_v15 = vpop.f32.mrf.mxu1  ;;  %5078 = vrot.lane.b32.xlu0 %v5037_v63, %s8085_s0  ;;  %v13911_v57 = vrot.slane %v11370_v55, 5  ;;  %v5162_v28 = vsel %vm480_vm1, %v13913_v3, %v5161_v33 }
 0x4a6   :  { %13910 = vst [vmem:[#allocation154_spill] sm:$0xff] %v11596_v15  ;;  %v11601_v5 = vsel %vm1793_vm7, %v4933_v11, %v4935_v53  ;;  %v11607_v59 = vsel %vm2015_vm9, %v5058_v48, %v5060_v12  ;;  %v11610_v50 = vsel %vm480_vm1, %v5183_v54, %v5185_v8  ;;  %v11613_v44 = vsel %vm1646_vm8, %v4851_v7, %v4853_v49 }
 0x4a7   :  { %v4264_v39 = vpop.f32.mrf.mxu1  ;;  %v4914_v46 = vsel %vm1793_vm7, %v4911_v25, %v13911_v57  ;;  %13912 = vst [vmem:[#allocation29_spill] sm:$0xff] %v11613_v44  ;;  %v4563_v11 = vrot.slane %v11367_v23, 2  ;;  %v4440_v54 = vrot.slane %v11383_v45, 1 }
 0x4a8   :  { %v4855_v9 = vrot.slane %v4264_v39, 4  ;;  %v4937_v4 = vrot.slane %v4264_v39, 5  ;;  %v5062_v63 = vrot.slane %v4264_v39, 6  ;;  %v5187_v26 = vrot.slane %v4264_v39, 7 }
 0x4a9   :  { %4955 = vrot.lane.b32.xlu1 %v4914_v46, %s8084_s21  ;;  %v11620_v48 = vpop.f32.mrf.mxu1  ;;  %5203 = vrot.lane.b32.xlu0 %v5162_v28, %s8083_s20  ;;  %v13916_v39 = vrot.slane %v11370_v55, 6 }
 0x4aa   :  { %13914 = vst [vmem:[#allocation26_spill] sm:$0xff] %v11620_v48  ;;  %v11625_v25 = vsel %vm1793_vm7, %v4935_v53, %v4937_v4  ;;  %v11633_v38 = vsel %vm2015_vm9, %v5060_v12, %v5062_v63  ;;  %v11636_v3 = vsel %vm480_vm1, %v5185_v8, %v5187_v26  ;;  %v11639_v46 = vsel %vm1646_vm8, %v4853_v49, %v4855_v9 }
 0x4ab   :  { %v11627_v7 = vpop.f32.mrf.mxu1  ;;  %v5039_v57 = vsel %vm2015_vm9, %v5036_v36, %v13916_v39  ;;  %13917 = vst [vmem:[#allocation148_spill] sm:$0xff] %v11639_v46  ;;  %v13918_v36 = vrot.slane %v11349_v17, 2 }
 0x4ac   :  { %13915 = vst [vmem:[#allocation81_spill] sm:$0xff] %v11627_v7  ;;  %v4939_v53 = vrot.slane %v11627_v7, 5  ;;  %v5064_v44 = vrot.slane %v11627_v7, 6  ;;  %v5189_v51 = vrot.slane %v11627_v7, 7  ;;  %v13919_v46 = vrot.slane %v11627_v7, 4 }
 0x4ad   :  { %v4564_v12 = vsel %vm1166_vm6, %v13918_v36, %v4563_v11  ;;  %5080 = vrot.lane.b32.xlu1 %v5039_v57, %s8085_s0  ;;  %v4272_v8 = vpop.f32.mrf.mxu1  ;;  %v4565_v36 = vrot.slane %v11383_v45, 2 }
 0x4ae   :  { %4603 = vrot.lane.b32.xlu0 %v4564_v12, %s8085_s0  ;;  %v11652_v49 = vsel %vm1793_vm7, %v4937_v4, %v4939_v53  ;;  %v11655_v39 = vsel %vm2015_vm9, %v5062_v63, %v5064_v44  ;;  %v11658_v28 = vsel %vm480_vm1, %v5187_v26, %v5189_v51  ;;  %v11663_v62 = vsel %vm1646_vm8, %v4855_v9, %v13919_v46 }
 0x4af   :  { %13920 = vst [vmem:[#allocation66_spill] sm:$0xff] %v11663_v62  ;;  %v4273_v57 = vpop.f32.mrf.mxu1  ;;  %v13921_v4 = vrot.slane %v11367_v23, 1  ;;  %v5163_v63 = vrot.slane %v11370_v55, 7  ;;  %v13922_v26 = vrot.slane %v11349_v17, 3  ;;  %v4690_v62 = vrot.slane %v11383_v45, 3 }
 0x4b0   :  { %v4941_v8 = vrot.slane %v4273_v57, 5  ;;  %v5066_v40 = vrot.slane %v4273_v57, 6  ;;  %v5191_v12 = vrot.slane %v4273_v57, 7  ;;  %v4566_v23 = vsel %vm1166_vm6, %v4563_v11, %v4565_v36 }
 0x4b1   :  { %v4441_v30 = vsel %vm944_vm5, %v13921_v4, %v4440_v54  ;;  %v4689_v32 = vsel %vm1388_vm4, %v13922_v26, %v4688_v27  ;;  %v4275_v9 = vpop.f32.mrf.mxu1  ;;  %v4915_v26 = vrot.slane %v11388_v16, 5 }
 0x4b2   :  { %4480 = vrot.lane.b32.xlu1 %v4441_v30, %s8084_s21  ;;  %4728 = vrot.lane.b32.xlu0 %v4689_v32, %s8083_s20  ;;  %v11676_v46 = vsel %vm2015_vm9, %v5064_v44, %v5066_v40  ;;  %v11679_v57 = vsel %vm1793_vm7, %v4939_v53, %v4941_v8  ;;  %v11682_v7 = vsel %vm480_vm1, %v5189_v51, %v5191_v12  ;;  %v5040_v32 = vrot.slane %v11388_v16, 6 }
 0x4b3   :  { %v4276_v4 = vpop.f32.mrf.mxu1  ;;  %v5164_v30 = vsel %vm480_vm1, %v5161_v33, %v5163_v63  ;;  %v4691_v40 = vsel %vm1388_vm4, %v4688_v27, %v4690_v62  ;;  %v4442_v51 = vrot.slane %v11401_v19, 1  ;;  %v13923_v44 = vrot.slane %v11370_v55, 5 }
 0x4b4   :  { %v13924_v33 = vrot.slane %v11370_v55, 6  ;;  %v4567_v53 = vrot.slane %v11401_v19, 2  ;;  %v4452_v8 = vrot.slane %v11473_v24, 1  ;;  %v13925_v12 = vrot.slane %v11388_v16, 7 }
 0x4b5   :  { %v4916_v11 = vsel %vm1793_vm7, %v13923_v44, %v4915_v26  ;;  %v4443_v27 = vsel %vm944_vm5, %v4440_v54, %v4442_v51  ;;  %v4692_v4 = vrot.slane %v11401_v19, 3  ;;  %v4577_v54 = vrot.slane %v11473_v24, 2 }
 0x4b6   :  { %4605 = vrot.lane.b32.xlu1 %v4566_v23, %s8085_s0  ;;  %5205 = vrot.lane.b32.xlu0 %v5164_v30, %s8083_s20  ;;  %v5041_v23 = vsel %vm2015_vm9, %v13924_v33, %v5040_v32  ;;  %v5166_v9 = vsel %vm480_vm1, %v5163_v63, %v13925_v12  ;;  %v4568_v55 = vsel %vm1166_vm6, %v4565_v36, %v4567_v53  ;;  %v4450_v30 = vrot.slane %v11453_v14, 1 }
 0x4b7   :  { %v4917_v51 = vrot.slane %v11407_v1, 5  ;;  %v4693_v16 = vsel %vm1388_vm4, %v4690_v62, %v4692_v4  ;;  %v4575_v19 = vrot.slane %v11453_v14, 2  ;;  %v4702_v36 = vrot.slane %v11473_v24, 3 }
 0x4b8   :  { %v5042_v44 = vrot.slane %v11407_v1, 6  ;;  %v4700_v33 = vrot.slane %v11453_v14, 3  ;;  %v4927_v62 = vrot.slane %v11476_v6, 5  ;;  %v5052_v1 = vrot.slane %v11476_v6, 6 }
 0x4b9   :  { %v4578_v63 = vsel %vm1166_vm6, %v4575_v19, %v4577_v54  ;;  %v4448_v12 = vrot.slane %v11441_v0, 1  ;;  %v13926_v4 = vrot.slane %v11460_v43, 6 }
 0x4ba   :  { %4730 = vrot.lane.b32.xlu1 %v4691_v40, %s8083_s20  ;;  %4957 = vrot.lane.b32.xlu0 %v4916_v11, %s8084_s21  ;;  %v4453_v40 = vsel %vm944_vm5, %v4450_v30, %v4452_v8  ;;  %v4918_v11 = vsel %vm1793_vm7, %v4915_v26, %v4917_v51  ;;  %v5043_v53 = vsel %vm2015_vm9, %v5040_v32, %v5042_v44  ;;  %v4579_v44 = vrot.slane %v11500_v20, 2 }
 0x4bb   :  { %v4451_v6 = vsel %vm944_vm5, %v4448_v12, %v4450_v30 }
 0x4be   :  { %5082 = vrot.lane.b32.xlu1 %v5041_v23, %s8085_s0  ;;  %4482 = vrot.lane.b32.xlu0 %v4443_v27, %s8084_s21  ;;  %v4703_v23 = vsel %vm1388_vm4, %v4700_v33, %v4702_v36  ;;  %v4925_v27 = vrot.slane %v11460_v43, 5 }
 0x4c0   :  { %v4928_v26 = vsel %vm1793_vm7, %v4925_v27, %v4927_v62 }
 0x4c2   :  { %5207 = vrot.lane.b32.xlu1 %v5166_v9, %s8083_s20  ;;  %4607 = vrot.lane.b32.xlu0 %v4568_v55, %s8085_s0  ;;  %v5053_v55 = vsel %vm2015_vm9, %v13926_v4, %v5052_v1  ;;  %v4580_v4 = vsel %vm1166_vm6, %v4577_v54, %v4579_v44 }
 0x4c6   :  { %4492 = vrot.lane.b32.xlu1 %v4453_v40, %s8084_s21  ;;  %4732 = vrot.lane.b32.xlu0 %v4693_v16, %s8083_s20  ;;  %v4573_v40 = vrot.slane %v11441_v0, 2 }
 0x4c8   :  { %v4576_v43 = vsel %vm1166_vm6, %v4573_v40, %v4575_v19 }
 0x4ca   :  { %4617 = vrot.lane.b32.xlu1 %v4578_v63, %s8085_s0  ;;  %4959 = vrot.lane.b32.xlu0 %v4918_v11, %s8084_s21  ;;  %v4698_v63 = vrot.slane %v11441_v0, 3 }
 0x4ce   :  { %4742 = vrot.lane.b32.xlu1 %v4703_v23, %s8083_s20  ;;  %5084 = vrot.lane.b32.xlu0 %v5043_v53, %s8085_s0  ;;  %v4923_v53 = vrot.slane %v11444_v41, 5 }
 0x4d2   :  { %4969 = vrot.lane.b32.xlu1 %v4928_v26, %s8084_s21  ;;  %5209 = vrot.lane.b32.xlu0 %v11425_v34, %s8083_s20  ;;  %v4454_v34 = vrot.slane %v11500_v20, 1  ;;  %v4701_v26 = vsel %vm1388_vm4, %v4698_v63, %v4700_v33  ;;  %v4456_v63 = vrot.slane %v11520_v35, 1 }
 0x4d3   :  { %v11740_v9 = vpop.permute.xlu1 %4716  ;;  %v11742_v32 = vpop.permute.xlu0 %4466 }
 0x4d4   :  { %v4455_v23 = vsel %vm944_vm5, %v4452_v8, %v4454_v34 }
 0x4d6   :  { %5094 = vrot.lane.b32.xlu1 %v5053_v55, %s8085_s0  ;;  %4490 = vrot.lane.b32.xlu0 %v4451_v6, %s8084_s21  ;;  %v4926_v55 = vsel %vm1793_vm7, %v4923_v53, %v4925_v27  ;;  %v13927_v27 = vrot.slane %v11504_v37, 5  ;;  %v4581_v53 = vrot.slane %v11520_v35, 2 }
 0x4d7   :  { %v11751_v51 = vpop.permute.xlu1 %5068  ;;  %v11754_v16 = vpop.permute.xlu0 %4591 }
 0x4d8   :  { %v4930_v6 = vsel %vm1793_vm7, %v4927_v62, %v13927_v27  ;;  %v4457_v62 = vsel %vm944_vm5, %v4454_v34, %v4456_v63 }
 0x4da   :  { %5219 = vrot.lane.b32.xlu1 %v11507_v18, %s8083_s20  ;;  %4615 = vrot.lane.b32.xlu0 %v4576_v43, %s8085_s0  ;;  %v4704_v18 = vrot.slane %v11500_v20, 3 }
 0x4db   :  { %v11761_v30 = vpop.permute.xlu1 %5193  ;;  %v11764_v11 = vpop.permute.xlu0 %4943 }
 0x4dc   :  { %v4705_v33 = vsel %vm1388_vm4, %v4702_v36, %v4704_v18 }
 0x4de   :  { %4494 = vrot.lane.b32.xlu1 %v4455_v23, %s8084_s21  ;;  %4740 = vrot.lane.b32.xlu0 %v4701_v26, %s8083_s20 }
 0x4df   :  { %v11771_v19 = vpop.permute.xlu1 %4468  ;;  %v11774_v12 = vpop.permute.xlu0 %4718 }
 0x4e2   :  { %4619 = vrot.lane.b32.xlu1 %v4580_v4, %s8085_s0  ;;  %4967 = vrot.lane.b32.xlu0 %v4926_v55, %s8084_s21  ;;  %v4458_v55 = vrot.slane %v11542_v13, 1 }
 0x4e3   :  { %v11780_v41 = vpop.permute.xlu1 %4593  ;;  %v11782_v8 = vpop.permute.xlu0 %5070 }
 0x4e6   :  { %4744 = vrot.lane.b32.xlu1 %v4705_v33, %s8083_s20  ;;  %5092 = vrot.lane.b32.xlu0 %v11481_v52, %s8085_s0  ;;  %v13928_v52 = vrot.slane %v11504_v37, 6  ;;  %v4582_v37 = vsel %vm1166_vm6, %v4579_v44, %v4581_v53  ;;  %v4459_v44 = vsel %vm944_vm5, %v4456_v63, %v4458_v55  ;;  %v4460_v63 = vrot.slane %v11572_v22, 1 }
 0x4e7   :  { %v11788_v40 = vpop.permute.xlu1 %4945  ;;  %v11790_v54 = vpop.permute.xlu0 %5195 }
 0x4e8   :  { %v5055_v23 = vsel %vm2015_vm9, %v5052_v1, %v13928_v52 }
 0x4ea   :  { %4971 = vrot.lane.b32.xlu1 %v4930_v6, %s8084_s21  ;;  %5217 = vrot.lane.b32.xlu0 %v11484_v58, %s8083_s20  ;;  %v4706_v58 = vrot.slane %v11520_v35, 3  ;;  %v4462_v35 = vrot.slane %v11596_v15, 1 }
 0x4eb   :  { %v11799_v36 = vpop.permute.xlu1 %4720  ;;  %v11801_v43 = vpop.permute.xlu0 %4470 }
 0x4ec   :  { %v4707_v33 = vsel %vm1388_vm4, %v4704_v18, %v4706_v58  ;;  %v4583_v18 = vrot.slane %v11542_v13, 2 }
 0x4ee   :  { %5096 = vrot.lane.b32.xlu1 %v5055_v23, %s8085_s0  ;;  %4496 = vrot.lane.b32.xlu0 %v4457_v62, %s8084_s21  ;;  %v4584_v62 = vsel %vm1166_vm6, %v4581_v53, %v4583_v18 }
 0x4ef   :  { %v11810_v26 = vpop.permute.xlu1 %5072  ;;  %v11813_v4 = vpop.permute.xlu0 %4595 }
 0x4f2   :  { %5221 = vrot.lane.b32.xlu1 %v11529_v2, %s8083_s20  ;;  %4621 = vrot.lane.b32.xlu0 %v4582_v37, %s8085_s0 }
 0x4f3   :  { %v11819_v1 = vpop.permute.xlu1 %5197  ;;  %v11822_v34 = vpop.permute.xlu0 %4947 }
 0x4f6   :  { %4746 = vrot.lane.b32.xlu1 %v4707_v33, %s8083_s20  ;;  %4973 = vrot.lane.b32.xlu0 %v11553_v10, %s8084_s21  ;;  %v4461_v33 = vsel %vm944_vm5, %v4458_v55, %v4460_v63  ;;  %v11873_v55 = vpop.f32.mrf.mxu0 }
 0x4f7   :  { %v11828_v27 = vpop.permute.xlu1 %4472  ;;  %v11830_v2 = vpop.permute.xlu0 %4597  ;;  %13930 = vst [vmem:[#allocation31_spill] sm:$0xff] %v11873_v55  ;;  %v4587_v55 = vrot.slane %v11596_v15, 2 }
 0x4fa   :  { %4498 = vrot.lane.b32.xlu1 %v4459_v44, %s8084_s21  ;;  %5098 = vrot.lane.b32.xlu0 %v11559_v61, %s8085_s0  ;;  %v4708_v61 = vrot.slane %v11542_v13, 3 }
 0x4fb   :  { %v11836_v6 = vpop.permute.xlu1 %4474  ;;  %v11838_v52 = vpop.permute.xlu0 %4722 }
 0x4fc   :  { %v4709_v44 = vsel %vm1388_vm4, %v4706_v58, %v4708_v61 }
 0x4fe   :  { %4975 = vrot.lane.b32.xlu1 %v11577_v29, %s8084_s21  ;;  %5223 = vrot.lane.b32.xlu0 %v11562_v42, %s8083_s20  ;;  %v4585_v29 = vrot.slane %v11572_v22, 2 }
 0x4ff   :  { %v11845_v10 = vpop.permute.xlu1 %4599  ;;  %v11848_v23 = vpop.permute.xlu0 %4949 }
 0x502   :  { %5100 = vrot.lane.b32.xlu1 %v11583_v21, %s8085_s0  ;;  %4623 = vrot.lane.b32.xlu0 %v4584_v62, %s8085_s0  ;;  %v4710_v21 = vrot.slane %v11572_v22, 3  ;;  %v4586_v62 = vsel %vm1166_vm6, %v4583_v18, %v4585_v29  ;;  %v11884_v18 = vpop.f32.mrf.mxu0 }
 0x503   :  { %v11855_v37 = vpop.permute.xlu1 %4724  ;;  %v11858_v42 = vpop.permute.xlu0 %5074  ;;  %13931 = vst [vmem:[#allocation97_spill] sm:$0xff] %v11884_v18  ;;  %v4712_v18 = vrot.slane %v11596_v15, 3 }
 0x504   :  { %v11895_v22 = vpop.f32.mrf.mxu0 }
 0x505   :  { %13933 = vst [vmem:[#allocation120_spill] sm:$0xff] %v11895_v22  ;;  %v4464_v22 = vrot.slane %v11620_v48, 1  ;;  %v4713_v24 = vsel %vm1388_vm4, %v4710_v21, %v4712_v18 }
 0x506   :  { %4500 = vrot.lane.b32.xlu1 %v4461_v33, %s8084_s21  ;;  %4748 = vrot.lane.b32.xlu0 %v4709_v44, %s8083_s20  ;;  %v4711_v44 = vsel %vm1388_vm4, %v4708_v61, %v4710_v21  ;;  %v4463_v61 = vsel %vm944_vm5, %v4460_v63, %v4462_v35  ;;  %v4714_v63 = vrot.slane %v11620_v48, 3 }
 0x507   :  { %v11864_v53 = vpop.permute.xlu1 %4951  ;;  %v11867_v13 = vpop.permute.xlu0 %5199 }
 0x508   :  { %13929 = vst [vmem:[#allocation78_spill] sm:$0xff] %v11867_v13  ;;  %v4465_v13 = vsel %vm944_vm5, %v4462_v35, %v4464_v22 }
 0x50a   :  { %4625 = vrot.lane.b32.xlu1 %v4586_v62, %s8085_s0  ;;  %5225 = vrot.lane.b32.xlu0 %v11586_v56, %s8083_s20 }
 0x50b   :  { %v11875_v58 = vpop.permute.xlu1 %5076  ;;  %v11877_v33 = vpop.permute.xlu0 %4476 }
 0x50e   :  { %4750 = vrot.lane.b32.xlu1 %v4711_v44, %s8083_s20  ;;  %4977 = vrot.lane.b32.xlu0 %v11601_v5, %s8084_s21 }
 0x50f   :  { %v11886_v62 = vpop.permute.xlu1 %5201  ;;  %v11888_v56 = vpop.permute.xlu0 %4601 }
 0x510   :  { %13932 = vst [vmem:[#allocation109_spill] sm:$0xff] %v11886_v62  ;;  %v4588_v62 = vsel %vm1166_vm6, %v4585_v29, %v4587_v55 }
 0x512   :  { %5102 = vrot.lane.b32.xlu1 %v11607_v59, %s8085_s0  ;;  %4502 = vrot.lane.b32.xlu0 %v4463_v61, %s8084_s21  ;;  %v11906_v59 = vpop.f32.mrf.mxu0 }
 0x513   :  { %v11897_v44 = vpop.permute.xlu1 %4726  ;;  %v11899_v5 = vpop.permute.xlu0 %4953  ;;  %13934 = vst [vmem:[#allocation28_spill] sm:$0xff] %v11906_v59 }
 0x514   :  { %v11916_v15 = vpop.f32.mrf.mxu0 }
 0x515   :  { %13936 = vst [vmem:[#allocation18_spill] sm:$0xff] %v11916_v15 }
 0x516   :  { %5227 = vrot.lane.b32.xlu1 %v11610_v50, %s8083_s20  ;;  %4627 = vrot.lane.b32.xlu0 %v4588_v62, %s8085_s0  ;;  %v11921_v29 = vpop.f32.mrf.mxu0  ;;  %v4589_v62 = vrot.slane %v11620_v48, 2 }
 0x517   :  { %v11909_v61 = vpop.permute.xlu1 %4478  ;;  %v11912_v20 = vpop.permute.xlu0 %5078  ;;  %13937 = vst [vmem:[#allocation30_spill] sm:$0xff] %v11921_v29 }
 0x518   :  { %13935 = vst [vmem:[#allocation134_spill] sm:$0xff] %v11912_v20  ;;  %v7956_v20 = vpop.f32.mrf.mxu0 }
 0x519   :  { %v4715_v20 = vsel %vm1388_vm4, %v4712_v18, %v4714_v63 }
 0x51a   :  { %4756 = vrot.lane.b32.xlu1 %v4714_v63, %s8083_s20  ;;  %4752 = vrot.lane.b32.xlu0 %v4713_v24, %s8083_s20  ;;  %v4590_v24 = vsel %vm1166_vm6, %v4587_v55, %v4589_v62 }
 0x51b   :  { %v11919_v50 = vpop.permute.xlu1 %4955  ;;  %v11924_v59 = vpop.permute.xlu0 %5203 }
 0x51c   :  { %13938 = vst [vmem:[#allocation163_spill] sm:$0xff] %v11924_v59 }
 0x51e   :  { %4504 = vrot.lane.b32.xlu1 %v4465_v13, %s8084_s21  ;;  %4979 = vrot.lane.b32.xlu0 %v11625_v25, %s8084_s21 }
 0x51f   :  { %v11930_v21 = vpop.permute.xlu1 %5080 }
 0x520   :  { %13939 = vst [vmem:[#allocation13_spill] sm:$0xff] %v11930_v21  ;;  %v11932_v15 = vpop.permute.xlu0 %4603 }
 0x522   :  { %4629 = vrot.lane.b32.xlu1 %v4590_v24, %s8085_s0  ;;  %5104 = vrot.lane.b32.xlu0 %v11633_v38, %s8085_s0 }
 0x524   :  { %v11938_v48 = vpop.permute.xlu1 %4480  ;;  %v11940_v35 = vpop.permute.xlu0 %4728 }
 0x526   :  { %4754 = vrot.lane.b32.xlu1 %v4715_v20, %s8083_s20  ;;  %5229 = vrot.lane.b32.xlu0 %v11636_v3, %s8083_s20 }
 0x528   :  { %v11946_v13 = vpop.permute.xlu1 %4605  ;;  %v11948_v25 = vpop.permute.xlu0 %5205 }
 0x529   :  { %13940 = vst [vmem:[#allocation83_spill] sm:$0xff] %v11948_v25 }
 0x52a   :  { %4981 = vrot.lane.b32.xlu1 %v11652_v49, %s8084_s21  ;;  %4506 = vrot.lane.b32.xlu0 %v4464_v22, %s8084_s21 }
 0x52c   :  { %v11953_v38 = vpop.permute.xlu1 %4730  ;;  %v11955_v55 = vpop.permute.xlu0 %4957 }
 0x52d   :  { %13941 = vst [vmem:[#allocation117_spill] sm:$0xff] %v11955_v55  ;;  %v4530_v55 = vadd.f32 %v11771_v19, %v11270_v60 }
 0x52e   :  { %5106 = vrot.lane.b32.xlu1 %v11655_v39, %s8085_s0  ;;  %4631 = vrot.lane.b32.xlu0 %v4589_v62, %s8085_s0 }
 0x530   :  { %v11960_v18 = vpop.permute.xlu1 %5082  ;;  %v11962_v3 = vpop.permute.xlu0 %4482 }
 0x531   :  { %13942 = vst [vmem:[#allocation125_spill] sm:$0xff] %v11960_v18 }
 0x532   :  { %5108 = vrot.lane.b32.xlu1 %v11676_v46, %s8085_s0  ;;  %4983 = vrot.lane.b32.xlu0 %v11679_v57, %s8084_s21 }
 0x534   :  { %v11968_v22 = vpop.permute.xlu1 %5207  ;;  %v11970_v49 = vpop.permute.xlu0 %4607 }
 0x535   :  { %13943 = vst [vmem:[#allocation44_spill] sm:$0xff] %v11968_v22 }
 0x536   :  { %5233 = vrot.lane.b32.xlu1 %v11682_v7, %s8083_s20  ;;  %5231 = vrot.lane.b32.xlu0 %v11658_v28, %s8083_s20 }
 0x538   :  { %v11976_v39 = vpop.permute.xlu1 %4492  ;;  %v11978_v63 = vpop.permute.xlu0 %4732 }
 0x53c   :  { %v11980_v62 = vpop.permute.xlu1 %4617  ;;  %v11982_v46 = vpop.permute.xlu0 %4959 }
 0x53d   :  { %13944 = vst [vmem:[#allocation128_spill] sm:$0xff] %v11982_v46 }
 0x540   :  { %v11984_v24 = vpop.permute.xlu1 %4742  ;;  %v11986_v57 = vpop.permute.xlu0 %5084 }
 0x541   :  { %13945 = vst [vmem:[#allocation47_spill] sm:$0xff] %v11984_v24  ;;  %13946 = vst [vmem:[#allocation32_spill] sm:$0xff] %v11986_v57 }
 0x544   :  { %v11988_v20 = vpop.permute.xlu1 %4969  ;;  %v11990_v29 = vpop.permute.xlu0 %5209 }
 0x545   :  { %13947 = vst [vmem:[#allocation34_spill] sm:$0xff] %v11988_v20  ;;  %13948 = vst [vmem:[#allocation74_spill] sm:$0xff] %v11990_v29 }
 0x548   :  { %v11992_v7 = vpop.permute.xlu1 %5094  ;;  %v11994_v22 = vpop.permute.xlu0 %4490 }
 0x549   :  { %13949 = vst [vmem:[#allocation80_spill] sm:$0xff] %v11992_v7  ;;  %v4529_v7 = vadd.f32 %v11742_v32, %v11262_v31 }
 0x54c   :  { %v11996_v28 = vpop.permute.xlu1 %5219  ;;  %v11998_v25 = vpop.permute.xlu0 %4615 }
 0x54d   :  { %13950 = vst [vmem:[#allocation139_spill] sm:$0xff] %v11996_v28  ;;  %v4654_v28 = vadd.f32 %v11754_v16, %v4529_v7  ;;  %v13957_v7 = vld [vmem:[#allocation113_spill] sm:$0xff] }
 0x550   :  { %v12000_v18 = vpop.permute.xlu1 %4494  ;;  %v12002_v59 = vpop.permute.xlu0 %4740 }
 0x551   :  { %13951 = vst [vmem:[#allocation138_spill] sm:$0xff] %v12002_v59 }
 0x554   :  { %v12004_v46 = vpop.permute.xlu1 %4619  ;;  %v12006_v24 = vpop.permute.xlu0 %4967 }
 0x555   :  { %13952 = vst [vmem:[#allocation36_spill] sm:$0xff] %v12004_v46  ;;  %13953 = vst [vmem:[#allocation149_spill] sm:$0xff] %v12006_v24  ;;  %v4655_v46 = vadd.f32 %v11780_v41, %v4530_v55  ;;  %v4531_v24 = vadd.f32 %v11801_v43, %v11284_v47  ;;  %v13959_v47 = vld [vmem:[#allocation21_spill] sm:$0xff] }
 0x557   :  { %v4656_v31 = vadd.f32 %v11813_v4, %v4531_v24  ;;  %v4780_v32 = vadd.f32 %v11774_v12, %v4655_v46  ;;  %v13960_v4 = vld [vmem:[#allocation108_spill] sm:$0xff]  ;;  %v13961_v46 = vld [vmem:[#allocation106_spill] sm:$0xff] }
 0x558   :  { %v12008_v57 = vpop.permute.xlu1 %4744  ;;  %v12010_v20 = vpop.permute.xlu0 %5092 }
 0x559   :  { %13954 = vst [vmem:[#allocation33_spill] sm:$0xff] %v12008_v57  ;;  %13955 = vst [vmem:[#allocation153_spill] sm:$0xff] %v12010_v20  ;;  %v4779_v20 = vadd.f32 %v11740_v9, %v4654_v28  ;;  %v4781_v41 = vadd.f32 %v11799_v36, %v4656_v31  ;;  %v4881_v43 = vadd.f32 %v13959_v47, %v4780_v32 }
 0x55b   :  { %v4882_v24 = vadd.f32 %v13960_v4, %v4781_v41  ;;  %v5007_v12 = vadd.f32 %v11788_v40, %v4881_v43 }
 0x55c   :  { %v12014_v29 = vpop.permute.xlu1 %4971  ;;  %v12017_v21 = vpop.permute.xlu0 %5217 }
 0x55d   :  { %13956 = vst [vmem:[#allocation91_spill] sm:$0xff] %v12017_v21  ;;  %v13958_v21 = vrot.slane %v13957_v7, 4  ;;  %v4532_v7 = vadd.f32 %v11828_v27, %v13961_v46  ;;  %v5008_v31 = vadd.f32 %v11822_v34, %v4882_v24  ;;  %v5132_v32 = vadd.f32 %v11782_v8, %v5007_v12  ;;  %v13963_v27 = vld [vmem:[#allocation20_spill] sm:$0xff] }
 0x55e   :  { %v4534_v43 = vadd.f32 %v11877_v33, %v13963_v27  ;;  %v13964_v33 = vld [vmem:[#allocation19_spill] sm:$0xff] }
 0x55f   :  { %v4880_v60 = vadd.f32 %v13958_v21, %v4779_v20 }
 0x560   :  { %v12024_v57 = vpop.permute.xlu1 %5096  ;;  %v12027_v59 = vpop.permute.xlu0 %4496  ;;  %v4659_v8 = vadd.f32 %v11888_v56, %v4534_v43  ;;  %v12081_v56 = vld [vmem:[%s13148_s6] ss:$0 sm:$0xff] }
 0x561   :  { %v5006_v9 = vadd.f32 %v11764_v11, %v4880_v60  ;;  %v4657_v11 = vadd.f32 %v11830_v2, %v4532_v7  ;;  %v13962_v60 = vld [vmem:[#allocation118_spill] sm:$0xff]  ;;  %v4535_v2 = vadd.f32 %v11909_v61, %v11349_v17  ;;  %v13966_v61 = vld [vmem:[#allocation96_spill] sm:$0xff] }
 0x562   :  { %v4533_v41 = vadd.f32 %v11836_v6, %v13962_v60  ;;  %v5257_v6 = vadd.f32 %v11790_v54, %v5132_v32  ;;  %v4784_v46 = vadd.f32 %v11897_v44, %v4659_v8  ;;  %v13965_v54 = vld [vmem:[#allocation67_spill] sm:$0xff] }
 0x563   :  { %v5131_v20 = vadd.f32 %v11751_v51, %v5006_v9  ;;  %v5133_v51 = vadd.f32 %v11810_v26, %v5008_v31  ;;  %v4782_v9 = vadd.f32 %v11838_v52, %v4657_v11  ;;  %v4660_v26 = vadd.f32 %v11932_v15, %v4535_v2  ;;  %v13968_v44 = vld [vmem:[#allocation23_spill] sm:$0xff] }
 0x564   :  { %v12031_v16 = vpop.permute.xlu1 %5221  ;;  %v12035_v19 = vpop.permute.xlu0 %4621  ;;  %v4658_v34 = vadd.f32 %v11845_v10, %v4533_v41  ;;  %v4536_v52 = vadd.f32 %v11938_v48, %v13965_v54  ;;  %v5278_v7 = vadd.f32 %v13966_v61, %v5257_v6  ;;  %v13969_v41 = vld [vmem:[#allocation85_spill] sm:$0xff] }
 0x565   :  { %v5256_v40 = vadd.f32 %v11761_v30, %v5131_v20  ;;  %v5258_v17 = vadd.f32 %v11819_v1, %v5133_v51  ;;  %v13967_v20 = vld [vmem:[#allocation157_spill] sm:$0xff]  ;;  %v13970_v1 = vld [vmem:[#allocation88_spill] sm:$0xff] }
 0x566   :  { %v4783_v30 = vadd.f32 %v11855_v37, %v4658_v34  ;;  %v4785_v37 = vadd.f32 %v11940_v35, %v4660_v26  ;;  %v4883_v31 = vadd.f32 %v13967_v20, %v4782_v9  ;;  %v4661_v15 = vadd.f32 %v11946_v13, %v4536_v52  ;;  %v13971_v51 = vld [vmem:[#allocation25_spill] sm:$0xff]  ;;  %v13974_v52 = vld [vmem:[#allocation126_spill] sm:$0xff] }
 0x567   :  { %v5277_v12 = vadd.f32 %v13964_v33, %v5256_v40  ;;  %v4885_v40 = vadd.f32 %v13969_v41, %v4784_v46  ;;  %v5279_v43 = vadd.f32 %v5258_v17, %v13970_v1  ;;  %v4537_v34 = vadd.f32 %v11962_v3, %v11383_v45  ;;  %v13972_v46 = vld [vmem:[#allocation147_spill] sm:$0xff]  ;;  %v13977_v20 = vld [vmem:[#allocation134_spill] sm:$0xff]  ;;  %v13982_v1 = vld [vmem:[#allocation13_spill] sm:$0xff] }
 0x568   :  { %v12039_v55 = vpop.permute.xlu1 %4746  ;;  %v12042_v28 = vpop.permute.xlu0 %4973  ;;  %v4884_v32 = vadd.f32 %v13968_v44, %v4783_v30  ;;  %v4786_v48 = vadd.f32 %v11953_v38, %v4661_v15  ;;  %v4886_v35 = vadd.f32 %v13971_v51, %v4785_v37  ;;  %v5306_v8 = vadd.f32 %v12081_v56, %v5278_v7  ;;  %v13975_v37 = vld [vmem:[#allocation162_spill] sm:$0xff]  ;;  %v13976_v7 = vld [vmem:[#allocation109_spill] sm:$0xff]  ;;  %v13980_v15 = vld [vmem:[#allocation36_spill] sm:$0xff] }
 0x569   :  { %v5305_v60 = vadd.f32 %v12081_v56, %v5277_v12  ;;  %v5009_v2 = vadd.f32 %v11848_v23, %v4883_v31  ;;  %v5011_v30 = vadd.f32 %v11899_v5, %v4885_v40  ;;  %v4662_v33 = vadd.f32 %v11970_v49, %v4537_v34  ;;  %v13979_v44 = vld [vmem:[#allocation117_spill] sm:$0xff]  ;;  %v13981_v41 = vld [vmem:[#allocation87_spill] sm:$0xff] }
 0x56a   :  { %v5010_v13 = vadd.f32 %v11864_v53, %v4884_v32  ;;  %v4541_v38 = vadd.f32 %v11994_v22, %v11441_v0  ;;  %v5307_v45 = vadd.f32 %v12081_v56, %v5279_v43  ;;  %v4887_v53 = vadd.f32 %v13972_v46, %v4786_v48  ;;  %v13973_v22 = vld [vmem:[#allocation78_spill] sm:$0xff]  ;;  %v13983_v48 = vld [vmem:[#allocation100_spill] sm:$0xff]  ;;  %v13985_v34 = vld [vmem:[#allocation33_spill] sm:$0xff] }
 0x56b   :  { %v12101_v9 = vmax.f32 %v5305_v60, 0.0  ;;  %v5134_v3 = vadd.f32 %v11858_v42, %v5009_v2  ;;  %v5012_v26 = vadd.f32 %v11919_v50, %v4886_v35  ;;  %v4787_v17 = vadd.f32 %v11978_v63, %v4662_v33  ;;  %v13989_v46 = vld [vmem:[#allocation76_spill] sm:$0xff] }
 0x56c   :  { %v12048_v21 = vpop.permute.xlu1 %4498  ;;  %v12051_v36 = vpop.permute.xlu0 %5098  ;;  %v5135_v23 = vadd.f32 %v11875_v58, %v5010_v13  ;;  %v4542_v5 = vadd.f32 %v11976_v39, %v11453_v14  ;;  %v4666_v49 = vadd.f32 %v11998_v25, %v4541_v38  ;;  %v12118_v0 = vmax.f32 %v5306_v8, 0.0  ;;  %v13978_v14 = vld [vmem:[#allocation138_spill] sm:$0xff] }
 0x56d   :  { %v5259_v54 = vadd.f32 %v13973_v22, %v5134_v3  ;;  %v4543_v42 = vadd.f32 %v12000_v18, %v13974_v52  ;;  %v4544_v58 = vadd.f32 %v12027_v59, %v13975_v37  ;;  %v5136_v63 = vadd.f32 %v13977_v20, %v5011_v30  ;;  %v13986_v30 = vld [vmem:[#allocation112_spill] sm:$0xff]  ;;  %v13988_v3 = vld [vmem:[#allocation163_spill] sm:$0xff] }
 0x56e   :  { %v5260_v50 = vadd.f32 %v13976_v7, %v5135_v23  ;;  %v4667_v31 = vadd.f32 %v11980_v62, %v4542_v5  ;;  %v4791_v39 = vadd.f32 %v13978_v14, %v4666_v49  ;;  %v5013_v32 = vadd.f32 %v13979_v44, %v4887_v53  ;;  %v13984_v62 = vld [vmem:[#allocation47_spill] sm:$0xff]  ;;  %v13991_v49 = vld [vmem:[#allocation125_spill] sm:$0xff]  ;;  %v13993_v37 = vld [vmem:[#allocation128_spill] sm:$0xff] }
 0x56f   :  { %v4668_v60 = vadd.f32 %v13980_v15, %v4543_v42  ;;  %v4669_v18 = vadd.f32 %v12035_v19, %v4544_v58  ;;  %v4545_v59 = vadd.f32 %v12048_v21, %v13981_v41  ;;  %v12136_v40 = vmax.f32 %v5307_v45, 0.0  ;;  %v13987_v21 = vld [vmem:[#allocation123_spill] sm:$0xff]  ;;  %v13994_v7 = vld [vmem:[#allocation64_spill] sm:$0xff]  ;;  %v13996_v14 = vld [vmem:[#allocation122_spill] sm:$0xff] }
 0x570   :  { %v12058_v47 = vpop.permute.xlu1 %4975  ;;  %v12063_v4 = vpop.permute.xlu0 %5223  ;;  %v5137_v43 = vadd.f32 %v13982_v1, %v5012_v26  ;;  %v4888_v51 = vadd.f32 %v13983_v48, %v4787_v17  ;;  %v4792_v35 = vadd.f32 %v13984_v62, %v4667_v31  ;;  %v5508_v19 = vrot.slane %v12101_v9, 4  ;;  %v13990_v17 = vld [vmem:[#allocation127_spill] sm:$0xff]  ;;  %v13998_v15 = vld [vmem:[#allocation32_spill] sm:$0xff] }
 0x571   :  { %v4793_v8 = vadd.f32 %v13985_v34, %v4668_v60  ;;  %v4794_v2 = vadd.f32 %v12039_v55, %v4669_v18  ;;  %v5280_v45 = vadd.f32 %v5259_v54, %v13987_v21  ;;  %v5261_v23 = vadd.f32 %v13988_v3, %v5136_v63  ;;  %v13995_v63 = vld [vmem:[#allocation105_spill] sm:$0xff] }
 0x572   :  { %v4892_v53 = vadd.f32 %v13989_v46, %v4791_v39  ;;  %v5281_v5 = vadd.f32 %v13990_v17, %v5260_v50  ;;  %v5138_v22 = vadd.f32 %v13991_v49, %v5013_v32  ;;  %v5014_v58 = vadd.f32 %v13993_v37, %v4888_v51  ;;  %v13999_v18 = vld [vmem:[#allocation149_spill] sm:$0xff]  ;;  %v14001_v51 = vld [vmem:[#allocation27_spill] sm:$0xff]  ;;  %v14010_v37 = vld [vmem:[#allocation22_spill] sm:$0xff] }
 0x573   :  { %v4893_v20 = vadd.f32 %v13994_v7, %v4792_v35  ;;  %v5511_v54 = vrot.slane %v12136_v40, 4  ;;  %v4894_v31 = vadd.f32 %v13995_v63, %v4793_v8  ;;  %v4895_v39 = vadd.f32 %v13996_v14, %v4794_v2  ;;  %v14002_v35 = vld [vmem:[#allocation135_spill] sm:$0xff]  ;;  %v14004_v2 = vld [vmem:[#allocation74_spill] sm:$0xff]  ;;  %v14006_v21 = vld [vmem:[#allocation153_spill] sm:$0xff] }
 0x574   :  { %v12073_v24 = vpop.permute.xlu1 %5100  ;;  %v4624_v10 = vpop.permute.xlu0 %4623  ;;  %v5139_v60 = vadd.f32 %v13998_v15, %v5014_v58  ;;  %v5018_v41 = vadd.f32 %v13999_v18, %v4892_v53  ;;  %v5309_v1 = vadd.f32 %v12081_v56, %v5281_v5  ;;  %v14007_v46 = vld [vmem:[#allocation29_spill] sm:$0xff]  ;;  %v14013_v18 = vld [vmem:[#allocation24_spill] sm:$0xff] }
 0x575   :  { %v4670_v13 = vadd.f32 %v4624_v10, %v4545_v59  ;;  %v5509_v10 = vrot.slane %v12118_v0, 4  ;;  %v5020_v3 = vadd.f32 %v12014_v29, %v4894_v31  ;;  %v14011_v31 = vld [vmem:[#allocation71_spill] sm:$0xff] }
 0x577   :  { %v5145_v29 = vadd.f32 %v12024_v57, %v5020_v3  ;;  %v5510_v57 = vsel %vm1646_vm8, %v5508_v19, %v5509_v10 }
 0x578   :  { %v4501_v11 = vpop.permute.xlu1 %4500  ;;  %v4749_v27 = vpop.permute.xlu0 %4748 }
 0x579   :  { %v4546_v33 = vadd.f32 %v4501_v11, %v13986_v30  ;;  %v4795_v52 = vadd.f32 %v4749_v27, %v4670_v13  ;;  %v13992_v11 = vld [vmem:[#allocation83_spill] sm:$0xff]  ;;  %v5308_v27 = vadd.f32 %v12081_v56, %v5280_v45  ;;  %v5264_v13 = vadd.f32 %v14004_v2, %v5139_v60  ;;  %v14005_v30 = vld [vmem:[#allocation34_spill] sm:$0xff] }
 0x57a   :  { %v5262_v42 = vadd.f32 %v13992_v11, %v5137_v43  ;;  %v14000_v43 = vld [vmem:[#allocation44_spill] sm:$0xff]  ;;  %v5143_v45 = vadd.f32 %v14006_v21, %v5018_v41 }
 0x57b   :  { %v5263_v48 = vadd.f32 %v14000_v43, %v5138_v22  ;;  %v4896_v62 = vadd.f32 %v14001_v51, %v4795_v52  ;;  %v12178_v49 = vmax.f32 %v5308_v27, 0.0  ;;  %v14008_v22 = vld [vmem:[#allocation80_spill] sm:$0xff]  ;;  %v5285_v14 = vadd.f32 %v14011_v31, %v5264_v13  ;;  %v14019_v31 = vld [vmem:[#allocation154_spill] sm:$0xff] }
 0x57c   :  { %v4626_v6 = vpop.permute.xlu1 %4625  ;;  %v12107_v12 = vpop.permute.xlu0 %5225  ;;  %v5270_v27 = vadd.f32 %v12031_v16, %v5145_v29  ;;  %v14014_v43 = vld [vmem:[#allocation148_spill] sm:$0xff]  ;;  %v5589_v13 = vsel %vm3047_vm10, %v5510_v57, 0.0 }
 0x57d   :  { %v4671_v55 = vadd.f32 %v4626_v6, %v4546_v33  ;;  %v13997_v6 = vld [vmem:[#allocation119_spill] sm:$0xff]  ;;  %v5019_v33 = vadd.f32 %v14005_v30, %v4893_v20  ;;  %v5284_v58 = vadd.f32 %v5263_v48, %v14010_v37  ;;  %v12186_v20 = vmax.f32 %v5309_v1, 0.0 }
 0x57e   :  { %v5282_v32 = vadd.f32 %v13997_v6, %v5261_v23  ;;  %v5021_v23 = vadd.f32 %v12042_v28, %v4895_v39  ;;  %v5022_v28 = vadd.f32 %v12058_v47, %v4896_v62  ;;  %v14012_v39 = vld [vmem:[#allocation139_spill] sm:$0xff]  ;;  %v5512_v47 = vsel %vm1646_vm8, %v5509_v10, %v5511_v54  ;;  %v14015_v10 = vld [vmem:[#allocation144_spill] sm:$0xff] }
 0x57f   :  { %v5144_v52 = vadd.f32 %v14008_v22, %v5019_v33  ;;  %v5513_v1 = vrot.slane %v12178_v49, 4  ;;  %v5312_v16 = vadd.f32 %v12081_v56, %v5284_v58  ;;  %v5515_v48 = vrot.slane %v12186_v20, 4  ;;  %v14017_v22 = vld [vmem:[#allocation28_spill] sm:$0xff] }
 0x580   :  { %v4751_v61 = vpop.permute.xlu1 %4750  ;;  %v12129_v25 = vpop.permute.xlu0 %4977  ;;  %v5146_v6 = vadd.f32 %v12051_v36, %v5021_v23  ;;  %v5147_v36 = vadd.f32 %v12073_v24, %v5022_v28  ;;  %v5313_v51 = vadd.f32 %v12081_v56, %v5285_v14  ;;  %v5590_v24 = vsel %vm3047_vm10, %v5512_v47, 0.0  ;;  %v14020_v47 = vld [vmem:[#allocation120_spill] sm:$0xff] }
 0x581   :  { %v4796_v44 = vadd.f32 %v4751_v61, %v4671_v55  ;;  %v14003_v61 = vld [vmem:[#allocation143_spill] sm:$0xff]  ;;  %v12220_v3 = vmax.f32 %v5312_v16, 0.0 }
 0x582   :  { %v5283_v8 = vadd.f32 %v5262_v42, %v14003_v61  ;;  %v14009_v55 = vld [vmem:[#allocation91_spill] sm:$0xff]  ;;  %v5271_v61 = vadd.f32 %v12063_v4, %v5146_v6  ;;  %v5272_v4 = vadd.f32 %v12107_v12, %v5147_v36 }
 0x583   :  { %v4897_v53 = vadd.f32 %v14007_v46, %v4796_v44  ;;  %v5268_v11 = vadd.f32 %v14009_v55, %v5143_v45  ;;  %v5269_v44 = vadd.f32 %v14012_v39, %v5144_v52  ;;  %v5514_v45 = vsel %vm1646_vm8, %v5511_v54, %v5513_v1 }
 0x584   :  { %v12144_v38 = vpop.permute.xlu1 %5102  ;;  %v4503_v26 = vpop.permute.xlu0 %4502  ;;  %v5311_v63 = vadd.f32 %v12081_v56, %v5283_v8  ;;  %v5292_v52 = vadd.f32 %v5271_v61, %v14017_v22  ;;  %v5592_v12 = vsel %vm3047_vm10, %v5514_v45, 0.0  ;;  %v5521_v28 = vrot.slane %v12220_v3, 4 }
 0x585   :  { %v4547_v34 = vadd.f32 %v4503_v26, %v14002_v35  ;;  %v5310_v26 = vadd.f32 %v12081_v56, %v5282_v32  ;;  %v5023_v32 = vadd.f32 %v12129_v25, %v4897_v53  ;;  %v5289_v41 = vadd.f32 %v14013_v18, %v5268_v11  ;;  %v14016_v35 = vld [vmem:[#allocation97_spill] sm:$0xff] }
 0x586   :  { %v12206_v19 = vmax.f32 %v5311_v63, 0.0  ;;  %v5290_v62 = vadd.f32 %v14015_v10, %v5269_v44  ;;  %v12225_v53 = vmax.f32 %v5313_v51, 0.0  ;;  %v5320_v57 = vadd.f32 %v12081_v56, %v5292_v52  ;;  %v14021_v51 = vld [vmem:[#allocation30_spill] sm:$0xff] }
 0x587   :  { %v12198_v60 = vmax.f32 %v5310_v26, 0.0  ;;  %v5148_v8 = vadd.f32 %v12144_v38, %v5023_v32  ;;  %v5317_v33 = vadd.f32 %v12081_v56, %v5289_v41  ;;  %v5516_v38 = vsel %vm1646_vm8, %v5513_v1, %v5515_v48 }
 0x588   :  { %v12159_v50 = vpop.permute.xlu1 %5227  ;;  %v4628_v59 = vpop.permute.xlu0 %4627  ;;  %v5519_v46 = vrot.slane %v12206_v19, 4  ;;  %v5594_v44 = vsel %vm3047_vm10, %v5516_v38, 0.0 }
 0x589   :  { %v4672_v17 = vadd.f32 %v4628_v59, %v4547_v34  ;;  %v5291_v34 = vadd.f32 %v5270_v27, %v14016_v35  ;;  %v5517_v30 = vrot.slane %v12198_v60, 4  ;;  %v5273_v55 = vadd.f32 %v12159_v50, %v5148_v8 }
 0x58a   :  { %v12233_v58 = vmax.f32 %v5317_v33, 0.0  ;;  %v5523_v27 = vrot.slane %v12225_v53, 4 }
 0x58b   :  { %v5319_v26 = vadd.f32 %v12081_v56, %v5291_v34  ;;  %v5518_v37 = vsel %vm1646_vm8, %v5515_v48, %v5517_v30  ;;  %v5520_v50 = vsel %vm1646_vm8, %v5517_v30, %v5519_v46  ;;  %v5294_v18 = vadd.f32 %v14020_v47, %v5273_v55 }
 0x58c   :  { %v12176_v5 = vpop.permute.xlu1 %4756  ;;  %v4753_v42 = vpop.permute.xlu0 %4752  ;;  %v5531_v16 = vrot.slane %v12233_v58, 4  ;;  %v5598_v35 = vsel %vm3047_vm10, %v5520_v50, 0.0  ;;  %v5524_v34 = vsel %vm1646_vm8, %v5521_v28, %v5523_v27 }
 0x58d   :  { %v4797_v7 = vadd.f32 %v4753_v42, %v4672_v17  ;;  %v5318_v17 = vadd.f32 %v12081_v56, %v5290_v62  ;;  %v5591_v42 = vadd.f32 %v5590_v24, %v5589_v13  ;;  %v12243_v32 = vmax.f32 %v5319_v26, 0.0  ;;  %v14022_v24 = vld [vmem:[#allocation26_spill] sm:$0xff] }
 0x58e   :  { %v5322_v13 = vadd.f32 %v12081_v56, %v5294_v18  ;;  %v5602_v55 = vsel %vm3047_vm10, %v5524_v34, 0.0 }
 0x58f   :  { %v4898_v25 = vadd.f32 %v14014_v43, %v4797_v7  ;;  %v14018_v7 = vld [vmem:[#allocation31_spill] sm:$0xff]  ;;  %v12241_v6 = vmax.f32 %v5318_v17, 0.0  ;;  %v5593_v1 = vadd.f32 %v5592_v12, %v5591_v42  ;;  %v5522_v43 = vsel %vm1646_vm8, %v5519_v46, %v5521_v28  ;;  %v14023_v17 = vld [vmem:[#allocation66_spill] sm:$0xff] }
 0x590   :  { %v4505_v15 = vpop.permute.xlu1 %4504  ;;  %v4980_v59 = vpop.permute.xlu0 %4979  ;;  %v5293_v63 = vadd.f32 %v14018_v7, %v5272_v4  ;;  %v5535_v8 = vrot.slane %v12243_v32, 4  ;;  %v5600_v45 = vsel %vm3047_vm10, %v5522_v43, 0.0  ;;  %v12269_v42 = vmax.f32 %v5322_v13, 0.0  ;;  %v8043_v43 = vld [vmem:[%s13151_s9 + $0x20] ss:$12 sps:$4 sm:$0xff]  }
 0x591   :  { %v5024_v23 = vadd.f32 %v4980_v59, %v4898_v25  ;;  %v4548_v14 = vadd.f32 %v4505_v15, %v14019_v31  ;;  %v5596_v15 = vsel %vm3047_vm10, %v5518_v37, 0.0  ;;  %v5595_v62 = vadd.f32 %v5594_v44, %v5593_v1  ;;  %v8036_v1 = vld [vmem:[%s13151_s9 + $0x18] ss:$12 sps:$4 sm:$0xff]   ;;  %v8039_v13 = vld [vmem:[%s13151_s9] ss:$12 sps:$4 sm:$0xff]   ;;  %7957 = vmatprep.subr.bf16.mxu0 %v8043_v43 }
 0x592   :  { %v5321_v25 = vadd.f32 %v12081_v56, %v5293_v63  ;;  %v5533_v61 = vrot.slane %v12241_v6, 4  ;;  %7958 = vmatpush3.bf16.msra.mxu0 %v8043_v43 }
 0x594   :  { %v4630_v2 = vpop.permute.xlu1 %4629  ;;  %v5105_v21 = vpop.permute.xlu0 %5104  ;;  %v5534_v4 = vsel %vm1646_vm8, %v5531_v16, %v5533_v61  ;;  %v12262_v38 = vmax.f32 %v5321_v25, 0.0 }
 0x595   :  { %v5149_v54 = vadd.f32 %v5105_v21, %v5024_v23  ;;  %v4673_v41 = vadd.f32 %v4630_v2, %v4548_v14  ;;  %v12256_v2 = vmax.f32 %v5320_v57, 0.0  ;;  %v5597_v21 = vadd.f32 %v5596_v15, %v5595_v62  ;;  %v8044_v62 = vld [vmem:[%s13151_s9 + $0x8] ss:$12 sps:$4 sm:$0xff]  }
 0x596   :  { %v5539_v63 = vrot.slane %v12262_v38, 4  ;;  %7959 = vmatprep.subr.bf16.mxu0 %v8044_v62 }
 0x597   :  { %v5599_v52 = vadd.f32 %v5598_v35, %v5597_v21  ;;  %7960 = vmatpush3.bf16.msra.mxu0 %v8044_v62 }
 0x598   :  { %v4755_v11 = vpop.permute.xlu1 %4754  ;;  %v5230_v29 = vpop.permute.xlu0 %5229 }
 0x599   :  { %v5274_v39 = vadd.f32 %v5230_v29, %v5149_v54  ;;  %v4798_v48 = vadd.f32 %v4755_v11, %v4673_v41  ;;  %v5536_v54 = vsel %vm1646_vm8, %v5533_v61, %v5535_v8  ;;  %v5537_v11 = vrot.slane %v12256_v2, 4  ;;  %v4393_v61 = vpop.f32.mrf.mxu0 }
 0x59a   :  { %v5601_v37 = vadd.f32 %v5600_v45, %v5599_v52  ;;  %v5612_v29 = vsel %vm3047_vm10, %v5534_v4, 0.0  ;;  %v5614_v57 = vsel %vm3047_vm10, %v5536_v54, 0.0 }
 0x59b   :  { %v5295_v10 = vadd.f32 %v5274_v39, %v14021_v51  ;;  %v4899_v26 = vadd.f32 %v14023_v17, %v4798_v48  ;;  %v14024_v39 = vld [vmem:[#allocation81_spill] sm:$0xff]  ;;  %v5538_v47 = vsel %vm1646_vm8, %v5535_v8, %v5537_v11  ;;  %v5540_v25 = vsel %vm1646_vm8, %v5537_v11, %v5539_v63 }
 0x59c   :  { %v4982_v59 = vpop.permute.xlu1 %4981  ;;  %v4507_v36 = vpop.permute.xlu0 %4506  ;;  %v14025_v44 = vrot.slane %v14024_v39, 4  ;;  %v5603_v27 = vadd.f32 %v5602_v55, %v5601_v37  ;;  %v5616_v34 = vsel %vm3047_vm10, %v5538_v47, 0.0  ;;  %v5618_v45 = vsel %vm3047_vm10, %v5540_v25, 0.0 }
 0x59d   :  { %v4549_v30 = vadd.f32 %v4507_v36, %v14022_v24  ;;  %v5323_v46 = vadd.f32 %v12081_v56, %v5295_v10  ;;  %v5025_v14 = vadd.f32 %v4982_v59, %v4899_v26  ;;  %v8038_v59 = vld [vmem:[%s13151_s9 + $0x1c] ss:$12 sps:$4 sm:$0xff]   ;;  %v8041_v36 = vld [vmem:[%s13151_s9 + $0x4] ss:$12 sps:$4 sm:$0xff]  }
 0x59e   :  { %v5613_v15 = vadd.f32 %v5612_v29, %v5603_v27  ;;  %6226 = vmatprep.subr.bf16.mxu1 %v8038_v59  ;;  %v8042_v24 = vld [vmem:[#allocation2] sm:$0xff]  }
 0x59f   :  { %v12274_v31 = vmax.f32 %v5323_v46, 0.0  ;;  %6227 = vmatpush1.bf16.msra.mxu1 %v8036_v1  ;;  %7961 = vmatprep.mubr.msk.bf16.mxu0 %vm3047_vm10, %v8042_v24  ;;  %v14026_v46 = vld [vmem:[#allocation18_spill] sm:$0xff] }
 0x5a0   :  { %v5107_v33 = vpop.permute.xlu1 %5106  ;;  %v4632_v23 = vpop.permute.xlu0 %4631  ;;  %v5615_v35 = vadd.f32 %v5614_v57, %v5613_v15  ;;  %6228 = vmatprep.subr.bf16.mxu1 %v8041_v36 }
 0x5a1   :  { %v4674_v22 = vadd.f32 %v4632_v23, %v4549_v30  ;;  %v5150_v18 = vadd.f32 %v5107_v33, %v5025_v14  ;;  %v5543_v48 = vrot.slane %v12274_v31, 4 }
 0x5a2   :  { %v5617_v4 = vadd.f32 %v5616_v34, %v5615_v35 }
 0x5a3   :  { %v4799_v12 = vadd.f32 %v12176_v5, %v4674_v22  ;;  %v5541_v5 = vrot.slane %v12269_v42, 4  ;;  %6229 = vmatpush1.bf16.msra.mxu1 %v8039_v13 }
 0x5a4   :  { %v5109_v28 = vpop.permute.xlu1 %5108  ;;  %v4984_v7 = vpop.permute.xlu0 %4983  ;;  %v5619_v52 = vadd.f32 %v5618_v45, %v5617_v4 }
 0x5a5   :  { %v4900_v50 = vadd.f32 %v14025_v44, %v4799_v12  ;;  %v5542_v30 = vsel %vm1646_vm8, %v5539_v63, %v5541_v5  ;;  %v5544_v23 = vsel %vm1646_vm8, %v5541_v5, %v5543_v48 }
 0x5a6   :  { %v5620_v22 = vsel %vm3047_vm10, %v5542_v30, 0.0  ;;  %v5622_v11 = vsel %vm3047_vm10, %v5544_v23, 0.0  ;;  %7764 = vmatmul.mubr.msk.bf16.vlgmr.msra.gmra.mxu1 %vm3047_vm10, %v8042_v24 }
 0x5a7   :  { %v5026_v41 = vadd.f32 %v4984_v7, %v4900_v50  ;;  %v5621_v12 = vadd.f32 %v5620_v22, %v5619_v52 }
 0x5a8   :  { %v5232_v16 = vpop.permute.xlu0 %5231  ;;  %v5234_v8 = vpop.permute.xlu1 %5233 }
 0x5a9   :  { %v5151_v51 = vadd.f32 %v5109_v28, %v5026_v41  ;;  %v5275_v10 = vadd.f32 %v5232_v16, %v5150_v18  ;;  %v14027_v28 = vmov 0   ;;  %v5623_v7 = vadd.f32 %v5622_v11, %v5621_v12 }
 0x5aa   :  { %6253 = vmatprep.mubr.bf16.mxu1 %v14027_v28 }
 0x5ab   :  { %v5276_v33 = vadd.f32 %v5234_v8, %v5151_v51  ;;  %v5296_v21 = vadd.f32 %v5275_v10, %v4393_v61 }
 0x5ad   :  { %v5297_v17 = vadd.f32 %v14026_v46, %v5276_v33  ;;  %v5324_v26 = vadd.f32 %v12081_v56, %v5296_v21 }
 0x5af   :  { %v5325_v55 = vadd.f32 %v12081_v56, %v5297_v17  ;;  %v12310_v54 = vmax.f32 %v5324_v26, 0.0 }
 0x5b1   :  { %v12313_v37 = vmax.f32 %v5325_v55, 0.0  ;;  %v5545_v29 = vrot.slane %v12310_v54, 4 }
 0x5b3   :  { %v5547_v63 = vrot.slane %v12313_v37, 4  ;;  %v5546_v14 = vsel %vm1646_vm8, %v5543_v48, %v5545_v29 }
 0x5b4   :  { %v5624_v56 = vsel %vm3047_vm10, %v5546_v14, 0.0 }
 0x5b5   :  { %v5548_v39 = vsel %vm1646_vm8, %v5545_v29, %v5547_v63  ;;  %v5625_v44 = vadd.f32 %v5624_v56, %v5623_v7 }
 0x5b6   :  { %v5626_v50 = vsel %vm3047_vm10, %v5548_v39, 0.0 }
 0x5b7   :  { %v5627_v27 = vadd.f32 %v5626_v50, %v5625_v44 }
 0x5b9   :  { %v5628_v57 = vrot.slane %v5627_v27, 4 }
 0x5bb   :  { %v5629_v47 = vadd.f32 %v5628_v57, %v5627_v27 }
 0x5bd   :  { %v5630_v5 = vrot.slane %v5629_v47, 2 }
 0x5bf   :  { %v5631_v18 = vadd.f32 %v5630_v5, %v5629_v47 }
 0x5c1   :  { %v5632_v41 = vrot.slane %v5631_v18, 1 }
 0x5c3   :  { %v5633_v1 = vadd.f32 %v5632_v41, %v5631_v18 }
 0x5c5   :  { %v12323_v59 = vmul.f32 0.0078125, %v5633_v1 }
 0x5c7   :  { %v5636_v15 = vsub.f32 %v12101_v9, %v12323_v59  ;;  %v5637_v16 = vsub.f32 %v12118_v0, %v12323_v59  ;;  %v5638_v36 = vsub.f32 %v12136_v40, %v12323_v59  ;;  %v5639_v43 = vsub.f32 %v12178_v49, %v12323_v59 }
 0x5c8   :  { %v5640_v25 = vsub.f32 %v12186_v20, %v12323_v59  ;;  %v5641_v62 = vsub.f32 %v12198_v60, %v12323_v59  ;;  %v5642_v34 = vsub.f32 %v12206_v19, %v12323_v59  ;;  %v5643_v24 = vsub.f32 %v12220_v3, %v12323_v59 }
 0x5c9   :  { %v5678_v48 = vrot.slane %v5636_v15, 4  ;;  %v5679_v51 = vrot.slane %v5637_v16, 4  ;;  %v5681_v10 = vrot.slane %v5638_v36, 4  ;;  %v5683_v35 = vrot.slane %v5639_v43, 4 }
 0x5ca   :  { %v5685_v13 = vrot.slane %v5640_v25, 4  ;;  %v5687_v33 = vrot.slane %v5641_v62, 4  ;;  %v5644_v4 = vsub.f32 %v12225_v53, %v12323_v59  ;;  %v5689_v46 = vrot.slane %v5642_v34, 4 }
 0x5cb   :  { %v5680_v61 = vsel %vm1646_vm8, %v5678_v48, %v5679_v51  ;;  %v5682_v8 = vsel %vm1646_vm8, %v5679_v51, %v5681_v10  ;;  %v5684_v30 = vsel %vm1646_vm8, %v5681_v10, %v5683_v35  ;;  %v5648_v26 = vsub.f32 %v12233_v58, %v12323_v59 }
 0x5cc   :  { %v5759_v21 = vmul.f32 %v5680_v61, %v5680_v61  ;;  %v5760_v45 = vmul.f32 %v5682_v8, %v5682_v8  ;;  %v5686_v23 = vsel %vm1646_vm8, %v5683_v35, %v5685_v13  ;;  %v5761_v17 = vmul.f32 %v5684_v30, %v5684_v30 }
 0x5cd   :  { %v5649_v22 = vsub.f32 %v12241_v6, %v12323_v59  ;;  %v5688_v52 = vsel %vm1646_vm8, %v5685_v13, %v5687_v33  ;;  %v5691_v55 = vrot.slane %v5643_v24, 4  ;;  %v5762_v11 = vmul.f32 %v5686_v23, %v5686_v23 }
 0x5ce   :  { %v5779_v12 = vsel %vm3047_vm10, %v5759_v21, 0.0  ;;  %v5780_v29 = vsel %vm3047_vm10, %v5760_v45, 0.0  ;;  %v5650_v7 = vsub.f32 %v12243_v32, %v12323_v59  ;;  %v5690_v63 = vsel %vm1646_vm8, %v5687_v33, %v5689_v46 }
 0x5cf   :  { %v5693_v14 = vrot.slane %v5644_v4, 4  ;;  %v5781_v56 = vadd.f32 %v5780_v29, %v5779_v12  ;;  %v5651_v39 = vsub.f32 %v12256_v2, %v12323_v59  ;;  %v5763_v44 = vmul.f32 %v5688_v52, %v5688_v52 }
 0x5d0   :  { %v5782_v50 = vsel %vm3047_vm10, %v5761_v17, 0.0  ;;  %v5692_v27 = vsel %vm1646_vm8, %v5689_v46, %v5691_v55  ;;  %v5701_v57 = vrot.slane %v5648_v26, 4  ;;  %v5703_v47 = vrot.slane %v5649_v22, 4 }
 0x5d1   :  { %v5783_v5 = vadd.f32 %v5782_v50, %v5781_v56  ;;  %v5764_v18 = vmul.f32 %v5690_v63, %v5690_v63  ;;  %v5784_v41 = vsel %vm3047_vm10, %v5762_v11, 0.0  ;;  %v5652_v1 = vsub.f32 %v12262_v38, %v12323_v59 }
 0x5d2   :  { %v5694_v15 = vsel %vm1646_vm8, %v5691_v55, %v5693_v14  ;;  %v5705_v16 = vrot.slane %v5650_v7, 4  ;;  %v5765_v43 = vmul.f32 %v5692_v27, %v5692_v27  ;;  %v5786_v25 = vsel %vm3047_vm10, %v5763_v44, 0.0 }
 0x5d3   :  { %v5785_v36 = vadd.f32 %v5784_v41, %v5783_v5  ;;  %v5653_v48 = vsub.f32 %v12269_v42, %v12323_v59  ;;  %v5704_v51 = vsel %vm1646_vm8, %v5701_v57, %v5703_v47  ;;  %v5707_v10 = vrot.slane %v5651_v39, 4 }
 0x5d4   :  { %v5766_v35 = vmul.f32 %v5694_v15, %v5694_v15  ;;  %v5788_v34 = vsel %vm3047_vm10, %v5764_v18, 0.0  ;;  %v5654_v61 = vsub.f32 %v12274_v31, %v12323_v59  ;;  %v5706_v8 = vsel %vm1646_vm8, %v5703_v47, %v5705_v16 }
 0x5d5   :  { %v5787_v62 = vadd.f32 %v5786_v25, %v5785_v36  ;;  %v5709_v13 = vrot.slane %v5652_v1, 4  ;;  %v5771_v30 = vmul.f32 %v5704_v51, %v5704_v51  ;;  %v5790_v33 = vsel %vm3047_vm10, %v5765_v43, 0.0 }
 0x5d6   :  { %v5655_v21 = vsub.f32 %v12310_v54, %v12323_v59  ;;  %v5708_v45 = vsel %vm1646_vm8, %v5705_v16, %v5707_v10  ;;  %v5711_v4 = vrot.slane %v5653_v48, 4  ;;  %v5772_v46 = vmul.f32 %v5706_v8, %v5706_v8 }
 0x5d7   :  { %v5789_v24 = vadd.f32 %v5788_v34, %v5787_v62  ;;  %v5792_v17 = vsel %vm3047_vm10, %v5766_v35, 0.0  ;;  %v5656_v26 = vsub.f32 %v12313_v37, %v12323_v59  ;;  %v5710_v22 = vsel %vm1646_vm8, %v5707_v10, %v5709_v13 }
 0x5d8   :  { %v5713_v52 = vrot.slane %v5654_v61, 4  ;;  %v5773_v11 = vmul.f32 %v5708_v45, %v5708_v45  ;;  %v5802_v12 = vsel %vm3047_vm10, %v5771_v30, 0.0  ;;  %v5712_v29 = vsel %vm1646_vm8, %v5709_v13, %v5711_v4 }
 0x5d9   :  { %v5791_v23 = vadd.f32 %v5790_v33, %v5789_v24  ;;  %v5715_v7 = vrot.slane %v5655_v21, 4  ;;  %v5774_v14 = vmul.f32 %v5710_v22, %v5710_v22  ;;  %v5804_v56 = vsel %vm3047_vm10, %v5772_v46, 0.0  ;;  %v14028_v22 = vld [vmem:[#allocation101_spill] sm:$0xff] }
 0x5da   :  { %v5714_v39 = vsel %vm1646_vm8, %v5711_v4, %v5713_v52  ;;  %v5717_v44 = vrot.slane %v5656_v26, 4  ;;  %v5775_v27 = vmul.f32 %v5712_v29, %v5712_v29  ;;  %v5806_v57 = vsel %vm3047_vm10, %v5773_v11, 0.0  ;;  %v5827_v4 = vld [vmem:[%s13149_s7] sm:$0x1] }
 0x5db   :  { %v5793_v55 = vadd.f32 %v5792_v17, %v5791_v23  ;;  %v5716_v47 = vsel %vm1646_vm8, %v5713_v52, %v5715_v7  ;;  %v5776_v18 = vmul.f32 %v5714_v39, %v5714_v39  ;;  %v5808_v41 = vsel %vm3047_vm10, %v5774_v14, 0.0  ;;  %v5829_v17 = vld [vmem:[%s13150_s8] sm:$0x1] }
 0x5dc   :  { %v5718_v1 = vsel %vm1646_vm8, %v5715_v7, %v5717_v44  ;;  %v5777_v16 = vmul.f32 %v5716_v47, %v5716_v47  ;;  %v5810_v36 = vsel %vm3047_vm10, %v5775_v27, 0.0  ;;  %v5913_v47 = vld [vmem:[#allocation3 + $0x49] ss:$2 sm:$0xff] }
 0x5dd   :  { %v5803_v63 = vadd.f32 %v5802_v12, %v5793_v55  ;;  %v5778_v25 = vmul.f32 %v5718_v1, %v5718_v1  ;;  %v5812_v48 = vsel %vm3047_vm10, %v5776_v18, 0.0 }
 0x5de   :  { %v5814_v10 = vsel %vm3047_vm10, %v5777_v16, 0.0 }
 0x5df   :  { %v5805_v50 = vadd.f32 %v5804_v56, %v5803_v63  ;;  %v5816_v35 = vsel %vm3047_vm10, %v5778_v25, 0.0 }
 0x5e1   :  { %v5807_v5 = vadd.f32 %v5806_v57, %v5805_v50  ;;  %v5908_v50 = vld [vmem:[#allocation3 + $0x48] ss:$2 sm:$0xff] }
 0x5e3   :  { %v5809_v15 = vadd.f32 %v5808_v41, %v5807_v5  ;;  %v5979_v5 = vld [vmem:[#allocation3 + $0xa0] ss:$2 sm:$0xff] }
 0x5e5   :  { %v5811_v43 = vadd.f32 %v5810_v36, %v5809_v15 }
 0x5e7   :  { %v5813_v51 = vadd.f32 %v5812_v48, %v5811_v43  ;;  %v12428_v43 = vmax.f32 %v5908_v50, %v5913_v47 }
 0x5e9   :  { %v5815_v62 = vadd.f32 %v5814_v10, %v5813_v51 }
 0x5eb   :  { %v5817_v34 = vadd.f32 %v5816_v35, %v5815_v62 }
 0x5ed   :  { %v5818_v61 = vrot.slane %v5817_v34, 4 }
 0x5ef   :  { %v5819_v8 = vadd.f32 %v5818_v61, %v5817_v34 }
 0x5f1   :  { %v5820_v13 = vrot.slane %v5819_v8, 2 }
 0x5f3   :  { %v5821_v24 = vadd.f32 %v5820_v13, %v5819_v8  ;;  %v5949_v8 = vrot.slane %v12428_v43, 6  ;;  %v5936_v13 = vrot.slane %v12428_v43, 1 }
 0x5f5   :  { %v5822_v30 = vrot.slane %v5821_v24, 1 }
 0x5f7   :  { %v5823_v33 = vadd.f32 %v5822_v30, %v5821_v24 }
 0x5f9   :  { %v5824_v21 = vmul.f32 0.0078125, %v5823_v33 }
 0x5fb   :  { %v5825_v45 = vadd.f32 1e-05, %v5824_v21 }
 0x5fd   :  { %8055 = vrsqrt.f32 %v5825_v45 }
 0x60a   :  { %v8056_v23 = vpop.eup %8055 }
 0x60b   :  { %v5828_v46 = vmul.f32 %v8056_v23, %v5827_v4 }
 0x60d   :  { %v5830_v26 = vmul.f32 %v5828_v46, %v12323_v59  ;;  %v5836_v52 = vrot.slane %v5828_v46, %v14028_v22 }
 0x60f   :  { %v5831_v55 = vsub.f32 %v5829_v17, %v5830_v26  ;;  %v5853_v11 = vmul.f32 %v5836_v52, %v12274_v31  ;;  %v5854_v12 = vmul.f32 %v5836_v52, %v12310_v54  ;;  %v5855_v29 = vmul.f32 %v5836_v52, %v12313_v37 }
 0x610   :  { %v5838_v7 = vmul.f32 %v5836_v52, %v12101_v9  ;;  %v5839_v63 = vmul.f32 %v5836_v52, %v12118_v0  ;;  %v5840_v14 = vmul.f32 %v5836_v52, %v12136_v40  ;;  %v5841_v56 = vmul.f32 %v5836_v52, %v12178_v49 }
 0x611   :  { %v5860_v39 = vrot.slane %v5831_v55, %v14028_v22  ;;  %v5842_v59 = vmul.f32 %v5836_v52, %v12186_v20  ;;  %v5843_v44 = vmul.f32 %v5836_v52, %v12198_v60  ;;  %v5844_v31 = vmul.f32 %v5836_v52, %v12206_v19  ;;  %v5988_v20 = vld [vmem:[#allocation3 + $0xa1] ss:$2 sm:$0xff] }
 0x612   :  { %v5845_v54 = vmul.f32 %v5836_v52, %v12220_v3  ;;  %v5846_v37 = vmul.f32 %v5836_v52, %v12225_v53  ;;  %v5847_v9 = vmul.f32 %v5836_v52, %v12233_v58  ;;  %v5848_v0 = vmul.f32 %v5836_v52, %v12241_v6 }
 0x613   :  { %v5877_v40 = vadd.f32 %v5860_v39, %v5853_v11  ;;  %v5878_v27 = vadd.f32 %v5860_v39, %v5854_v12  ;;  %v5879_v49 = vadd.f32 %v5860_v39, %v5855_v29  ;;  %v5862_v57 = vadd.f32 %v5860_v39, %v5838_v7 }
 0x614   :  { %v5863_v18 = vadd.f32 %v5860_v39, %v5839_v63  ;;  %v5864_v60 = vadd.f32 %v5860_v39, %v5840_v14  ;;  %v5865_v41 = vadd.f32 %v5860_v39, %v5841_v56  ;;  %v5866_v19 = vadd.f32 %v5860_v39, %v5842_v59 }
 0x615   :  { %5901 = vst.msk [vmem:[#allocation3 + $0x8c] sm:$0xff] %vm3047_vm10, %v5877_v40  ;;  %5902 = vst.msk [vmem:[#allocation3 + $0x94] sm:$0xff] %vm3047_vm10, %v5878_v27  ;;  %v5867_v3 = vadd.f32 %v5860_v39, %v5843_v44  ;;  %v5868_v53 = vadd.f32 %v5860_v39, %v5844_v31  ;;  %v5869_v58 = vadd.f32 %v5860_v39, %v5845_v54  ;;  %v5962_v12 = vrot.slane %v12428_v43, 2  ;;  %v14030_v54 = vld [vmem:[#allocation7_spill] sm:$0xff] }
 0x616   :  { %5903 = vst.msk [vmem:[#allocation3 + $0x9c] sm:$0xf] %vm3567_vm3, %v5879_v49  ;;  %v5870_v6 = vadd.f32 %v5860_v39, %v5846_v37  ;;  %v5849_v1 = vmul.f32 %v5836_v52, %v12243_v32  ;;  %v5850_v15 = vmul.f32 %v5836_v52, %v12256_v2  ;;  %v5851_v16 = vmul.f32 %v5836_v52, %v12262_v38 }
 0x617   :  { %5883 = vst.msk [vmem:[#allocation3 + $0x4] sm:$0xf0] %vm3550_vm11, %v5862_v57  ;;  %v5852_v36 = vmul.f32 %v5836_v52, %v12269_v42  ;;  %v12430_v25 = vmax.f32 %v5979_v5, %v5988_v20  ;;  %v5871_v48 = vadd.f32 %v5860_v39, %v5847_v9  ;;  %v5872_v32 = vadd.f32 %v5860_v39, %v5848_v0 }
 0x618   :  { %5884 = vst.msk [vmem:[#allocation3 + $0xc] sm:$0xff] %vm3047_vm10, %v5863_v18  ;;  %5885 = vst.msk [vmem:[#allocation3 + $0x14] sm:$0xff] %vm3047_vm10, %v5864_v60  ;;  %v5873_v51 = vadd.f32 %v5860_v39, %v5849_v1  ;;  %v5874_v2 = vadd.f32 %v5860_v39, %v5850_v15  ;;  %v5875_v10 = vadd.f32 %v5860_v39, %v5851_v16  ;;  %v5923_v42 = vrot.slane %v12428_v43, 7 }
 0x619   :  { %5886 = vst.msk [vmem:[#allocation3 + $0x1c] sm:$0xff] %vm3047_vm10, %v5865_v41  ;;  %5887 = vst.msk [vmem:[#allocation3 + $0x24] sm:$0xff] %vm3047_vm10, %v5866_v19  ;;  %v5876_v38 = vadd.f32 %v5860_v39, %v5852_v36  ;;  %v5998_v62 = vrot.slane %v12430_v25, 7  ;;  %v6024_v35 = vrot.slane %v12430_v25, 6  ;;  %v14029_v52 = vmov -1e+30  }
 0x61a   :  { %5888 = vst.msk [vmem:[#allocation3 + $0x2c] sm:$0xff] %vm3047_vm10, %v5867_v3  ;;  %5889 = vst.msk [vmem:[#allocation3 + $0x34] sm:$0xff] %vm3047_vm10, %v5868_v53  ;;  %vm7449_vm0 = vcmp.eq.s32.totalorder %v14030_v54, 0 }
 0x61b   :  { %5890 = vst.msk [vmem:[#allocation3 + $0x3c] sm:$0xff] %vm3047_vm10, %v5869_v58  ;;  %5896 = vst.msk [vmem:[#allocation3 + $0x64] sm:$0xff] %vm3047_vm10, %v5872_v32 }
 0x61c   :  { %5891 = vst.msk [vmem:[#allocation3 + $0x44] sm:$0xf] %vm3567_vm3, %v5870_v6 }
 0x61d   :  { %5895 = vst.msk [vmem:[#allocation3 + $0x5c] sm:$0xf0] %vm3550_vm11, %v5871_v48  ;;  %v5978_v34 = vld [vmem:[#allocation3 + $0x90] ss:$2 sm:$0xff]  ;;  %v5987_v61 = vld [vmem:[#allocation3 + $0x91] ss:$2 sm:$0xff] }
 0x61e   :  { %5897 = vst.msk [vmem:[#allocation3 + $0x6c] sm:$0xff] %vm3047_vm10, %v5873_v51  ;;  %5898 = vst.msk [vmem:[#allocation3 + $0x74] sm:$0xff] %vm3047_vm10, %v5874_v2  ;;  %v12447_v46 = vmax.f32 %v5978_v34, %v5987_v61 }
 0x61f   :  { %5899 = vst.msk [vmem:[#allocation3 + $0x7c] sm:$0xff] %vm3047_vm10, %v5875_v10  ;;  %5900 = vst.msk [vmem:[#allocation3 + $0x84] sm:$0xff] %vm3047_vm10, %v5876_v38  ;;  %v5904_v24 = vld [vmem:[#allocation3 + $0x8] ss:$2 sm:$0xff]  ;;  %v5909_v33 = vld [vmem:[#allocation3 + $0x9] ss:$2 sm:$0xff] }
 0x620   :  { %v5905_v30 = vld [vmem:[#allocation3 + $0x18] ss:$2 sm:$0xff]  ;;  %v5910_v45 = vld [vmem:[#allocation3 + $0x19] ss:$2 sm:$0xff]  ;;  %v5914_v23 = vmax.f32 %v5904_v24, %v5909_v33 }
 0x621   :  { %v5906_v21 = vld [vmem:[#allocation3 + $0x28] ss:$2 sm:$0xff]  ;;  %v5911_v4 = vld [vmem:[#allocation3 + $0x29] ss:$2 sm:$0xff]  ;;  %v5915_v17 = vmax.f32 %v5905_v30, %v5910_v45 }
 0x622   :  { %v12449_v26 = vmax.f32 %v5906_v21, %v5911_v4  ;;  %7332 = vst.msk [vmem:[#allocation3 + $0x28] sm:$0xff] %vm3047_vm10, %v14029_v52  ;;  %7333 = vst.msk [vmem:[#allocation3 + $0x30] sm:$0xff] %vm3047_vm10, %v14029_v52  ;;  %v5919_v29 = vrot.slane %v5914_v23, 7  ;;  %v5932_v7 = vrot.slane %v5914_v23, 1  ;;  %v5945_v63 = vrot.slane %v5914_v23, 6 }
 0x623   :  { %v5907_v55 = vld [vmem:[#allocation3 + $0x38] ss:$2 sm:$0xff]  ;;  %v5912_v11 = vld [vmem:[#allocation3 + $0x39] ss:$2 sm:$0xff]  ;;  %v5958_v14 = vrot.slane %v5914_v23, 2  ;;  %v5920_v56 = vrot.slane %v5915_v17, 7 }
 0x624   :  { %7339 = vst.msk [vmem:[#allocation3 + $0x38] sm:$0xff] %vm3047_vm10, %v14029_v52  ;;  %v5933_v39 = vrot.slane %v5915_v17, 1  ;;  %v5934_v59 = vrot.slane %v12449_v26, 1  ;;  %v5946_v44 = vrot.slane %v5915_v17, 6  ;;  %v5927_v37 = vsel %vm3643_vm12, %v5923_v42, %v5919_v29 }
 0x625   :  { %v5972_v31 = vld [vmem:[#allocation3 + $0x60] ss:$2 sm:$0xff]  ;;  %v5953_v9 = vsel %vm3695_vm14, %v5949_v8, %v5945_v63  ;;  %v5959_v0 = vrot.slane %v5915_v17, 2  ;;  %v5960_v50 = vrot.slane %v12449_v26, 2  ;;  %v5926_v49 = vsel %vm3643_vm12, %v5919_v29, %v5920_v56  ;;  %v5981_v20 = vld [vmem:[#allocation3 + $0x61] ss:$2 sm:$0xff] }
 0x626   :  { %v5974_v40 = vld [vmem:[#allocation3 + $0x70] ss:$2 sm:$0xff]  ;;  %v5976_v27 = vld [vmem:[#allocation3 + $0x80] ss:$2 sm:$0xff]  ;;  %v5928_v57 = vmax.f32 %v5914_v23, %v5927_v37  ;;  %v5939_v47 = vsel %vm3669_vm13, %v5933_v39, %v5934_v59  ;;  %v5940_v5 = vsel %vm3669_vm13, %v5932_v7, %v5933_v39  ;;  %v5983_v18 = vld [vmem:[#allocation3 + $0x71] ss:$2 sm:$0xff]  ;;  %v5929_v41 = vmax.f32 %v5915_v17, %v5926_v49 }
 0x627   :  { %v5985_v60 = vld [vmem:[#allocation3 + $0x81] ss:$2 sm:$0xff]  ;;  %v5952_v19 = vsel %vm3695_vm14, %v5945_v63, %v5946_v44  ;;  %v5965_v3 = vsel %vm3721_vm15, %v5959_v0, %v5960_v50  ;;  %v5966_v53 = vsel %vm3721_vm15, %v5958_v14, %v5959_v0  ;;  %7340 = vst.msk [vmem:[#allocation3 + $0x60] sm:$0xff] %vm3047_vm10, %v14029_v52  ;;  %7341 = vst.msk [vmem:[#allocation3 + $0x68] sm:$0xff] %vm3047_vm10, %v14029_v52  ;;  %v5921_v1 = vrot.slane %v12449_v26, 7 }
 0x628   :  { %v5941_v58 = vmax.f32 %v5928_v57, %v5940_v5  ;;  %v5917_v6 = vmax.f32 %v5907_v55, %v5912_v11  ;;  %v5947_v15 = vrot.slane %v12449_v26, 6  ;;  %v5942_v16 = vmax.f32 %v5929_v41, %v5939_v47 }
 0x629   :  { %v12482_v36 = vmax.f32 %v5972_v31, %v5981_v20  ;;  %v12484_v48 = vmax.f32 %v5974_v40, %v5983_v18  ;;  %v12486_v32 = vmax.f32 %v5976_v27, %v5985_v60  ;;  %v5925_v10 = vsel %vm3643_vm12, %v5920_v56, %v5921_v1 }
 0x62a   :  { %v5954_v51 = vmax.f32 %v5941_v58, %v5953_v9  ;;  %v5922_v2 = vrot.slane %v5917_v6, 7  ;;  %v5935_v38 = vrot.slane %v5917_v6, 1  ;;  %v5955_v42 = vmax.f32 %v5942_v16, %v5952_v19 }
 0x62b   :  { %v5930_v34 = vmax.f32 %v12449_v26, %v5925_v10  ;;  %v5948_v61 = vrot.slane %v5917_v6, 6  ;;  %v5951_v8 = vsel %vm3695_vm14, %v5946_v44, %v5947_v15  ;;  %v5961_v52 = vrot.slane %v5917_v6, 2 }
 0x62c   :  { %v5967_v24 = vmax.f32 %v5954_v51, %v5966_v53  ;;  %v5924_v30 = vsel %vm3643_vm12, %v5921_v1, %v5922_v2  ;;  %v5937_v33 = vsel %vm3669_vm13, %v5935_v38, %v5936_v13  ;;  %v5938_v21 = vsel %vm3669_vm13, %v5934_v59, %v5935_v38 }
 0x62d   :  { %v5968_v45 = vmax.f32 %v5955_v42, %v5965_v3  ;;  %v5931_v4 = vmax.f32 %v5917_v6, %v5924_v30  ;;  %v5943_v23 = vmax.f32 %v5930_v34, %v5938_v21  ;;  %v5950_v17 = vsel %vm3695_vm14, %v5947_v15, %v5948_v61 }
 0x62e   :  { %v7834_v26 = vpack.c.bf16 %v5967_v24, %v5967_v24  ;;  %v5994_v55 = vrot.slane %v12482_v36, 7  ;;  %v5995_v11 = vrot.slane %v12484_v48, 7  ;;  %v6007_v13 = vrot.slane %v12482_v36, 1 }
 0x62f   :  { %v7835_v29 = vpack.c.bf16 %v5968_v45, %v5968_v45  ;;  %v5944_v7 = vmax.f32 %v5931_v4, %v5937_v33  ;;  %v5956_v63 = vmax.f32 %v5943_v23, %v5951_v8  ;;  %v5963_v14 = vsel %vm3721_vm15, %v5961_v52, %v5962_v12 }
 0x630   :  { %6066 = vst.msk [vmem:[#allocation2 + $0x8] sm:$0xf] %vm3567_vm3, %v7834_v26  ;;  %v5964_v56 = vsel %vm3721_vm15, %v5960_v50, %v5961_v52  ;;  %v6001_v39 = vsel %vm3643_vm12, %v5994_v55, %v5995_v11  ;;  %v6002_v59 = vsel %vm3643_vm12, %v5998_v62, %v5994_v55  ;;  %v6008_v12 = vrot.slane %v12484_v48, 1 }
 0x631   :  { %6067 = vst.msk [vmem:[#allocation2 + $0xc] sm:$0xf] %vm3567_vm3, %v7835_v29  ;;  %v5957_v44 = vmax.f32 %v5944_v7, %v5950_v17  ;;  %v5969_v31 = vmax.f32 %v5956_v63, %v5964_v56  ;;  %v6003_v43 = vmax.f32 %v12482_v36, %v6002_v59  ;;  %v6004_v37 = vmax.f32 %v12484_v48, %v6001_v39  ;;  %v8048_v29 = vld [vmem:[#allocation2 + $0x20] sm:$0xff]   ;;  %v8051_v59 = vld [vmem:[#allocation2 + $0x38] sm:$0xff]  }
 0x632   :  { %v6009_v9 = vrot.slane %v12486_v32, 1  ;;  %v6020_v0 = vrot.slane %v12482_v36, 6  ;;  %v6021_v50 = vrot.slane %v12484_v48, 6  ;;  %v6033_v62 = vrot.slane %v12482_v36, 2 }
 0x633   :  { %v5970_v40 = vmax.f32 %v5957_v44, %v5963_v14  ;;  %v7836_v27 = vpack.c.bf16 %v5969_v31, %v5969_v31  ;;  %v6034_v49 = vrot.slane %v12484_v48, 2  ;;  %v6011_v57 = vrot.slane %v12430_v25, 1 }
 0x634   :  { %v6014_v47 = vsel %vm3669_vm13, %v6008_v12, %v6009_v9  ;;  %v6015_v5 = vsel %vm3669_vm13, %v6007_v13, %v6008_v12  ;;  %v5997_v20 = vrot.slane %v12447_v46, 7  ;;  %v6035_v19 = vrot.slane %v12486_v32, 2 }
 0x635   :  { %v7837_v18 = vpack.c.bf16 %v5970_v40, %v5970_v40  ;;  %6068 = vst.msk [vmem:[#allocation2 + $0x10] sm:$0xf] %vm3567_vm3, %v7836_v27  ;;  %v6016_v60 = vmax.f32 %v6003_v43, %v6015_v5  ;;  %v6017_v41 = vmax.f32 %v6004_v37, %v6014_v47  ;;  %v6027_v3 = vsel %vm3695_vm14, %v6020_v0, %v6021_v50 }
 0x636   :  { %v6028_v53 = vsel %vm3695_vm14, %v6024_v35, %v6020_v0  ;;  %v5996_v58 = vrot.slane %v12486_v32, 7  ;;  %v6010_v6 = vrot.slane %v12447_v46, 1  ;;  %v6040_v16 = vsel %vm3721_vm15, %v6034_v49, %v6035_v19 }
 0x637   :  { %6069 = vst.msk [vmem:[#allocation2 + $0x14] sm:$0xf] %vm3567_vm3, %v7837_v18  ;;  %v6029_v1 = vmax.f32 %v6016_v60, %v6028_v53  ;;  %v6030_v15 = vmax.f32 %v6017_v41, %v6027_v3  ;;  %v6041_v36 = vsel %vm3721_vm15, %v6033_v62, %v6034_v49  ;;  %v6022_v2 = vrot.slane %v12486_v32, 6 }
 0x638   :  { %v8045_v48 = vld [vmem:[#allocation2 + $0x8] sm:$0xff]   ;;  %v5999_v51 = vsel %vm3643_vm12, %v5996_v58, %v5997_v20  ;;  %v6000_v35 = vsel %vm3643_vm12, %v5995_v11, %v5996_v58  ;;  %v6023_v10 = vrot.slane %v12447_v46, 6  ;;  %v6012_v8 = vsel %vm3669_vm13, %v6010_v6, %v6011_v57 }
 0x639   :  { %v6042_v38 = vmax.f32 %v6029_v1, %v6041_v36  ;;  %v6043_v42 = vmax.f32 %v6030_v15, %v6040_v16  ;;  %v6005_v34 = vmax.f32 %v12486_v32, %v6000_v35  ;;  %v6006_v61 = vmax.f32 %v12447_v46, %v5999_v51  ;;  %7765 = vmatmul.mubr.msk.bf16.gmra.mxu1 %vm3047_vm10, %v8045_v48 }
 0x63a   :  { %7962 = vmatmul.mubr.msk.bf16.vlgmr.msra.gmra.mxu0 %vm3047_vm10, %v8045_v48  ;;  %v6013_v24 = vsel %vm3669_vm13, %v6009_v9, %v6010_v6  ;;  %v6036_v30 = vrot.slane %v12447_v46, 2  ;;  %v6037_v33 = vrot.slane %v12430_v25, 2  ;;  %6263 = vmatprep.mubr.bf16.mxu1 %v14027_v28  ;;  %v6025_v23 = vsel %vm3695_vm14, %v6022_v2, %v6023_v10  ;;  %v8047_v25 = vld [vmem:[#allocation2 + $0x18] sm:$0xff]  }
 0x63b   :  { %v7838_v21 = vpack.c.bf16 %v6042_v38, %v6042_v38  ;;  %v7839_v32 = vpack.c.bf16 %v6043_v42, %v6043_v42  ;;  %v6018_v45 = vmax.f32 %v6005_v34, %v6013_v24  ;;  %v6019_v4 = vmax.f32 %v6006_v61, %v6012_v8 }
 0x63c   :  { %v6026_v17 = vsel %vm3695_vm14, %v6021_v50, %v6022_v2  ;;  %v6038_v55 = vsel %vm3721_vm15, %v6036_v30, %v6037_v33  ;;  %v6039_v11 = vsel %vm3721_vm15, %v6035_v19, %v6036_v30 }
 0x63d   :  { %6090 = vst.msk [vmem:[#allocation2 + $0x28] sm:$0xf] %vm3567_vm3, %v7838_v21  ;;  %6091 = vst.msk [vmem:[#allocation2 + $0x2c] sm:$0xf] %vm3567_vm3, %v7839_v32  ;;  %v6031_v26 = vmax.f32 %v6018_v45, %v6026_v17  ;;  %v6032_v46 = vmax.f32 %v6019_v4, %v6025_v23 }
 0x63e   :  { %v8046_v52 = vld [vmem:[#allocation2 + $0x10] sm:$0xff]  }
 0x63f   :  { %v6044_v7 = vmax.f32 %v6031_v26, %v6039_v11  ;;  %v6045_v63 = vmax.f32 %v6032_v46, %v6038_v55  ;;  %7965 = vmatprep.mubr.msk.bf16.mxu0 %vm3047_vm10, %v8046_v52 }
 0x641   :  { %v7840_v13 = vpack.c.bf16 %v6044_v7, %v6044_v7  ;;  %v7841_v14 = vpack.c.bf16 %v6045_v63, %v6045_v63  ;;  %7766 = vmatmul.mubr.msk.bf16.gmra.mxu1 %vm3047_vm10, %v8046_v52 }
 0x642   :  { %7966 = vmatmul.mubr.msk.bf16.gmra.mxu0 %vm3047_vm10, %v8047_v25  ;;  %6273 = vmatprep.mubr.bf16.mxu1 %v14027_v28 }
 0x643   :  { %7969 = vmatprep.mubr.msk.bf16.mxu0 %vm3047_vm10, %v8048_v29  ;;  %6092 = vst.msk [vmem:[#allocation2 + $0x30] sm:$0xf] %vm3567_vm3, %v7840_v13  ;;  %6093 = vst.msk [vmem:[#allocation2 + $0x34] sm:$0xf] %vm3567_vm3, %v7841_v14 }
 0x644   :  { %v8049_v56 = vld [vmem:[#allocation2 + $0x28] sm:$0xff]  }
 0x649   :  { %7767 = vmatmul.mubr.msk.bf16.gmra.mxu1 %vm3047_vm10, %v8047_v25 }
 0x64a   :  { %7970 = vmatmul.mubr.msk.bf16.gmra.mxu0 %vm3047_vm10, %v8049_v56  ;;  %v8050_v39 = vld [vmem:[#allocation2 + $0x30] sm:$0xff]   ;;  %6283 = vmatprep.mubr.bf16.mxu1 %v14027_v28 }
 0x64b   :  { %7973 = vmatprep.mubr.msk.bf16.mxu0 %vm3047_vm10, %v8050_v39 }
 0x651   :  { %7768 = vmatmul.mubr.msk.bf16.gmra.mxu1 %vm3047_vm10, %v8048_v29 }
 0x652   :  { %7974 = vmatmul.mubr.msk.bf16.gmra.mxu0 %vm3047_vm10, %v8051_v59  ;;  %6293 = vmatprep.mubr.bf16.mxu1 %v14027_v28 }
 0x659   :  { %7769 = vmatmul.mubr.msk.bf16.gmra.mxu1 %vm3047_vm10, %v8049_v56 }
 0x65a   :  { %6303 = vmatprep.mubr.bf16.mxu1 %v14027_v28 }
 0x661   :  { %7770 = vmatmul.mubr.msk.bf16.gmra.mxu1 %vm3047_vm10, %v8050_v39 }
 0x662   :  { %6313 = vmatprep.mubr.bf16.mxu1 %v14027_v28 }
 0x666   :  { %v6248_v44 = vpop.f32.mrf.mxu1 }
 0x668   :  { %v6249_v31 = vpop.f32.mrf.mxu1 }
 0x669   :  { %7771 = vmatmul.mubr.msk.bf16.gmra.mxu1 %vm3047_vm10, %v8051_v59 }
 0x66a   :  { %v12595_v43 = vpop.f32.mrf.mxu1 }
 0x66b   :  { %v6582_v0 = vrot.slane %v12595_v43, 3  ;;  %v6428_v27 = vrot.slane %v12595_v43, 1  ;;  %v6505_v60 = vrot.slane %v12595_v43, 2 }
 0x66c   :  { %v6252_v37 = vpop.f32.mrf.mxu1 }
 0x6f9   :  { %v12597_v12 = vpop.f32.mrf.mxu1 }
 0x6fa   :  { %v12599_v9 = vpop.f32.mrf.mxu0  ;;  %v6429_v50 = vrot.slane %v12597_v12, 1  ;;  %v6583_v40 = vrot.slane %v12597_v12, 3  ;;  %v6506_v57 = vrot.slane %v12597_v12, 2 }
 0x6fb   :  { %v12605_v28 = vpop.f32.mrf.mxu1 }
 0x6fc   :  { %v6355_v62 = vpop.f32.mrf.mxu0  ;;  %v6584_v49 = vsel %vm1388_vm4, %v6582_v0, %v6583_v40  ;;  %v6430_v5 = vsel %vm944_vm5, %v6428_v27, %v6429_v50  ;;  %v6507_v6 = vsel %vm1166_vm6, %v6505_v60, %v6506_v57  ;;  %v6671_v16 = vrot.slane %v12605_v28, 4 }
 0x6fd   :  { %6607 = vrot.lane.b32.xlu1 %v6584_v49, %s8083_s20  ;;  %v12615_v20 = vpop.f32.mrf.mxu1  ;;  %6453 = vrot.lane.b32.xlu0 %v6430_v5, %s8084_s21  ;;  %v6721_v35 = vrot.slane %v12605_v28, 5  ;;  %v6798_v30 = vrot.slane %v12605_v28, 6  ;;  %v6875_v46 = vrot.slane %v12605_v28, 7 }
 0x6fe   :  { %v12611_v47 = vpop.f32.mrf.mxu0  ;;  %v6431_v18 = vrot.slane %v12615_v20, 1  ;;  %v6508_v53 = vrot.slane %v12615_v20, 2  ;;  %v6585_v25 = vrot.slane %v12615_v20, 3 }
 0x6ff   :  { %v12620_v41 = vpop.f32.mrf.mxu1 }
 0x700   :  { %v6357_v19 = vpop.f32.mrf.mxu0  ;;  %v6672_v3 = vrot.slane %v12620_v41, 4  ;;  %v6432_v1 = vsel %vm944_vm5, %v6429_v50, %v6431_v18  ;;  %v6722_v10 = vrot.slane %v12620_v41, 5  ;;  %v6509_v42 = vsel %vm1166_vm6, %v6506_v57, %v6508_v53 }
 0x701   :  { %v12628_v15 = vpop.f32.mrf.mxu1  ;;  %6530 = vrot.lane.b32.xlu0 %v6507_v6, %s8085_s0  ;;  %6455 = vrot.lane.b32.xlu1 %v6432_v1, %s8084_s21  ;;  %v6799_v21 = vrot.slane %v12620_v41, 6  ;;  %v6876_v55 = vrot.slane %v12620_v41, 7  ;;  %v6586_v59 = vsel %vm1388_vm4, %v6583_v40, %v6585_v25 }
 0x702   :  { %v12624_v58 = vpop.f32.mrf.mxu0  ;;  %v12640_v51 = vsel %vm1646_vm8, %v6671_v16, %v6672_v3  ;;  %v6723_v45 = vsel %vm1793_vm7, %v6721_v35, %v6722_v10  ;;  %v6433_v56 = vrot.slane %v12628_v15, 1  ;;  %v6587_v39 = vrot.slane %v12628_v15, 3 }
 0x703   :  { %v12633_v36 = vpop.f32.mrf.mxu1  ;;  %v6800_v29 = vsel %vm2015_vm9, %v6798_v30, %v6799_v21  ;;  %v6877_v44 = vsel %vm480_vm1, %v6875_v46, %v6876_v55  ;;  %v6510_v0 = vrot.slane %v12628_v15, 2 }
 0x704   :  { %v12635_v48 = vpop.f32.mrf.mxu0  ;;  %v6674_v2 = vrot.slane %v12633_v36, 4  ;;  %v6588_v27 = vsel %vm1388_vm4, %v6585_v25, %v6587_v39  ;;  %v6434_v62 = vsel %vm944_vm5, %v6431_v18, %v6433_v56  ;;  %v6724_v57 = vrot.slane %v12633_v36, 5 }
 0x705   :  { %v12648_v34 = vpop.f32.mrf.mxu1  ;;  %6746 = vrot.lane.b32.xlu0 %v6721_v35, %s8084_s21  ;;  %6532 = vrot.lane.b32.xlu1 %v6509_v42, %s8085_s0  ;;  %v6511_v60 = vsel %vm1166_vm6, %v6508_v53, %v6510_v0  ;;  %v6801_v1 = vrot.slane %v12633_v36, 6 }
 0x706   :  { %v7968_v38 = vpop.f32.mrf.mxu0  ;;  %v12657_v24 = vsel %vm1646_vm8, %v6672_v3, %v6674_v2  ;;  %v6435_v50 = vrot.slane %v12648_v34, 1  ;;  %v6589_v5 = vrot.slane %v12648_v34, 3  ;;  %v6725_v53 = vsel %vm1793_vm7, %v6722_v10, %v6724_v57 }
 0x707   :  { %v12652_v61 = vpop.f32.mrf.mxu1  ;;  %v6802_v10 = vsel %vm2015_vm9, %v6799_v21, %v6801_v1 }
 0x708   :  { %v12654_v8 = vpop.f32.mrf.mxu0  ;;  %v6676_v33 = vrot.slane %v12652_v61, 4  ;;  %v6436_v41 = vsel %vm944_vm5, %v6433_v56, %v6435_v50  ;;  %v6726_v35 = vrot.slane %v12652_v61, 5 }
 0x709   :  { %v12665_v4 = vpop.f32.mrf.mxu1  ;;  %6823 = vrot.lane.b32.xlu0 %v6798_v30, %s8085_s0  ;;  %6748 = vrot.lane.b32.xlu1 %v6723_v45, %s8084_s21  ;;  %v6878_v45 = vrot.slane %v12633_v36, 7  ;;  %v6512_v36 = vrot.slane %v12648_v34, 2 }
 0x70a   :  { %v12662_v32 = vpop.f32.mrf.mxu0  ;;  %v12672_v26 = vsel %vm1646_vm8, %v6674_v2, %v6676_v33  ;;  %v6590_v2 = vsel %vm1388_vm4, %v6587_v39, %v6589_v5 }
 0x70b   :  { %v12669_v23 = vpop.f32.mrf.mxu1  ;;  %v6879_v21 = vsel %vm480_vm1, %v6876_v55, %v6878_v45  ;;  %v6513_v55 = vsel %vm1166_vm6, %v6510_v0, %v6512_v36  ;;  %v6514_v0 = vrot.slane %v12665_v4, 2 }
 0x70c   :  { %v6385_v17 = vpop.f32.mrf.mxu0  ;;  %v6678_v52 = vrot.slane %v12669_v23, 4 }
 0x70d   :  { %v6279_v7 = vpop.f32.mrf.mxu1  ;;  %6900 = vrot.lane.b32.xlu0 %v6875_v46, %s8083_s20  ;;  %6825 = vrot.lane.b32.xlu1 %v6800_v29, %s8085_s0  ;;  %v6803_v17 = vrot.slane %v12652_v61, 6  ;;  %v6727_v46 = vsel %vm1793_vm7, %v6724_v57, %v6726_v35 }
 0x70e   :  { %v12678_v11 = vpop.f32.mrf.mxu0  ;;  %v12684_v14 = vsel %vm1646_vm8, %v6676_v33, %v6678_v52 }
 0x70f   :  { %v6281_v63 = vpop.f32.mrf.mxu1 }
 0x710   :  { %v6388_v13 = vpop.f32.mrf.mxu0  ;;  %v6437_v63 = vrot.slane %v12665_v4, 1 }
 0x711   :  { %v6285_v31 = vpop.f32.mrf.mxu1  ;;  %6609 = vrot.lane.b32.xlu0 %v6586_v59, %s8083_s20  ;;  %6902 = vrot.lane.b32.xlu1 %v6877_v44, %s8083_s20  ;;  %v6804_v13 = vsel %vm2015_vm9, %v6801_v1, %v6803_v17 }
 0x712   :  { %v6880_v31 = vrot.slane %v12652_v61, 7 }
 0x713   :  { %v6287_v37 = vpop.f32.mrf.mxu1 }
 0x714   :  { %v6591_v37 = vrot.slane %v12665_v4, 3  ;;  %v6882_v4 = vrot.slane %v12669_v23, 7 }
 0x715   :  { %v12698_v49 = vpop.f32.mrf.mxu1  ;;  %6611 = vrot.lane.b32.xlu1 %v6588_v27, %s8083_s20  ;;  %6457 = vrot.lane.b32.xlu0 %v6434_v62, %s8084_s21  ;;  %v6438_v27 = vsel %vm944_vm5, %v6435_v50, %v6437_v63  ;;  %v6805_v50 = vrot.slane %v12669_v23, 6 }
 0x716   :  { %v6520_v63 = vrot.slane %v12698_v49, 2 }
 0x717   :  { %v12702_v40 = vpop.f32.mrf.mxu1 }
 0x718   :  { %v6684_v18 = vrot.slane %v12702_v40, 4 }
 0x719   :  { %v12710_v19 = vpop.f32.mrf.mxu1  ;;  %6534 = vrot.lane.b32.xlu0 %v6511_v60, %s8085_s0  ;;  %6459 = vrot.lane.b32.xlu1 %v6436_v41, %s8084_s21 }
 0x71b   :  { %v12715_v3 = vpop.f32.mrf.mxu1 }
 0x71c   :  { %v6686_v6 = vrot.slane %v12715_v3, 4 }
 0x71d   :  { %v12722_v38 = vpop.f32.mrf.mxu1  ;;  %6750 = vrot.lane.b32.xlu0 %v6725_v53, %s8084_s21  ;;  %6613 = vrot.lane.b32.xlu1 %v6590_v2, %s8083_s20 }
 0x71e   :  { %v12729_v30 = vsel %vm1646_vm8, %v6684_v18, %v6686_v6  ;;  %v6881_v18 = vsel %vm480_vm1, %v6878_v45, %v6880_v31  ;;  %v6806_v45 = vsel %vm2015_vm9, %v6803_v17, %v6805_v50  ;;  %v6597_v17 = vrot.slane %v12698_v49, 3 }
 0x71f   :  { %v12726_v42 = vpop.f32.mrf.mxu1  ;;  %v6811_v50 = vrot.slane %v12702_v40, 6 }
 0x720   :  { %v6688_v33 = vrot.slane %v12726_v42, 4 }
 0x721   :  { %v12736_v52 = vpop.f32.mrf.mxu1  ;;  %6827 = vrot.lane.b32.xlu0 %v6802_v10, %s8085_s0  ;;  %6752 = vrot.lane.b32.xlu1 %v6727_v46, %s8084_s21  ;;  %v6515_v10 = vsel %vm1166_vm6, %v6512_v36, %v6514_v0  ;;  %v6888_v36 = vrot.slane %v12702_v40, 7 }
 0x722   :  { %v12743_v29 = vsel %vm1646_vm8, %v6686_v6, %v6688_v33  ;;  %v6592_v6 = vsel %vm1388_vm4, %v6589_v5, %v6591_v37  ;;  %v6883_v5 = vsel %vm480_vm1, %v6880_v31, %v6882_v4  ;;  %v6738_v4 = vrot.slane %v12726_v42, 5 }
 0x723   :  { %v12740_v25 = vpop.f32.mrf.mxu1 }
 0x724   :  { %v6690_v7 = vrot.slane %v12740_v25, 4 }
 0x725   :  { %v12750_v56 = vpop.f32.mrf.mxu1  ;;  %6904 = vrot.lane.b32.xlu0 %v6879_v21, %s8083_s20  ;;  %6829 = vrot.lane.b32.xlu1 %v6804_v13, %s8085_s0  ;;  %v6445_v21 = vrot.slane %v12710_v19, 1  ;;  %v6599_v13 = vrot.slane %v12710_v19, 3 }
 0x726   :  { %v12757_v59 = vsel %vm1646_vm8, %v6688_v33, %v6690_v7  ;;  %v6728_v33 = vrot.slane %v12669_v23, 5  ;;  %v6522_v23 = vrot.slane %v12710_v19, 2 }
 0x727   :  { %v12754_v39 = vpop.f32.mrf.mxu1 }
 0x728   :  { %v6692_v44 = vrot.slane %v12754_v39, 4  ;;  %v6896_v61 = vrot.slane %v12754_v39, 7  ;;  %v6729_v46 = vsel %vm1793_vm7, %v6726_v35, %v6728_v33  ;;  %v6890_v35 = vrot.slane %v12715_v3, 7 }
 0x729   :  { %v6315_v62 = vpop.f32.mrf.mxu1  ;;  %6536 = vrot.lane.b32.xlu0 %v6513_v55, %s8085_s0  ;;  %6461 = vrot.lane.b32.xlu1 %v6438_v27, %s8084_s21  ;;  %v6523_v31 = vsel %vm1166_vm6, %v6520_v63, %v6522_v23  ;;  %v6734_v55 = vrot.slane %v12702_v40, 5  ;;  %v6736_v27 = vrot.slane %v12715_v3, 5  ;;  %v6447_v33 = vrot.slane %v12722_v38, 1 }
 0x72a   :  { %v12771_v60 = vsel %vm1646_vm8, %v6690_v7, %v6692_v44  ;;  %v6443_v7 = vrot.slane %v12698_v49, 1  ;;  %v6524_v62 = vrot.slane %v12722_v38, 2  ;;  %v6891_v0 = vsel %vm480_vm1, %v6888_v36, %v6890_v35 }
 0x72b   :  { %v12766_v57 = vpop.f32.mrf.mxu1  ;;  %v6449_v63 = vrot.slane %v12736_v52, 1 }
 0x72c   :  { %v6898_v41 = vrot.slane %v12766_v57, 7  ;;  %v6446_v37 = vsel %vm944_vm5, %v6443_v7, %v6445_v21  ;;  %v6739_v7 = vsel %vm1793_vm7, %v6736_v27, %v6738_v4 }
 0x72d   :  { %v6318_v1 = vpop.f32.mrf.mxu1  ;;  %6906 = vrot.lane.b32.xlu0 %v6881_v18, %s8083_s20  ;;  %6615 = vrot.lane.b32.xlu1 %v6592_v6, %s8083_s20  ;;  %v6813_v18 = vrot.slane %v12715_v3, 6  ;;  %v6601_v6 = vrot.slane %v12722_v38, 3 }
 0x72e   :  { %v12784_v53 = vsel %vm480_vm1, %v6896_v61, %v6898_v41  ;;  %v6600_v41 = vsel %vm1388_vm4, %v6597_v17, %v6599_v13  ;;  %v6737_v1 = vsel %vm1793_vm7, %v6734_v55, %v6736_v27  ;;  %v6451_v55 = vrot.slane %v12750_v56, 1 }
 0x72f   :  { %v6319_v2 = vpop.f32.mrf.mxu1  ;;  %v6602_v40 = vsel %vm1388_vm4, %v6599_v13, %v6601_v6  ;;  %v6450_v13 = vsel %vm944_vm5, %v6447_v33, %v6449_v63  ;;  %v6740_v27 = vrot.slane %v12740_v25, 5 }
 0x730   :  { %v6525_v2 = vsel %vm1166_vm6, %v6522_v23, %v6524_v62  ;;  %v6817_v23 = vrot.slane %v12740_v25, 6 }
 0x731   :  { %6538 = vrot.lane.b32.xlu0 %v6515_v10, %s8085_s0  ;;  %6831 = vrot.lane.b32.xlu1 %v6806_v45, %s8085_s0  ;;  %v6814_v10 = vsel %vm2015_vm9, %v6811_v50, %v6813_v18  ;;  %v6815_v45 = vrot.slane %v12726_v42, 6 }
 0x733   :  { %v6816_v17 = vsel %vm2015_vm9, %v6813_v18, %v6815_v45  ;;  %v6528_v18 = vrot.slane %v12750_v56, 2 }
 0x735   :  { %6908 = vrot.lane.b32.xlu1 %v6883_v5, %s8083_s20  ;;  %6754 = vrot.lane.b32.xlu0 %v6729_v46, %s8084_s21  ;;  %v6603_v5 = vrot.slane %v12736_v52, 3  ;;  %v6448_v46 = vsel %vm944_vm5, %v6445_v21, %v6447_v33  ;;  %v6526_v21 = vrot.slane %v12736_v52, 2 }
 0x737   :  { %v6604_v36 = vsel %vm1388_vm4, %v6601_v6, %v6603_v5  ;;  %v6894_v6 = vrot.slane %v12740_v25, 7  ;;  %v6452_v25 = vsel %vm944_vm5, %v6449_v63, %v6451_v55 }
 0x739   :  { %6546 = vrot.lane.b32.xlu1 %v6523_v31, %s8085_s0  ;;  %6469 = vrot.lane.b32.xlu0 %v6446_v37, %s8084_s21  ;;  %v6818_v31 = vsel %vm2015_vm9, %v6815_v45, %v6817_v23  ;;  %v12847_v37 = vpop.f32.mrf.mxu0 }
 0x73d   :  { %6623 = vrot.lane.b32.xlu1 %v6600_v41, %s8083_s20  ;;  %6916 = vrot.lane.b32.xlu0 %v6891_v0, %s8083_s20  ;;  %v6527_v41 = vsel %vm1166_vm6, %v6524_v62, %v6526_v21  ;;  %v12852_v0 = vpop.f32.mrf.mxu0  ;;  %v6605_v62 = vrot.slane %v12750_v56, 3 }
 0x73f   :  { %v7976_v50 = vpop.f32.mrf.mxu0 }
 0x741   :  { %6762 = vrot.lane.b32.xlu1 %v6737_v1, %s8084_s21  ;;  %6548 = vrot.lane.b32.xlu0 %v6525_v2, %s8085_s0  ;;  %v6741_v1 = vsel %vm1793_vm7, %v6738_v4, %v6740_v27  ;;  %v6892_v2 = vrot.slane %v12726_v42, 7  ;;  %v6742_v4 = vrot.slane %v12754_v39, 5  ;;  %v6819_v42 = vrot.slane %v12754_v39, 6 }
 0x743   :  { %v6895_v33 = vsel %vm480_vm1, %v6892_v2, %v6894_v6  ;;  %v6893_v45 = vsel %vm480_vm1, %v6890_v35, %v6892_v2  ;;  %v6820_v63 = vsel %vm2015_vm9, %v6817_v23, %v6819_v42 }
 0x745   :  { %6839 = vrot.lane.b32.xlu1 %v6814_v10, %s8085_s0  ;;  %6625 = vrot.lane.b32.xlu0 %v6602_v40, %s8083_s20  ;;  %v6529_v10 = vsel %vm1166_vm6, %v6526_v21, %v6528_v18  ;;  %v6606_v40 = vsel %vm1388_vm4, %v6603_v5, %v6605_v62 }
 0x749   :  { %6471 = vrot.lane.b32.xlu1 %v6448_v46, %s8084_s21  ;;  %6764 = vrot.lane.b32.xlu0 %v6739_v7, %s8084_s21  ;;  %v6744_v46 = vrot.slane %v12766_v57, 5  ;;  %v6821_v7 = vrot.slane %v12766_v57, 6  ;;  %v6897_v57 = vsel %vm480_vm1, %v6894_v6, %v6896_v61 }
 0x74b   :  { %v6822_v3 = vsel %vm2015_vm9, %v6819_v42, %v6821_v7  ;;  %v6745_v35 = vsel %vm1793_vm7, %v6742_v4, %v6744_v46 }
 0x74d   :  { %6841 = vrot.lane.b32.xlu0 %v6816_v17, %s8085_s0  ;;  %6627 = vrot.lane.b32.xlu1 %v6604_v36, %s8083_s20  ;;  %v6743_v17 = vsel %vm1793_vm7, %v6740_v27, %v6742_v4  ;;  %vm7507_vm7 = vcmp.eq.s32.totalorder %v14030_v54, 1 }
 0x751   :  { %6473 = vrot.lane.b32.xlu0 %v6450_v13, %s8084_s21  ;;  %6843 = vrot.lane.b32.xlu1 %v6818_v31, %s8085_s0 }
 0x755   :  { %6550 = vrot.lane.b32.xlu0 %v6527_v41, %s8085_s0  ;;  %6477 = vrot.lane.b32.xlu1 %v6451_v55, %s8084_s21 }
 0x759   :  { %6766 = vrot.lane.b32.xlu0 %v6741_v1, %s8084_s21  ;;  %6554 = vrot.lane.b32.xlu1 %v6528_v18, %s8085_s0 }
 0x75d   :  { %6920 = vrot.lane.b32.xlu0 %v6895_v33, %s8083_s20  ;;  %6631 = vrot.lane.b32.xlu1 %v6605_v62, %s8083_s20 }
 0x761   :  { %6552 = vrot.lane.b32.xlu0 %v6529_v10, %s8085_s0  ;;  %6475 = vrot.lane.b32.xlu1 %v6452_v25, %s8084_s21 }
 0x765   :  { %6629 = vrot.lane.b32.xlu0 %v6606_v40, %s8083_s20  ;;  %6918 = vrot.lane.b32.xlu1 %v6893_v45, %s8083_s20 }
 0x769   :  { %6845 = vrot.lane.b32.xlu1 %v6820_v63, %s8085_s0  ;;  %6768 = vrot.lane.b32.xlu0 %v6743_v17, %s8084_s21 }
 0x76d   :  { %6847 = vrot.lane.b32.xlu1 %v6822_v3, %s8085_s0  ;;  %6770 = vrot.lane.b32.xlu0 %v6745_v35, %s8084_s21 }
 0x76f   :  { %v6608_v5 = vpop.permute.xlu1 %6607  ;;  %v6454_v36 = vpop.permute.xlu0 %6453 }
 0x770   :  { %v6492_v23 = vadd.f32 %v6454_v36, %v12595_v43 }
 0x771   :  { %6924 = vrot.lane.b32.xlu1 %v12784_v53, %s8083_s20  ;;  %6922 = vrot.lane.b32.xlu0 %v6897_v57, %s8083_s20 }
 0x773   :  { %v6531_v21 = vpop.permute.xlu0 %6530  ;;  %v6456_v13 = vpop.permute.xlu1 %6455 }
 0x774   :  { %v6569_v31 = vadd.f32 %v6531_v21, %v6492_v23  ;;  %v6493_v27 = vadd.f32 %v6456_v13, %v12597_v12 }
 0x776   :  { %v6646_v55 = vadd.f32 %v6608_v5, %v6569_v31 }
 0x777   :  { %v6747_v41 = vpop.permute.xlu0 %6746  ;;  %v6533_v50 = vpop.permute.xlu1 %6532 }
 0x778   :  { %v6707_v18 = vadd.f32 %v6671_v16, %v6646_v55  ;;  %v6570_v1 = vadd.f32 %v6533_v50, %v6493_v27 }
 0x77a   :  { %v6785_v61 = vadd.f32 %v6747_v41, %v6707_v18 }
 0x77b   :  { %v6824_v6 = vpop.permute.xlu0 %6823  ;;  %v6749_v2 = vpop.permute.xlu1 %6748 }
 0x77c   :  { %v6862_v53 = vadd.f32 %v6824_v6, %v6785_v61 }
 0x77f   :  { %v6901_v62 = vpop.permute.xlu0 %6900  ;;  %v6826_v33 = vpop.permute.xlu1 %6825 }
 0x780   :  { %v12898_v10 = vadd.f32 %v6901_v62, %v6862_v53 }
 0x783   :  { %v6610_v43 = vpop.permute.xlu0 %6609  ;;  %v6903_v25 = vpop.permute.xlu1 %6902 }
 0x784   :  { %v6647_v4 = vadd.f32 %v6610_v43, %v6570_v1 }
 0x786   :  { %v6708_v42 = vadd.f32 %v12640_v51, %v6647_v4 }
 0x787   :  { %v6612_v12 = vpop.permute.xlu1 %6611  ;;  %v6458_v40 = vpop.permute.xlu0 %6457 }
 0x788   :  { %v6786_v45 = vadd.f32 %v6749_v2, %v6708_v42  ;;  %v6494_v28 = vadd.f32 %v6458_v40, %v12615_v20 }
 0x78a   :  { %v6863_v46 = vadd.f32 %v6826_v33, %v6786_v45 }
 0x78b   :  { %v6535_v16 = vpop.permute.xlu0 %6534  ;;  %v6460_v7 = vpop.permute.xlu1 %6459 }
 0x78c   :  { %v12902_v63 = vadd.f32 %v6903_v25, %v6863_v46  ;;  %v6571_v17 = vadd.f32 %v6535_v16, %v6494_v28  ;;  %v6495_v27 = vadd.f32 %v6460_v7, %v12628_v15 }
 0x78e   :  { %v6648_v3 = vadd.f32 %v6612_v12, %v6571_v17 }
 0x78f   :  { %v6751_v35 = vpop.permute.xlu0 %6750  ;;  %v6614_v5 = vpop.permute.xlu1 %6613 }
 0x790   :  { %v6709_v36 = vadd.f32 %v12657_v24, %v6648_v3 }
 0x792   :  { %v6787_v57 = vadd.f32 %v6751_v35, %v6709_v36 }
 0x793   :  { %v6828_v23 = vpop.permute.xlu0 %6827  ;;  %v6753_v21 = vpop.permute.xlu1 %6752 }
 0x794   :  { %v6864_v51 = vadd.f32 %v6828_v23, %v6787_v57 }
 0x797   :  { %v6905_v13 = vpop.permute.xlu0 %6904  ;;  %v6830_v31 = vpop.permute.xlu1 %6829 }
 0x798   :  { %v6941_v55 = vadd.f32 %v6905_v13, %v6864_v51 }
 0x79b   :  { %v6537_v20 = vpop.permute.xlu0 %6536  ;;  %v6462_v41 = vpop.permute.xlu1 %6461 }
 0x79c   :  { %v6572_v50 = vadd.f32 %v6537_v20, %v6495_v27  ;;  %v6496_v45 = vadd.f32 %v6462_v41, %v12648_v34 }
 0x79e   :  { %v6649_v18 = vadd.f32 %v6614_v5, %v6572_v50 }
 0x79f   :  { %v6907_v1 = vpop.permute.xlu0 %6906  ;;  %v6616_v61 = vpop.permute.xlu1 %6615 }
 0x7a0   :  { %v6710_v6 = vadd.f32 %v12672_v26, %v6649_v18 }
 0x7a2   :  { %v6788_v2 = vadd.f32 %v6753_v21, %v6710_v6 }
 0x7a3   :  { %v6539_v53 = vpop.permute.xlu0 %6538  ;;  %v6832_v24 = vpop.permute.xlu1 %6831 }
 0x7a4   :  { %v6865_v62 = vadd.f32 %v6830_v31, %v6788_v2  ;;  %v6573_v16 = vadd.f32 %v6539_v53, %v6496_v45  ;;  %v6954_v2 = vadd.f32 %v6941_v55, %v12635_v48  ;;  %v6952_v48 = vadd.f32 %v12599_v9, %v12898_v10 }
 0x7a6   :  { %v6650_v3 = vadd.f32 %v6616_v61, %v6573_v16 }
 0x7a7   :  { %v6909_v33 = vpop.permute.xlu1 %6908  ;;  %v6755_v43 = vpop.permute.xlu0 %6754 }
 0x7a8   :  { %v6711_v57 = vadd.f32 %v12684_v14, %v6650_v3  ;;  %v6942_v14 = vadd.f32 %v6907_v1, %v6865_v62 }
 0x7aa   :  { %v6789_v31 = vadd.f32 %v6755_v43, %v6711_v57  ;;  %v6953_v43 = vadd.f32 %v12611_v47, %v12902_v63  ;;  %v6955_v1 = vadd.f32 %v6942_v14, %v12654_v8 }
 0x7ab   :  { %v6547_v25 = vpop.permute.xlu1 %6546  ;;  %v6470_v4 = vpop.permute.xlu0 %6469 }
 0x7ac   :  { %v6500_v26 = vadd.f32 %v6470_v4, %v12698_v49  ;;  %v6866_v18 = vadd.f32 %v6832_v24, %v6789_v31 }
 0x7ae   :  { %v6577_v36 = vadd.f32 %v6547_v25, %v6500_v26 }
 0x7af   :  { %v6624_v42 = vpop.permute.xlu1 %6623  ;;  %v6917_v12 = vpop.permute.xlu0 %6916 }
 0x7b0   :  { %v6654_v13 = vadd.f32 %v6624_v42, %v6577_v36 }
 0x7b2   :  { %v6715_v50 = vadd.f32 %v12729_v30, %v6654_v13  ;;  %v12920_v30 = vld [vmem:[%s13152_s10] ss:$0 sm:$0xff] }
 0x7b3   :  { %v6763_v40 = vpop.permute.xlu1 %6762  ;;  %v6549_v15 = vpop.permute.xlu0 %6548  ;;  %v6974_v55 = vadd.f32 %v12920_v30, %v6954_v2  ;;  %v6973_v47 = vadd.f32 %v12920_v30, %v6953_v43  ;;  %v6972_v45 = vadd.f32 %v12920_v30, %v6952_v48 }
 0x7b4   :  { %v6793_v25 = vadd.f32 %v6763_v40, %v6715_v50 }
 0x7b5   :  { %v12934_v16 = vmax.f32 %v6973_v47, 0.0  ;;  %v12939_v3 = vmax.f32 %v6972_v45, 0.0 }
 0x7b7   :  { %v6840_v46 = vpop.permute.xlu1 %6839  ;;  %v6626_v28 = vpop.permute.xlu0 %6625  ;;  %v7096_v31 = vrot.slane %v12934_v16, 4 }
 0x7b8   :  { %v6870_v24 = vadd.f32 %v6840_v46, %v6793_v25  ;;  %v12930_v46 = vmax.f32 %v6974_v55, 0.0 }
 0x7bb   :  { %v6472_v7 = vpop.permute.xlu1 %6471  ;;  %v6765_v17 = vpop.permute.xlu0 %6764 }
 0x7bc   :  { %v6501_v23 = vadd.f32 %v6472_v7, %v12710_v19 }
 0x7be   :  { %v6578_v34 = vadd.f32 %v6549_v15, %v6501_v23 }
 0x7bf   :  { %v6842_v35 = vpop.permute.xlu0 %6841  ;;  %v6628_v5 = vpop.permute.xlu1 %6627 }
 0x7c0   :  { %v6655_v61 = vadd.f32 %v6626_v28, %v6578_v34 }
 0x7c2   :  { %v6716_v42 = vadd.f32 %v12743_v29, %v6655_v61  ;;  %v6975_v29 = vadd.f32 %v12920_v30, %v6955_v1 }
 0x7c3   :  { %v6474_v21 = vpop.permute.xlu0 %6473  ;;  %v6844_v51 = vpop.permute.xlu1 %6843 }
 0x7c4   :  { %v6502_v27 = vadd.f32 %v6474_v21, %v12722_v38  ;;  %v6943_v38 = vadd.f32 %v6909_v33, %v6866_v18  ;;  %v6947_v33 = vadd.f32 %v6917_v12, %v6870_v24  ;;  %v6794_v15 = vadd.f32 %v6765_v17, %v6716_v42 }
 0x7c5   :  { %v12942_v36 = vmax.f32 %v6975_v29, 0.0 }
 0x7c6   :  { %v6956_v63 = vadd.f32 %v12624_v58, %v6943_v38  ;;  %v6960_v26 = vadd.f32 %v12662_v32, %v6947_v33  ;;  %v6871_v58 = vadd.f32 %v6842_v35, %v6794_v15 }
 0x7c7   :  { %v6551_v20 = vpop.permute.xlu0 %6550  ;;  %v6478_v41 = vpop.permute.xlu1 %6477  ;;  %v7100_v18 = vrot.slane %v12942_v36, 4 }
 0x7c8   :  { %v6579_v49 = vadd.f32 %v6551_v20, %v6502_v27  ;;  %v6976_v7 = vadd.f32 %v12920_v30, %v6956_v63  ;;  %v6504_v12 = vadd.f32 %v6478_v41, %v12750_v56  ;;  %v6980_v32 = vadd.f32 %v12920_v30, %v6960_v26 }
 0x7c9   :  { %v7095_v20 = vrot.slane %v12939_v3, 4 }
 0x7ca   :  { %v6656_v6 = vadd.f32 %v6628_v5, %v6579_v49  ;;  %v7098_v5 = vrot.slane %v12930_v46, 4  ;;  %v12945_v34 = vmax.f32 %v6976_v7, 0.0 }
 0x7cb   :  { %v6767_v53 = vpop.permute.xlu0 %6766  ;;  %v6555_v19 = vpop.permute.xlu1 %6554  ;;  %v7097_v2 = vsel %vm1646_vm8, %v7095_v20, %v7096_v31 }
 0x7cc   :  { %v6717_v4 = vadd.f32 %v12757_v59, %v6656_v6  ;;  %v6581_v21 = vadd.f32 %v6555_v19, %v6504_v12  ;;  %v7099_v49 = vsel %vm1646_vm8, %v7096_v31, %v7098_v5  ;;  %v7102_v14 = vrot.slane %v12945_v34, 4 }
 0x7cd   :  { %v7145_v25 = vsel %vm3047_vm10, %v7099_v49, 0.0  ;;  %v7144_v48 = vsel %vm3047_vm10, %v7097_v2, 0.0 }
 0x7ce   :  { %v6795_v40 = vadd.f32 %v6767_v53, %v6717_v4  ;;  %v12957_v53 = vmax.f32 %v6980_v32, 0.0  ;;  %v7103_v55 = vsel %vm1646_vm8, %v7100_v18, %v7102_v14 }
 0x7cf   :  { %v6921_v59 = vpop.permute.xlu0 %6920  ;;  %v6632_v62 = vpop.permute.xlu1 %6631  ;;  %v7149_v29 = vsel %vm3047_vm10, %v7103_v55, 0.0 }
 0x7d0   :  { %v6872_v28 = vadd.f32 %v6844_v51, %v6795_v40  ;;  %v6658_v56 = vadd.f32 %v6632_v62, %v6581_v21  ;;  %v7110_v1 = vrot.slane %v12957_v53, 4 }
 0x7d2   :  { %v6719_v19 = vadd.f32 %v6692_v44, %v6658_v56  ;;  %v7146_v44 = vadd.f32 %v7145_v25, %v7144_v48 }
 0x7d3   :  { %v6553_v9 = vpop.permute.xlu0 %6552  ;;  %v6476_v10 = vpop.permute.xlu1 %6475 }
 0x7d4   :  { %v6503_v8 = vadd.f32 %v6476_v10, %v12736_v52  ;;  %v6949_v52 = vadd.f32 %v6921_v59, %v6872_v28 }
 0x7d6   :  { %v6580_v17 = vadd.f32 %v6553_v9, %v6503_v8  ;;  %v6962_v61 = vadd.f32 %v6949_v52, %v12852_v0  ;;  %v7101_v0 = vsel %vm1646_vm8, %v7098_v5, %v7100_v18  ;;  %v6404_v9 = vpop.f32.mrf.mxu0 }
 0x7d7   :  { %v6630_v57 = vpop.permute.xlu0 %6629  ;;  %v6919_v23 = vpop.permute.xlu1 %6918  ;;  %v7147_v62 = vsel %vm3047_vm10, %v7101_v0, 0.0 }
 0x7d8   :  { %v6657_v51 = vadd.f32 %v6630_v57, %v6580_v17  ;;  %v6948_v13 = vadd.f32 %v6919_v23, %v6871_v58  ;;  %v6982_v38 = vadd.f32 %v12920_v30, %v6962_v61  ;;  %v7148_v10 = vadd.f32 %v7147_v62, %v7146_v44 }
 0x7da   :  { %v6961_v35 = vadd.f32 %v12678_v11, %v6948_v13  ;;  %v6718_v27 = vadd.f32 %v12771_v60, %v6657_v51  ;;  %v12971_v63 = vmax.f32 %v6982_v38, 0.0  ;;  %v7150_v58 = vadd.f32 %v7149_v29, %v7148_v10 }
 0x7db   :  { %v6846_v41 = vpop.permute.xlu1 %6845  ;;  %v6769_v50 = vpop.permute.xlu0 %6768 }
 0x7dc   :  { %v6981_v6 = vadd.f32 %v12920_v30, %v6961_v35  ;;  %v6796_v60 = vadd.f32 %v6769_v50, %v6718_v27  ;;  %v7114_v26 = vrot.slane %v12971_v63, 4 }
 0x7de   :  { %v12959_v11 = vmax.f32 %v6981_v6, 0.0  ;;  %v6873_v39 = vadd.f32 %v6846_v41, %v6796_v60 }
 0x7df   :  { %v6848_v4 = vpop.permute.xlu1 %6847  ;;  %v6771_v43 = vpop.permute.xlu0 %6770 }
 0x7e0   :  { %v7112_v24 = vrot.slane %v12959_v11, 4  ;;  %v6797_v42 = vadd.f32 %v6771_v43, %v6719_v19 }
 0x7e2   :  { %v6874_v59 = vadd.f32 %v6848_v4, %v6797_v42  ;;  %v7113_v33 = vsel %vm1646_vm8, %v7110_v1, %v7112_v24  ;;  %v7115_v5 = vsel %vm1646_vm8, %v7112_v24, %v7114_v26 }
 0x7e3   :  { %v6925_v40 = vpop.permute.xlu1 %6924  ;;  %v6923_v47 = vpop.permute.xlu0 %6922  ;;  %v7159_v7 = vsel %vm3047_vm10, %v7113_v33, 0.0  ;;  %v7161_v51 = vsel %vm3047_vm10, %v7115_v5, 0.0 }
 0x7e4   :  { %v6951_v15 = vadd.f32 %v6925_v40, %v6874_v59  ;;  %v6950_v45 = vadd.f32 %v6923_v47, %v6873_v39  ;;  %v7160_v57 = vadd.f32 %v7159_v7, %v7150_v58 }
 0x7e6   :  { %v6964_v28 = vadd.f32 %v12847_v37, %v6951_v15  ;;  %v6963_v8 = vadd.f32 %v6950_v45, %v6404_v9  ;;  %v7162_v13 = vadd.f32 %v7161_v51, %v7160_v57 }
 0x7e8   :  { %v6984_v12 = vadd.f32 %v12920_v30, %v6964_v28  ;;  %v6983_v17 = vadd.f32 %v12920_v30, %v6963_v8 }
 0x7ea   :  { %v12981_v23 = vmax.f32 %v6984_v12, 0.0  ;;  %v12983_v21 = vmax.f32 %v6983_v17, 0.0 }
 0x7ec   :  { %v7118_v52 = vrot.slane %v12981_v23, 4  ;;  %v7116_v37 = vrot.slane %v12983_v21, 4 }
 0x7ee   :  { %v7117_v31 = vsel %vm1646_vm8, %v7114_v26, %v7116_v37  ;;  %v7119_v32 = vsel %vm1646_vm8, %v7116_v37, %v7118_v52 }
 0x7ef   :  { %v7163_v30 = vsel %vm3047_vm10, %v7117_v31, 0.0  ;;  %v7165_v35 = vsel %vm3047_vm10, %v7119_v32, 0.0 }
 0x7f0   :  { %v7164_v56 = vadd.f32 %v7163_v30, %v7162_v13 }
 0x7f2   :  { %v7166_v27 = vadd.f32 %v7165_v35, %v7164_v56 }
 0x7f4   :  { %v7167_v20 = vrot.slane %v7166_v27, 4 }
 0x7f6   :  { %v7168_v41 = vadd.f32 %v7167_v20, %v7166_v27 }
 0x7f8   :  { %v7169_v50 = vrot.slane %v7168_v41, 2 }
 0x7fa   :  { %v7170_v49 = vadd.f32 %v7169_v50, %v7168_v41 }
 0x7fc   :  { %v7171_v18 = vrot.slane %v7170_v49, 1 }
 0x7fe   :  { %v7172_v61 = vadd.f32 %v7171_v18, %v7170_v49 }
 0x800   :  { %v12992_v6 = vmul.f32 0.015625, %v7172_v61 }
 0x802   :  { %v7175_v2 = vsub.f32 %v12939_v3, %v12992_v6  ;;  %v7176_v14 = vsub.f32 %v12934_v16, %v12992_v6  ;;  %v7177_v60 = vsub.f32 %v12930_v46, %v12992_v6  ;;  %v7178_v19 = vsub.f32 %v12942_v36, %v12992_v6 }
 0x803   :  { %v7179_v25 = vsub.f32 %v12945_v34, %v12992_v6  ;;  %v7183_v4 = vsub.f32 %v12957_v53, %v12992_v6  ;;  %v7184_v43 = vsub.f32 %v12959_v11, %v12992_v6  ;;  %v7185_v0 = vsub.f32 %v12971_v63, %v12992_v6 }
 0x804   :  { %v7201_v38 = vrot.slane %v7175_v2, 4  ;;  %v7202_v24 = vrot.slane %v7176_v14, 4  ;;  %v7204_v42 = vrot.slane %v7177_v60, 4  ;;  %v7206_v48 = vrot.slane %v7178_v19, 4 }
 0x805   :  { %v7208_v55 = vrot.slane %v7179_v25, 4  ;;  %v7186_v1 = vsub.f32 %v12983_v21, %v12992_v6  ;;  %v7216_v39 = vrot.slane %v7183_v4, 4  ;;  %v7218_v44 = vrot.slane %v7184_v43, 4 }
 0x806   :  { %v7203_v59 = vsel %vm1646_vm8, %v7201_v38, %v7202_v24  ;;  %v7205_v62 = vsel %vm1646_vm8, %v7202_v24, %v7204_v42  ;;  %v7207_v40 = vsel %vm1646_vm8, %v7204_v42, %v7206_v48  ;;  %v7187_v47 = vsub.f32 %v12981_v23, %v12992_v6  ;;  %v7294_v38 = vld [vmem:[%s13153_s11] sm:$0x1] }
 0x807   :  { %v7209_v33 = vsel %vm1646_vm8, %v7206_v48, %v7208_v55  ;;  %v7220_v15 = vrot.slane %v7185_v0, 4  ;;  %v7250_v45 = vmul.f32 %v7203_v59, %v7203_v59  ;;  %v7251_v29 = vmul.f32 %v7205_v62, %v7205_v62  ;;  %v7296_v48 = vld [vmem:[%s13154_s12] sm:$0x1] }
 0x808   :  { %v7252_v9 = vmul.f32 %v7207_v40, %v7207_v40  ;;  %v7219_v10 = vsel %vm1646_vm8, %v7216_v39, %v7218_v44  ;;  %v7222_v28 = vrot.slane %v7186_v1, 4  ;;  %v7253_v8 = vmul.f32 %v7209_v33, %v7209_v33 }
 0x809   :  { %v7262_v7 = vsel %vm3047_vm10, %v7250_v45, 0.0  ;;  %v7263_v26 = vsel %vm3047_vm10, %v7251_v29, 0.0  ;;  %v7221_v58 = vsel %vm1646_vm8, %v7218_v44, %v7220_v15  ;;  %v7224_v12 = vrot.slane %v7187_v47, 4 }
 0x80a   :  { %v7264_v17 = vadd.f32 %v7263_v26, %v7262_v7  ;;  %v7258_v5 = vmul.f32 %v7219_v10, %v7219_v10  ;;  %v7265_v57 = vsel %vm3047_vm10, %v7252_v9, 0.0  ;;  %v7223_v52 = vsel %vm1646_vm8, %v7220_v15, %v7222_v28  ;;  %v7349_v7 = vld [vmem:[#allocation3 + $0x28] ss:$2 sm:$0xff] }
 0x80b   :  { %v7259_v51 = vmul.f32 %v7221_v58, %v7221_v58  ;;  %v7267_v13 = vsel %vm3047_vm10, %v7253_v8, 0.0  ;;  %v7225_v31 = vsel %vm1646_vm8, %v7222_v28, %v7224_v12  ;;  %v7260_v30 = vmul.f32 %v7223_v52, %v7223_v52 }
 0x80c   :  { %v7266_v37 = vadd.f32 %v7265_v57, %v7264_v17  ;;  %v7277_v56 = vsel %vm3047_vm10, %v7258_v5, 0.0  ;;  %v7261_v27 = vmul.f32 %v7225_v31, %v7225_v31 }
 0x80d   :  { %v7279_v20 = vsel %vm3047_vm10, %v7259_v51, 0.0  ;;  %v7281_v50 = vsel %vm3047_vm10, %v7260_v30, 0.0 }
 0x80e   :  { %v7268_v32 = vadd.f32 %v7267_v13, %v7266_v37  ;;  %v7283_v18 = vsel %vm3047_vm10, %v7261_v27, 0.0 }
 0x810   :  { %v7278_v35 = vadd.f32 %v7277_v56, %v7268_v32 }
 0x812   :  { %v7280_v41 = vadd.f32 %v7279_v20, %v7278_v35 }
 0x814   :  { %v7282_v49 = vadd.f32 %v7281_v50, %v7280_v41 }
 0x816   :  { %v7284_v61 = vadd.f32 %v7283_v18, %v7282_v49 }
 0x818   :  { %v7285_v2 = vrot.slane %v7284_v61, 4 }
 0x81a   :  { %v7286_v14 = vadd.f32 %v7285_v2, %v7284_v61 }
 0x81c   :  { %v7287_v60 = vrot.slane %v7286_v14, 2 }
 0x81e   :  { %v7288_v19 = vadd.f32 %v7287_v60, %v7286_v14 }
 0x820   :  { %v7289_v25 = vrot.slane %v7288_v19, 1 }
 0x822   :  { %v7290_v4 = vadd.f32 %v7289_v25, %v7288_v19 }
 0x824   :  { %v7291_v43 = vmul.f32 0.015625, %v7290_v4 }
 0x826   :  { %v7292_v0 = vadd.f32 1e-05, %v7291_v43 }
 0x828   :  { %8057 = vrsqrt.f32 %v7292_v0 }
 0x835   :  { %v8058_v24 = vpop.eup %8057 }
 0x836   :  { %v7295_v42 = vmul.f32 %v8058_v24, %v7294_v38 }
 0x838   :  { %v7297_v55 = vmul.f32 %v7295_v42, %v12992_v6  ;;  %v7303_v1 = vrot.slane %v7295_v42, %v14028_v22 }
 0x83a   :  { %v7298_v59 = vsub.f32 %v7296_v48, %v7297_v55  ;;  %v7307_v39 = vmul.f32 %v7303_v1, %v12930_v46  ;;  %v7311_v44 = vmul.f32 %v7303_v1, %v12959_v11  ;;  %v7312_v62 = vmul.f32 %v7303_v1, %v12971_v63 }
 0x83b   :  { %v7313_v40 = vmul.f32 %v7303_v1, %v12983_v21  ;;  %v7305_v33 = vmul.f32 %v7303_v1, %v12939_v3  ;;  %v7306_v15 = vmul.f32 %v7303_v1, %v12934_v16  ;;  %v7308_v45 = vmul.f32 %v7303_v1, %v12942_v36  ;;  %v7352_v3 = vld [vmem:[#allocation3 + $0x29] ss:$2 sm:$0xff] }
 0x83c   :  { %v7319_v47 = vrot.slane %v7298_v59, %v14028_v22  ;;  %v7309_v6 = vmul.f32 %v7303_v1, %v12945_v34  ;;  %v7310_v29 = vmul.f32 %v7303_v1, %v12957_v53  ;;  %v7314_v46 = vmul.f32 %v7303_v1, %v12981_v23  ;;  %v7388_v34 = vld [vmem:[#allocation3 + $0x60] ss:$2 sm:$0xff]  ;;  %v7393_v53 = vld [vmem:[#allocation3 + $0x61] ss:$2 sm:$0xff] }
 0x83d   :  { %v7355_v23 = vmax.f32 %v7349_v7, %v7352_v3  ;;  %v13059_v26 = vmax.f32 %v7388_v34, %v7393_v53  ;;  %v7783_v7 = vld [vmem:[%s13155_s13 + $0x20] sm:$0xff] }
 0x83e   :  { %v7323_v9 = vadd.f32 %v7319_v47, %v7307_v39  ;;  %v7327_v11 = vadd.f32 %v7319_v47, %v7311_v44  ;;  %v7328_v10 = vadd.f32 %v7319_v47, %v7312_v62  ;;  %v7329_v63 = vadd.f32 %v7319_v47, %v7313_v40 }
 0x83f   :  { %v7321_v28 = vadd.f32 %v7319_v47, %v7305_v33  ;;  %v7322_v21 = vadd.f32 %v7319_v47, %v7306_v15  ;;  %v7324_v8 = vadd.f32 %v7319_v47, %v7308_v45  ;;  %v7325_v22 = vadd.f32 %v7319_v47, %v7309_v6 }
 0x840   :  { %7345 = vst.msk [vmem:[#allocation3 + $0x54] sm:$0xff] %vm3047_vm10, %v7329_v63  ;;  %7336 = vst.msk [vmem:[#allocation3 + $0x14] sm:$0xff] %vm3047_vm10, %v7323_v9  ;;  %v7326_v16 = vadd.f32 %v7319_v47, %v7310_v29  ;;  %v7330_v36 = vadd.f32 %v7319_v47, %v7314_v46  ;;  %v7358_v58 = vrot.slane %v7355_v23, 7  ;;  %v7365_v12 = vrot.slane %v7355_v23, 1  ;;  %v7781_v63 = vld [vmem:[%s13155_s13 + $0x10] sm:$0xff] }
 0x841   :  { %7343 = vst.msk [vmem:[#allocation3 + $0x44] sm:$0xff] %vm3047_vm10, %v7327_v11  ;;  %7344 = vst.msk [vmem:[#allocation3 + $0x4c] sm:$0xff] %vm3047_vm10, %v7328_v10  ;;  %v7372_v17 = vrot.slane %v7355_v23, 6  ;;  %v7379_v5 = vrot.slane %v7355_v23, 2  ;;  %v7399_v57 = vrot.slane %v13059_v26, 7  ;;  %v7406_v30 = vrot.slane %v13059_v26, 1 }
 0x842   :  { %7334 = vst.msk [vmem:[#allocation3 + $0x4] sm:$0xf0] %vm3550_vm11, %v7321_v28  ;;  %7342 = vst.msk [vmem:[#allocation3 + $0x3c] sm:$0xf0] %vm3550_vm11, %v7326_v16  ;;  %v7413_v56 = vrot.slane %v13059_v26, 6  ;;  %v7420_v61 = vrot.slane %v13059_v26, 2 }
 0x843   :  { %7335 = vst.msk [vmem:[#allocation3 + $0xc] sm:$0xff] %vm3047_vm10, %v7322_v21  ;;  %7337 = vst.msk [vmem:[#allocation3 + $0x1c] sm:$0xff] %vm3047_vm10, %v7324_v8  ;;  %v7425_v28 = vld [vmem:[%s13155_s13] sm:$0xff]  ;;  %v7782_v16 = vld [vmem:[%s13155_s13 + $0x18] sm:$0xff]  ;;  %vm7556_vm11 = vcmask 17408  }
 0x844   :  { %7338 = vst.msk [vmem:[#allocation3 + $0x24] sm:$0xf] %vm3567_vm3, %v7325_v22  ;;  %7346 = vst.msk [vmem:[#allocation3 + $0x5c] sm:$0xf] %vm3567_vm3, %v7330_v36  ;;  %v7426_v36 = vld [vmem:[%s13155_s13 + $0x8] sm:$0xff] }
 0x849   :  { %v7385_v32 = vld [vmem:[#allocation3 + $0x40] ss:$2 sm:$0xff]  ;;  %v7390_v20 = vld [vmem:[#allocation3 + $0x41] ss:$2 sm:$0xff] }
 0x84a   :  { %v7347_v52 = vld [vmem:[#allocation3 + $0x8] ss:$2 sm:$0xff]  ;;  %v7350_v51 = vld [vmem:[#allocation3 + $0x9] ss:$2 sm:$0xff]  ;;  %v7394_v43 = vmax.f32 %v7385_v32, %v7390_v20 }
 0x84b   :  { %v7348_v37 = vld [vmem:[#allocation3 + $0x18] ss:$2 sm:$0xff]  ;;  %v7351_v13 = vld [vmem:[#allocation3 + $0x19] ss:$2 sm:$0xff]  ;;  %v7353_v31 = vmax.f32 %v7347_v52, %v7350_v51 }
 0x84c   :  { %v7354_v35 = vmax.f32 %v7348_v37, %v7351_v13  ;;  %v7387_v27 = vld [vmem:[#allocation3 + $0x50] ss:$2 sm:$0xff]  ;;  %v7392_v41 = vld [vmem:[#allocation3 + $0x51] ss:$2 sm:$0xff]  ;;  %v7397_v62 = vrot.slane %v7394_v43, 7  ;;  %v7404_v47 = vrot.slane %v7394_v43, 1 }
 0x84d   :  { %v7356_v50 = vrot.slane %v7353_v31, 7  ;;  %v7363_v49 = vrot.slane %v7353_v31, 1  ;;  %v7370_v18 = vrot.slane %v7353_v31, 6  ;;  %v7377_v4 = vrot.slane %v7353_v31, 2 }
 0x84e   :  { %v7357_v2 = vrot.slane %v7354_v35, 7  ;;  %v7364_v14 = vrot.slane %v7354_v35, 1  ;;  %v7371_v60 = vrot.slane %v7354_v35, 6  ;;  %v7378_v19 = vrot.slane %v7354_v35, 2 }
 0x84f   :  { %v7360_v25 = vsel %vm3643_vm12, %v7358_v58, %v7356_v50  ;;  %v7395_v0 = vmax.f32 %v7387_v27, %v7392_v41  ;;  %v7374_v48 = vsel %vm3695_vm14, %v7372_v17, %v7370_v18  ;;  %v7411_v45 = vrot.slane %v7394_v43, 6 }
 0x850   :  { %v7359_v38 = vsel %vm3643_vm12, %v7356_v50, %v7357_v2  ;;  %v7361_v24 = vmax.f32 %v7353_v31, %v7360_v25  ;;  %v7366_v42 = vsel %vm3669_vm13, %v7364_v14, %v7365_v12  ;;  %v7367_v1 = vsel %vm3669_vm13, %v7363_v49, %v7364_v14 }
 0x851   :  { %v7362_v55 = vmax.f32 %v7354_v35, %v7359_v38  ;;  %v7373_v59 = vsel %vm3695_vm14, %v7370_v18, %v7371_v60  ;;  %v7380_v39 = vsel %vm3721_vm15, %v7378_v19, %v7379_v5  ;;  %v7398_v40 = vrot.slane %v7395_v0, 7 }
 0x852   :  { %v7368_v44 = vmax.f32 %v7361_v24, %v7367_v1  ;;  %v7405_v15 = vrot.slane %v7395_v0, 1  ;;  %v7412_v6 = vrot.slane %v7395_v0, 6  ;;  %v7381_v46 = vsel %vm3721_vm15, %v7377_v4, %v7378_v19 }
 0x853   :  { %v7369_v33 = vmax.f32 %v7362_v55, %v7366_v42  ;;  %v7400_v9 = vsel %vm3643_vm12, %v7397_v62, %v7398_v40  ;;  %v7401_v11 = vsel %vm3643_vm12, %v7399_v57, %v7397_v62  ;;  %v7418_v22 = vrot.slane %v7394_v43, 2 }
 0x854   :  { %v7375_v29 = vmax.f32 %v7368_v44, %v7374_v48  ;;  %v7402_v21 = vmax.f32 %v7394_v43, %v7401_v11  ;;  %v7403_v8 = vmax.f32 %v7395_v0, %v7400_v9  ;;  %v7407_v34 = vsel %vm3669_vm13, %v7405_v15, %v7406_v30  ;;  %v7784_v30 = vld [vmem:[%s13155_s13 + $0x28] sm:$0xff] }
 0x855   :  { %v7376_v10 = vmax.f32 %v7369_v33, %v7373_v59  ;;  %v7408_v53 = vsel %vm3669_vm13, %v7404_v47, %v7405_v15  ;;  %v7414_v23 = vsel %vm3695_vm14, %v7411_v45, %v7412_v6  ;;  %v7419_v17 = vrot.slane %v7395_v0, 2 }
 0x856   :  { %v7382_v3 = vmax.f32 %v7375_v29, %v7381_v46  ;;  %v7409_v58 = vmax.f32 %v7402_v21, %v7408_v53  ;;  %v7410_v12 = vmax.f32 %v7403_v8, %v7407_v34  ;;  %v7415_v52 = vsel %vm3695_vm14, %v7413_v56, %v7411_v45 }
 0x857   :  { %v7383_v26 = vmax.f32 %v7376_v10, %v7380_v39  ;;  %v7421_v20 = vsel %vm3721_vm15, %v7419_v17, %v7420_v61  ;;  %v7422_v41 = vsel %vm3721_vm15, %v7418_v22, %v7419_v17 }
 0x858   :  { %v7455_v5 = vmul.f32 %v7781_v63, %v7382_v3  ;;  %v7435_v57 = vmul.f32 %v7425_v28, %v7382_v3  ;;  %v7474_v37 = vmul.f32 %v7783_v7, %v7382_v3  ;;  %v7416_v31 = vmax.f32 %v7409_v58, %v7415_v52 }
 0x859   :  { %v7456_v51 = vmul.f32 %v7782_v16, %v7383_v26  ;;  %v7436_v13 = vmul.f32 %v7426_v36, %v7383_v26  ;;  %v7417_v32 = vmax.f32 %v7410_v12, %v7414_v23  ;;  %v7475_v60 = vmul.f32 %v7784_v30, %v7383_v26 }
 0x85a   :  { %v7457_v35 = vsel %vm3047_vm10, %v7455_v5, 0.0  ;;  %v7437_v27 = vsel %vm3047_vm10, %v7435_v57, 0.0  ;;  %v7423_v49 = vmax.f32 %v7416_v31, %v7422_v41  ;;  %v7476_v19 = vsel %vm3047_vm10, %v7474_v37, 0.0 }
 0x85b   :  { %v7458_v56 = vsel %vm3047_vm10, %v7456_v51, 0.0  ;;  %v7438_v50 = vsel %vm3047_vm10, %v7436_v13, 0.0  ;;  %v7424_v18 = vmax.f32 %v7417_v32, %v7421_v20  ;;  %v7477_v61 = vsel %vm3047_vm10, %v7475_v60, 0.0 }
 0x85c   :  { %v7459_v2 = vadd.f32 %v7458_v56, %v7457_v35  ;;  %v7439_v14 = vadd.f32 %v7438_v50, %v7437_v27  ;;  %v7512_v25 = vmul.f32 %v7781_v63, %v7423_v49  ;;  %v7493_v43 = vmul.f32 %v7425_v28, %v7423_v49 }
 0x85d   :  { %v7513_v4 = vmul.f32 %v7782_v16, %v7424_v18  ;;  %v7494_v0 = vmul.f32 %v7426_v36, %v7424_v18  ;;  %v7478_v48 = vadd.f32 %v7477_v61, %v7476_v19  ;;  %v7530_v59 = vmul.f32 %v7783_v7, %v7423_v49 }
 0x85e   :  { %7460 = vadd.xlane.f32.xlu1 %v7459_v2  ;;  %7440 = vadd.xlane.f32.xlu0 %v7439_v14  ;;  %v7514_v38 = vsel %vm3047_vm10, %v7512_v25, 0.0  ;;  %v7495_v55 = vsel %vm3047_vm10, %v7493_v43, 0.0  ;;  %v7531_v39 = vmul.f32 %v7784_v30, %v7424_v18  ;;  %v14031_v2 = vlaneseq }
 0x85f   :  { %v7515_v24 = vsel %vm3047_vm10, %v7513_v4, 0.0  ;;  %v7496_v1 = vsel %vm3047_vm10, %v7494_v0, 0.0  ;;  %v7532_v62 = vsel %vm3047_vm10, %v7530_v59, 0.0 }
 0x860   :  { %v7516_v42 = vadd.f32 %v7515_v24, %v7514_v38  ;;  %v7497_v44 = vadd.f32 %v7496_v1, %v7495_v55  ;;  %v7533_v40 = vsel %vm3047_vm10, %v7531_v39, 0.0  ;;  %v7434_v14 = vand.u32 127, %v14031_v2 }
 0x861   :  { %v7534_v47 = vadd.f32 %v7533_v40, %v7532_v62 }
 0x862   :  { %7517 = vadd.xlane.f32.xlu1 %v7516_v42  ;;  %7479 = vadd.xlane.f32.xlu0 %v7478_v48  ;;  %vm7450_vm1 = vcmp.eq.s32.totalorder %v7434_v14, 0  ;;  %vm7469_vm2 = vcmp.eq.s32.totalorder %v7434_v14, 1  ;;  %vm7488_vm4 = vcmp.eq.s32.totalorder %v7434_v14, 2 }
 0x863   :  { %vm7451_vm3 = vmand %vm7449_vm0, %vm7450_vm1 }
 0x864   :  { %vm7470_vm5 = vmand %vm7449_vm0, %vm7469_vm2 }
 0x865   :  { %vm7489_vm6 = vmand %vm7449_vm0, %vm7488_vm4 }
 0x866   :  { %7498 = vadd.xlane.f32.xlu0 %v7497_v44  ;;  %vm7508_vm8 = vmand %vm7507_vm7, %vm7450_vm1  ;;  %v7785_v44 = vld [vmem:[%s13156_s14] ss:$0 sm:$0xff] }
 0x867   :  { %vm7526_vm9 = vmand %vm7507_vm7, %vm7469_vm2 }
 0x868   :  { %vm7544_vm10 = vmand %vm7507_vm7, %vm7488_vm4 }
 0x86a   :  { %7535 = vadd.xlane.f32.xlu0 %v7534_v47 }
 0x8e7   :  { %v7461_v33 = vpop.xlane.xlu1 %7460  ;;  %v7441_v15 = vpop.xlane.xlu0 %7440 }
 0x8e8   :  { %v7462_v45 = vrot.slane %v7461_v33, 4  ;;  %v7442_v6 = vrot.slane %v7441_v15, 4 }
 0x8ea   :  { %v7463_v29 = vadd.f32 %v7462_v45, %v7461_v33  ;;  %v7443_v46 = vadd.f32 %v7442_v6, %v7441_v15 }
 0x8eb   :  { %v7518_v9 = vpop.xlane.xlu1 %7517  ;;  %v7480_v11 = vpop.xlane.xlu0 %7479 }
 0x8ec   :  { %v7464_v10 = vrot.slane %v7463_v29, 2  ;;  %v7444_v63 = vrot.slane %v7443_v46, 2  ;;  %v7519_v28 = vrot.slane %v7518_v9, 4  ;;  %v7481_v21 = vrot.slane %v7480_v11, 4 }
 0x8ee   :  { %v7520_v8 = vadd.f32 %v7519_v28, %v7518_v9  ;;  %v7482_v22 = vadd.f32 %v7481_v21, %v7480_v11  ;;  %v7445_v7 = vadd.f32 %v7444_v63, %v7443_v46  ;;  %v7465_v3 = vadd.f32 %v7464_v10, %v7463_v29 }
 0x8ef   :  { %v7499_v16 = vpop.xlane.xlu0 %7498 }
 0x8f0   :  { %v7521_v36 = vrot.slane %v7520_v8, 2  ;;  %v7483_v34 = vrot.slane %v7482_v22, 2  ;;  %v7500_v53 = vrot.slane %v7499_v16, 4  ;;  %v7446_v23 = vrot.slane %v7445_v7, 1 }
 0x8f1   :  { %v7466_v26 = vrot.slane %v7465_v3, 1 }
 0x8f2   :  { %v7501_v58 = vadd.f32 %v7500_v53, %v7499_v16  ;;  %v7447_v12 = vadd.f32 %v7446_v23, %v7445_v7  ;;  %v7484_v17 = vadd.f32 %v7483_v34, %v7482_v22  ;;  %v7522_v5 = vadd.f32 %v7521_v36, %v7520_v8 }
 0x8f3   :  { %v7536_v57 = vpop.xlane.xlu0 %7535  ;;  %v7467_v52 = vadd.f32 %v7466_v26, %v7465_v3 }
 0x8f4   :  { %v7502_v37 = vrot.slane %v7501_v58, 2  ;;  %v7537_v51 = vrot.slane %v7536_v57, 4  ;;  %7978 = vpush %v7447_v12  ;;  %v7485_v13 = vrot.slane %v7484_v17, 1  ;;  %v7523_v35 = vrot.slane %v7522_v5, 1 }
 0x8f5   :  { %7980 = vpush %v7467_v52 }
 0x8f6   :  { %v7538_v31 = vadd.f32 %v7537_v51, %v7536_v57  ;;  %v7486_v32 = vadd.f32 %v7485_v13, %v7484_v17  ;;  %v7503_v30 = vadd.f32 %v7502_v37, %v7501_v58  ;;  %v7524_v50 = vadd.f32 %v7523_v35, %v7522_v5 }
 0x8f8   :  { %v7539_v27 = vrot.slane %v7538_v31, 2  ;;  %7982 = vpush %v7486_v32  ;;  %v7504_v20 = vrot.slane %v7503_v30, 1 }
 0x8fa   :  { %v7540_v41 = vadd.f32 %v7539_v27, %v7538_v31  ;;  %v7505_v56 = vadd.f32 %v7504_v20, %v7503_v30 }
 0x8fc   :  { %7984 = vpush %v7505_v56  ;;  %v7541_v49 = vrot.slane %v7540_v41, 1 }
 0x8fd   :  { %7986 = vpush %v7524_v50 }
 0x8fe   :  { %v7542_v18 = vadd.f32 %v7541_v49, %v7540_v41 }
 0x900   :  { %7988 = vpush %v7542_v18 }
 0x925   :  { %s7979_s13 = spop %7978 }
 0x926   :  { %v7452_v60 = vstv %s7979_s13  ;;  %s7981_s27 = spop %7980 }
 0x927   :  { %v7471_v19 = vstv %s7981_s27  ;;  %v7453_v25 = vsel %vm7451_vm3, %v7452_v60, 0.0 }
 0x928   :  { %v7472_v4 = vsel %vm7470_vm5, %v7471_v19, 0.0 }
 0x929   :  { %s7983_s28 = spop %7982  ;;  %v7473_v61 = vadd.f32 %v7472_v4, %v7453_v25 }
 0x92a   :  { %v7490_v43 = vstv %s7983_s28 }
 0x92b   :  { %v7491_v0 = vsel %vm7489_vm6, %v7490_v43, 0.0 }
 0x92c   :  { %v7492_v38 = vadd.f32 %v7491_v0, %v7473_v61 }
 0x92d   :  { %s7985_s29 = spop %7984 }
 0x92e   :  { %v7509_v24 = vstv %s7985_s29  ;;  %s7987_s30 = spop %7986 }
 0x92f   :  { %v7510_v42 = vsel %vm7508_vm8, %v7509_v24, 0.0  ;;  %v7527_v48 = vstv %s7987_s30 }
 0x930   :  { %v7511_v55 = vadd.f32 %v7510_v42, %v7492_v38  ;;  %v7528_v1 = vsel %vm7526_vm9, %v7527_v48, 0.0 }
 0x931   :  { %s7989_s16 = spop %7988 }
 0x932   :  { %v7529_v59 = vadd.f32 %v7528_v1, %v7511_v55  ;;  %v7545_v54 = vstv %s7989_s16 }
 0x933   :  { %v7546_v39 = vsel %vm7544_vm10, %v7545_v54, 0.0 }
 0x934   :  { %v7547_v62 = vadd.f32 %v7546_v39, %v7529_v59 }
 0x936   :  { %v7555_v40 = vadd.f32 %v7785_v44, %v7547_v62 }
 0x938   :  { %7557 = vst.msk [vmem:[#allocation4] sm:$0x3] %vm7556_vm11, %v7555_v40 }
 0x939   :  { %8070 = shalt.err (!%p8067_p4)
}
 0x93a   :  { %7567 = dma.vmem_to_hbm [thread:$0]  %s7565_s5, 32, %s13157_s15, [#allocation5]  }
 0x93b   :  { %8079 = dma.done.wait [#allocation5], 32  }
 0x93c   :  { %8080 = vsyncadd [#allocation5], 4294967264 }
 0x93d   :  { %7571 = vsyncpa [#allocation5], 1 }

</bundles_post_ra>
